<compile_context>
chip_gen: v7x
topology: tpu7x:2x2x1
jax: 0.10.0
libtpu: 0.0.40
codegen_flags: <defaults>
</compile_context>

<pallas_src>
import jax
import jax.numpy as jnp
from jax.experimental import pallas as pl
from jax.experimental.pallas import tpu as pltpu


def _round_up(v, m):
    return (v + m - 1) // m * m


def gdc_kernel(x_ref, w_ref, bias_ref, o_ref):
    # x_ref:    (TN, K)  native dtype (f32 or bf16); K = C*HW
    # w_ref:    (K, E)   bf16 fused (depthwise * BN2d * linear * BN1d) weight, resident
    # bias_ref: (1, E)   f32 folded bias, resident
    # o_ref:    (TN, E)  f32
    x = x_ref[...].astype(jnp.bfloat16)                       # in-kernel cast -> bf16 MXU path
    o_ref[...] = jnp.dot(x, w_ref[...],
                         preferred_element_type=jnp.float32) + bias_ref[...]


def gdc_forward(x_nchw, dw_weight, bn1_params, lin_weight, bn2_params, eps=1e-5):
    """x_nchw: (N, 512, 7, 7); dw_weight: (512, 1, 7, 7) (Conv2d groups=512, no bias);
    lin_weight: (E, 512) as in nn.Linear; BN params: (gamma, beta, mean, var)."""
    N, C, H, W = x_nchw.shape
    HW = H * W
    K = C * HW
    E = lin_weight.shape[0]

    # ---- fold both BatchNorms + the depthwise reduce into (K, E) weight + bias (all f32) ----
    g1, b1, m1, v1 = [p.astype(jnp.float32) for p in bn1_params]
    s1 = g1 * jax.lax.rsqrt(v1 + eps)                          # (C,)
    sh1 = b1 - m1 * s1                                         # (C,)
    g2, b2, m2, v2 = [p.astype(jnp.float32) for p in bn2_params]
    s2 = g2 * jax.lax.rsqrt(v2 + eps)                          # (E,)
    sh2 = b2 - m2 * s2                                         # (E,)

    w_ce = lin_weight.astype(jnp.float32).T * s2[None, :]      # (C, E): W[e,c]*s2[e]
    dww = dw_weight.astype(jnp.float32).reshape(C, HW) * s1[:, None]   # (C, HW): dw*s1
    w_fused = (dww[:, :, None] * w_ce[:, None, :]).reshape(K, E)       # (K, E) f32
    w_fused = w_fused.astype(jnp.bfloat16)                     # single rounding to bf16
    bias = (sh1 @ w_ce + sh2).reshape(1, E).astype(jnp.float32)

    # ---- activations: natural NCHW layout, native dtype; contiguous reshape is free ----
    x2d = x_nchw.reshape(N, K)
    itemsize = jnp.dtype(x2d.dtype).itemsize

    # ---- batch tile: >=2 tiles when N > 8 (v7x megacore), capped for VMEM ----
    max_tn = 128 if itemsize <= 2 else 64                      # keep x tile ~<=12.8 MB/buffer
    if N <= 8:
        tn = 8
    else:
        tn = min(max_tn, _round_up(pl.cdiv(N, 2), 8))
    grid = (pl.cdiv(N, tn),)                                   # partial edge block is fine:
                                                               # matmul rows are independent

    # ---- scoped-VMEM budget: double-buffered x/out tiles + resident fused weight ----
    vmem_bytes = (2 * tn * K * itemsize       # x tile buffers
                  + 2 * K * E * 2             # fused weight (bf16)
                  + 2 * tn * E * 4            # output tile buffers
                  + 2 * E * 4)                # bias
    vmem_limit = int(min(1.25 * vmem_bytes + (4 << 20), 100 << 20))

    out = pl.pallas_call(
        gdc_kernel,
        out_shape=jax.ShapeDtypeStruct((N, E), jnp.float32),
        grid=grid,
        in_specs=[
            pl.BlockSpec((tn, K), lambda i: (i, 0)),           # x: tiled over batch
            pl.BlockSpec((K, E), lambda i: (0, 0)),            # fused weight: resident
            pl.BlockSpec((1, E), lambda i: (0, 0)),            # bias: resident
        ],
        out_specs=pl.BlockSpec((tn, E), lambda i: (i, 0)),
        compiler_params=pltpu.CompilerParams(
            dimension_semantics=("parallel",),
            vmem_limit_bytes=vmem_limit),
    )(x2d, w_fused, bias)

    return out


def _reference(x_nchw, dw_weight, bn1_params, lin_weight, bn2_params, eps=1e-5):
    # Pure-JAX f32 reference mirroring the PyTorch forward (BN in eval mode).
    N, C, H, W = x_nchw.shape
    pooled = jnp.einsum("nchw,chw->nc", x_nchw, dw_weight.reshape(C, H, W))
    g1, b1, m1, v1 = bn1_params
    y = (pooled - m1) / jnp.sqrt(v1 + eps) * g1 + b1
    z = y @ lin_weight.T
    g2, b2, m2, v2 = bn2_params
    return (z - m2) / jnp.sqrt(v2 + eps) * g2 + b2


if __name__ == "__main__":
    key = jax.random.PRNGKey(0)
    N, C, H, W = 2, 512, 7, 7    # GDC's input is fixed by the module at (N, 512, 7, 7)
    E = 128                      # embedding_size

    k = jax.random.split(key, 8)
    x = jax.random.normal(k[0], (N, C, H, W), jnp.float32)
    dw_weight = jax.random.normal(k[1], (C, 1, H, W), jnp.float32) * 0.1
    lin_weight = jax.random.normal(k[2], (E, C), jnp.float32) * 0.05

    bn1 = (
        jax.random.normal(k[3], (C,), jnp.float32) * 0.1 + 1.0,      # gamma
        jax.random.normal(k[4], (C,), jnp.float32) * 0.1,            # beta
        jax.random.normal(k[5], (C,), jnp.float32) * 0.1,            # running_mean
        jnp.abs(jax.random.normal(k[6], (C,), jnp.float32)) + 0.5,   # running_var
    )
    kk = jax.random.split(k[7], 4)
    bn2 = (
        jax.random.normal(kk[0], (E,), jnp.float32) * 0.1 + 1.0,
        jax.random.normal(kk[1], (E,), jnp.float32) * 0.1,
        jax.random.normal(kk[2], (E,), jnp.float32) * 0.1,
        jnp.abs(jax.random.normal(kk[3], (E,), jnp.float32)) + 0.5,
    )

    out = jax.block_until_ready(gdc_forward(x, dw_weight, bn1, lin_weight, bn2))
    ref = _reference(x, dw_weight, bn1, lin_weight, bn2)

    assert out.shape == (N, E)
    # bf16 fused weight + in-kernel bf16 x cast (f32 accumulate) -> relaxed tolerance vs f32 ref.
    assert jnp.allclose(out, ref, atol=3e-2, rtol=3e-2), "mismatch vs reference"
    print("KERNEL_OK")
</pallas_src>

<mosaic_0001>
module attributes {stable_mosaic.version = 11 : i64} {
  func.func @gdc_kernel(%arg0: i32, %arg1: memref<8x25088xf32, #tpu.memory_space<vmem>>, %arg2: memref<25088x128xbf16, #tpu.memory_space<vmem>>, %arg3: memref<1x128xf32, #tpu.memory_space<vmem>>, %arg4: memref<8x128xf32, #tpu.memory_space<vmem>>) attributes {dimension_semantics = [#tpu.dimension_semantics<parallel>], iteration_bounds = array<i64: 1>, scalar_prefetch = 0 : i64, scratch_operands = 0 : i64, tpu.core_type = #tpu.core_type<tc>, window_params = [{transform_indices = @transform_0, window_bounds = array<i64: 8, 25088>}, {pipeline_mode = #tpu.pipeline_mode<synchronous>, transform_indices = @transform_1, window_bounds = array<i64: 25088, 128>}, {pipeline_mode = #tpu.pipeline_mode<synchronous>, transform_indices = @transform_2, window_bounds = array<i64: 1, 128>}, {transform_indices = @transform_3, window_bounds = array<i64: 8, 128>}]} {
    %c0 = arith.constant 0 : index
    %c0_0 = arith.constant 0 : index
    %0 = vector.load %arg1[%c0, %c0_0] : memref<8x25088xf32, #tpu.memory_space<vmem>>, vector<8x25088xf32>
    %1 = arith.truncf %0 : vector<8x25088xf32> to vector<8x25088xbf16>
    %c0_1 = arith.constant 0 : index
    %c0_2 = arith.constant 0 : index
    %2 = vector.load %arg2[%c0_1, %c0_2] : memref<25088x128xbf16, #tpu.memory_space<vmem>>, vector<25088x128xbf16>
    %cst = arith.constant dense<0.000000e+00> : vector<8x128xf32>
    %3 = tpu.matmul %1, %2, %cst {dimension_numbers = #tpu.dot_dimension_numbers<[1], [0], [0], [1], [0, 0, 1, 1], [], []>} : vector<8x25088xbf16>, vector<25088x128xbf16>, vector<8x128xf32> -> vector<8x128xf32>
    %c0_3 = arith.constant 0 : index
    %c0_4 = arith.constant 0 : index
    %4 = vector.load %arg3[%c0_3, %c0_4] : memref<1x128xf32, #tpu.memory_space<vmem>>, vector<1x128xf32>
    %5 = vector.broadcast %4 : vector<1x128xf32> to vector<8x128xf32>
    %6 = arith.addf %3, %5 : vector<8x128xf32>
    %c0_5 = arith.constant 0 : index
    %c0_6 = arith.constant 0 : index
    %7 = vector.load %arg4[%c0_5, %c0_6] : memref<8x128xf32, #tpu.memory_space<vmem>>, vector<8x128xf32>
    tpu.vector_store %arg4[%c0_5, %c0_6], %6 {strides = array<i32>} : memref<8x128xf32, #tpu.memory_space<vmem>>, vector<8x128xf32>,
    return
  }
  func.func @transform_0(%arg0: i32) -> (i32, i32) {
    %c0_i32 = arith.constant 0 : i32
    %c0_i32_0 = arith.constant 0 : i32
    return %arg0, %c0_i32 : i32, i32
  }
  func.func @transform_1(%arg0: i32) -> (i32, i32) {
    %c0_i32 = arith.constant 0 : i32
    %c0_i32_0 = arith.constant 0 : i32
    %c0_i32_1 = arith.constant 0 : i32
    return %c0_i32, %c0_i32_0 : i32, i32
  }
  func.func @transform_2(%arg0: i32) -> (i32, i32) {
    %c0_i32 = arith.constant 0 : i32
    %c0_i32_0 = arith.constant 0 : i32
    %c0_i32_1 = arith.constant 0 : i32
    return %c0_i32, %c0_i32_0 : i32, i32
  }
  func.func @transform_3(%arg0: i32) -> (i32, i32) {
    %c0_i32 = arith.constant 0 : i32
    %c0_i32_0 = arith.constant 0 : i32
    return %arg0, %c0_i32 : i32, i32
  }
}

</mosaic_0001>

<bundles_post_ra>
// kernel: tpu_custom_call.1
= control target key start
LH: loop header
LB: loop body
LE: loop exit
PB: predicated region body
PF: predicated region fallthrough
CT: control target
= control target key end

     0   :  { %8 = vsyncpa [#allocation3], 0  ;;  %s25188_s0 = inlined_call_operand.hbm [shape: f32[2,25088], index: 0, kind: input, shape index: {}]   ;;  %s25189_s1 = inlined_call_operand.hbm [shape: bf16[25088,128], index: 1, kind: input, shape index: {}]   ;;  %s25190_s2 = inlined_call_operand.hbm [shape: f32[1,128], index: 2, kind: input, shape index: {}]   ;;  %s25191_s3 = inlined_call_operand.hbm [shape: f32[2,128], index: 3, kind: output, shape index: {}]  }
   0x1   :  { %9 = vsyncpa [#allocation6], 0 }
   0x2   :  { %10 = vsyncpa [#allocation4], 0 }
   0x3   :  { %15 = vsyncadd [#allocation3], 18816  ;;  %s24785_s12 = smov [#allocation5]   ;;  %s24691_s16 = scalar_lea.hbm %s25189_s1, 200704 }
   0x4   :  { %s28_s13 = sshll.u32 %s24785_s12, 4  ;;  %p24692_p0 = scmp.ne.s32.totalorder %s25189_s1, %s24691_s16  ;;  %s29_s13 = int_to_ptr.vmem [resolvable:$true] %s28_s13 }
   0x5   :  { %p24695_p1 = scmp.lt.u32.totalorder %s24691_s16, %s25189_s1 }
   0x7   :  { %p24697_p2 = pnand %p24695_p1, %p24692_p0 }
   0x9   :  { %24700 = shalt.err (!%p24697_p2)
}
   0xa   :  { %s24701_s21 = scalar_lea.vmem %s29_s13, 200704  ;;  %p24706_p4 = scmp.lt.s32.totalorder %s29_s13, %s29_s13 }
   0xb   :  { %p24702_p3 = scmp.ne.s32.totalorder %s29_s13, %s24701_s21  ;;  %p24707_p5 = scmp.lt.s32.totalorder %s24701_s21, %s24701_s21 }
   0xd   :  { %p24708_p6 = por %p24707_p5, %p24706_p4 }
   0xf   :  { %p24709_p7 = pnand %p24708_p6, %p24702_p3 }
  0x11   :  { %24712 = shalt.err (!%p24709_p7)
}
  0x12   :  { %s24786_s22 = smov 64   ;;  %s24787_s23 = smov 4  }
  0x13   :  { %34 = dma.hbm_to_vmem [thread:$0]  %s25189_s1, 200704, %s29_s13, [#allocation6], %s24786_s22, %s24786_s22, %s24787_s23  }
  0x14   :  { %s24788_s26 = smov [#allocation2]   ;;  %s24713_s30 = scalar_lea.hbm %s25188_s0, 6272 }
  0x15   :  { %s16_s27 = sshll.u32 %s24788_s26, 4  ;;  %p24714_p8 = scmp.ne.s32.totalorder %s25188_s0, %s24713_s30  ;;  %s17_s27 = int_to_ptr.vmem [resolvable:$true] %s16_s27 }
  0x16   :  { %p24717_p9 = scmp.lt.u32.totalorder %s24713_s30, %s25188_s0 }
  0x18   :  { %p24719_p10 = pnand %p24717_p9, %p24714_p8 }
  0x1a   :  { %24722 = shalt.err (!%p24719_p10)
}
  0x1b   :  { %s24723_s8 = scalar_lea.vmem %s17_s27, 6272  ;;  %s24727_s1 = scalar_lea.vmem %s17_s27, 25088 }
  0x1c   :  { %p24724_p11 = scmp.ne.s32.totalorder %s17_s27, %s24723_s8  ;;  %p24728_p12 = scmp.lt.s32.totalorder %s17_s27, %s17_s27 }
  0x1d   :  { %p24729_p13 = scmp.lt.s32.totalorder %s24727_s1, %s24723_s8 }
  0x1f   :  { %p24730_p0 = por %p24729_p13, %p24728_p12 }
  0x21   :  { %p24731_p1 = pnand %p24730_p0, %p24724_p11 }
  0x23   :  { %24734 = shalt.err (!%p24731_p1)
}
  0x24   :  { %s24789_s9 = smov 6272   ;;  %s24790_s10 = smov 392  }
  0x25   :  { %22 = dma.hbm_to_vmem [thread:$0]  %s25188_s0, 6272, %s17_s27, [#allocation3], %s24789_s9, %s24789_s9, %s24790_s10  }
  0x26   :  { %s24791_s13 = smov [#allocation7]   ;;  %s24735_s17 = scalar_lea.hbm %s25190_s2, 16 }
  0x27   :  { %s41_s14 = sshll.u32 %s24791_s13, 4  ;;  %p24736_p2 = scmp.ne.s32.totalorder %s25190_s2, %s24735_s17  ;;  %s42_s14 = int_to_ptr.vmem [resolvable:$true] %s41_s14 }
  0x28   :  { %p24739_p3 = scmp.lt.u32.totalorder %s24735_s17, %s25190_s2 }
  0x2a   :  { %p24741_p4 = pnand %p24739_p3, %p24736_p2 }
  0x2c   :  { %24744 = shalt.err (!%p24741_p4)
}
  0x2d   :  { %s24745_s22 = scalar_lea.vmem %s42_s14, 16  ;;  %s24749_s0 = scalar_lea.vmem %s42_s14, 32 }
  0x2e   :  { %p24746_p5 = scmp.ne.s32.totalorder %s42_s14, %s24745_s22  ;;  %p24750_p6 = scmp.lt.s32.totalorder %s42_s14, %s42_s14 }
  0x2f   :  { %p24751_p7 = scmp.lt.s32.totalorder %s24749_s0, %s24745_s22 }
  0x31   :  { %p24752_p8 = por %p24751_p7, %p24750_p6 }
  0x33   :  { %p24753_p9 = pnand %p24752_p8, %p24746_p5 }
  0x35   :  { %24756 = shalt.err (!%p24753_p9)
}
  0x36   :  { %44 = dma.hbm_to_vmem [thread:$0]  %s25190_s2, 16, %s42_s14, [#allocation6]  }
  0x37   :  { %24779 = dma.done.wait [#allocation3], 25088  }
  0x38   :  { %24780 = vsyncadd [#allocation3], 4294942208 }
  0x39   :  { %24781 = dma.done.wait [#allocation6], 200720  }
  0x3a   :  { %24782 = vsyncadd [#allocation6], 4294766576  ;;  %v22829_v0 = vld [vmem:[#allocation5 + $0x40] sm:$0xff]   ;;  %v22833_v4 = vld [vmem:[#allocation5 + $0x48] sm:$0xff]   ;;  %v24792_v24 = vmov 1983009808   ;;  %v454_v26 = vlaneseq }
  0x3b   :  { %v22830_v1 = vld [vmem:[#allocation5 + $0xc0] sm:$0xff]   ;;  %20662 = vmatprep.subr.bf16.mxu0 %v22829_v0  ;;  %v22834_v5 = vld [vmem:[#allocation5 + $0xc8] sm:$0xff]   ;;  %v22837_v8 = vld [vmem:[#allocation5 + $0x50] sm:$0xff]   ;;  %v452_v25 = vunpack.c.l.s4 %v24792_v24 }
  0x3c   :  { %v22831_v2 = vld [vmem:[#allocation5] sm:$0xff]   ;;  %20684 = vmatprep.subr.bf16.mxu1 %v22830_v1  ;;  %v22835_v6 = vld [vmem:[#allocation5 + $0x8] sm:$0xff]   ;;  %v22838_v9 = vld [vmem:[#allocation5 + $0xd0] sm:$0xff]   ;;  %v455_v32 = vshrl.u32 %v454_v26, 7 }
  0x3d   :  { %v22832_v3 = vld [vmem:[#allocation5 + $0x80] sm:$0xff]   ;;  %20663 = vmatpush3.bf16.msra.mxu0 %v22831_v2  ;;  %v22836_v7 = vld [vmem:[#allocation5 + $0x88] sm:$0xff]   ;;  %v22839_v10 = vld [vmem:[#allocation5 + $0x10] sm:$0xff]   ;;  %v453_v31 = vunpack.c.0.s8 %v452_v25 }
  0x3e   :  { %20685 = vmatpush3.bf16.msra.mxu1 %v22832_v3  ;;  %20664 = vmatprep.subr.bf16.mxu0 %v22833_v4  ;;  %v22840_v11 = vld [vmem:[#allocation5 + $0x90] sm:$0xff]   ;;  %v22841_v12 = vld [vmem:[#allocation5 + $0x58] sm:$0xff]   ;;  %v22845_v16 = vld [vmem:[#allocation5 + $0x60] sm:$0xff]  }
  0x3f   :  { %20686 = vmatprep.subr.bf16.mxu1 %v22834_v5  ;;  %v22842_v13 = vld [vmem:[#allocation5 + $0xd8] sm:$0xff]   ;;  %v22846_v17 = vld [vmem:[#allocation5 + $0xe0] sm:$0xff]   ;;  %v22849_v20 = vld [vmem:[#allocation5 + $0x68] sm:$0xff]   ;;  %v24852_v37 = vsub.s32 %v453_v31, %v455_v32 }
  0x40   :  { %v22843_v14 = vld [vmem:[#allocation5 + $0x18] sm:$0xff]   ;;  %v22847_v18 = vld [vmem:[#allocation5 + $0x20] sm:$0xff]   ;;  %v22850_v21 = vld [vmem:[#allocation5 + $0xe8] sm:$0xff]  }
  0x41   :  { %20665 = vmatpush3.bf16.msra.mxu0 %v22835_v6  ;;  %v22844_v15 = vld [vmem:[#allocation5 + $0x98] sm:$0xff]   ;;  %v22848_v19 = vld [vmem:[#allocation5 + $0xa0] sm:$0xff]   ;;  %v22851_v22 = vld [vmem:[#allocation5 + $0x28] sm:$0xff]  }
  0x42   :  { %20687 = vmatpush3.bf16.msra.mxu1 %v22836_v7  ;;  %20666 = vmatprep.subr.bf16.mxu0 %v22837_v8  ;;  %v22852_v23 = vld [vmem:[#allocation5 + $0xa8] sm:$0xff]   ;;  %v22853_v27 = vld [vmem:[#allocation5 + $0x70] sm:$0xff]   ;;  %v22857_v33 = vld [vmem:[#allocation5 + $0x78] sm:$0xff]  }
  0x43   :  { %20688 = vmatprep.subr.bf16.mxu1 %v22838_v9  ;;  %v22854_v28 = vld [vmem:[#allocation5 + $0xf0] sm:$0xff]   ;;  %v22858_v34 = vld [vmem:[#allocation5 + $0xf8] sm:$0xff]   ;;  %v22861_v38 = vld [vmem:[#allocation2] ss:$392 sps:$4 sm:$0xff]  }
  0x44   :  { %v22855_v29 = vld [vmem:[#allocation5 + $0x30] sm:$0xff]   ;;  %v22859_v35 = vld [vmem:[#allocation5 + $0x38] sm:$0xff]   ;;  %v22865_v40 = vld [vmem:[#allocation2 + $0x4] ss:$392 sps:$4 sm:$0xff]   ;;  %v457_v42 = vrot.slane %v22861_v38, %v24852_v37 }
  0x45   :  { %20667 = vmatpush3.bf16.msra.mxu0 %v22839_v10  ;;  %v22856_v30 = vld [vmem:[#allocation5 + $0xb0] sm:$0xff]   ;;  %v22860_v36 = vld [vmem:[#allocation5 + $0xb8] sm:$0xff]   ;;  %v22867_v44 = vld [vmem:[#allocation5 + $0x140] sm:$0xff]   ;;  %v464_v45 = vrot.slane %v22865_v40, %v24852_v37 }
  0x46   :  { %20689 = vmatpush3.bf16.msra.mxu1 %v22840_v11  ;;  %20668 = vmatprep.subr.bf16.mxu0 %v22841_v12  ;;  %v22863_v39 = vld [vmem:[#allocation2 + $0x310] ss:$392 sps:$4 sm:$0xff]   ;;  %v22866_v41 = vld [vmem:[#allocation2 + $0x314] ss:$392 sps:$4 sm:$0xff]   ;;  %v22868_v47 = vld [vmem:[#allocation5 + $0x1c0] sm:$0xff]  }
  0x47   :  { %20690 = vmatprep.subr.bf16.mxu1 %v22842_v13  ;;  %v471_v43 = vrot.slane %v22863_v39, %v24852_v37  ;;  %v478_v46 = vrot.slane %v22866_v41, %v24852_v37  ;;  %v22869_v50 = vld [vmem:[#allocation5 + $0x100] sm:$0xff]   ;;  %v22871_v56 = vld [vmem:[#allocation5 + $0x148] sm:$0xff]   ;;  %v22875_v62 = vld [vmem:[#allocation5 + $0x150] sm:$0xff]  }
  0x48   :  { %v22870_v53 = vld [vmem:[#allocation5 + $0x180] sm:$0xff]   ;;  %v22872_v59 = vld [vmem:[#allocation5 + $0x1c8] sm:$0xff]   ;;  %v22876_v63 = vld [vmem:[#allocation5 + $0x1d0] sm:$0xff]  }
  0x49   :  { %20669 = vmatpush3.bf16.msra.mxu0 %v22843_v14  ;;  %v480_v48 = vcombine.high %v457_v42, %v471_v43  ;;  %v479_v49 = vcombine.low %v457_v42, %v471_v43  ;;  %v482_v51 = vcombine.high %v464_v45, %v478_v46  ;;  %v481_v52 = vcombine.low %v464_v45, %v478_v46  ;;  %v22873_v60 = vld [vmem:[#allocation5 + $0x108] sm:$0xff]   ;;  %v22877_v0 = vld [vmem:[#allocation5 + $0x110] sm:$0xff]   ;;  %v22879_v2 = vld [vmem:[#allocation5 + $0x158] sm:$0xff]  }
  0x4a   :  { %20691 = vmatpush3.bf16.msra.mxu1 %v22844_v15  ;;  %20670 = vmatprep.subr.bf16.mxu0 %v22845_v16  ;;  %v22874_v61 = vld [vmem:[#allocation5 + $0x188] sm:$0xff]   ;;  %v22878_v1 = vld [vmem:[#allocation5 + $0x190] sm:$0xff]   ;;  %v22880_v3 = vld [vmem:[#allocation5 + $0x1d8] sm:$0xff]  }
  0x4b   :  { %20692 = vmatprep.subr.bf16.mxu1 %v22846_v17  ;;  %v2408_v54 = vpack.c.bf16 %v480_v48, %v480_v48  ;;  %v2407_v55 = vpack.c.bf16 %v479_v49, %v479_v49  ;;  %v2410_v57 = vpack.c.bf16 %v482_v51, %v482_v51  ;;  %v2409_v58 = vpack.c.bf16 %v481_v52, %v481_v52  ;;  %v22881_v4 = vld [vmem:[#allocation5 + $0x118] sm:$0xff]   ;;  %v22883_v6 = vld [vmem:[#allocation5 + $0x160] sm:$0xff]   ;;  %v22887_v10 = vld [vmem:[#allocation5 + $0x168] sm:$0xff]  }
  0x4c   :  { %v22882_v5 = vld [vmem:[#allocation5 + $0x198] sm:$0xff]   ;;  %v22884_v7 = vld [vmem:[#allocation5 + $0x1e0] sm:$0xff]   ;;  %v22888_v11 = vld [vmem:[#allocation5 + $0x1e8] sm:$0xff]  }
  0x4d   :  { %20671 = vmatpush3.bf16.msra.mxu0 %v22847_v18  ;;  %15186 = vmatprep.mubr.bf16.mxu0 %v2408_v54  ;;  %v22885_v8 = vld [vmem:[#allocation5 + $0x120] sm:$0xff]   ;;  %v22889_v12 = vld [vmem:[#allocation5 + $0x128] sm:$0xff]   ;;  %v22891_v14 = vld [vmem:[#allocation5 + $0x170] sm:$0xff]  }
  0x4e   :  { %20693 = vmatpush3.bf16.msra.mxu1 %v22848_v19  ;;  %20672 = vmatprep.subr.bf16.mxu0 %v22849_v20  ;;  %v22886_v9 = vld [vmem:[#allocation5 + $0x1a0] sm:$0xff]   ;;  %v22890_v13 = vld [vmem:[#allocation5 + $0x1a8] sm:$0xff]   ;;  %v22892_v15 = vld [vmem:[#allocation5 + $0x1f0] sm:$0xff]  }
  0x4f   :  { %20694 = vmatprep.subr.bf16.mxu1 %v22850_v21  ;;  %15226 = vmatprep.mubr.bf16.mxu1 %v2410_v57  ;;  %v22893_v16 = vld [vmem:[#allocation5 + $0x130] sm:$0xff]   ;;  %v22895_v18 = vld [vmem:[#allocation5 + $0x178] sm:$0xff]   ;;  %v22906_v31 = vld [vmem:[#allocation5 + $0x2c0] sm:$0xff]  }
  0x50   :  { %v22894_v17 = vld [vmem:[#allocation5 + $0x1b0] sm:$0xff]   ;;  %v22896_v19 = vld [vmem:[#allocation5 + $0x1f8] sm:$0xff]   ;;  %v22908_v38 = vld [vmem:[#allocation5 + $0x280] sm:$0xff]  }
  0x51   :  { %20673 = vmatpush3.bf16.msra.mxu0 %v22851_v22  ;;  %v22897_v20 = vld [vmem:[#allocation5 + $0x138] sm:$0xff]   ;;  %v22899_v22 = vld [vmem:[#allocation2 + $0x8] ss:$392 sps:$4 sm:$0xff]   ;;  %v22903_v24 = vld [vmem:[#allocation2 + $0xc] ss:$392 sps:$4 sm:$0xff]  }
  0x52   :  { %20695 = vmatpush3.bf16.msra.mxu1 %v22852_v23  ;;  %20674 = vmatprep.subr.bf16.mxu0 %v22853_v27  ;;  %v22898_v21 = vld [vmem:[#allocation5 + $0x1b8] sm:$0xff]   ;;  %v493_v26 = vrot.slane %v22899_v22, %v24852_v37  ;;  %v22909_v41 = vld [vmem:[#allocation5 + $0x248] sm:$0xff]   ;;  %v22914_v48 = vld [vmem:[#allocation5 + $0x2d0] sm:$0xff]  }
  0x53   :  { %20696 = vmatprep.subr.bf16.mxu1 %v22854_v28  ;;  %v22901_v23 = vld [vmem:[#allocation2 + $0x318] ss:$392 sps:$4 sm:$0xff]   ;;  %v22904_v25 = vld [vmem:[#allocation2 + $0x31c] ss:$392 sps:$4 sm:$0xff]   ;;  %v500_v28 = vrot.slane %v22903_v24, %v24852_v37  ;;  %v22911_v45 = vld [vmem:[#allocation5 + $0x208] sm:$0xff]  }
  0x54   :  { %v507_v27 = vrot.slane %v22901_v23, %v24852_v37  ;;  %v22912_v46 = vld [vmem:[#allocation5 + $0x288] sm:$0xff]   ;;  %v22915_v49 = vld [vmem:[#allocation5 + $0x210] sm:$0xff]   ;;  %v22917_v51 = vld [vmem:[#allocation5 + $0x258] sm:$0xff]  }
  0x55   :  { %20675 = vmatpush3.bf16.msra.mxu0 %v22855_v29  ;;  %v22905_v29 = vld [vmem:[#allocation5 + $0x240] sm:$0xff]   ;;  %v22918_v52 = vld [vmem:[#allocation5 + $0x2d8] sm:$0xff]  }
  0x56   :  { %20697 = vmatpush3.bf16.msra.mxu1 %v22856_v30  ;;  %20676 = vmatprep.subr.bf16.mxu0 %v22857_v33  ;;  %v514_v30 = vrot.slane %v22904_v25, %v24852_v37  ;;  %v516_v32 = vcombine.high %v493_v26, %v507_v27  ;;  %v515_v33 = vcombine.low %v493_v26, %v507_v27  ;;  %v22920_v54 = vld [vmem:[#allocation5 + $0x298] sm:$0xff]   ;;  %v22923_v57 = vld [vmem:[#allocation5 + $0x220] sm:$0xff]   ;;  %v22947_v27 = vld [vmem:[#allocation5 + $0x348] sm:$0xff]  }
  0x57   :  { %20698 = vmatprep.subr.bf16.mxu1 %v22858_v34  ;;  %v22907_v34 = vld [vmem:[#allocation5 + $0x200] sm:$0xff]  }
  0x58   :  { %v2412_v39 = vpack.c.bf16 %v516_v32, %v516_v32  ;;  %v2411_v40 = vpack.c.bf16 %v515_v33, %v515_v33  ;;  %v22946_v22 = vld [vmem:[#allocation5 + $0x380] sm:$0xff]   ;;  %v22952_v32 = vld [vmem:[#allocation5 + $0x3d0] sm:$0xff]  }
  0x59   :  { %20677 = vmatpush3.bf16.msra.mxu0 %v22859_v35  ;;  %v518_v35 = vcombine.high %v500_v28, %v514_v30  ;;  %v22953_v33 = vld [vmem:[#allocation5 + $0x310] sm:$0xff]  }
  0x5a   :  { %20699 = vmatpush3.bf16.msra.mxu1 %v22860_v36  ;;  %20706 = vmatprep.subr.bf16.mxu0 %v22867_v44  ;;  %v517_v36 = vcombine.low %v500_v28, %v514_v30  ;;  %v22910_v44 = vld [vmem:[#allocation5 + $0x2c8] sm:$0xff]  }
  0x5b   :  { %20728 = vmatprep.subr.bf16.mxu1 %v22868_v47  ;;  %v2414_v42 = vpack.c.bf16 %v518_v35, %v518_v35  ;;  %v22913_v47 = vld [vmem:[#allocation5 + $0x250] sm:$0xff]   ;;  %v22948_v28 = vld [vmem:[#allocation5 + $0x3c8] sm:$0xff]   ;;  %v22955_v35 = vld [vmem:[#allocation5 + $0x358] sm:$0xff]  }
  0x5c   :  { %15187 = vmatmul.mubr.bf16.vlgmr.msra.gmra.mrb[0].mxu0 %v2407_v55  ;;  %v2413_v43 = vpack.c.bf16 %v517_v36, %v517_v36  ;;  %v22921_v55 = vld [vmem:[#allocation5 + $0x260] sm:$0xff]   ;;  %v22950_v30 = vld [vmem:[#allocation5 + $0x388] sm:$0xff]   ;;  %v22956_v36 = vld [vmem:[#allocation5 + $0x3d8] sm:$0xff]  }
  0x5d   :  { %15227 = vmatmul.mubr.bf16.vlgmr.msra.gmra.mrb[0].mxu1 %v2409_v58  ;;  %20707 = vmatpush3.bf16.msra.mxu0 %v22869_v50  ;;  %v22916_v50 = vld [vmem:[#allocation5 + $0x290] sm:$0xff]   ;;  %v22924_v58 = vld [vmem:[#allocation5 + $0x2a0] sm:$0xff]  }
  0x5e   :  { %20729 = vmatpush3.bf16.msra.mxu1 %v22870_v53  ;;  %20708 = vmatprep.subr.bf16.mxu0 %v22871_v56  ;;  %v22919_v53 = vld [vmem:[#allocation5 + $0x218] sm:$0xff]   ;;  %v22922_v56 = vld [vmem:[#allocation5 + $0x2e0] sm:$0xff]  }
  0x5f   :  { %20730 = vmatprep.subr.bf16.mxu1 %v22872_v59  ;;  %15266 = vmatprep.mubr.bf16.mxu0 %v2412_v39  ;;  %v22925_v59 = vld [vmem:[#allocation5 + $0x268] sm:$0xff]   ;;  %v22958_v39 = vld [vmem:[#allocation5 + $0x398] sm:$0xff]  }
  0x60   :  { %15306 = vmatprep.mubr.bf16.mxu1 %v2414_v42  ;;  %v22961_v42 = vld [vmem:[#allocation5 + $0x320] sm:$0xff]  }
  0x61   :  { %20709 = vmatpush3.bf16.msra.mxu0 %v22873_v60  ;;  %v22926_v60 = vld [vmem:[#allocation5 + $0x2e8] sm:$0xff]  }
  0x62   :  { %20731 = vmatpush3.bf16.msra.mxu1 %v22874_v61  ;;  %20710 = vmatprep.subr.bf16.mxu0 %v22875_v62  ;;  %v22927_v61 = vld [vmem:[#allocation5 + $0x228] sm:$0xff]  }
  0x63   :  { %20732 = vmatprep.subr.bf16.mxu1 %v22876_v63  ;;  %v22928_v62 = vld [vmem:[#allocation5 + $0x2a8] sm:$0xff]   ;;  %v22929_v63 = vld [vmem:[#allocation5 + $0x270] sm:$0xff]  }
  0x65   :  { %20711 = vmatpush3.bf16.msra.mxu0 %v22877_v0  ;;  %v22930_v0 = vld [vmem:[#allocation5 + $0x2f0] sm:$0xff]  }
  0x66   :  { %20733 = vmatpush3.bf16.msra.mxu1 %v22878_v1  ;;  %20712 = vmatprep.subr.bf16.mxu0 %v22879_v2  ;;  %v22931_v1 = vld [vmem:[#allocation5 + $0x230] sm:$0xff]  }
  0x67   :  { %20734 = vmatprep.subr.bf16.mxu1 %v22880_v3  ;;  %v22932_v2 = vld [vmem:[#allocation5 + $0x2b0] sm:$0xff]   ;;  %v22933_v3 = vld [vmem:[#allocation5 + $0x278] sm:$0xff]  }
  0x69   :  { %20713 = vmatpush3.bf16.msra.mxu0 %v22881_v4  ;;  %v22934_v4 = vld [vmem:[#allocation5 + $0x2f8] sm:$0xff]  }
  0x6a   :  { %20735 = vmatpush3.bf16.msra.mxu1 %v22882_v5  ;;  %20714 = vmatprep.subr.bf16.mxu0 %v22883_v6  ;;  %v22935_v5 = vld [vmem:[#allocation5 + $0x238] sm:$0xff]  }
  0x6b   :  { %20736 = vmatprep.subr.bf16.mxu1 %v22884_v7  ;;  %v22936_v6 = vld [vmem:[#allocation5 + $0x2b8] sm:$0xff]  }
  0x6c   :  { %v22937_v7 = vld [vmem:[#allocation2 + $0x10] ss:$392 sps:$4 sm:$0xff]  }
  0x6d   :  { %20715 = vmatpush3.bf16.msra.mxu0 %v22885_v8  ;;  %v22939_v8 = vld [vmem:[#allocation2 + $0x320] ss:$392 sps:$4 sm:$0xff]  }
  0x6e   :  { %20737 = vmatpush3.bf16.msra.mxu1 %v22886_v9  ;;  %20716 = vmatprep.subr.bf16.mxu0 %v22887_v10  ;;  %v22941_v9 = vld [vmem:[#allocation2 + $0x14] ss:$392 sps:$4 sm:$0xff]   ;;  %v22942_v10 = vld [vmem:[#allocation2 + $0x324] ss:$392 sps:$4 sm:$0xff]  }
  0x6f   :  { %20738 = vmatprep.subr.bf16.mxu1 %v22888_v11  ;;  %v529_v11 = vrot.slane %v22937_v7, %v24852_v37  ;;  %v22984_v7 = vld [vmem:[#allocation5 + $0x480] sm:$0xff]  }
  0x71   :  { %20717 = vmatpush3.bf16.msra.mxu0 %v22889_v12  ;;  %v22943_v12 = vld [vmem:[#allocation5 + $0x340] sm:$0xff]  }
  0x72   :  { %20739 = vmatpush3.bf16.msra.mxu1 %v22890_v13  ;;  %20718 = vmatprep.subr.bf16.mxu0 %v22891_v14  ;;  %v543_v13 = vrot.slane %v22939_v8, %v24852_v37  ;;  %v536_v14 = vrot.slane %v22941_v9, %v24852_v37 }
  0x73   :  { %20740 = vmatprep.subr.bf16.mxu1 %v22892_v15  ;;  %v550_v15 = vrot.slane %v22942_v10, %v24852_v37  ;;  %v22985_v10 = vld [vmem:[#allocation5 + $0x448] sm:$0xff]  }
  0x75   :  { %20719 = vmatpush3.bf16.msra.mxu0 %v22893_v16  ;;  %v22944_v16 = vld [vmem:[#allocation5 + $0x3c0] sm:$0xff]  }
  0x76   :  { %20741 = vmatpush3.bf16.msra.mxu1 %v22894_v17  ;;  %20720 = vmatprep.subr.bf16.mxu0 %v22895_v18  ;;  %v552_v17 = vcombine.high %v529_v11, %v543_v13  ;;  %v554_v18 = vcombine.high %v536_v14, %v550_v15 }
  0x77   :  { %20742 = vmatprep.subr.bf16.mxu1 %v22896_v19  ;;  %v551_v19 = vcombine.low %v529_v11, %v543_v13  ;;  %v22986_v13 = vld [vmem:[#allocation5 + $0x4c8] sm:$0xff]  }
  0x78   :  { %v2416_v23 = vpack.c.bf16 %v552_v17, %v552_v17  ;;  %v2418_v24 = vpack.c.bf16 %v554_v18, %v554_v18  ;;  %v22990_v17 = vld [vmem:[#allocation5 + $0x4d0] sm:$0xff]  }
  0x79   :  { %20721 = vmatpush3.bf16.msra.mxu0 %v22897_v20  ;;  %v553_v20 = vcombine.low %v536_v14, %v550_v15  ;;  %v2415_v25 = vpack.c.bf16 %v551_v19, %v551_v19  ;;  %v22987_v14 = vld [vmem:[#allocation5 + $0x408] sm:$0xff]   ;;  %v22991_v18 = vld [vmem:[#allocation5 + $0x410] sm:$0xff]  }
  0x7a   :  { %20743 = vmatpush3.bf16.msra.mxu1 %v22898_v21  ;;  %20750 = vmatprep.subr.bf16.mxu0 %v22905_v29  ;;  %v22945_v21 = vld [vmem:[#allocation5 + $0x300] sm:$0xff]   ;;  %v22949_v29 = vld [vmem:[#allocation5 + $0x308] sm:$0xff]   ;;  %v22992_v19 = vld [vmem:[#allocation5 + $0x490] sm:$0xff]  }
  0x7b   :  { %20772 = vmatprep.subr.bf16.mxu1 %v22906_v31  ;;  %v2417_v26 = vpack.c.bf16 %v553_v20, %v553_v20  ;;  %v22951_v31 = vld [vmem:[#allocation5 + $0x350] sm:$0xff]   ;;  %v22988_v15 = vld [vmem:[#allocation5 + $0x488] sm:$0xff]   ;;  %v22993_v20 = vld [vmem:[#allocation5 + $0x458] sm:$0xff]  }
  0x7c   :  { %15267 = vmatmul.mubr.bf16.vlgmr.msra.gmra.mrb[4].mxu0 %v2411_v40  ;;  %v22959_v40 = vld [vmem:[#allocation5 + $0x360] sm:$0xff]  }
  0x7d   :  { %15307 = vmatmul.mubr.bf16.vlgmr.msra.gmra.mrb[4].mxu1 %v2413_v43  ;;  %20751 = vmatpush3.bf16.msra.mxu0 %v22907_v34  ;;  %v22954_v34 = vld [vmem:[#allocation5 + $0x390] sm:$0xff]   ;;  %v22962_v43 = vld [vmem:[#allocation5 + $0x3a0] sm:$0xff]  }
  0x7e   :  { %20773 = vmatpush3.bf16.msra.mxu1 %v22908_v38  ;;  %20752 = vmatprep.subr.bf16.mxu0 %v22909_v41  ;;  %v22957_v38 = vld [vmem:[#allocation5 + $0x318] sm:$0xff]   ;;  %v22960_v41 = vld [vmem:[#allocation5 + $0x3e0] sm:$0xff]  }
  0x7f   :  { %20774 = vmatprep.subr.bf16.mxu1 %v22910_v44  ;;  %15346 = vmatprep.mubr.bf16.mxu0 %v2416_v23  ;;  %v22963_v44 = vld [vmem:[#allocation5 + $0x368] sm:$0xff]   ;;  %v22996_v23 = vld [vmem:[#allocation5 + $0x498] sm:$0xff]  }
  0x80   :  { %15386 = vmatprep.mubr.bf16.mxu1 %v2418_v24  ;;  %v22997_v24 = vld [vmem:[#allocation5 + $0x460] sm:$0xff]  }
  0x81   :  { %20753 = vmatpush3.bf16.msra.mxu0 %v22911_v45  ;;  %v22964_v45 = vld [vmem:[#allocation5 + $0x3e8] sm:$0xff]  }
  0x82   :  { %20775 = vmatpush3.bf16.msra.mxu1 %v22912_v46  ;;  %20754 = vmatprep.subr.bf16.mxu0 %v22913_v47  ;;  %v22965_v46 = vld [vmem:[#allocation5 + $0x328] sm:$0xff]  }
  0x83   :  { %20776 = vmatprep.subr.bf16.mxu1 %v22914_v48  ;;  %v22966_v47 = vld [vmem:[#allocation5 + $0x3a8] sm:$0xff]   ;;  %v22967_v48 = vld [vmem:[#allocation5 + $0x370] sm:$0xff]  }
  0x85   :  { %20755 = vmatpush3.bf16.msra.mxu0 %v22915_v49  ;;  %v22968_v49 = vld [vmem:[#allocation5 + $0x3f0] sm:$0xff]  }
  0x86   :  { %20777 = vmatpush3.bf16.msra.mxu1 %v22916_v50  ;;  %20756 = vmatprep.subr.bf16.mxu0 %v22917_v51  ;;  %v22969_v50 = vld [vmem:[#allocation5 + $0x330] sm:$0xff]  }
  0x87   :  { %20778 = vmatprep.subr.bf16.mxu1 %v22918_v52  ;;  %v22970_v51 = vld [vmem:[#allocation5 + $0x3b0] sm:$0xff]   ;;  %v22971_v52 = vld [vmem:[#allocation5 + $0x378] sm:$0xff]  }
  0x89   :  { %20757 = vmatpush3.bf16.msra.mxu0 %v22919_v53  ;;  %v22972_v53 = vld [vmem:[#allocation5 + $0x3f8] sm:$0xff]  }
  0x8a   :  { %20779 = vmatpush3.bf16.msra.mxu1 %v22920_v54  ;;  %20758 = vmatprep.subr.bf16.mxu0 %v22921_v55  ;;  %v22973_v54 = vld [vmem:[#allocation5 + $0x338] sm:$0xff]  }
  0x8b   :  { %20780 = vmatprep.subr.bf16.mxu1 %v22922_v56  ;;  %v22974_v55 = vld [vmem:[#allocation5 + $0x3b8] sm:$0xff]  }
  0x8c   :  { %v22975_v56 = vld [vmem:[#allocation2 + $0x18] ss:$392 sps:$4 sm:$0xff]  }
  0x8d   :  { %20759 = vmatpush3.bf16.msra.mxu0 %v22923_v57  ;;  %v22977_v57 = vld [vmem:[#allocation2 + $0x328] ss:$392 sps:$4 sm:$0xff]  }
  0x8e   :  { %20781 = vmatpush3.bf16.msra.mxu1 %v22924_v58  ;;  %20760 = vmatprep.subr.bf16.mxu0 %v22925_v59  ;;  %v22979_v58 = vld [vmem:[#allocation2 + $0x1c] ss:$392 sps:$4 sm:$0xff]   ;;  %v22980_v59 = vld [vmem:[#allocation2 + $0x32c] ss:$392 sps:$4 sm:$0xff]  }
  0x8f   :  { %20782 = vmatprep.subr.bf16.mxu1 %v22926_v60  ;;  %v565_v60 = vrot.slane %v22975_v56, %v24852_v37  ;;  %v23022_v56 = vld [vmem:[#allocation5 + $0x580] sm:$0xff]  }
  0x91   :  { %20761 = vmatpush3.bf16.msra.mxu0 %v22927_v61  ;;  %v579_v61 = vrot.slane %v22977_v57, %v24852_v37 }
  0x92   :  { %20783 = vmatpush3.bf16.msra.mxu1 %v22928_v62  ;;  %20762 = vmatprep.subr.bf16.mxu0 %v22929_v63  ;;  %v22981_v62 = vld [vmem:[#allocation5 + $0x440] sm:$0xff]   ;;  %v572_v63 = vrot.slane %v22979_v58, %v24852_v37 }
  0x93   :  { %20784 = vmatprep.subr.bf16.mxu1 %v22930_v0  ;;  %v586_v0 = vrot.slane %v22980_v59, %v24852_v37  ;;  %v23023_v59 = vld [vmem:[#allocation5 + $0x548] sm:$0xff]  }
  0x95   :  { %20763 = vmatpush3.bf16.msra.mxu0 %v22931_v1  ;;  %v22982_v1 = vld [vmem:[#allocation5 + $0x4c0] sm:$0xff]  }
  0x96   :  { %20785 = vmatpush3.bf16.msra.mxu1 %v22932_v2  ;;  %20764 = vmatprep.subr.bf16.mxu0 %v22933_v3  ;;  %v588_v2 = vcombine.high %v565_v60, %v579_v61  ;;  %v587_v3 = vcombine.low %v565_v60, %v579_v61 }
  0x97   :  { %20786 = vmatprep.subr.bf16.mxu1 %v22934_v4  ;;  %v22983_v4 = vld [vmem:[#allocation5 + $0x400] sm:$0xff]  }
  0x98   :  { %v2420_v8 = vpack.c.bf16 %v588_v2, %v588_v2  ;;  %v2419_v9 = vpack.c.bf16 %v587_v3, %v587_v3  ;;  %v23028_v2 = vld [vmem:[#allocation5 + $0x5d0] sm:$0xff]  }
  0x99   :  { %20765 = vmatpush3.bf16.msra.mxu0 %v22935_v5  ;;  %v590_v5 = vcombine.high %v572_v63, %v586_v0  ;;  %v23029_v3 = vld [vmem:[#allocation5 + $0x510] sm:$0xff]  }
  0x9a   :  { %20787 = vmatpush3.bf16.msra.mxu1 %v22936_v6  ;;  %20794 = vmatprep.subr.bf16.mxu0 %v22943_v12  ;;  %v589_v6 = vcombine.low %v572_v63, %v586_v0  ;;  %v23025_v63 = vld [vmem:[#allocation5 + $0x508] sm:$0xff]  }
  0x9b   :  { %20816 = vmatprep.subr.bf16.mxu1 %v22944_v16  ;;  %v2422_v11 = vpack.c.bf16 %v590_v5, %v590_v5  ;;  %v22989_v16 = vld [vmem:[#allocation5 + $0x450] sm:$0xff]   ;;  %v23026_v0 = vld [vmem:[#allocation5 + $0x588] sm:$0xff]   ;;  %v23031_v5 = vld [vmem:[#allocation5 + $0x558] sm:$0xff]  }
  0x9c   :  { %15347 = vmatmul.mubr.bf16.vlgmr.msra.gmra.mrb[8].mxu0 %v2415_v25  ;;  %v2421_v12 = vpack.c.bf16 %v589_v6, %v589_v6  ;;  %v22998_v25 = vld [vmem:[#allocation5 + $0x4e0] sm:$0xff]   ;;  %v23032_v6 = vld [vmem:[#allocation5 + $0x5d8] sm:$0xff]  }
  0x9d   :  { %15387 = vmatmul.mubr.bf16.vlgmr.msra.gmra.mrb[8].mxu1 %v2417_v26  ;;  %20795 = vmatpush3.bf16.msra.mxu0 %v22945_v21  ;;  %v22994_v21 = vld [vmem:[#allocation5 + $0x4d8] sm:$0xff]   ;;  %v22999_v26 = vld [vmem:[#allocation5 + $0x420] sm:$0xff]  }
  0x9e   :  { %20817 = vmatpush3.bf16.msra.mxu1 %v22946_v22  ;;  %20796 = vmatprep.subr.bf16.mxu0 %v22947_v27  ;;  %v22995_v22 = vld [vmem:[#allocation5 + $0x418] sm:$0xff]   ;;  %v23000_v27 = vld [vmem:[#allocation5 + $0x4a0] sm:$0xff]  }
  0x9f   :  { %20818 = vmatprep.subr.bf16.mxu1 %v22948_v28  ;;  %15426 = vmatprep.mubr.bf16.mxu0 %v2420_v8  ;;  %v23001_v28 = vld [vmem:[#allocation5 + $0x468] sm:$0xff]   ;;  %v23034_v8 = vld [vmem:[#allocation5 + $0x598] sm:$0xff]  }
  0xa0   :  { %15466 = vmatprep.mubr.bf16.mxu1 %v2422_v11  ;;  %v23037_v11 = vld [vmem:[#allocation5 + $0x520] sm:$0xff]  }
  0xa1   :  { %20797 = vmatpush3.bf16.msra.mxu0 %v22949_v29  ;;  %v23002_v29 = vld [vmem:[#allocation5 + $0x4e8] sm:$0xff]  }
  0xa2   :  { %20819 = vmatpush3.bf16.msra.mxu1 %v22950_v30  ;;  %20798 = vmatprep.subr.bf16.mxu0 %v22951_v31  ;;  %v23003_v30 = vld [vmem:[#allocation5 + $0x428] sm:$0xff]  }
  0xa3   :  { %20820 = vmatprep.subr.bf16.mxu1 %v22952_v32  ;;  %v23004_v31 = vld [vmem:[#allocation5 + $0x4a8] sm:$0xff]   ;;  %v23005_v32 = vld [vmem:[#allocation5 + $0x470] sm:$0xff]  }
  0xa5   :  { %20799 = vmatpush3.bf16.msra.mxu0 %v22953_v33  ;;  %v23006_v33 = vld [vmem:[#allocation5 + $0x4f0] sm:$0xff]  }
  0xa6   :  { %20821 = vmatpush3.bf16.msra.mxu1 %v22954_v34  ;;  %20800 = vmatprep.subr.bf16.mxu0 %v22955_v35  ;;  %v23007_v34 = vld [vmem:[#allocation5 + $0x430] sm:$0xff]  }
  0xa7   :  { %20822 = vmatprep.subr.bf16.mxu1 %v22956_v36  ;;  %v23008_v35 = vld [vmem:[#allocation5 + $0x4b0] sm:$0xff]   ;;  %v23009_v36 = vld [vmem:[#allocation5 + $0x478] sm:$0xff]  }
  0xa9   :  { %20801 = vmatpush3.bf16.msra.mxu0 %v22957_v38  ;;  %v23010_v38 = vld [vmem:[#allocation5 + $0x4f8] sm:$0xff]  }
  0xaa   :  { %20823 = vmatpush3.bf16.msra.mxu1 %v22958_v39  ;;  %20802 = vmatprep.subr.bf16.mxu0 %v22959_v40  ;;  %v23011_v39 = vld [vmem:[#allocation5 + $0x438] sm:$0xff]  }
  0xab   :  { %20824 = vmatprep.subr.bf16.mxu1 %v22960_v41  ;;  %v23012_v40 = vld [vmem:[#allocation5 + $0x4b8] sm:$0xff]   ;;  %v23013_v41 = vld [vmem:[#allocation2 + $0x20] ss:$392 sps:$4 sm:$0xff]  }
  0xad   :  { %20803 = vmatpush3.bf16.msra.mxu0 %v22961_v42  ;;  %v23015_v42 = vld [vmem:[#allocation2 + $0x330] ss:$392 sps:$4 sm:$0xff]  }
  0xae   :  { %20825 = vmatpush3.bf16.msra.mxu1 %v22962_v43  ;;  %20804 = vmatprep.subr.bf16.mxu0 %v22963_v44  ;;  %v23017_v43 = vld [vmem:[#allocation2 + $0x24] ss:$392 sps:$4 sm:$0xff]   ;;  %v23018_v44 = vld [vmem:[#allocation2 + $0x334] ss:$392 sps:$4 sm:$0xff]  }
  0xaf   :  { %20826 = vmatprep.subr.bf16.mxu1 %v22964_v45  ;;  %v601_v45 = vrot.slane %v23013_v41, %v24852_v37  ;;  %v23060_v41 = vld [vmem:[#allocation5 + $0x680] sm:$0xff]  }
  0xb1   :  { %20805 = vmatpush3.bf16.msra.mxu0 %v22965_v46  ;;  %v615_v46 = vrot.slane %v23015_v42, %v24852_v37 }
  0xb2   :  { %20827 = vmatpush3.bf16.msra.mxu1 %v22966_v47  ;;  %20806 = vmatprep.subr.bf16.mxu0 %v22967_v48  ;;  %v608_v47 = vrot.slane %v23017_v43, %v24852_v37  ;;  %v23019_v48 = vld [vmem:[#allocation5 + $0x540] sm:$0xff]  }
  0xb3   :  { %20828 = vmatprep.subr.bf16.mxu1 %v22968_v49  ;;  %v622_v49 = vrot.slane %v23018_v44, %v24852_v37 }
  0xb5   :  { %20807 = vmatpush3.bf16.msra.mxu0 %v22969_v50  ;;  %v23020_v50 = vld [vmem:[#allocation5 + $0x5c0] sm:$0xff]  }
  0xb6   :  { %20829 = vmatpush3.bf16.msra.mxu1 %v22970_v51  ;;  %20808 = vmatprep.subr.bf16.mxu0 %v22971_v52  ;;  %v624_v51 = vcombine.high %v601_v45, %v615_v46  ;;  %v623_v52 = vcombine.low %v601_v45, %v615_v46  ;;  %v23061_v46 = vld [vmem:[#allocation5 + $0x648] sm:$0xff]  }
  0xb7   :  { %20830 = vmatprep.subr.bf16.mxu1 %v22972_v53  ;;  %v23021_v53 = vld [vmem:[#allocation5 + $0x500] sm:$0xff]  }
  0xb8   :  { %v2424_v57 = vpack.c.bf16 %v624_v51, %v624_v51  ;;  %v2423_v58 = vpack.c.bf16 %v623_v52, %v623_v52  ;;  %v23066_v51 = vld [vmem:[#allocation5 + $0x6d0] sm:$0xff]  }
  0xb9   :  { %20809 = vmatpush3.bf16.msra.mxu0 %v22973_v54  ;;  %v626_v54 = vcombine.high %v608_v47, %v622_v49  ;;  %v23067_v52 = vld [vmem:[#allocation5 + $0x610] sm:$0xff]  }
  0xba   :  { %20831 = vmatpush3.bf16.msra.mxu1 %v22974_v55  ;;  %20838 = vmatprep.subr.bf16.mxu0 %v22981_v62  ;;  %v625_v55 = vcombine.low %v608_v47, %v622_v49  ;;  %v23024_v62 = vld [vmem:[#allocation5 + $0x5c8] sm:$0xff]  }
  0xbb   :  { %20860 = vmatprep.subr.bf16.mxu1 %v22982_v1  ;;  %v2426_v60 = vpack.c.bf16 %v626_v54, %v626_v54  ;;  %v23027_v1 = vld [vmem:[#allocation5 + $0x550] sm:$0xff]   ;;  %v23062_v47 = vld [vmem:[#allocation5 + $0x6c8] sm:$0xff]   ;;  %v23069_v54 = vld [vmem:[#allocation5 + $0x658] sm:$0xff]  }
  0xbc   :  { %15427 = vmatmul.mubr.bf16.vlgmr.msra.gmra.mrb[12].mxu0 %v2419_v9  ;;  %v2425_v61 = vpack.c.bf16 %v625_v55, %v625_v55  ;;  %v23035_v9 = vld [vmem:[#allocation5 + $0x560] sm:$0xff]   ;;  %v23064_v49 = vld [vmem:[#allocation5 + $0x688] sm:$0xff]   ;;  %v23070_v55 = vld [vmem:[#allocation5 + $0x6d8] sm:$0xff]  }
  0xbd   :  { %15467 = vmatmul.mubr.bf16.vlgmr.msra.gmra.mrb[12].mxu1 %v2421_v12  ;;  %20839 = vmatpush3.bf16.msra.mxu0 %v22983_v4  ;;  %v23030_v4 = vld [vmem:[#allocation5 + $0x590] sm:$0xff]   ;;  %v23038_v12 = vld [vmem:[#allocation5 + $0x5a0] sm:$0xff]  }
  0xbe   :  { %20861 = vmatpush3.bf16.msra.mxu1 %v22984_v7  ;;  %20840 = vmatprep.subr.bf16.mxu0 %v22985_v10  ;;  %v23033_v7 = vld [vmem:[#allocation5 + $0x518] sm:$0xff]   ;;  %v23036_v10 = vld [vmem:[#allocation5 + $0x5e0] sm:$0xff]  }
  0xbf   :  { %20862 = vmatprep.subr.bf16.mxu1 %v22986_v13  ;;  %15506 = vmatprep.mubr.bf16.mxu0 %v2424_v57  ;;  %v23039_v13 = vld [vmem:[#allocation5 + $0x568] sm:$0xff]   ;;  %v23072_v57 = vld [vmem:[#allocation5 + $0x698] sm:$0xff]  }
  0xc0   :  { %15546 = vmatprep.mubr.bf16.mxu1 %v2426_v60  ;;  %v23075_v60 = vld [vmem:[#allocation5 + $0x620] sm:$0xff]  }
  0xc1   :  { %20841 = vmatpush3.bf16.msra.mxu0 %v22987_v14  ;;  %v23040_v14 = vld [vmem:[#allocation5 + $0x5e8] sm:$0xff]  }
  0xc2   :  { %20863 = vmatpush3.bf16.msra.mxu1 %v22988_v15  ;;  %20842 = vmatprep.subr.bf16.mxu0 %v22989_v16  ;;  %v23041_v15 = vld [vmem:[#allocation5 + $0x528] sm:$0xff]  }
  0xc3   :  { %20864 = vmatprep.subr.bf16.mxu1 %v22990_v17  ;;  %v23042_v16 = vld [vmem:[#allocation5 + $0x5a8] sm:$0xff]   ;;  %v23043_v17 = vld [vmem:[#allocation5 + $0x570] sm:$0xff]  }
  0xc5   :  { %20843 = vmatpush3.bf16.msra.mxu0 %v22991_v18  ;;  %v23044_v18 = vld [vmem:[#allocation5 + $0x5f0] sm:$0xff]  }
  0xc6   :  { %20865 = vmatpush3.bf16.msra.mxu1 %v22992_v19  ;;  %20844 = vmatprep.subr.bf16.mxu0 %v22993_v20  ;;  %v23045_v19 = vld [vmem:[#allocation5 + $0x530] sm:$0xff]  }
  0xc7   :  { %20866 = vmatprep.subr.bf16.mxu1 %v22994_v21  ;;  %v23046_v20 = vld [vmem:[#allocation5 + $0x5b0] sm:$0xff]   ;;  %v23047_v21 = vld [vmem:[#allocation5 + $0x578] sm:$0xff]  }
  0xc9   :  { %20845 = vmatpush3.bf16.msra.mxu0 %v22995_v22  ;;  %v23048_v22 = vld [vmem:[#allocation5 + $0x5f8] sm:$0xff]  }
  0xca   :  { %20867 = vmatpush3.bf16.msra.mxu1 %v22996_v23  ;;  %20846 = vmatprep.subr.bf16.mxu0 %v22997_v24  ;;  %v23049_v23 = vld [vmem:[#allocation5 + $0x538] sm:$0xff]  }
  0xcb   :  { %20868 = vmatprep.subr.bf16.mxu1 %v22998_v25  ;;  %v23050_v24 = vld [vmem:[#allocation5 + $0x5b8] sm:$0xff]   ;;  %v23051_v25 = vld [vmem:[#allocation2 + $0x28] ss:$392 sps:$4 sm:$0xff]  }
  0xcd   :  { %20847 = vmatpush3.bf16.msra.mxu0 %v22999_v26  ;;  %v23053_v26 = vld [vmem:[#allocation2 + $0x338] ss:$392 sps:$4 sm:$0xff]  }
  0xce   :  { %20869 = vmatpush3.bf16.msra.mxu1 %v23000_v27  ;;  %20848 = vmatprep.subr.bf16.mxu0 %v23001_v28  ;;  %v23055_v27 = vld [vmem:[#allocation2 + $0x2c] ss:$392 sps:$4 sm:$0xff]   ;;  %v23056_v28 = vld [vmem:[#allocation2 + $0x33c] ss:$392 sps:$4 sm:$0xff]  }
  0xcf   :  { %20870 = vmatprep.subr.bf16.mxu1 %v23002_v29  ;;  %v637_v29 = vrot.slane %v23051_v25, %v24852_v37  ;;  %v23098_v25 = vld [vmem:[#allocation5 + $0x780] sm:$0xff]  }
  0xd1   :  { %20849 = vmatpush3.bf16.msra.mxu0 %v23003_v30  ;;  %v23057_v30 = vld [vmem:[#allocation5 + $0x640] sm:$0xff]  }
  0xd2   :  { %20871 = vmatpush3.bf16.msra.mxu1 %v23004_v31  ;;  %20850 = vmatprep.subr.bf16.mxu0 %v23005_v32  ;;  %v651_v31 = vrot.slane %v23053_v26, %v24852_v37  ;;  %v644_v32 = vrot.slane %v23055_v27, %v24852_v37 }
  0xd3   :  { %20872 = vmatprep.subr.bf16.mxu1 %v23006_v33  ;;  %v658_v33 = vrot.slane %v23056_v28, %v24852_v37  ;;  %v23099_v28 = vld [vmem:[#allocation5 + $0x748] sm:$0xff]  }
  0xd5   :  { %20851 = vmatpush3.bf16.msra.mxu0 %v23007_v34  ;;  %v23058_v34 = vld [vmem:[#allocation5 + $0x6c0] sm:$0xff]  }
  0xd6   :  { %20873 = vmatpush3.bf16.msra.mxu1 %v23008_v35  ;;  %20852 = vmatprep.subr.bf16.mxu0 %v23009_v36  ;;  %v660_v35 = vcombine.high %v637_v29, %v651_v31  ;;  %v662_v36 = vcombine.high %v644_v32, %v658_v33 }
  0xd7   :  { %20874 = vmatprep.subr.bf16.mxu1 %v23010_v38  ;;  %v659_v38 = vcombine.low %v637_v29, %v651_v31  ;;  %v23100_v31 = vld [vmem:[#allocation5 + $0x7c8] sm:$0xff]  }
  0xd8   :  { %v2428_v42 = vpack.c.bf16 %v660_v35, %v660_v35  ;;  %v2430_v43 = vpack.c.bf16 %v662_v36, %v662_v36  ;;  %v23104_v35 = vld [vmem:[#allocation5 + $0x7d0] sm:$0xff]  }
  0xd9   :  { %20853 = vmatpush3.bf16.msra.mxu0 %v23011_v39  ;;  %v661_v39 = vcombine.low %v644_v32, %v658_v33  ;;  %v2427_v44 = vpack.c.bf16 %v659_v38, %v659_v38  ;;  %v23101_v32 = vld [vmem:[#allocation5 + $0x708] sm:$0xff]   ;;  %v23105_v36 = vld [vmem:[#allocation5 + $0x710] sm:$0xff]  }
  0xda   :  { %20875 = vmatpush3.bf16.msra.mxu1 %v23012_v40  ;;  %20882 = vmatprep.subr.bf16.mxu0 %v23019_v48  ;;  %v23059_v40 = vld [vmem:[#allocation5 + $0x600] sm:$0xff]   ;;  %v23063_v48 = vld [vmem:[#allocation5 + $0x608] sm:$0xff]  }
  0xdb   :  { %20904 = vmatprep.subr.bf16.mxu1 %v23020_v50  ;;  %v2429_v45 = vpack.c.bf16 %v661_v39, %v661_v39  ;;  %v23065_v50 = vld [vmem:[#allocation5 + $0x650] sm:$0xff]   ;;  %v23102_v33 = vld [vmem:[#allocation5 + $0x788] sm:$0xff]  }
  0xdc   :  { %15507 = vmatmul.mubr.bf16.vlgmr.msra.gmra.mrb[16].mxu0 %v2423_v58  ;;  %v23073_v58 = vld [vmem:[#allocation5 + $0x660] sm:$0xff]   ;;  %v23106_v39 = vld [vmem:[#allocation5 + $0x790] sm:$0xff]  }
  0xdd   :  { %15547 = vmatmul.mubr.bf16.vlgmr.msra.gmra.mrb[16].mxu1 %v2425_v61  ;;  %20883 = vmatpush3.bf16.msra.mxu0 %v23021_v53  ;;  %v23068_v53 = vld [vmem:[#allocation5 + $0x690] sm:$0xff]   ;;  %v23076_v61 = vld [vmem:[#allocation5 + $0x6a0] sm:$0xff]  }
  0xde   :  { %20905 = vmatpush3.bf16.msra.mxu1 %v23022_v56  ;;  %20884 = vmatprep.subr.bf16.mxu0 %v23023_v59  ;;  %v23071_v56 = vld [vmem:[#allocation5 + $0x618] sm:$0xff]   ;;  %v23074_v59 = vld [vmem:[#allocation5 + $0x6e0] sm:$0xff]  }
  0xdf   :  { %20906 = vmatprep.subr.bf16.mxu1 %v23024_v62  ;;  %15586 = vmatprep.mubr.bf16.mxu0 %v2428_v42  ;;  %v23077_v62 = vld [vmem:[#allocation5 + $0x668] sm:$0xff]  }
  0xe0   :  { %15626 = vmatprep.mubr.bf16.mxu1 %v2430_v43  ;;  %v23108_v43 = vld [vmem:[#allocation5 + $0x7d8] sm:$0xff]  }
  0xe1   :  { %20885 = vmatpush3.bf16.msra.mxu0 %v23025_v63  ;;  %v23078_v63 = vld [vmem:[#allocation5 + $0x6e8] sm:$0xff]  }
  0xe2   :  { %20907 = vmatpush3.bf16.msra.mxu1 %v23026_v0  ;;  %20886 = vmatprep.subr.bf16.mxu0 %v23027_v1  ;;  %v23079_v0 = vld [vmem:[#allocation5 + $0x628] sm:$0xff]  }
  0xe3   :  { %20908 = vmatprep.subr.bf16.mxu1 %v23028_v2  ;;  %v23080_v1 = vld [vmem:[#allocation5 + $0x6a8] sm:$0xff]   ;;  %v23081_v2 = vld [vmem:[#allocation5 + $0x670] sm:$0xff]  }
  0xe5   :  { %20887 = vmatpush3.bf16.msra.mxu0 %v23029_v3  ;;  %v23082_v3 = vld [vmem:[#allocation5 + $0x6f0] sm:$0xff]  }
  0xe6   :  { %20909 = vmatpush3.bf16.msra.mxu1 %v23030_v4  ;;  %20888 = vmatprep.subr.bf16.mxu0 %v23031_v5  ;;  %v23083_v4 = vld [vmem:[#allocation5 + $0x630] sm:$0xff]  }
  0xe7   :  { %20910 = vmatprep.subr.bf16.mxu1 %v23032_v6  ;;  %v23084_v5 = vld [vmem:[#allocation5 + $0x6b0] sm:$0xff]   ;;  %v23085_v6 = vld [vmem:[#allocation5 + $0x678] sm:$0xff]  }
  0xe9   :  { %20889 = vmatpush3.bf16.msra.mxu0 %v23033_v7  ;;  %v23086_v7 = vld [vmem:[#allocation5 + $0x6f8] sm:$0xff]  }
  0xea   :  { %20911 = vmatpush3.bf16.msra.mxu1 %v23034_v8  ;;  %20890 = vmatprep.subr.bf16.mxu0 %v23035_v9  ;;  %v23087_v8 = vld [vmem:[#allocation5 + $0x638] sm:$0xff]  }
  0xeb   :  { %20912 = vmatprep.subr.bf16.mxu1 %v23036_v10  ;;  %v23088_v9 = vld [vmem:[#allocation5 + $0x6b8] sm:$0xff]  }
  0xec   :  { %v23089_v10 = vld [vmem:[#allocation2 + $0x30] ss:$392 sps:$4 sm:$0xff]  }
  0xed   :  { %20891 = vmatpush3.bf16.msra.mxu0 %v23037_v11  ;;  %v23091_v11 = vld [vmem:[#allocation2 + $0x340] ss:$392 sps:$4 sm:$0xff]  }
  0xee   :  { %20913 = vmatpush3.bf16.msra.mxu1 %v23038_v12  ;;  %20892 = vmatprep.subr.bf16.mxu0 %v23039_v13  ;;  %v23093_v12 = vld [vmem:[#allocation2 + $0x34] ss:$392 sps:$4 sm:$0xff]   ;;  %v23094_v13 = vld [vmem:[#allocation2 + $0x344] ss:$392 sps:$4 sm:$0xff]  }
  0xef   :  { %20914 = vmatprep.subr.bf16.mxu1 %v23040_v14  ;;  %v673_v14 = vrot.slane %v23089_v10, %v24852_v37  ;;  %v23131_v10 = vld [vmem:[#allocation2 + $0x3c] ss:$392 sps:$4 sm:$0xff]  }
  0xf1   :  { %20893 = vmatpush3.bf16.msra.mxu0 %v23041_v15  ;;  %v687_v15 = vrot.slane %v23091_v11, %v24852_v37  ;;  %v23132_v11 = vld [vmem:[#allocation2 + $0x34c] ss:$392 sps:$4 sm:$0xff]  }
  0xf2   :  { %20915 = vmatpush3.bf16.msra.mxu1 %v23042_v16  ;;  %20894 = vmatprep.subr.bf16.mxu0 %v23043_v17  ;;  %v23095_v16 = vld [vmem:[#allocation5 + $0x740] sm:$0xff]   ;;  %v680_v17 = vrot.slane %v23093_v12, %v24852_v37 }
  0xf3   :  { %20916 = vmatprep.subr.bf16.mxu1 %v23044_v18  ;;  %v694_v18 = vrot.slane %v23094_v13, %v24852_v37 }
  0xf5   :  { %20895 = vmatpush3.bf16.msra.mxu0 %v23045_v19  ;;  %v23096_v19 = vld [vmem:[#allocation5 + $0x7c0] sm:$0xff]  }
  0xf6   :  { %20917 = vmatpush3.bf16.msra.mxu1 %v23046_v20  ;;  %20896 = vmatprep.subr.bf16.mxu0 %v23047_v21  ;;  %v696_v20 = vcombine.high %v673_v14, %v687_v15  ;;  %v695_v21 = vcombine.low %v673_v14, %v687_v15  ;;  %v23133_v14 = vld [vmem:[#allocation5 + $0x840] sm:$0xff]   ;;  %v716_v15 = vrot.slane %v23131_v10, %v24852_v37 }
  0xf7   :  { %20918 = vmatprep.subr.bf16.mxu1 %v23048_v22  ;;  %v23097_v22 = vld [vmem:[#allocation5 + $0x700] sm:$0xff]  }
  0xf8   :  { %v2432_v26 = vpack.c.bf16 %v696_v20, %v696_v20  ;;  %v2431_v27 = vpack.c.bf16 %v695_v21, %v695_v21  ;;  %v23135_v20 = vld [vmem:[#allocation5 + $0x800] sm:$0xff]  }
  0xf9   :  { %20897 = vmatpush3.bf16.msra.mxu0 %v23049_v23  ;;  %v698_v23 = vcombine.high %v680_v17, %v694_v18 }
  0xfa   :  { %20919 = vmatpush3.bf16.msra.mxu1 %v23050_v24  ;;  %20926 = vmatprep.subr.bf16.mxu0 %v23057_v30  ;;  %v697_v24 = vcombine.low %v680_v17, %v694_v18  ;;  %v23134_v17 = vld [vmem:[#allocation5 + $0x8c0] sm:$0xff]  }
  0xfb   :  { %20948 = vmatprep.subr.bf16.mxu1 %v23058_v34  ;;  %v2434_v29 = vpack.c.bf16 %v698_v23, %v698_v23  ;;  %v23103_v34 = vld [vmem:[#allocation5 + $0x750] sm:$0xff]   ;;  %v23136_v23 = vld [vmem:[#allocation5 + $0x880] sm:$0xff]  }
  0xfc   :  { %15587 = vmatmul.mubr.bf16.vlgmr.msra.gmra.mrb[20].mxu0 %v2427_v44  ;;  %v2433_v30 = vpack.c.bf16 %v697_v24, %v697_v24 }
  0xfd   :  { %15627 = vmatmul.mubr.bf16.vlgmr.msra.gmra.mrb[20].mxu1 %v2429_v45  ;;  %20927 = vmatpush3.bf16.msra.mxu0 %v23059_v40 }
  0xfe   :  { %20949 = vmatpush3.bf16.msra.mxu1 %v23060_v41  ;;  %20928 = vmatprep.subr.bf16.mxu0 %v23061_v46  ;;  %v23107_v41 = vld [vmem:[#allocation5 + $0x758] sm:$0xff]  }
  0xff   :  { %20950 = vmatprep.subr.bf16.mxu1 %v23062_v47  ;;  %15666 = vmatprep.mubr.bf16.mxu0 %v2432_v26  ;;  %v23109_v46 = vld [vmem:[#allocation5 + $0x718] sm:$0xff]   ;;  %v23137_v26 = vld [vmem:[#allocation5 + $0x848] sm:$0xff]  }
 0x100   :  { %15706 = vmatprep.mubr.bf16.mxu1 %v2434_v29  ;;  %v23138_v29 = vld [vmem:[#allocation5 + $0x8c8] sm:$0xff]  }
 0x101   :  { %20929 = vmatpush3.bf16.msra.mxu0 %v23063_v48 }
 0x102   :  { %20951 = vmatpush3.bf16.msra.mxu1 %v23064_v49  ;;  %20930 = vmatprep.subr.bf16.mxu0 %v23065_v50  ;;  %v23110_v49 = vld [vmem:[#allocation5 + $0x798] sm:$0xff]  }
 0x103   :  { %20952 = vmatprep.subr.bf16.mxu1 %v23066_v51  ;;  %v23111_v51 = vld [vmem:[#allocation5 + $0x760] sm:$0xff]  }
 0x105   :  { %20931 = vmatpush3.bf16.msra.mxu0 %v23067_v52 }
 0x106   :  { %20953 = vmatpush3.bf16.msra.mxu1 %v23068_v53  ;;  %20932 = vmatprep.subr.bf16.mxu0 %v23069_v54  ;;  %v23112_v53 = vld [vmem:[#allocation5 + $0x7e0] sm:$0xff]  }
 0x107   :  { %20954 = vmatprep.subr.bf16.mxu1 %v23070_v55  ;;  %v23113_v55 = vld [vmem:[#allocation5 + $0x720] sm:$0xff]  }
 0x109   :  { %20933 = vmatpush3.bf16.msra.mxu0 %v23071_v56  ;;  %v23114_v56 = vld [vmem:[#allocation5 + $0x7a0] sm:$0xff]  }
 0x10a   :  { %20955 = vmatpush3.bf16.msra.mxu1 %v23072_v57  ;;  %20934 = vmatprep.subr.bf16.mxu0 %v23073_v58  ;;  %v19093_v57 = vld [vmem:[#allocation7] ss:$0 sm:$0xff] }
 0x10b   :  { %20956 = vmatprep.subr.bf16.mxu1 %v23074_v59  ;;  %v23115_v59 = vld [vmem:[#allocation5 + $0x768] sm:$0xff]  }
 0x10d   :  { %20935 = vmatpush3.bf16.msra.mxu0 %v23075_v60  ;;  %v23116_v60 = vld [vmem:[#allocation5 + $0x7e8] sm:$0xff]  }
 0x10e   :  { %20957 = vmatpush3.bf16.msra.mxu1 %v23076_v61  ;;  %20936 = vmatprep.subr.bf16.mxu0 %v23077_v62  ;;  %v23117_v62 = vld [vmem:[#allocation5 + $0x728] sm:$0xff]  }
 0x10f   :  { %20958 = vmatprep.subr.bf16.mxu1 %v23078_v63  ;;  %v23118_v63 = vld [vmem:[#allocation5 + $0x7a8] sm:$0xff]  }
 0x111   :  { %20937 = vmatpush3.bf16.msra.mxu0 %v23079_v0  ;;  %v23119_v0 = vld [vmem:[#allocation5 + $0x770] sm:$0xff]  }
 0x112   :  { %20959 = vmatpush3.bf16.msra.mxu1 %v23080_v1  ;;  %20938 = vmatprep.subr.bf16.mxu0 %v23081_v2  ;;  %v23120_v1 = vld [vmem:[#allocation5 + $0x7f0] sm:$0xff]  }
 0x113   :  { %20960 = vmatprep.subr.bf16.mxu1 %v23082_v3  ;;  %v23121_v2 = vld [vmem:[#allocation5 + $0x730] sm:$0xff]  }
 0x114   :  { %v23122_v3 = vld [vmem:[#allocation5 + $0x7b0] sm:$0xff]  }
 0x115   :  { %20939 = vmatpush3.bf16.msra.mxu0 %v23083_v4  ;;  %v23123_v4 = vld [vmem:[#allocation5 + $0x778] sm:$0xff]  }
 0x116   :  { %20961 = vmatpush3.bf16.msra.mxu1 %v23084_v5  ;;  %20940 = vmatprep.subr.bf16.mxu0 %v23085_v6  ;;  %v23124_v5 = vld [vmem:[#allocation5 + $0x7f8] sm:$0xff]  }
 0x117   :  { %20962 = vmatprep.subr.bf16.mxu1 %v23086_v7  ;;  %v23125_v6 = vld [vmem:[#allocation5 + $0x738] sm:$0xff]  }
 0x118   :  { %v23126_v7 = vld [vmem:[#allocation5 + $0x7b8] sm:$0xff]  }
 0x119   :  { %20941 = vmatpush3.bf16.msra.mxu0 %v23087_v8  ;;  %v23127_v8 = vld [vmem:[#allocation2 + $0x38] ss:$392 sps:$4 sm:$0xff]  }
 0x11a   :  { %20963 = vmatpush3.bf16.msra.mxu1 %v23088_v9  ;;  %20970 = vmatprep.subr.bf16.mxu0 %v23095_v16  ;;  %v23129_v9 = vld [vmem:[#allocation2 + $0x348] ss:$392 sps:$4 sm:$0xff]   ;;  %v709_v12 = vrot.slane %v23127_v8, %v24852_v37  ;;  %v730_v16 = vrot.slane %v23132_v11, %v24852_v37  ;;  %v23170_v8 = vld [vmem:[#allocation2 + $0x354] ss:$392 sps:$4 sm:$0xff]  }
 0x11b   :  { %20992 = vmatprep.subr.bf16.mxu1 %v23096_v19  ;;  %v723_v13 = vrot.slane %v23129_v9, %v24852_v37 }
 0x11c   :  { %15667 = vmatmul.mubr.bf16.vlgmr.msra.gmra.mrb[24].mxu0 %v2431_v27  ;;  %v734_v21 = vcombine.high %v716_v15, %v730_v16 }
 0x11d   :  { %15707 = vmatmul.mubr.bf16.vlgmr.msra.gmra.mrb[24].mxu1 %v2433_v30  ;;  %20971 = vmatpush3.bf16.msra.mxu0 %v23097_v22  ;;  %v732_v18 = vcombine.high %v709_v12, %v723_v13  ;;  %v731_v19 = vcombine.low %v709_v12, %v723_v13  ;;  %v733_v22 = vcombine.low %v716_v15, %v730_v16  ;;  %v23139_v30 = vld [vmem:[#allocation5 + $0x808] sm:$0xff]   ;;  %v23171_v12 = vld [vmem:[#allocation5 + $0x940] sm:$0xff]  }
 0x11e   :  { %20993 = vmatpush3.bf16.msra.mxu1 %v23098_v25  ;;  %20972 = vmatprep.subr.bf16.mxu0 %v23099_v28  ;;  %v2438_v27 = vpack.c.bf16 %v734_v21, %v734_v21  ;;  %v766_v13 = vrot.slane %v23170_v8, %v24852_v37 }
 0x11f   :  { %20994 = vmatprep.subr.bf16.mxu1 %v23100_v31  ;;  %v2436_v24 = vpack.c.bf16 %v732_v18, %v732_v18  ;;  %v2435_v25 = vpack.c.bf16 %v731_v19, %v731_v19  ;;  %v2437_v28 = vpack.c.bf16 %v733_v22, %v733_v22  ;;  %v23140_v31 = vld [vmem:[#allocation5 + $0x888] sm:$0xff]  }
 0x120   :  { %15786 = vmatprep.mubr.bf16.mxu1 %v2438_v27  ;;  %v23177_v27 = vld [vmem:[#allocation5 + $0x908] sm:$0xff]  }
 0x121   :  { %20973 = vmatpush3.bf16.msra.mxu0 %v23101_v32  ;;  %15746 = vmatprep.mubr.bf16.mxu0 %v2436_v24  ;;  %v23141_v32 = vld [vmem:[#allocation5 + $0x850] sm:$0xff]  }
 0x122   :  { %20995 = vmatpush3.bf16.msra.mxu1 %v23102_v33  ;;  %20974 = vmatprep.subr.bf16.mxu0 %v23103_v34  ;;  %v23142_v33 = vld [vmem:[#allocation5 + $0x8d0] sm:$0xff]  }
 0x123   :  { %20996 = vmatprep.subr.bf16.mxu1 %v23104_v35  ;;  %v23143_v34 = vld [vmem:[#allocation5 + $0x810] sm:$0xff]  }
 0x125   :  { %20975 = vmatpush3.bf16.msra.mxu0 %v23105_v36  ;;  %v23144_v36 = vld [vmem:[#allocation5 + $0x890] sm:$0xff]  }
 0x126   :  { %20997 = vmatpush3.bf16.msra.mxu1 %v23106_v39  ;;  %20976 = vmatprep.subr.bf16.mxu0 %v23107_v41  ;;  %v23145_v39 = vld [vmem:[#allocation5 + $0x858] sm:$0xff]  }
 0x127   :  { %20998 = vmatprep.subr.bf16.mxu1 %v23108_v43  ;;  %v23146_v41 = vld [vmem:[#allocation5 + $0x8d8] sm:$0xff]  }
 0x129   :  { %20977 = vmatpush3.bf16.msra.mxu0 %v23109_v46 }
 0x12a   :  { %20999 = vmatpush3.bf16.msra.mxu1 %v23110_v49  ;;  %20978 = vmatprep.subr.bf16.mxu0 %v23111_v51 }
 0x12b   :  { %21000 = vmatprep.subr.bf16.mxu1 %v23112_v53 }
 0x12d   :  { %20979 = vmatpush3.bf16.msra.mxu0 %v23113_v55  ;;  %v23151_v55 = vld [vmem:[#allocation5 + $0x820] sm:$0xff]  }
 0x12e   :  { %21001 = vmatpush3.bf16.msra.mxu1 %v23114_v56  ;;  %20980 = vmatprep.subr.bf16.mxu0 %v23115_v59  ;;  %v23152_v56 = vld [vmem:[#allocation5 + $0x8a0] sm:$0xff]   ;;  %v23155_v59 = vld [vmem:[#allocation5 + $0x828] sm:$0xff]  }
 0x12f   :  { %v20678_v38 = vpop.f32.mrb[0].mxu0  ;;  %21002 = vmatprep.subr.bf16.mxu1 %v23116_v60  ;;  %v23156_v60 = vld [vmem:[#allocation5 + $0x8a8] sm:$0xff]  }
 0x130   :  { %v20700_v40 = vpop.f32.mrb[0].mxu1  ;;  %v20679_v42 = vpop.f32.mrb[1].mxu0 }
 0x131   :  { %v20680_v44 = vadd.f32 %v20679_v42, %v20678_v38  ;;  %v20701_v45 = vpop.f32.mrb[1].mxu1  ;;  %v20681_v48 = vpop.f32.mrb[2].mxu0  ;;  %20981 = vmatpush3.bf16.msra.mxu0 %v23117_v62  ;;  %v23158_v62 = vld [vmem:[#allocation5 + $0x8f0] sm:$0xff]  }
 0x132   :  { %v20702_v47 = vadd.f32 %v20701_v45, %v20700_v40  ;;  %v20703_v50 = vpop.f32.mrb[2].mxu1  ;;  %v20682_v52 = vpop.f32.mrb[3].mxu0  ;;  %21003 = vmatpush3.bf16.msra.mxu1 %v23118_v63  ;;  %20982 = vmatprep.subr.bf16.mxu0 %v23119_v0  ;;  %v23159_v63 = vld [vmem:[#allocation5 + $0x830] sm:$0xff]  }
 0x133   :  { %v20704_v54 = vpop.f32.mrb[3].mxu1  ;;  %v15189_v58 = vadd.f32 %v20680_v44, %v19093_v57  ;;  %21004 = vmatprep.subr.bf16.mxu1 %v23120_v1  ;;  %v23147_v44 = vld [vmem:[#allocation5 + $0x818] sm:$0xff]   ;;  %v23149_v50 = vld [vmem:[#allocation5 + $0x860] sm:$0xff]   ;;  %v23153_v57 = vld [vmem:[#allocation5 + $0x868] sm:$0xff]  }
 0x134   :  { %v23150_v52 = vld [vmem:[#allocation5 + $0x8e0] sm:$0xff]   ;;  %v23160_v0 = vld [vmem:[#allocation5 + $0x8b0] sm:$0xff]   ;;  %v23161_v1 = vld [vmem:[#allocation5 + $0x878] sm:$0xff]  }
 0x135   :  { %v24882_v61 = vadd.f32 %v20702_v47, %v15189_v58  ;;  %20983 = vmatpush3.bf16.msra.mxu0 %v23121_v2  ;;  %v23148_v47 = vld [vmem:[#allocation5 + $0x898] sm:$0xff]   ;;  %v23154_v58 = vld [vmem:[#allocation5 + $0x8e8] sm:$0xff]  }
 0x136   :  { %21005 = vmatpush3.bf16.msra.mxu1 %v23122_v3  ;;  %20984 = vmatprep.subr.bf16.mxu0 %v23123_v4  ;;  %v23162_v2 = vld [vmem:[#allocation5 + $0x8f8] sm:$0xff]  }
 0x137   :  { %21006 = vmatprep.subr.bf16.mxu1 %v23124_v5  ;;  %v23163_v3 = vld [vmem:[#allocation5 + $0x838] sm:$0xff]   ;;  %v23165_v5 = vld [vmem:[#allocation2 + $0x40] ss:$392 sps:$4 sm:$0xff]  }
 0x138   :  { %v23164_v4 = vld [vmem:[#allocation5 + $0x8b8] sm:$0xff]   ;;  %v745_v9 = vrot.slane %v23165_v5, %v24852_v37 }
 0x139   :  { %20985 = vmatpush3.bf16.msra.mxu0 %v23125_v6  ;;  %v23167_v6 = vld [vmem:[#allocation2 + $0x350] ss:$392 sps:$4 sm:$0xff]   ;;  %v23208_v5 = vld [vmem:[#allocation2 + $0x35c] ss:$392 sps:$4 sm:$0xff]  }
 0x13a   :  { %21007 = vmatpush3.bf16.msra.mxu1 %v23126_v7  ;;  %21014 = vmatprep.subr.bf16.mxu0 %v23133_v14  ;;  %v23169_v7 = vld [vmem:[#allocation2 + $0x44] ss:$392 sps:$4 sm:$0xff]   ;;  %v759_v10 = vrot.slane %v23167_v6, %v24852_v37 }
 0x13b   :  { %21036 = vmatprep.subr.bf16.mxu1 %v23134_v17  ;;  %v752_v11 = vrot.slane %v23169_v7, %v24852_v37  ;;  %v23172_v14 = vld [vmem:[#allocation5 + $0x9c0] sm:$0xff]  }
 0x13c   :  { %15747 = vmatmul.mubr.bf16.vlgmr.msra.gmra.mrb[28].mxu0 %v2435_v25  ;;  %v768_v15 = vcombine.high %v745_v9, %v759_v10  ;;  %v767_v16 = vcombine.low %v745_v9, %v759_v10  ;;  %v23173_v17 = vld [vmem:[#allocation5 + $0x900] sm:$0xff]   ;;  %v802_v10 = vrot.slane %v23208_v5, %v24852_v37 }
 0x13d   :  { %15787 = vmatmul.mubr.bf16.vlgmr.msra.gmra.mrb[28].mxu1 %v2437_v28  ;;  %21015 = vmatpush3.bf16.msra.mxu0 %v23135_v20  ;;  %v770_v18 = vcombine.high %v752_v11, %v766_v13  ;;  %v769_v19 = vcombine.low %v752_v11, %v766_v13  ;;  %v23174_v20 = vld [vmem:[#allocation5 + $0x980] sm:$0xff]   ;;  %v23178_v28 = vld [vmem:[#allocation5 + $0x988] sm:$0xff]  }
 0x13e   :  { %21037 = vmatpush3.bf16.msra.mxu1 %v23136_v23  ;;  %21016 = vmatprep.subr.bf16.mxu0 %v23137_v26  ;;  %v2440_v21 = vpack.c.bf16 %v768_v15, %v768_v15  ;;  %v2439_v22 = vpack.c.bf16 %v767_v16, %v767_v16  ;;  %v23175_v23 = vld [vmem:[#allocation5 + $0x948] sm:$0xff]   ;;  %v23209_v7 = vld [vmem:[#allocation5 + $0xa40] sm:$0xff]  }
 0x13f   :  { %21038 = vmatprep.subr.bf16.mxu1 %v23138_v29  ;;  %v2442_v24 = vpack.c.bf16 %v770_v18, %v770_v18  ;;  %v2441_v25 = vpack.c.bf16 %v769_v19, %v769_v19  ;;  %v23176_v26 = vld [vmem:[#allocation5 + $0x9c8] sm:$0xff]   ;;  %v23179_v29 = vld [vmem:[#allocation5 + $0x950] sm:$0xff]   ;;  %v23210_v11 = vld [vmem:[#allocation5 + $0xac0] sm:$0xff]  }
 0x140   :  { %15826 = vmatprep.mubr.bf16.mxu0 %v2440_v21  ;;  %v23211_v16 = vld [vmem:[#allocation5 + $0xa00] sm:$0xff]  }
 0x141   :  { %21017 = vmatpush3.bf16.msra.mxu0 %v23139_v30  ;;  %15866 = vmatprep.mubr.bf16.mxu1 %v2442_v24  ;;  %v23180_v30 = vld [vmem:[#allocation5 + $0x9d0] sm:$0xff]   ;;  %v23215_v24 = vld [vmem:[#allocation5 + $0xa08] sm:$0xff]   ;;  %v23247_v5 = vld [vmem:[#allocation5 + $0xb40] sm:$0xff]  }
 0x142   :  { %21039 = vmatpush3.bf16.msra.mxu1 %v23140_v31  ;;  %21018 = vmatprep.subr.bf16.mxu0 %v23141_v32  ;;  %v23181_v31 = vld [vmem:[#allocation5 + $0x910] sm:$0xff]  }
 0x143   :  { %21040 = vmatprep.subr.bf16.mxu1 %v23142_v33  ;;  %v23182_v33 = vld [vmem:[#allocation5 + $0x990] sm:$0xff]  }
 0x145   :  { %21019 = vmatpush3.bf16.msra.mxu0 %v23143_v34 }
 0x146   :  { %21041 = vmatpush3.bf16.msra.mxu1 %v23144_v36  ;;  %21020 = vmatprep.subr.bf16.mxu0 %v23145_v39 }
 0x147   :  { %21042 = vmatprep.subr.bf16.mxu1 %v23146_v41  ;;  %v23185_v41 = vld [vmem:[#allocation5 + $0x918] sm:$0xff]  }
 0x149   :  { %21021 = vmatpush3.bf16.msra.mxu0 %v23147_v44  ;;  %v23186_v44 = vld [vmem:[#allocation5 + $0x998] sm:$0xff]  }
 0x14a   :  { %21043 = vmatpush3.bf16.msra.mxu1 %v23148_v47  ;;  %21022 = vmatprep.subr.bf16.mxu0 %v23149_v50  ;;  %v23187_v47 = vld [vmem:[#allocation5 + $0x960] sm:$0xff]  }
 0x14b   :  { %21044 = vmatprep.subr.bf16.mxu1 %v23150_v52  ;;  %v23189_v52 = vld [vmem:[#allocation5 + $0x920] sm:$0xff]  }
 0x14d   :  { %21023 = vmatpush3.bf16.msra.mxu0 %v23151_v55  ;;  %v23191_v55 = vld [vmem:[#allocation5 + $0x968] sm:$0xff]  }
 0x14e   :  { %21045 = vmatpush3.bf16.msra.mxu1 %v23152_v56  ;;  %21024 = vmatprep.subr.bf16.mxu0 %v23153_v57  ;;  %v23192_v56 = vld [vmem:[#allocation5 + $0x9e8] sm:$0xff]  }
 0x14f   :  { %v20722_v35 = vpop.f32.mrb[4].mxu0  ;;  %21046 = vmatprep.subr.bf16.mxu1 %v23154_v58  ;;  %v23194_v57 = vld [vmem:[#allocation5 + $0x9a8] sm:$0xff]   ;;  %v23195_v58 = vld [vmem:[#allocation5 + $0x970] sm:$0xff]  }
 0x150   :  { %v20744_v38 = vpop.f32.mrb[4].mxu1  ;;  %v20723_v40 = vpop.f32.mrb[5].mxu0 }
 0x151   :  { %v20724_v42 = vadd.f32 %v20723_v40, %v20722_v35  ;;  %v20745_v43 = vpop.f32.mrb[5].mxu1  ;;  %v20725_v46 = vpop.f32.mrb[6].mxu0  ;;  %21025 = vmatpush3.bf16.msra.mxu0 %v23155_v59  ;;  %v23183_v35 = vld [vmem:[#allocation5 + $0x958] sm:$0xff]   ;;  %v23196_v59 = vld [vmem:[#allocation5 + $0x9f0] sm:$0xff]  }
 0x152   :  { %v20746_v45 = vadd.f32 %v20745_v43, %v20744_v38  ;;  %v20747_v49 = vpop.f32.mrb[6].mxu1  ;;  %v20726_v51 = vpop.f32.mrb[7].mxu0  ;;  %21047 = vmatpush3.bf16.msra.mxu1 %v23156_v60  ;;  %v23184_v38 = vld [vmem:[#allocation5 + $0x9d8] sm:$0xff]   ;;  %v23197_v60 = vld [vmem:[#allocation5 + $0x930] sm:$0xff]  }
 0x153   :  { %v15269_v48 = vadd.f32 %v20724_v42, %v24882_v61  ;;  %v20748_v54 = vpop.f32.mrb[7].mxu1  ;;  %v23157_v61 = vld [vmem:[#allocation5 + $0x870] sm:$0xff]   ;;  %21048 = vmatprep.subr.bf16.mxu1 %v23158_v62  ;;  %v23188_v49 = vld [vmem:[#allocation5 + $0x9e0] sm:$0xff]   ;;  %v23199_v62 = vld [vmem:[#allocation5 + $0x978] sm:$0xff]  }
 0x154   :  { %21026 = vmatprep.subr.bf16.mxu0 %v23157_v61  ;;  %v23190_v54 = vld [vmem:[#allocation5 + $0x9a0] sm:$0xff]   ;;  %v23198_v61 = vld [vmem:[#allocation5 + $0x9b0] sm:$0xff]  }
 0x155   :  { %v24889_v53 = vadd.f32 %v20746_v45, %v15269_v48  ;;  %21027 = vmatpush3.bf16.msra.mxu0 %v23159_v63  ;;  %v23200_v63 = vld [vmem:[#allocation5 + $0x9f8] sm:$0xff]  }
 0x156   :  { %21049 = vmatpush3.bf16.msra.mxu1 %v23160_v0  ;;  %21028 = vmatprep.subr.bf16.mxu0 %v23161_v1  ;;  %v23201_v0 = vld [vmem:[#allocation5 + $0x938] sm:$0xff]  }
 0x157   :  { %21050 = vmatprep.subr.bf16.mxu1 %v23162_v2  ;;  %v23202_v1 = vld [vmem:[#allocation5 + $0x9b8] sm:$0xff]   ;;  %v23203_v2 = vld [vmem:[#allocation2 + $0x48] ss:$392 sps:$4 sm:$0xff]  }
 0x158   :  { %v781_v6 = vrot.slane %v23203_v2, %v24852_v37  ;;  %v23246_v2 = vld [vmem:[#allocation2 + $0x364] ss:$392 sps:$4 sm:$0xff]  }
 0x159   :  { %21029 = vmatpush3.bf16.msra.mxu0 %v23163_v3  ;;  %v23205_v3 = vld [vmem:[#allocation2 + $0x358] ss:$392 sps:$4 sm:$0xff]  }
 0x15a   :  { %21051 = vmatpush3.bf16.msra.mxu1 %v23164_v4  ;;  %21058 = vmatprep.subr.bf16.mxu0 %v23171_v12  ;;  %v23207_v4 = vld [vmem:[#allocation2 + $0x4c] ss:$392 sps:$4 sm:$0xff]   ;;  %v795_v8 = vrot.slane %v23205_v3, %v24852_v37 }
 0x15b   :  { %21080 = vmatprep.subr.bf16.mxu1 %v23172_v14  ;;  %v788_v9 = vrot.slane %v23207_v4, %v24852_v37 }
 0x15c   :  { %15827 = vmatmul.mubr.bf16.vlgmr.msra.gmra.mrb[32].mxu0 %v2439_v22  ;;  %v804_v12 = vcombine.high %v781_v6, %v795_v8  ;;  %v803_v14 = vcombine.low %v781_v6, %v795_v8  ;;  %v23213_v22 = vld [vmem:[#allocation5 + $0xa48] sm:$0xff]   ;;  %v23248_v8 = vld [vmem:[#allocation5 + $0xbc0] sm:$0xff]  }
 0x15d   :  { %15867 = vmatmul.mubr.bf16.vlgmr.msra.gmra.mrb[32].mxu1 %v2441_v25  ;;  %21059 = vmatpush3.bf16.msra.mxu0 %v23173_v17  ;;  %v806_v13 = vcombine.high %v788_v9, %v802_v10  ;;  %v805_v15 = vcombine.low %v788_v9, %v802_v10  ;;  %v23212_v17 = vld [vmem:[#allocation5 + $0xa80] sm:$0xff]   ;;  %v23216_v25 = vld [vmem:[#allocation5 + $0xa88] sm:$0xff]  }
 0x15e   :  { %21081 = vmatpush3.bf16.msra.mxu1 %v23174_v20  ;;  %21060 = vmatprep.subr.bf16.mxu0 %v23175_v23  ;;  %v2444_v18 = vpack.c.bf16 %v804_v12, %v804_v12  ;;  %v2443_v20 = vpack.c.bf16 %v803_v14, %v803_v14  ;;  %v23214_v23 = vld [vmem:[#allocation5 + $0xac8] sm:$0xff]   ;;  %v23250_v14 = vld [vmem:[#allocation5 + $0xb80] sm:$0xff]  }
 0x15f   :  { %21082 = vmatprep.subr.bf16.mxu1 %v23176_v26  ;;  %v2446_v19 = vpack.c.bf16 %v806_v13, %v806_v13  ;;  %v2445_v21 = vpack.c.bf16 %v805_v15, %v805_v15  ;;  %v23217_v26 = vld [vmem:[#allocation5 + $0xa50] sm:$0xff]  }
 0x160   :  { %15906 = vmatprep.mubr.bf16.mxu0 %v2444_v18 }
 0x161   :  { %21061 = vmatpush3.bf16.msra.mxu0 %v23177_v27  ;;  %15946 = vmatprep.mubr.bf16.mxu1 %v2446_v19  ;;  %v23218_v27 = vld [vmem:[#allocation5 + $0xad0] sm:$0xff]  }
 0x162   :  { %21083 = vmatpush3.bf16.msra.mxu1 %v23178_v28  ;;  %21062 = vmatprep.subr.bf16.mxu0 %v23179_v29  ;;  %v23219_v29 = vld [vmem:[#allocation5 + $0xa10] sm:$0xff]  }
 0x163   :  { %21084 = vmatprep.subr.bf16.mxu1 %v23180_v30 }
 0x165   :  { %21063 = vmatpush3.bf16.msra.mxu0 %v23181_v31  ;;  %v23220_v31 = vld [vmem:[#allocation5 + $0xa90] sm:$0xff]  }
 0x166   :  { %21085 = vmatpush3.bf16.msra.mxu1 %v23182_v33  ;;  %21064 = vmatprep.subr.bf16.mxu0 %v23183_v35  ;;  %v23221_v33 = vld [vmem:[#allocation5 + $0xa58] sm:$0xff]  }
 0x167   :  { %21086 = vmatprep.subr.bf16.mxu1 %v23184_v38 }
 0x169   :  { %21065 = vmatpush3.bf16.msra.mxu0 %v23185_v41 }
 0x16a   :  { %21087 = vmatpush3.bf16.msra.mxu1 %v23186_v44  ;;  %21066 = vmatprep.subr.bf16.mxu0 %v23187_v47 }
 0x16b   :  { %21088 = vmatprep.subr.bf16.mxu1 %v23188_v49  ;;  %v23227_v49 = vld [vmem:[#allocation5 + $0xa20] sm:$0xff]  }
 0x16d   :  { %21067 = vmatpush3.bf16.msra.mxu0 %v23189_v52  ;;  %v23229_v52 = vld [vmem:[#allocation5 + $0xa68] sm:$0xff]  }
 0x16e   :  { %21089 = vmatpush3.bf16.msra.mxu1 %v23190_v54  ;;  %21068 = vmatprep.subr.bf16.mxu0 %v23191_v55  ;;  %v23231_v54 = vld [vmem:[#allocation5 + $0xa28] sm:$0xff]  }
 0x16f   :  { %v20766_v32 = vpop.f32.mrb[8].mxu0  ;;  %21090 = vmatprep.subr.bf16.mxu1 %v23192_v56  ;;  %v23232_v55 = vld [vmem:[#allocation5 + $0xaa8] sm:$0xff]   ;;  %v23233_v56 = vld [vmem:[#allocation5 + $0xa70] sm:$0xff]  }
 0x170   :  { %v20788_v34 = vpop.f32.mrb[8].mxu1  ;;  %v20767_v36 = vpop.f32.mrb[9].mxu0 }
 0x171   :  { %v20768_v39 = vadd.f32 %v20767_v36, %v20766_v32  ;;  %v20789_v40 = vpop.f32.mrb[9].mxu1  ;;  %v20769_v43 = vpop.f32.mrb[10].mxu0  ;;  %v23222_v36 = vld [vmem:[#allocation5 + $0xad8] sm:$0xff]  }
 0x172   :  { %v20790_v42 = vadd.f32 %v20789_v40, %v20788_v34  ;;  %v20791_v46 = vpop.f32.mrb[10].mxu1  ;;  %v20770_v48 = vpop.f32.mrb[11].mxu0  ;;  %21091 = vmatpush3.bf16.msra.mxu1 %v23194_v57  ;;  %v23223_v40 = vld [vmem:[#allocation5 + $0xa18] sm:$0xff]   ;;  %v23235_v57 = vld [vmem:[#allocation5 + $0xa30] sm:$0xff]  }
 0x173   :  { %v15349_v45 = vadd.f32 %v20768_v39, %v24889_v53  ;;  %v20792_v51 = vpop.f32.mrb[11].mxu1  ;;  %v23193_v53 = vld [vmem:[#allocation5 + $0x928] sm:$0xff]   ;;  %21092 = vmatprep.subr.bf16.mxu1 %v23196_v59  ;;  %v23224_v43 = vld [vmem:[#allocation5 + $0xa98] sm:$0xff]   ;;  %v23226_v48 = vld [vmem:[#allocation5 + $0xae0] sm:$0xff]  }
 0x174   :  { %21069 = vmatpush3.bf16.msra.mxu0 %v23193_v53  ;;  %v23228_v51 = vld [vmem:[#allocation5 + $0xaa0] sm:$0xff]   ;;  %v23234_v53 = vld [vmem:[#allocation5 + $0xaf0] sm:$0xff]   ;;  %v23237_v59 = vld [vmem:[#allocation5 + $0xa78] sm:$0xff]  }
 0x175   :  { %v24896_v50 = vadd.f32 %v20790_v42, %v15349_v45  ;;  %21070 = vmatprep.subr.bf16.mxu0 %v23195_v58  ;;  %v23225_v45 = vld [vmem:[#allocation5 + $0xa60] sm:$0xff]   ;;  %v23236_v58 = vld [vmem:[#allocation5 + $0xab0] sm:$0xff]  }
 0x176   :  { %21093 = vmatpush3.bf16.msra.mxu1 %v23198_v61  ;;  %v23239_v61 = vld [vmem:[#allocation5 + $0xa38] sm:$0xff]  }
 0x177   :  { %21094 = vmatprep.subr.bf16.mxu1 %v23200_v63  ;;  %v23241_v63 = vld [vmem:[#allocation2 + $0x50] ss:$392 sps:$4 sm:$0xff]  }
 0x178   :  { %21071 = vmatpush3.bf16.msra.mxu0 %v23197_v60  ;;  %v23238_v60 = vld [vmem:[#allocation5 + $0xaf8] sm:$0xff]   ;;  %v817_v3 = vrot.slane %v23241_v63, %v24852_v37  ;;  %v23284_v63 = vld [vmem:[#allocation2 + $0x36c] ss:$392 sps:$4 sm:$0xff]  }
 0x179   :  { %21072 = vmatprep.subr.bf16.mxu0 %v23199_v62  ;;  %v23240_v62 = vld [vmem:[#allocation5 + $0xab8] sm:$0xff]  }
 0x17a   :  { %21095 = vmatpush3.bf16.msra.mxu1 %v23202_v1  ;;  %v23245_v1 = vld [vmem:[#allocation2 + $0x54] ss:$392 sps:$4 sm:$0xff]  }
 0x17b   :  { %21124 = vmatprep.subr.bf16.mxu1 %v23210_v11  ;;  %v824_v6 = vrot.slane %v23245_v1, %v24852_v37  ;;  %v23249_v11 = vld [vmem:[#allocation5 + $0xb00] sm:$0xff]  }
 0x17c   :  { %21073 = vmatpush3.bf16.msra.mxu0 %v23201_v0  ;;  %v23243_v0 = vld [vmem:[#allocation2 + $0x360] ss:$392 sps:$4 sm:$0xff]  }
 0x17d   :  { %21102 = vmatprep.subr.bf16.mxu0 %v23209_v7  ;;  %15947 = vmatmul.mubr.bf16.vlgmr.msra.gmra.mrb[36].mxu1 %v2445_v21  ;;  %v831_v4 = vrot.slane %v23243_v0, %v24852_v37  ;;  %v838_v7 = vrot.slane %v23246_v2, %v24852_v37  ;;  %v23253_v21 = vld [vmem:[#allocation5 + $0xb08] sm:$0xff]  }
 0x17e   :  { %21125 = vmatpush3.bf16.msra.mxu1 %v23212_v17  ;;  %v23251_v17 = vld [vmem:[#allocation5 + $0xb48] sm:$0xff]  }
 0x17f   :  { %15907 = vmatmul.mubr.bf16.vlgmr.msra.gmra.mrb[36].mxu0 %v2443_v20  ;;  %21126 = vmatprep.subr.bf16.mxu1 %v23214_v23  ;;  %v840_v9 = vcombine.high %v817_v3, %v831_v4  ;;  %v839_v10 = vcombine.low %v817_v3, %v831_v4  ;;  %v842_v12 = vcombine.high %v824_v6, %v838_v7  ;;  %v23252_v20 = vld [vmem:[#allocation5 + $0xbc8] sm:$0xff]   ;;  %v23255_v23 = vld [vmem:[#allocation5 + $0xb50] sm:$0xff]   ;;  %v23285_v3 = vld [vmem:[#allocation5 + $0xc40] sm:$0xff]  }
 0x180   :  { %21103 = vmatpush3.bf16.msra.mxu0 %v23211_v16  ;;  %v841_v13 = vcombine.low %v824_v6, %v838_v7  ;;  %v874_v4 = vrot.slane %v23284_v63, %v24852_v37 }
 0x181   :  { %21104 = vmatprep.subr.bf16.mxu0 %v23213_v22  ;;  %v2448_v15 = vpack.c.bf16 %v840_v9, %v840_v9  ;;  %v2447_v16 = vpack.c.bf16 %v839_v10, %v839_v10  ;;  %v2450_v18 = vpack.c.bf16 %v842_v12, %v842_v12  ;;  %v23254_v22 = vld [vmem:[#allocation5 + $0xb88] sm:$0xff]  }
 0x182   :  { %21127 = vmatpush3.bf16.msra.mxu1 %v23216_v25  ;;  %v2449_v19 = vpack.c.bf16 %v841_v13, %v841_v13  ;;  %v23257_v25 = vld [vmem:[#allocation5 + $0xb10] sm:$0xff]  }
 0x183   :  { %21128 = vmatprep.subr.bf16.mxu1 %v23218_v27  ;;  %15986 = vmatprep.mubr.bf16.mxu0 %v2448_v15  ;;  %v23258_v27 = vld [vmem:[#allocation5 + $0xb90] sm:$0xff]  }
 0x184   :  { %21105 = vmatpush3.bf16.msra.mxu0 %v23215_v24  ;;  %16026 = vmatprep.mubr.bf16.mxu1 %v2450_v18  ;;  %v23256_v24 = vld [vmem:[#allocation5 + $0xbd0] sm:$0xff]   ;;  %v23291_v18 = vld [vmem:[#allocation5 + $0xc08] sm:$0xff]  }
 0x185   :  { %21106 = vmatprep.subr.bf16.mxu0 %v23217_v26 }
 0x186   :  { %21129 = vmatpush3.bf16.msra.mxu1 %v23220_v31  ;;  %v23260_v31 = vld [vmem:[#allocation5 + $0xbd8] sm:$0xff]  }
 0x187   :  { %21130 = vmatprep.subr.bf16.mxu1 %v23222_v36 }
 0x188   :  { %21107 = vmatpush3.bf16.msra.mxu0 %v23219_v29  ;;  %v23259_v29 = vld [vmem:[#allocation5 + $0xb58] sm:$0xff]  }
 0x189   :  { %21108 = vmatprep.subr.bf16.mxu0 %v23221_v33 }
 0x18a   :  { %21131 = vmatpush3.bf16.msra.mxu1 %v23224_v43  ;;  %v23264_v43 = vld [vmem:[#allocation5 + $0xbe0] sm:$0xff]  }
 0x18b   :  { %21132 = vmatprep.subr.bf16.mxu1 %v23226_v48  ;;  %v23266_v48 = vld [vmem:[#allocation5 + $0xba0] sm:$0xff]  }
 0x18c   :  { %21109 = vmatpush3.bf16.msra.mxu0 %v23223_v40 }
 0x18d   :  { %21110 = vmatprep.subr.bf16.mxu0 %v23225_v45 }
 0x18e   :  { %21133 = vmatpush3.bf16.msra.mxu1 %v23228_v51  ;;  %v23268_v51 = vld [vmem:[#allocation5 + $0xbe8] sm:$0xff]  }
 0x18f   :  { %v20810_v28 = vpop.f32.mrb[12].mxu0 }
 0x190   :  { %v20832_v30 = vpop.f32.mrb[12].mxu1  ;;  %v20811_v32 = vpop.f32.mrb[13].mxu0  ;;  %21111 = vmatpush3.bf16.msra.mxu0 %v23227_v49  ;;  %v23267_v49 = vld [vmem:[#allocation5 + $0xb68] sm:$0xff]  }
 0x191   :  { %v20812_v34 = vadd.f32 %v20811_v32, %v20810_v28  ;;  %v20833_v35 = vpop.f32.mrb[13].mxu1  ;;  %v20813_v39 = vpop.f32.mrb[14].mxu0  ;;  %21112 = vmatprep.subr.bf16.mxu0 %v23229_v52  ;;  %v23270_v52 = vld [vmem:[#allocation5 + $0xba8] sm:$0xff]  }
 0x192   :  { %v20834_v38 = vadd.f32 %v20833_v35, %v20832_v30  ;;  %v20835_v42 = vpop.f32.mrb[14].mxu1  ;;  %v20814_v44 = vpop.f32.mrb[15].mxu0 }
 0x193   :  { %v15429_v41 = vadd.f32 %v20812_v34, %v24896_v50  ;;  %v20836_v47 = vpop.f32.mrb[15].mxu1  ;;  %v23230_v50 = vld [vmem:[#allocation5 + $0xae8] sm:$0xff]   ;;  %v23261_v34 = vld [vmem:[#allocation5 + $0xb18] sm:$0xff]  }
 0x194   :  { %21134 = vmatprep.subr.bf16.mxu1 %v23230_v50  ;;  %21113 = vmatpush3.bf16.msra.mxu0 %v23231_v54  ;;  %v23265_v47 = vld [vmem:[#allocation5 + $0xb20] sm:$0xff]   ;;  %v23271_v50 = vld [vmem:[#allocation5 + $0xb70] sm:$0xff]  }
 0x195   :  { %v24903_v46 = vadd.f32 %v20834_v38, %v15429_v41  ;;  %21135 = vmatpush3.bf16.msra.mxu1 %v23232_v55  ;;  %21114 = vmatprep.subr.bf16.mxu0 %v23233_v56  ;;  %v23262_v38 = vld [vmem:[#allocation5 + $0xb98] sm:$0xff]   ;;  %v23263_v41 = vld [vmem:[#allocation5 + $0xb60] sm:$0xff]   ;;  %v23272_v54 = vld [vmem:[#allocation5 + $0xbf0] sm:$0xff]  }
 0x196   :  { %21136 = vmatprep.subr.bf16.mxu1 %v23234_v53  ;;  %v23273_v55 = vld [vmem:[#allocation5 + $0xb30] sm:$0xff]   ;;  %v23275_v53 = vld [vmem:[#allocation5 + $0xb78] sm:$0xff]  }
 0x197   :  { %v23274_v56 = vld [vmem:[#allocation5 + $0xbb0] sm:$0xff]  }
 0x198   :  { %21115 = vmatpush3.bf16.msra.mxu0 %v23235_v57  ;;  %v23276_v57 = vld [vmem:[#allocation5 + $0xbf8] sm:$0xff]  }
 0x199   :  { %21137 = vmatpush3.bf16.msra.mxu1 %v23236_v58  ;;  %21116 = vmatprep.subr.bf16.mxu0 %v23237_v59  ;;  %v23277_v58 = vld [vmem:[#allocation5 + $0xb38] sm:$0xff]  }
 0x19a   :  { %21138 = vmatprep.subr.bf16.mxu1 %v23238_v60  ;;  %v23278_v59 = vld [vmem:[#allocation5 + $0xbb8] sm:$0xff]  }
 0x19b   :  { %v23279_v60 = vld [vmem:[#allocation2 + $0x58] ss:$392 sps:$4 sm:$0xff]  }
 0x19c   :  { %21117 = vmatpush3.bf16.msra.mxu0 %v23239_v61  ;;  %v23281_v61 = vld [vmem:[#allocation2 + $0x368] ss:$392 sps:$4 sm:$0xff]   ;;  %v853_v0 = vrot.slane %v23279_v60, %v24852_v37  ;;  %v23322_v60 = vld [vmem:[#allocation2 + $0x374] ss:$392 sps:$4 sm:$0xff]  }
 0x19d   :  { %21139 = vmatpush3.bf16.msra.mxu1 %v23240_v62  ;;  %21146 = vmatprep.subr.bf16.mxu0 %v23247_v5  ;;  %v23283_v62 = vld [vmem:[#allocation2 + $0x5c] ss:$392 sps:$4 sm:$0xff]   ;;  %v867_v1 = vrot.slane %v23281_v61, %v24852_v37 }
 0x19e   :  { %21168 = vmatprep.subr.bf16.mxu1 %v23248_v8  ;;  %v860_v2 = vrot.slane %v23283_v62, %v24852_v37  ;;  %v23286_v5 = vld [vmem:[#allocation5 + $0xcc0] sm:$0xff]  }
 0x19f   :  { %15987 = vmatmul.mubr.bf16.vlgmr.msra.gmra.mrb[40].mxu0 %v2447_v16  ;;  %v876_v6 = vcombine.high %v853_v0, %v867_v1  ;;  %v875_v7 = vcombine.low %v853_v0, %v867_v1  ;;  %v23287_v8 = vld [vmem:[#allocation5 + $0xc00] sm:$0xff]   ;;  %v910_v1 = vrot.slane %v23322_v60, %v24852_v37 }
 0x1a0   :  { %16027 = vmatmul.mubr.bf16.vlgmr.msra.gmra.mrb[40].mxu1 %v2449_v19  ;;  %21147 = vmatpush3.bf16.msra.mxu0 %v23249_v11  ;;  %v878_v9 = vcombine.high %v860_v2, %v874_v4  ;;  %v877_v10 = vcombine.low %v860_v2, %v874_v4  ;;  %v23288_v11 = vld [vmem:[#allocation5 + $0xc80] sm:$0xff]   ;;  %v23292_v19 = vld [vmem:[#allocation5 + $0xc88] sm:$0xff]  }
 0x1a1   :  { %21169 = vmatpush3.bf16.msra.mxu1 %v23250_v14  ;;  %21148 = vmatprep.subr.bf16.mxu0 %v23251_v17  ;;  %v2452_v12 = vpack.c.bf16 %v876_v6, %v876_v6  ;;  %v2451_v13 = vpack.c.bf16 %v875_v7, %v875_v7  ;;  %v23289_v14 = vld [vmem:[#allocation5 + $0xc48] sm:$0xff]   ;;  %v23323_v62 = vld [vmem:[#allocation5 + $0xd40] sm:$0xff]  }
 0x1a2   :  { %21170 = vmatprep.subr.bf16.mxu1 %v23252_v20  ;;  %v2454_v15 = vpack.c.bf16 %v878_v9, %v878_v9  ;;  %v2453_v16 = vpack.c.bf16 %v877_v10, %v877_v10  ;;  %v23290_v17 = vld [vmem:[#allocation5 + $0xcc8] sm:$0xff]   ;;  %v23293_v20 = vld [vmem:[#allocation5 + $0xc50] sm:$0xff]   ;;  %v23324_v2 = vld [vmem:[#allocation5 + $0xdc0] sm:$0xff]  }
 0x1a3   :  { %16066 = vmatprep.mubr.bf16.mxu0 %v2452_v12  ;;  %v23325_v7 = vld [vmem:[#allocation5 + $0xd00] sm:$0xff]  }
 0x1a4   :  { %21149 = vmatpush3.bf16.msra.mxu0 %v23253_v21  ;;  %16106 = vmatprep.mubr.bf16.mxu1 %v2454_v15  ;;  %v23294_v21 = vld [vmem:[#allocation5 + $0xcd0] sm:$0xff]   ;;  %v23329_v15 = vld [vmem:[#allocation5 + $0xd08] sm:$0xff]   ;;  %v23361_v60 = vld [vmem:[#allocation5 + $0xe40] sm:$0xff]  }
 0x1a5   :  { %21171 = vmatpush3.bf16.msra.mxu1 %v23254_v22  ;;  %21150 = vmatprep.subr.bf16.mxu0 %v23255_v23  ;;  %v23295_v22 = vld [vmem:[#allocation5 + $0xc10] sm:$0xff]  }
 0x1a6   :  { %21172 = vmatprep.subr.bf16.mxu1 %v23256_v24  ;;  %v23296_v24 = vld [vmem:[#allocation5 + $0xc90] sm:$0xff]  }
 0x1a8   :  { %21151 = vmatpush3.bf16.msra.mxu0 %v23257_v25 }
 0x1a9   :  { %21173 = vmatpush3.bf16.msra.mxu1 %v23258_v27  ;;  %21152 = vmatprep.subr.bf16.mxu0 %v23259_v29 }
 0x1aa   :  { %21174 = vmatprep.subr.bf16.mxu1 %v23260_v31  ;;  %v23299_v31 = vld [vmem:[#allocation5 + $0xc18] sm:$0xff]  }
 0x1ac   :  { %21153 = vmatpush3.bf16.msra.mxu0 %v23261_v34  ;;  %v23300_v34 = vld [vmem:[#allocation5 + $0xc98] sm:$0xff]  }
 0x1ad   :  { %21175 = vmatpush3.bf16.msra.mxu1 %v23262_v38  ;;  %21154 = vmatprep.subr.bf16.mxu0 %v23263_v41  ;;  %v23301_v38 = vld [vmem:[#allocation5 + $0xc60] sm:$0xff]  }
 0x1ae   :  { %21176 = vmatprep.subr.bf16.mxu1 %v23264_v43  ;;  %v23303_v43 = vld [vmem:[#allocation5 + $0xc20] sm:$0xff]  }
 0x1af   :  { %v20854_v26 = vpop.f32.mrb[16].mxu0 }
 0x1b0   :  { %v20876_v28 = vpop.f32.mrb[16].mxu1  ;;  %v20855_v30 = vpop.f32.mrb[17].mxu0  ;;  %21155 = vmatpush3.bf16.msra.mxu0 %v23265_v47  ;;  %v23305_v47 = vld [vmem:[#allocation5 + $0xc68] sm:$0xff]  }
 0x1b1   :  { %v20856_v32 = vadd.f32 %v20855_v30, %v20854_v26  ;;  %v20877_v33 = vpop.f32.mrb[17].mxu1  ;;  %v20857_v36 = vpop.f32.mrb[18].mxu0  ;;  %21177 = vmatpush3.bf16.msra.mxu1 %v23266_v48  ;;  %21156 = vmatprep.subr.bf16.mxu0 %v23267_v49  ;;  %v23297_v26 = vld [vmem:[#allocation5 + $0xc58] sm:$0xff]   ;;  %v23306_v48 = vld [vmem:[#allocation5 + $0xce8] sm:$0xff]  }
 0x1b2   :  { %v20878_v35 = vadd.f32 %v20877_v33, %v20876_v28  ;;  %v20879_v40 = vpop.f32.mrb[18].mxu1  ;;  %v20858_v42 = vpop.f32.mrb[19].mxu0  ;;  %21178 = vmatprep.subr.bf16.mxu1 %v23268_v51  ;;  %v23298_v28 = vld [vmem:[#allocation5 + $0xcd8] sm:$0xff]   ;;  %v23308_v49 = vld [vmem:[#allocation5 + $0xca8] sm:$0xff]   ;;  %v23309_v51 = vld [vmem:[#allocation5 + $0xc70] sm:$0xff]  }
 0x1b3   :  { %v15509_v39 = vadd.f32 %v20856_v32, %v24903_v46  ;;  %v20880_v45 = vpop.f32.mrb[19].mxu1  ;;  %v23269_v46 = vld [vmem:[#allocation5 + $0xb28] sm:$0xff]   ;;  %v23302_v40 = vld [vmem:[#allocation5 + $0xce0] sm:$0xff]  }
 0x1b4   :  { %21157 = vmatpush3.bf16.msra.mxu0 %v23269_v46  ;;  %v23304_v45 = vld [vmem:[#allocation5 + $0xca0] sm:$0xff]   ;;  %v23310_v46 = vld [vmem:[#allocation5 + $0xcf0] sm:$0xff]  }
 0x1b5   :  { %v24910_v44 = vadd.f32 %v20878_v35, %v15509_v39  ;;  %21179 = vmatpush3.bf16.msra.mxu1 %v23270_v52  ;;  %21158 = vmatprep.subr.bf16.mxu0 %v23271_v50  ;;  %v23311_v52 = vld [vmem:[#allocation5 + $0xc30] sm:$0xff]  }
 0x1b6   :  { %21180 = vmatprep.subr.bf16.mxu1 %v23272_v54  ;;  %v23312_v50 = vld [vmem:[#allocation5 + $0xcb0] sm:$0xff]   ;;  %v23313_v54 = vld [vmem:[#allocation5 + $0xc78] sm:$0xff]  }
 0x1b8   :  { %21159 = vmatpush3.bf16.msra.mxu0 %v23273_v55  ;;  %v23314_v55 = vld [vmem:[#allocation5 + $0xcf8] sm:$0xff]  }
 0x1b9   :  { %21181 = vmatpush3.bf16.msra.mxu1 %v23274_v56  ;;  %21160 = vmatprep.subr.bf16.mxu0 %v23275_v53  ;;  %v23315_v56 = vld [vmem:[#allocation5 + $0xc38] sm:$0xff]  }
 0x1ba   :  { %21182 = vmatprep.subr.bf16.mxu1 %v23276_v57  ;;  %v23316_v53 = vld [vmem:[#allocation5 + $0xcb8] sm:$0xff]   ;;  %v23317_v57 = vld [vmem:[#allocation2 + $0x60] ss:$392 sps:$4 sm:$0xff]  }
 0x1bb   :  { %v889_v61 = vrot.slane %v23317_v57, %v24852_v37  ;;  %v23360_v57 = vld [vmem:[#allocation2 + $0x37c] ss:$392 sps:$4 sm:$0xff]  }
 0x1bc   :  { %21161 = vmatpush3.bf16.msra.mxu0 %v23277_v58  ;;  %v23319_v58 = vld [vmem:[#allocation2 + $0x370] ss:$392 sps:$4 sm:$0xff]  }
 0x1bd   :  { %21183 = vmatpush3.bf16.msra.mxu1 %v23278_v59  ;;  %21190 = vmatprep.subr.bf16.mxu0 %v23285_v3  ;;  %v23321_v59 = vld [vmem:[#allocation2 + $0x64] ss:$392 sps:$4 sm:$0xff]   ;;  %v903_v63 = vrot.slane %v23319_v58, %v24852_v37 }
 0x1be   :  { %21212 = vmatprep.subr.bf16.mxu1 %v23286_v5  ;;  %v896_v0 = vrot.slane %v23321_v59, %v24852_v37 }
 0x1bf   :  { %16067 = vmatmul.mubr.bf16.vlgmr.msra.gmra.mrb[44].mxu0 %v2451_v13  ;;  %v912_v3 = vcombine.high %v889_v61, %v903_v63  ;;  %v911_v5 = vcombine.low %v889_v61, %v903_v63  ;;  %v23327_v13 = vld [vmem:[#allocation5 + $0xd48] sm:$0xff]   ;;  %v23362_v63 = vld [vmem:[#allocation5 + $0xec0] sm:$0xff]  }
 0x1c0   :  { %16107 = vmatmul.mubr.bf16.vlgmr.msra.gmra.mrb[44].mxu1 %v2453_v16  ;;  %21191 = vmatpush3.bf16.msra.mxu0 %v23287_v8  ;;  %v914_v4 = vcombine.high %v896_v0, %v910_v1  ;;  %v913_v6 = vcombine.low %v896_v0, %v910_v1  ;;  %v23326_v8 = vld [vmem:[#allocation5 + $0xd80] sm:$0xff]   ;;  %v23330_v16 = vld [vmem:[#allocation5 + $0xd88] sm:$0xff]  }
 0x1c1   :  { %21213 = vmatpush3.bf16.msra.mxu1 %v23288_v11  ;;  %21192 = vmatprep.subr.bf16.mxu0 %v23289_v14  ;;  %v2456_v9 = vpack.c.bf16 %v912_v3, %v912_v3  ;;  %v2455_v11 = vpack.c.bf16 %v911_v5, %v911_v5  ;;  %v23328_v14 = vld [vmem:[#allocation5 + $0xdc8] sm:$0xff]   ;;  %v23364_v5 = vld [vmem:[#allocation5 + $0xe80] sm:$0xff]  }
 0x1c2   :  { %21214 = vmatprep.subr.bf16.mxu1 %v23290_v17  ;;  %v2458_v10 = vpack.c.bf16 %v914_v4, %v914_v4  ;;  %v2457_v12 = vpack.c.bf16 %v913_v6, %v913_v6  ;;  %v23331_v17 = vld [vmem:[#allocation5 + $0xd50] sm:$0xff]  }
 0x1c3   :  { %16146 = vmatprep.mubr.bf16.mxu0 %v2456_v9 }
 0x1c4   :  { %21193 = vmatpush3.bf16.msra.mxu0 %v23291_v18  ;;  %16186 = vmatprep.mubr.bf16.mxu1 %v2458_v10  ;;  %v23332_v18 = vld [vmem:[#allocation5 + $0xdd0] sm:$0xff]  }
 0x1c5   :  { %21215 = vmatpush3.bf16.msra.mxu1 %v23292_v19  ;;  %21194 = vmatprep.subr.bf16.mxu0 %v23293_v20  ;;  %v23333_v20 = vld [vmem:[#allocation5 + $0xd10] sm:$0xff]  }
 0x1c6   :  { %21216 = vmatprep.subr.bf16.mxu1 %v23294_v21 }
 0x1c8   :  { %21195 = vmatpush3.bf16.msra.mxu0 %v23295_v22  ;;  %v23334_v22 = vld [vmem:[#allocation5 + $0xd90] sm:$0xff]  }
 0x1c9   :  { %21217 = vmatpush3.bf16.msra.mxu1 %v23296_v24  ;;  %21196 = vmatprep.subr.bf16.mxu0 %v23297_v26  ;;  %v23335_v24 = vld [vmem:[#allocation5 + $0xd58] sm:$0xff]  }
 0x1ca   :  { %21218 = vmatprep.subr.bf16.mxu1 %v23298_v28 }
 0x1cc   :  { %21197 = vmatpush3.bf16.msra.mxu0 %v23299_v31 }
 0x1cd   :  { %21219 = vmatpush3.bf16.msra.mxu1 %v23300_v34  ;;  %21198 = vmatprep.subr.bf16.mxu0 %v23301_v38 }
 0x1ce   :  { %21220 = vmatprep.subr.bf16.mxu1 %v23302_v40  ;;  %v23341_v40 = vld [vmem:[#allocation5 + $0xd20] sm:$0xff]  }
 0x1cf   :  { %v20898_v23 = vpop.f32.mrb[20].mxu0 }
 0x1d0   :  { %v20920_v25 = vpop.f32.mrb[20].mxu1  ;;  %v20899_v27 = vpop.f32.mrb[21].mxu0  ;;  %21199 = vmatpush3.bf16.msra.mxu0 %v23303_v43  ;;  %v23343_v43 = vld [vmem:[#allocation5 + $0xd68] sm:$0xff]  }
 0x1d1   :  { %v20900_v29 = vadd.f32 %v20899_v27, %v20898_v23  ;;  %v20921_v30 = vpop.f32.mrb[21].mxu1  ;;  %v20901_v33 = vpop.f32.mrb[22].mxu0  ;;  %21221 = vmatpush3.bf16.msra.mxu1 %v23304_v45  ;;  %21200 = vmatprep.subr.bf16.mxu0 %v23305_v47  ;;  %v23336_v27 = vld [vmem:[#allocation5 + $0xdd8] sm:$0xff]   ;;  %v23345_v45 = vld [vmem:[#allocation5 + $0xd28] sm:$0xff]  }
 0x1d2   :  { %v20922_v32 = vadd.f32 %v20921_v30, %v20920_v25  ;;  %v20923_v36 = vpop.f32.mrb[22].mxu1  ;;  %v20902_v39 = vpop.f32.mrb[23].mxu0  ;;  %21222 = vmatprep.subr.bf16.mxu1 %v23306_v48  ;;  %v23337_v30 = vld [vmem:[#allocation5 + $0xd18] sm:$0xff]   ;;  %v23346_v47 = vld [vmem:[#allocation5 + $0xda8] sm:$0xff]   ;;  %v23347_v48 = vld [vmem:[#allocation5 + $0xd70] sm:$0xff]  }
 0x1d3   :  { %v15589_v35 = vadd.f32 %v20900_v29, %v24910_v44  ;;  %v20924_v42 = vpop.f32.mrb[23].mxu1  ;;  %v23307_v44 = vld [vmem:[#allocation5 + $0xc28] sm:$0xff]   ;;  %v23338_v33 = vld [vmem:[#allocation5 + $0xd98] sm:$0xff]   ;;  %v23340_v39 = vld [vmem:[#allocation5 + $0xde0] sm:$0xff]  }
 0x1d4   :  { %21201 = vmatpush3.bf16.msra.mxu0 %v23307_v44  ;;  %v23342_v42 = vld [vmem:[#allocation5 + $0xda0] sm:$0xff]   ;;  %v23348_v44 = vld [vmem:[#allocation5 + $0xdf0] sm:$0xff]  }
 0x1d5   :  { %v24917_v41 = vadd.f32 %v20922_v32, %v15589_v35  ;;  %21223 = vmatpush3.bf16.msra.mxu1 %v23308_v49  ;;  %21202 = vmatprep.subr.bf16.mxu0 %v23309_v51  ;;  %v23339_v35 = vld [vmem:[#allocation5 + $0xd60] sm:$0xff]   ;;  %v23349_v49 = vld [vmem:[#allocation5 + $0xd30] sm:$0xff]  }
 0x1d6   :  { %21224 = vmatprep.subr.bf16.mxu1 %v23310_v46  ;;  %v23350_v51 = vld [vmem:[#allocation5 + $0xdb0] sm:$0xff]   ;;  %v23351_v46 = vld [vmem:[#allocation5 + $0xd78] sm:$0xff]  }
 0x1d8   :  { %21203 = vmatpush3.bf16.msra.mxu0 %v23311_v52  ;;  %v23352_v52 = vld [vmem:[#allocation5 + $0xdf8] sm:$0xff]  }
 0x1d9   :  { %21225 = vmatpush3.bf16.msra.mxu1 %v23312_v50  ;;  %21204 = vmatprep.subr.bf16.mxu0 %v23313_v54  ;;  %v23353_v50 = vld [vmem:[#allocation5 + $0xd38] sm:$0xff]  }
 0x1da   :  { %21226 = vmatprep.subr.bf16.mxu1 %v23314_v55  ;;  %v23354_v54 = vld [vmem:[#allocation5 + $0xdb8] sm:$0xff]   ;;  %v23355_v55 = vld [vmem:[#allocation2 + $0x68] ss:$392 sps:$4 sm:$0xff]  }
 0x1db   :  { %v925_v58 = vrot.slane %v23355_v55, %v24852_v37  ;;  %v23398_v55 = vld [vmem:[#allocation2 + $0x384] ss:$392 sps:$4 sm:$0xff]  }
 0x1dc   :  { %21205 = vmatpush3.bf16.msra.mxu0 %v23315_v56  ;;  %v23357_v56 = vld [vmem:[#allocation2 + $0x378] ss:$392 sps:$4 sm:$0xff]  }
 0x1dd   :  { %21227 = vmatpush3.bf16.msra.mxu1 %v23316_v53  ;;  %21234 = vmatprep.subr.bf16.mxu0 %v23323_v62  ;;  %v23359_v53 = vld [vmem:[#allocation2 + $0x6c] ss:$392 sps:$4 sm:$0xff]   ;;  %v939_v59 = vrot.slane %v23357_v56, %v24852_v37  ;;  %v946_v62 = vrot.slane %v23360_v57, %v24852_v37 }
 0x1de   :  { %21256 = vmatprep.subr.bf16.mxu1 %v23324_v2  ;;  %v932_v61 = vrot.slane %v23359_v53, %v24852_v37  ;;  %v23363_v2 = vld [vmem:[#allocation5 + $0xe00] sm:$0xff]  }
 0x1df   :  { %16147 = vmatmul.mubr.bf16.vlgmr.msra.gmra.mrb[48].mxu0 %v2455_v11  ;;  %v948_v0 = vcombine.high %v925_v58, %v939_v59  ;;  %v947_v1 = vcombine.low %v925_v58, %v939_v59  ;;  %v23366_v11 = vld [vmem:[#allocation5 + $0xec8] sm:$0xff]   ;;  %v23399_v58 = vld [vmem:[#allocation5 + $0xf40] sm:$0xff]   ;;  %v982_v59 = vrot.slane %v23398_v55, %v24852_v37 }
 0x1e0   :  { %16187 = vmatmul.mubr.bf16.vlgmr.msra.gmra.mrb[48].mxu1 %v2457_v12  ;;  %21235 = vmatpush3.bf16.msra.mxu0 %v23325_v7  ;;  %v950_v3 = vcombine.high %v932_v61, %v946_v62  ;;  %v949_v4 = vcombine.low %v932_v61, %v946_v62  ;;  %v23367_v12 = vld [vmem:[#allocation5 + $0xe08] sm:$0xff]  }
 0x1e1   :  { %21257 = vmatpush3.bf16.msra.mxu1 %v23326_v8  ;;  %21236 = vmatprep.subr.bf16.mxu0 %v23327_v13  ;;  %v2460_v6 = vpack.c.bf16 %v948_v0, %v948_v0  ;;  %v2459_v7 = vpack.c.bf16 %v947_v1, %v947_v1  ;;  %v23365_v8 = vld [vmem:[#allocation5 + $0xe48] sm:$0xff]  }
 0x1e2   :  { %21258 = vmatprep.subr.bf16.mxu1 %v23328_v14  ;;  %v2462_v9 = vpack.c.bf16 %v950_v3, %v950_v3  ;;  %v2461_v10 = vpack.c.bf16 %v949_v4, %v949_v4  ;;  %v23368_v13 = vld [vmem:[#allocation5 + $0xe88] sm:$0xff]   ;;  %v23369_v14 = vld [vmem:[#allocation5 + $0xe50] sm:$0xff]  }
 0x1e3   :  { %16226 = vmatprep.mubr.bf16.mxu0 %v2460_v6 }
 0x1e4   :  { %21237 = vmatpush3.bf16.msra.mxu0 %v23329_v15  ;;  %16266 = vmatprep.mubr.bf16.mxu1 %v2462_v9  ;;  %v23370_v15 = vld [vmem:[#allocation5 + $0xed0] sm:$0xff]   ;;  %v23405_v9 = vld [vmem:[#allocation5 + $0xf08] sm:$0xff]  }
 0x1e5   :  { %21259 = vmatpush3.bf16.msra.mxu1 %v23330_v16  ;;  %21238 = vmatprep.subr.bf16.mxu0 %v23331_v17  ;;  %v23371_v16 = vld [vmem:[#allocation5 + $0xe10] sm:$0xff]  }
 0x1e6   :  { %21260 = vmatprep.subr.bf16.mxu1 %v23332_v18  ;;  %v23372_v18 = vld [vmem:[#allocation5 + $0xe90] sm:$0xff]  }
 0x1e8   :  { %21239 = vmatpush3.bf16.msra.mxu0 %v23333_v20  ;;  %v23373_v20 = vld [vmem:[#allocation5 + $0xe58] sm:$0xff]  }
 0x1e9   :  { %21261 = vmatpush3.bf16.msra.mxu1 %v23334_v22  ;;  %21240 = vmatprep.subr.bf16.mxu0 %v23335_v24  ;;  %v23374_v22 = vld [vmem:[#allocation5 + $0xed8] sm:$0xff]  }
 0x1ea   :  { %21262 = vmatprep.subr.bf16.mxu1 %v23336_v27 }
 0x1ec   :  { %21241 = vmatpush3.bf16.msra.mxu0 %v23337_v30 }
 0x1ed   :  { %21263 = vmatpush3.bf16.msra.mxu1 %v23338_v33  ;;  %21242 = vmatprep.subr.bf16.mxu0 %v23339_v35  ;;  %v23378_v33 = vld [vmem:[#allocation5 + $0xee0] sm:$0xff]  }
 0x1ee   :  { %21264 = vmatprep.subr.bf16.mxu1 %v23340_v39  ;;  %v23380_v39 = vld [vmem:[#allocation5 + $0xea0] sm:$0xff]  }
 0x1ef   :  { %v20942_v19 = vpop.f32.mrb[24].mxu0 }
 0x1f0   :  { %v20964_v21 = vpop.f32.mrb[24].mxu1  ;;  %v20943_v23 = vpop.f32.mrb[25].mxu0  ;;  %21243 = vmatpush3.bf16.msra.mxu0 %v23341_v40  ;;  %v23381_v40 = vld [vmem:[#allocation5 + $0xe68] sm:$0xff]  }
 0x1f1   :  { %v20944_v25 = vadd.f32 %v20943_v23, %v20942_v19  ;;  %v20965_v26 = vpop.f32.mrb[25].mxu1  ;;  %v20945_v29 = vpop.f32.mrb[26].mxu0  ;;  %21265 = vmatpush3.bf16.msra.mxu1 %v23342_v42  ;;  %21244 = vmatprep.subr.bf16.mxu0 %v23343_v43  ;;  %v23382_v42 = vld [vmem:[#allocation5 + $0xee8] sm:$0xff]  }
 0x1f2   :  { %v20966_v28 = vadd.f32 %v20965_v26, %v20964_v21  ;;  %v20967_v32 = vpop.f32.mrb[26].mxu1  ;;  %v20946_v34 = vpop.f32.mrb[27].mxu0  ;;  %v23384_v43 = vld [vmem:[#allocation5 + $0xea8] sm:$0xff]  }
 0x1f3   :  { %v15669_v31 = vadd.f32 %v20944_v25, %v24917_v41  ;;  %v20968_v38 = vpop.f32.mrb[27].mxu1  ;;  %v23344_v41 = vld [vmem:[#allocation5 + $0xde8] sm:$0xff]   ;;  %v23375_v25 = vld [vmem:[#allocation5 + $0xe18] sm:$0xff]  }
 0x1f4   :  { %21266 = vmatprep.subr.bf16.mxu1 %v23344_v41  ;;  %21245 = vmatpush3.bf16.msra.mxu0 %v23345_v45  ;;  %v23379_v38 = vld [vmem:[#allocation5 + $0xe20] sm:$0xff]   ;;  %v23385_v41 = vld [vmem:[#allocation5 + $0xe70] sm:$0xff]  }
 0x1f5   :  { %v24924_v36 = vadd.f32 %v20966_v28, %v15669_v31  ;;  %21267 = vmatpush3.bf16.msra.mxu1 %v23346_v47  ;;  %21246 = vmatprep.subr.bf16.mxu0 %v23347_v48  ;;  %v23376_v28 = vld [vmem:[#allocation5 + $0xe98] sm:$0xff]   ;;  %v23377_v31 = vld [vmem:[#allocation5 + $0xe60] sm:$0xff]   ;;  %v23386_v45 = vld [vmem:[#allocation5 + $0xef0] sm:$0xff]  }
 0x1f6   :  { %21268 = vmatprep.subr.bf16.mxu1 %v23348_v44  ;;  %v23387_v47 = vld [vmem:[#allocation5 + $0xe30] sm:$0xff]   ;;  %v23389_v44 = vld [vmem:[#allocation5 + $0xe78] sm:$0xff]  }
 0x1f7   :  { %v23388_v48 = vld [vmem:[#allocation5 + $0xeb0] sm:$0xff]  }
 0x1f8   :  { %21247 = vmatpush3.bf16.msra.mxu0 %v23349_v49  ;;  %v23390_v49 = vld [vmem:[#allocation5 + $0xef8] sm:$0xff]  }
 0x1f9   :  { %21269 = vmatpush3.bf16.msra.mxu1 %v23350_v51  ;;  %21248 = vmatprep.subr.bf16.mxu0 %v23351_v46  ;;  %v23391_v51 = vld [vmem:[#allocation5 + $0xe38] sm:$0xff]  }
 0x1fa   :  { %21270 = vmatprep.subr.bf16.mxu1 %v23352_v52  ;;  %v23392_v46 = vld [vmem:[#allocation5 + $0xeb8] sm:$0xff]  }
 0x1fb   :  { %v23393_v52 = vld [vmem:[#allocation2 + $0x70] ss:$392 sps:$4 sm:$0xff]  }
 0x1fc   :  { %21249 = vmatpush3.bf16.msra.mxu0 %v23353_v50  ;;  %v23395_v50 = vld [vmem:[#allocation2 + $0x380] ss:$392 sps:$4 sm:$0xff]   ;;  %v961_v56 = vrot.slane %v23393_v52, %v24852_v37  ;;  %v23436_v52 = vld [vmem:[#allocation2 + $0x38c] ss:$392 sps:$4 sm:$0xff]  }
 0x1fd   :  { %21271 = vmatpush3.bf16.msra.mxu1 %v23354_v54  ;;  %21278 = vmatprep.subr.bf16.mxu0 %v23361_v60  ;;  %v23397_v54 = vld [vmem:[#allocation2 + $0x74] ss:$392 sps:$4 sm:$0xff]   ;;  %v975_v53 = vrot.slane %v23395_v50, %v24852_v37  ;;  %v23400_v60 = vld [vmem:[#allocation5 + $0xfc0] sm:$0xff]  }
 0x1fe   :  { %21300 = vmatprep.subr.bf16.mxu1 %v23362_v63  ;;  %v968_v57 = vrot.slane %v23397_v54, %v24852_v37  ;;  %v23401_v63 = vld [vmem:[#allocation5 + $0xf00] sm:$0xff]  }
 0x1ff   :  { %16227 = vmatmul.mubr.bf16.vlgmr.msra.gmra.mrb[52].mxu0 %v2459_v7  ;;  %v984_v61 = vcombine.high %v961_v56, %v975_v53  ;;  %v983_v62 = vcombine.low %v961_v56, %v975_v53  ;;  %v23437_v54 = vld [vmem:[#allocation5 + $0x1040] sm:$0xff]   ;;  %v1018_v53 = vrot.slane %v23436_v52, %v24852_v37 }
 0x200   :  { %16267 = vmatmul.mubr.bf16.vlgmr.msra.gmra.mrb[52].mxu1 %v2461_v10  ;;  %21279 = vmatpush3.bf16.msra.mxu0 %v23363_v2  ;;  %v986_v0 = vcombine.high %v968_v57, %v982_v59  ;;  %v985_v1 = vcombine.low %v968_v57, %v982_v59  ;;  %v23402_v2 = vld [vmem:[#allocation5 + $0xf80] sm:$0xff]   ;;  %v23406_v10 = vld [vmem:[#allocation5 + $0xf88] sm:$0xff]  }
 0x201   :  { %21301 = vmatpush3.bf16.msra.mxu1 %v23364_v5  ;;  %21280 = vmatprep.subr.bf16.mxu0 %v23365_v8  ;;  %v2464_v3 = vpack.c.bf16 %v984_v61, %v984_v61  ;;  %v2463_v4 = vpack.c.bf16 %v983_v62, %v983_v62  ;;  %v23403_v5 = vld [vmem:[#allocation5 + $0xf48] sm:$0xff]   ;;  %v23438_v57 = vld [vmem:[#allocation5 + $0x10c0] sm:$0xff]  }
 0x202   :  { %21302 = vmatprep.subr.bf16.mxu1 %v23366_v11  ;;  %v2466_v6 = vpack.c.bf16 %v986_v0, %v986_v0  ;;  %v2465_v7 = vpack.c.bf16 %v985_v1, %v985_v1  ;;  %v23404_v8 = vld [vmem:[#allocation5 + $0xfc8] sm:$0xff]   ;;  %v23407_v11 = vld [vmem:[#allocation5 + $0xf50] sm:$0xff]   ;;  %v23439_v62 = vld [vmem:[#allocation5 + $0x1000] sm:$0xff]  }
 0x203   :  { %16306 = vmatprep.mubr.bf16.mxu0 %v2464_v3  ;;  %v23475_v52 = vld [vmem:[#allocation5 + $0x1140] sm:$0xff]  }
 0x204   :  { %21281 = vmatpush3.bf16.msra.mxu0 %v23367_v12  ;;  %16346 = vmatprep.mubr.bf16.mxu1 %v2466_v6  ;;  %v23408_v12 = vld [vmem:[#allocation5 + $0xfd0] sm:$0xff]   ;;  %v23443_v6 = vld [vmem:[#allocation5 + $0x1008] sm:$0xff]  }
 0x205   :  { %21303 = vmatpush3.bf16.msra.mxu1 %v23368_v13  ;;  %21282 = vmatprep.subr.bf16.mxu0 %v23369_v14  ;;  %v23409_v13 = vld [vmem:[#allocation5 + $0xf10] sm:$0xff]  }
 0x206   :  { %21304 = vmatprep.subr.bf16.mxu1 %v23370_v15  ;;  %v23410_v15 = vld [vmem:[#allocation5 + $0xf90] sm:$0xff]  }
 0x208   :  { %21283 = vmatpush3.bf16.msra.mxu0 %v23371_v16 }
 0x209   :  { %21305 = vmatpush3.bf16.msra.mxu1 %v23372_v18  ;;  %21284 = vmatprep.subr.bf16.mxu0 %v23373_v20 }
 0x20a   :  { %21306 = vmatprep.subr.bf16.mxu1 %v23374_v22  ;;  %v23413_v22 = vld [vmem:[#allocation5 + $0xf18] sm:$0xff]  }
 0x20c   :  { %21285 = vmatpush3.bf16.msra.mxu0 %v23375_v25  ;;  %v23414_v25 = vld [vmem:[#allocation5 + $0xf98] sm:$0xff]  }
 0x20d   :  { %21307 = vmatpush3.bf16.msra.mxu1 %v23376_v28  ;;  %21286 = vmatprep.subr.bf16.mxu0 %v23377_v31  ;;  %v23415_v28 = vld [vmem:[#allocation5 + $0xf60] sm:$0xff]  }
 0x20e   :  { %21308 = vmatprep.subr.bf16.mxu1 %v23378_v33  ;;  %v23417_v33 = vld [vmem:[#allocation5 + $0xf20] sm:$0xff]  }
 0x20f   :  { %v20986_v17 = vpop.f32.mrb[28].mxu0 }
 0x210   :  { %v21008_v19 = vpop.f32.mrb[28].mxu1  ;;  %v20987_v21 = vpop.f32.mrb[29].mxu0  ;;  %21287 = vmatpush3.bf16.msra.mxu0 %v23379_v38  ;;  %v23419_v38 = vld [vmem:[#allocation5 + $0xf68] sm:$0xff]  }
 0x211   :  { %v20988_v23 = vadd.f32 %v20987_v21, %v20986_v17  ;;  %v21009_v24 = vpop.f32.mrb[29].mxu1  ;;  %v20989_v27 = vpop.f32.mrb[30].mxu0  ;;  %21309 = vmatpush3.bf16.msra.mxu1 %v23380_v39  ;;  %21288 = vmatprep.subr.bf16.mxu0 %v23381_v40  ;;  %v23411_v17 = vld [vmem:[#allocation5 + $0xf58] sm:$0xff]   ;;  %v23420_v39 = vld [vmem:[#allocation5 + $0xfe8] sm:$0xff]  }
 0x212   :  { %v21010_v26 = vadd.f32 %v21009_v24, %v21008_v19  ;;  %v21011_v30 = vpop.f32.mrb[30].mxu1  ;;  %v20990_v32 = vpop.f32.mrb[31].mxu0  ;;  %21310 = vmatprep.subr.bf16.mxu1 %v23382_v42  ;;  %v23412_v19 = vld [vmem:[#allocation5 + $0xfd8] sm:$0xff]   ;;  %v23422_v40 = vld [vmem:[#allocation5 + $0xfa8] sm:$0xff]   ;;  %v23423_v42 = vld [vmem:[#allocation5 + $0xf70] sm:$0xff]  }
 0x213   :  { %v15749_v29 = vadd.f32 %v20988_v23, %v24924_v36  ;;  %v21012_v35 = vpop.f32.mrb[31].mxu1  ;;  %v23383_v36 = vld [vmem:[#allocation5 + $0xe28] sm:$0xff]   ;;  %v23416_v30 = vld [vmem:[#allocation5 + $0xfe0] sm:$0xff]  }
 0x214   :  { %21289 = vmatpush3.bf16.msra.mxu0 %v23383_v36  ;;  %v23418_v35 = vld [vmem:[#allocation5 + $0xfa0] sm:$0xff]   ;;  %v23424_v36 = vld [vmem:[#allocation5 + $0xff0] sm:$0xff]  }
 0x215   :  { %v24931_v34 = vadd.f32 %v21010_v26, %v15749_v29  ;;  %21311 = vmatpush3.bf16.msra.mxu1 %v23384_v43  ;;  %21290 = vmatprep.subr.bf16.mxu0 %v23385_v41  ;;  %v23425_v43 = vld [vmem:[#allocation5 + $0xf30] sm:$0xff]  }
 0x216   :  { %21312 = vmatprep.subr.bf16.mxu1 %v23386_v45  ;;  %v23426_v41 = vld [vmem:[#allocation5 + $0xfb0] sm:$0xff]   ;;  %v23427_v45 = vld [vmem:[#allocation5 + $0xf78] sm:$0xff]  }
 0x218   :  { %21291 = vmatpush3.bf16.msra.mxu0 %v23387_v47  ;;  %v23428_v47 = vld [vmem:[#allocation5 + $0xff8] sm:$0xff]  }
 0x219   :  { %21313 = vmatpush3.bf16.msra.mxu1 %v23388_v48  ;;  %21292 = vmatprep.subr.bf16.mxu0 %v23389_v44  ;;  %v23429_v48 = vld [vmem:[#allocation5 + $0xf38] sm:$0xff]  }
 0x21a   :  { %21314 = vmatprep.subr.bf16.mxu1 %v23390_v49  ;;  %v23430_v44 = vld [vmem:[#allocation5 + $0xfb8] sm:$0xff]  }
 0x21b   :  { %v23431_v49 = vld [vmem:[#allocation2 + $0x78] ss:$392 sps:$4 sm:$0xff]  }
 0x21c   :  { %21293 = vmatpush3.bf16.msra.mxu0 %v23391_v51  ;;  %v23433_v51 = vld [vmem:[#allocation2 + $0x388] ss:$392 sps:$4 sm:$0xff]   ;;  %v997_v50 = vrot.slane %v23431_v49, %v24852_v37  ;;  %v23474_v49 = vld [vmem:[#allocation2 + $0x394] ss:$392 sps:$4 sm:$0xff]  }
 0x21d   :  { %21315 = vmatpush3.bf16.msra.mxu1 %v23392_v46  ;;  %21322 = vmatprep.subr.bf16.mxu0 %v23399_v58  ;;  %v23435_v46 = vld [vmem:[#allocation2 + $0x7c] ss:$392 sps:$4 sm:$0xff]   ;;  %v1011_v55 = vrot.slane %v23433_v51, %v24852_v37 }
 0x21e   :  { %21344 = vmatprep.subr.bf16.mxu1 %v23400_v60  ;;  %v1004_v56 = vrot.slane %v23435_v46, %v24852_v37 }
 0x21f   :  { %16307 = vmatmul.mubr.bf16.vlgmr.msra.gmra.mrb[56].mxu0 %v2463_v4  ;;  %v1020_v58 = vcombine.high %v997_v50, %v1011_v55  ;;  %v1019_v60 = vcombine.low %v997_v50, %v1011_v55  ;;  %v23441_v4 = vld [vmem:[#allocation5 + $0x1048] sm:$0xff]   ;;  %v23476_v55 = vld [vmem:[#allocation5 + $0x11c0] sm:$0xff]  }
 0x220   :  { %16347 = vmatmul.mubr.bf16.vlgmr.msra.gmra.mrb[56].mxu1 %v2465_v7  ;;  %21323 = vmatpush3.bf16.msra.mxu0 %v23401_v63  ;;  %v1022_v59 = vcombine.high %v1004_v56, %v1018_v53  ;;  %v1021_v61 = vcombine.low %v1004_v56, %v1018_v53  ;;  %v23440_v63 = vld [vmem:[#allocation5 + $0x1080] sm:$0xff]   ;;  %v23444_v7 = vld [vmem:[#allocation5 + $0x1088] sm:$0xff]  }
 0x221   :  { %21345 = vmatpush3.bf16.msra.mxu1 %v23402_v2  ;;  %21324 = vmatprep.subr.bf16.mxu0 %v23403_v5  ;;  %v2468_v0 = vpack.c.bf16 %v1020_v58, %v1020_v58  ;;  %v2467_v2 = vpack.c.bf16 %v1019_v60, %v1019_v60  ;;  %v23442_v5 = vld [vmem:[#allocation5 + $0x10c8] sm:$0xff]   ;;  %v23478_v60 = vld [vmem:[#allocation5 + $0x1180] sm:$0xff]  }
 0x222   :  { %21346 = vmatprep.subr.bf16.mxu1 %v23404_v8  ;;  %v2470_v1 = vpack.c.bf16 %v1022_v59, %v1022_v59  ;;  %v2469_v3 = vpack.c.bf16 %v1021_v61, %v1021_v61  ;;  %v23445_v8 = vld [vmem:[#allocation5 + $0x1050] sm:$0xff]  }
 0x223   :  { %16386 = vmatprep.mubr.bf16.mxu0 %v2468_v0 }
 0x224   :  { %21325 = vmatpush3.bf16.msra.mxu0 %v23405_v9  ;;  %16426 = vmatprep.mubr.bf16.mxu1 %v2470_v1  ;;  %v23446_v9 = vld [vmem:[#allocation5 + $0x10d0] sm:$0xff]  }
 0x225   :  { %21347 = vmatpush3.bf16.msra.mxu1 %v23406_v10  ;;  %21326 = vmatprep.subr.bf16.mxu0 %v23407_v11  ;;  %v23447_v10 = vld [vmem:[#allocation5 + $0x1010] sm:$0xff]  }
 0x226   :  { %21348 = vmatprep.subr.bf16.mxu1 %v23408_v12  ;;  %v23448_v12 = vld [vmem:[#allocation5 + $0x1090] sm:$0xff]  }
 0x228   :  { %21327 = vmatpush3.bf16.msra.mxu0 %v23409_v13 }
 0x229   :  { %21349 = vmatpush3.bf16.msra.mxu1 %v23410_v15  ;;  %21328 = vmatprep.subr.bf16.mxu0 %v23411_v17 }
 0x22a   :  { %21350 = vmatprep.subr.bf16.mxu1 %v23412_v19  ;;  %v23451_v19 = vld [vmem:[#allocation5 + $0x1018] sm:$0xff]  }
 0x22c   :  { %21329 = vmatpush3.bf16.msra.mxu0 %v23413_v22  ;;  %v23452_v22 = vld [vmem:[#allocation5 + $0x1098] sm:$0xff]  }
 0x22d   :  { %21351 = vmatpush3.bf16.msra.mxu1 %v23414_v25  ;;  %21330 = vmatprep.subr.bf16.mxu0 %v23415_v28  ;;  %v23453_v25 = vld [vmem:[#allocation5 + $0x1060] sm:$0xff]  }
 0x22e   :  { %21352 = vmatprep.subr.bf16.mxu1 %v23416_v30  ;;  %v23455_v30 = vld [vmem:[#allocation5 + $0x1020] sm:$0xff]  }
 0x22f   :  { %v21030_v14 = vpop.f32.mrb[32].mxu0 }
 0x230   :  { %v21052_v16 = vpop.f32.mrb[32].mxu1  ;;  %v21031_v18 = vpop.f32.mrb[33].mxu0  ;;  %21331 = vmatpush3.bf16.msra.mxu0 %v23417_v33  ;;  %v23457_v33 = vld [vmem:[#allocation5 + $0x1068] sm:$0xff]  }
 0x231   :  { %v21032_v20 = vadd.f32 %v21031_v18, %v21030_v14  ;;  %v21053_v21 = vpop.f32.mrb[33].mxu1  ;;  %v21033_v24 = vpop.f32.mrb[34].mxu0  ;;  %21353 = vmatpush3.bf16.msra.mxu1 %v23418_v35  ;;  %21332 = vmatprep.subr.bf16.mxu0 %v23419_v38  ;;  %v23449_v14 = vld [vmem:[#allocation5 + $0x1058] sm:$0xff]   ;;  %v23458_v35 = vld [vmem:[#allocation5 + $0x10e8] sm:$0xff]  }
 0x232   :  { %v21054_v23 = vadd.f32 %v21053_v21, %v21052_v16  ;;  %v21055_v27 = vpop.f32.mrb[34].mxu1  ;;  %v21034_v29 = vpop.f32.mrb[35].mxu0  ;;  %21354 = vmatprep.subr.bf16.mxu1 %v23420_v39  ;;  %v23450_v16 = vld [vmem:[#allocation5 + $0x10d8] sm:$0xff]   ;;  %v23460_v38 = vld [vmem:[#allocation5 + $0x10a8] sm:$0xff]   ;;  %v23461_v39 = vld [vmem:[#allocation5 + $0x1070] sm:$0xff]  }
 0x233   :  { %v15829_v26 = vadd.f32 %v21032_v20, %v24931_v34  ;;  %v21056_v32 = vpop.f32.mrb[35].mxu1  ;;  %v23421_v34 = vld [vmem:[#allocation5 + $0xf28] sm:$0xff]   ;;  %v23454_v27 = vld [vmem:[#allocation5 + $0x10e0] sm:$0xff]  }
 0x234   :  { %21333 = vmatpush3.bf16.msra.mxu0 %v23421_v34  ;;  %v23456_v32 = vld [vmem:[#allocation5 + $0x10a0] sm:$0xff]   ;;  %v23462_v34 = vld [vmem:[#allocation5 + $0x10f0] sm:$0xff]  }
 0x235   :  { %v24938_v31 = vadd.f32 %v21054_v23, %v15829_v26  ;;  %21355 = vmatpush3.bf16.msra.mxu1 %v23422_v40  ;;  %21334 = vmatprep.subr.bf16.mxu0 %v23423_v42  ;;  %v23463_v40 = vld [vmem:[#allocation5 + $0x1030] sm:$0xff]  }
 0x236   :  { %21356 = vmatprep.subr.bf16.mxu1 %v23424_v36  ;;  %v23464_v42 = vld [vmem:[#allocation5 + $0x10b0] sm:$0xff]   ;;  %v23465_v36 = vld [vmem:[#allocation5 + $0x1078] sm:$0xff]  }
 0x238   :  { %21335 = vmatpush3.bf16.msra.mxu0 %v23425_v43  ;;  %v23466_v43 = vld [vmem:[#allocation5 + $0x10f8] sm:$0xff]  }
 0x239   :  { %21357 = vmatpush3.bf16.msra.mxu1 %v23426_v41  ;;  %21336 = vmatprep.subr.bf16.mxu0 %v23427_v45  ;;  %v23467_v41 = vld [vmem:[#allocation5 + $0x1038] sm:$0xff]  }
 0x23a   :  { %21358 = vmatprep.subr.bf16.mxu1 %v23428_v47  ;;  %v23468_v45 = vld [vmem:[#allocation5 + $0x10b8] sm:$0xff]   ;;  %v23469_v47 = vld [vmem:[#allocation2 + $0x80] ss:$392 sps:$4 sm:$0xff]  }
 0x23b   :  { %v1033_v51 = vrot.slane %v23469_v47, %v24852_v37  ;;  %v23512_v47 = vld [vmem:[#allocation2 + $0x39c] ss:$392 sps:$4 sm:$0xff]  }
 0x23c   :  { %21337 = vmatpush3.bf16.msra.mxu0 %v23429_v48  ;;  %v23471_v48 = vld [vmem:[#allocation2 + $0x390] ss:$392 sps:$4 sm:$0xff]  }
 0x23d   :  { %21359 = vmatpush3.bf16.msra.mxu1 %v23430_v44  ;;  %21366 = vmatprep.subr.bf16.mxu0 %v23437_v54  ;;  %v23473_v44 = vld [vmem:[#allocation2 + $0x84] ss:$392 sps:$4 sm:$0xff]   ;;  %v1047_v46 = vrot.slane %v23471_v48, %v24852_v37  ;;  %v1054_v54 = vrot.slane %v23474_v49, %v24852_v37 }
 0x23e   :  { %21388 = vmatprep.subr.bf16.mxu1 %v23438_v57  ;;  %v1040_v50 = vrot.slane %v23473_v44, %v24852_v37  ;;  %v23477_v57 = vld [vmem:[#allocation5 + $0x1100] sm:$0xff]  }
 0x23f   :  { %16387 = vmatmul.mubr.bf16.vlgmr.msra.gmra.mrb[60].mxu0 %v2467_v2  ;;  %v1056_v56 = vcombine.high %v1033_v51, %v1047_v46  ;;  %v1055_v53 = vcombine.low %v1033_v51, %v1047_v46  ;;  %v23480_v2 = vld [vmem:[#allocation5 + $0x11c8] sm:$0xff]   ;;  %v23513_v51 = vld [vmem:[#allocation5 + $0x1240] sm:$0xff]   ;;  %v1090_v46 = vrot.slane %v23512_v47, %v24852_v37 }
 0x240   :  { %16427 = vmatmul.mubr.bf16.vlgmr.msra.gmra.mrb[60].mxu1 %v2469_v3  ;;  %21367 = vmatpush3.bf16.msra.mxu0 %v23439_v62  ;;  %v1058_v58 = vcombine.high %v1040_v50, %v1054_v54  ;;  %v1057_v59 = vcombine.low %v1040_v50, %v1054_v54  ;;  %v23481_v3 = vld [vmem:[#allocation5 + $0x1108] sm:$0xff]  }
 0x241   :  { %21389 = vmatpush3.bf16.msra.mxu1 %v23440_v63  ;;  %21368 = vmatprep.subr.bf16.mxu0 %v23441_v4  ;;  %v2472_v61 = vpack.c.bf16 %v1056_v56, %v1056_v56  ;;  %v2471_v62 = vpack.c.bf16 %v1055_v53, %v1055_v53  ;;  %v23479_v63 = vld [vmem:[#allocation5 + $0x1148] sm:$0xff]  }
 0x242   :  { %21390 = vmatprep.subr.bf16.mxu1 %v23442_v5  ;;  %v2474_v0 = vpack.c.bf16 %v1058_v58, %v1058_v58  ;;  %v2473_v1 = vpack.c.bf16 %v1057_v59, %v1057_v59  ;;  %v23482_v4 = vld [vmem:[#allocation5 + $0x1188] sm:$0xff]   ;;  %v23483_v5 = vld [vmem:[#allocation5 + $0x1150] sm:$0xff]  }
 0x243   :  { %16466 = vmatprep.mubr.bf16.mxu0 %v2472_v61 }
 0x244   :  { %21369 = vmatpush3.bf16.msra.mxu0 %v23443_v6  ;;  %16506 = vmatprep.mubr.bf16.mxu1 %v2474_v0  ;;  %v23484_v6 = vld [vmem:[#allocation5 + $0x11d0] sm:$0xff]   ;;  %v23519_v0 = vld [vmem:[#allocation5 + $0x1208] sm:$0xff]  }
 0x245   :  { %21391 = vmatpush3.bf16.msra.mxu1 %v23444_v7  ;;  %21370 = vmatprep.subr.bf16.mxu0 %v23445_v8  ;;  %v23485_v7 = vld [vmem:[#allocation5 + $0x1110] sm:$0xff]  }
 0x246   :  { %21392 = vmatprep.subr.bf16.mxu1 %v23446_v9  ;;  %v23486_v9 = vld [vmem:[#allocation5 + $0x1190] sm:$0xff]  }
 0x248   :  { %21371 = vmatpush3.bf16.msra.mxu0 %v23447_v10 }
 0x249   :  { %21393 = vmatpush3.bf16.msra.mxu1 %v23448_v12  ;;  %21372 = vmatprep.subr.bf16.mxu0 %v23449_v14 }
 0x24a   :  { %21394 = vmatprep.subr.bf16.mxu1 %v23450_v16  ;;  %v23489_v16 = vld [vmem:[#allocation5 + $0x1118] sm:$0xff]  }
 0x24c   :  { %21373 = vmatpush3.bf16.msra.mxu0 %v23451_v19  ;;  %v23490_v19 = vld [vmem:[#allocation5 + $0x1198] sm:$0xff]  }
 0x24d   :  { %21395 = vmatpush3.bf16.msra.mxu1 %v23452_v22  ;;  %21374 = vmatprep.subr.bf16.mxu0 %v23453_v25  ;;  %v23491_v22 = vld [vmem:[#allocation5 + $0x1160] sm:$0xff]  }
 0x24e   :  { %21396 = vmatprep.subr.bf16.mxu1 %v23454_v27  ;;  %v23493_v27 = vld [vmem:[#allocation5 + $0x1120] sm:$0xff]  }
 0x250   :  { %v21096_v13 = vpop.f32.mrb[36].mxu1  ;;  %21375 = vmatpush3.bf16.msra.mxu0 %v23455_v30  ;;  %v23495_v30 = vld [vmem:[#allocation5 + $0x1168] sm:$0xff]  }
 0x251   :  { %v21097_v18 = vpop.f32.mrb[37].mxu1  ;;  %21397 = vmatpush3.bf16.msra.mxu1 %v23456_v32  ;;  %21376 = vmatprep.subr.bf16.mxu0 %v23457_v33  ;;  %v23496_v32 = vld [vmem:[#allocation5 + $0x11e8] sm:$0xff]  }
 0x252   :  { %v21074_v11 = vpop.f32.mrb[36].mxu0  ;;  %v21098_v20 = vadd.f32 %v21097_v18, %v21096_v13  ;;  %v21099_v24 = vpop.f32.mrb[38].mxu1  ;;  %21398 = vmatprep.subr.bf16.mxu1 %v23458_v35  ;;  %v23488_v13 = vld [vmem:[#allocation5 + $0x11d8] sm:$0xff]   ;;  %v23498_v33 = vld [vmem:[#allocation5 + $0x11a8] sm:$0xff]   ;;  %v23499_v35 = vld [vmem:[#allocation5 + $0x1170] sm:$0xff]  }
 0x253   :  { %v21075_v15 = vpop.f32.mrb[37].mxu0  ;;  %v21100_v29 = vpop.f32.mrb[39].mxu1  ;;  %v23492_v24 = vld [vmem:[#allocation5 + $0x11e0] sm:$0xff]  }
 0x254   :  { %v21076_v17 = vadd.f32 %v21075_v15, %v21074_v11  ;;  %v21077_v21 = vpop.f32.mrb[38].mxu0  ;;  %v23487_v11 = vld [vmem:[#allocation5 + $0x1158] sm:$0xff]   ;;  %v23494_v29 = vld [vmem:[#allocation5 + $0x11a0] sm:$0xff]  }
 0x255   :  { %v21078_v26 = vpop.f32.mrb[39].mxu0  ;;  %21399 = vmatpush3.bf16.msra.mxu1 %v23460_v38  ;;  %v23501_v38 = vld [vmem:[#allocation5 + $0x1130] sm:$0xff]  }
 0x256   :  { %v15909_v23 = vadd.f32 %v21076_v17, %v24938_v31  ;;  %v23459_v31 = vld [vmem:[#allocation5 + $0x1028] sm:$0xff]   ;;  %21400 = vmatprep.subr.bf16.mxu1 %v23462_v34  ;;  %v23503_v34 = vld [vmem:[#allocation5 + $0x1178] sm:$0xff]  }
 0x257   :  { %21377 = vmatpush3.bf16.msra.mxu0 %v23459_v31  ;;  %v23500_v31 = vld [vmem:[#allocation5 + $0x11f0] sm:$0xff]  }
 0x258   :  { %v24945_v28 = vadd.f32 %v21098_v20, %v15909_v23  ;;  %21378 = vmatprep.subr.bf16.mxu0 %v23461_v39  ;;  %v23502_v39 = vld [vmem:[#allocation5 + $0x11b0] sm:$0xff]  }
 0x259   :  { %21401 = vmatpush3.bf16.msra.mxu1 %v23464_v42  ;;  %v23505_v42 = vld [vmem:[#allocation5 + $0x1138] sm:$0xff]  }
 0x25a   :  { %21402 = vmatprep.subr.bf16.mxu1 %v23466_v43  ;;  %v23507_v43 = vld [vmem:[#allocation2 + $0x88] ss:$392 sps:$4 sm:$0xff]  }
 0x25b   :  { %21379 = vmatpush3.bf16.msra.mxu0 %v23463_v40  ;;  %v23504_v40 = vld [vmem:[#allocation5 + $0x11f8] sm:$0xff]   ;;  %v1069_v48 = vrot.slane %v23507_v43, %v24852_v37  ;;  %v23550_v43 = vld [vmem:[#allocation2 + $0x3a4] ss:$392 sps:$4 sm:$0xff]  }
 0x25c   :  { %21380 = vmatprep.subr.bf16.mxu0 %v23465_v36  ;;  %v23506_v36 = vld [vmem:[#allocation5 + $0x11b8] sm:$0xff]  }
 0x25d   :  { %21403 = vmatpush3.bf16.msra.mxu1 %v23468_v45  ;;  %v23511_v45 = vld [vmem:[#allocation2 + $0x8c] ss:$392 sps:$4 sm:$0xff]  }
 0x25e   :  { %21432 = vmatprep.subr.bf16.mxu1 %v23476_v55  ;;  %v1076_v49 = vrot.slane %v23511_v45, %v24852_v37  ;;  %v23515_v55 = vld [vmem:[#allocation5 + $0x1200] sm:$0xff]  }
 0x25f   :  { %21381 = vmatpush3.bf16.msra.mxu0 %v23467_v41  ;;  %v23509_v41 = vld [vmem:[#allocation2 + $0x398] ss:$392 sps:$4 sm:$0xff]  }
 0x260   :  { %21410 = vmatprep.subr.bf16.mxu0 %v23475_v52  ;;  %16507 = vmatmul.mubr.bf16.vlgmr.msra.gmra.mrb[64].mxu1 %v2473_v1  ;;  %v1083_v44 = vrot.slane %v23509_v41, %v24852_v37  ;;  %v23514_v52 = vld [vmem:[#allocation5 + $0x12c0] sm:$0xff]   ;;  %v1094_v56 = vcombine.high %v1076_v49, %v1090_v46  ;;  %v1093_v53 = vcombine.low %v1076_v49, %v1090_v46  ;;  %v23520_v1 = vld [vmem:[#allocation5 + $0x1288] sm:$0xff]  }
 0x261   :  { %21433 = vmatpush3.bf16.msra.mxu1 %v23478_v60  ;;  %v23517_v60 = vld [vmem:[#allocation5 + $0x1248] sm:$0xff]   ;;  %v23551_v45 = vld [vmem:[#allocation5 + $0x1340] sm:$0xff]  }
 0x262   :  { %16467 = vmatmul.mubr.bf16.vlgmr.msra.gmra.mrb[64].mxu0 %v2471_v62  ;;  %21434 = vmatprep.subr.bf16.mxu1 %v23480_v2  ;;  %v1092_v50 = vcombine.high %v1069_v48, %v1083_v44  ;;  %v1091_v54 = vcombine.low %v1069_v48, %v1083_v44  ;;  %v2478_v61 = vpack.c.bf16 %v1094_v56, %v1094_v56  ;;  %v23521_v2 = vld [vmem:[#allocation5 + $0x1250] sm:$0xff]   ;;  %v23552_v49 = vld [vmem:[#allocation5 + $0x13c0] sm:$0xff]  }
 0x263   :  { %21411 = vmatpush3.bf16.msra.mxu0 %v23477_v57  ;;  %v23516_v57 = vld [vmem:[#allocation5 + $0x1280] sm:$0xff]   ;;  %v2477_v62 = vpack.c.bf16 %v1093_v53, %v1093_v53  ;;  %v1126_v44 = vrot.slane %v23550_v43, %v24852_v37 }
 0x264   :  { %21412 = vmatprep.subr.bf16.mxu0 %v23479_v63  ;;  %v2476_v58 = vpack.c.bf16 %v1092_v50, %v1092_v50  ;;  %v2475_v59 = vpack.c.bf16 %v1091_v54, %v1091_v54  ;;  %v23518_v63 = vld [vmem:[#allocation5 + $0x12c8] sm:$0xff]   ;;  %16586 = vmatprep.mubr.bf16.mxu1 %v2478_v61  ;;  %v23553_v54 = vld [vmem:[#allocation5 + $0x1300] sm:$0xff]  }
 0x265   :  { %21435 = vmatpush3.bf16.msra.mxu1 %v23482_v4  ;;  %v23523_v4 = vld [vmem:[#allocation5 + $0x1210] sm:$0xff]   ;;  %v23557_v61 = vld [vmem:[#allocation5 + $0x1308] sm:$0xff]   ;;  %v23589_v43 = vld [vmem:[#allocation5 + $0x1440] sm:$0xff]  }
 0x266   :  { %21436 = vmatprep.subr.bf16.mxu1 %v23484_v6  ;;  %16546 = vmatprep.mubr.bf16.mxu0 %v2476_v58  ;;  %v23524_v6 = vld [vmem:[#allocation5 + $0x1290] sm:$0xff]  }
 0x267   :  { %21413 = vmatpush3.bf16.msra.mxu0 %v23481_v3  ;;  %v23522_v3 = vld [vmem:[#allocation5 + $0x12d0] sm:$0xff]  }
 0x268   :  { %21414 = vmatprep.subr.bf16.mxu0 %v23483_v5 }
 0x269   :  { %21437 = vmatpush3.bf16.msra.mxu1 %v23486_v9 }
 0x26a   :  { %21438 = vmatprep.subr.bf16.mxu1 %v23488_v13  ;;  %v23527_v13 = vld [vmem:[#allocation5 + $0x1218] sm:$0xff]  }
 0x26b   :  { %21415 = vmatpush3.bf16.msra.mxu0 %v23485_v7 }
 0x26c   :  { %21416 = vmatprep.subr.bf16.mxu0 %v23487_v11 }
 0x26d   :  { %21439 = vmatpush3.bf16.msra.mxu1 %v23490_v19  ;;  %v23529_v19 = vld [vmem:[#allocation5 + $0x1260] sm:$0xff]  }
 0x26e   :  { %21440 = vmatprep.subr.bf16.mxu1 %v23492_v24  ;;  %v23531_v24 = vld [vmem:[#allocation5 + $0x1220] sm:$0xff]  }
 0x26f   :  { %21417 = vmatpush3.bf16.msra.mxu0 %v23489_v16  ;;  %v23528_v16 = vld [vmem:[#allocation5 + $0x1298] sm:$0xff]  }
 0x270   :  { %21418 = vmatprep.subr.bf16.mxu0 %v23491_v22 }
 0x271   :  { %21441 = vmatpush3.bf16.msra.mxu1 %v23494_v29  ;;  %v23534_v29 = vld [vmem:[#allocation5 + $0x12e8] sm:$0xff]  }
 0x272   :  { %v21118_v8 = vpop.f32.mrb[40].mxu0  ;;  %21442 = vmatprep.subr.bf16.mxu1 %v23496_v32  ;;  %v23537_v32 = vld [vmem:[#allocation5 + $0x1270] sm:$0xff]  }
 0x273   :  { %v21140_v10 = vpop.f32.mrb[40].mxu1  ;;  %v21119_v12 = vpop.f32.mrb[41].mxu0  ;;  %21419 = vmatpush3.bf16.msra.mxu0 %v23493_v27  ;;  %v23533_v27 = vld [vmem:[#allocation5 + $0x1268] sm:$0xff]  }
 0x274   :  { %v21120_v14 = vadd.f32 %v21119_v12, %v21118_v8  ;;  %v21141_v15 = vpop.f32.mrb[41].mxu1  ;;  %v21121_v18 = vpop.f32.mrb[42].mxu0  ;;  %21420 = vmatprep.subr.bf16.mxu0 %v23495_v30  ;;  %v23525_v8 = vld [vmem:[#allocation5 + $0x1258] sm:$0xff]   ;;  %v23536_v30 = vld [vmem:[#allocation5 + $0x12a8] sm:$0xff]  }
 0x275   :  { %v21142_v17 = vadd.f32 %v21141_v15, %v21140_v10  ;;  %v21143_v21 = vpop.f32.mrb[42].mxu1  ;;  %v21122_v23 = vpop.f32.mrb[43].mxu0  ;;  %21443 = vmatpush3.bf16.msra.mxu1 %v23498_v33  ;;  %v23526_v10 = vld [vmem:[#allocation5 + $0x12d8] sm:$0xff]   ;;  %v23539_v33 = vld [vmem:[#allocation5 + $0x1230] sm:$0xff]  }
 0x276   :  { %v15989_v20 = vadd.f32 %v21120_v14, %v24945_v28  ;;  %v21144_v26 = vpop.f32.mrb[43].mxu1  ;;  %v23497_v28 = vld [vmem:[#allocation5 + $0x1128] sm:$0xff]   ;;  %21444 = vmatprep.subr.bf16.mxu1 %v23500_v31  ;;  %v23530_v21 = vld [vmem:[#allocation5 + $0x12e0] sm:$0xff]   ;;  %v23541_v31 = vld [vmem:[#allocation5 + $0x1278] sm:$0xff]  }
 0x277   :  { %21421 = vmatpush3.bf16.msra.mxu0 %v23497_v28  ;;  %v23532_v26 = vld [vmem:[#allocation5 + $0x12a0] sm:$0xff]   ;;  %v23538_v28 = vld [vmem:[#allocation5 + $0x12f0] sm:$0xff]  }
 0x278   :  { %v24952_v25 = vadd.f32 %v21142_v17, %v15989_v20  ;;  %21422 = vmatprep.subr.bf16.mxu0 %v23499_v35  ;;  %v23540_v35 = vld [vmem:[#allocation5 + $0x12b0] sm:$0xff]  }
 0x279   :  { %21445 = vmatpush3.bf16.msra.mxu1 %v23502_v39  ;;  %v23543_v39 = vld [vmem:[#allocation5 + $0x1238] sm:$0xff]  }
 0x27a   :  { %21446 = vmatprep.subr.bf16.mxu1 %v23504_v40  ;;  %v23545_v40 = vld [vmem:[#allocation2 + $0x90] ss:$392 sps:$4 sm:$0xff]  }
 0x27b   :  { %21423 = vmatpush3.bf16.msra.mxu0 %v23501_v38  ;;  %v23542_v38 = vld [vmem:[#allocation5 + $0x12f8] sm:$0xff]   ;;  %v1105_v41 = vrot.slane %v23545_v40, %v24852_v37  ;;  %v23588_v40 = vld [vmem:[#allocation2 + $0x3ac] ss:$392 sps:$4 sm:$0xff]  }
 0x27c   :  { %21424 = vmatprep.subr.bf16.mxu0 %v23503_v34  ;;  %v23544_v34 = vld [vmem:[#allocation5 + $0x12b8] sm:$0xff]  }
 0x27d   :  { %21447 = vmatpush3.bf16.msra.mxu1 %v23506_v36  ;;  %v23549_v36 = vld [vmem:[#allocation2 + $0x94] ss:$392 sps:$4 sm:$0xff]  }
 0x27e   :  { %21476 = vmatprep.subr.bf16.mxu1 %v23514_v52  ;;  %v1112_v48 = vrot.slane %v23549_v36, %v24852_v37 }
 0x27f   :  { %21425 = vmatpush3.bf16.msra.mxu0 %v23505_v42  ;;  %v23547_v42 = vld [vmem:[#allocation2 + $0x3a0] ss:$392 sps:$4 sm:$0xff]  }
 0x280   :  { %21454 = vmatprep.subr.bf16.mxu0 %v23513_v51  ;;  %16587 = vmatmul.mubr.bf16.vlgmr.msra.gmra.mrb[68].mxu1 %v2477_v62  ;;  %v1119_v47 = vrot.slane %v23547_v42, %v24852_v37  ;;  %v1130_v46 = vcombine.high %v1112_v48, %v1126_v44  ;;  %v1129_v50 = vcombine.low %v1112_v48, %v1126_v44  ;;  %v23558_v62 = vld [vmem:[#allocation5 + $0x1388] sm:$0xff]  }
 0x281   :  { %21477 = vmatpush3.bf16.msra.mxu1 %v23516_v57 }
 0x282   :  { %16547 = vmatmul.mubr.bf16.vlgmr.msra.gmra.mrb[68].mxu0 %v2475_v59  ;;  %21478 = vmatprep.subr.bf16.mxu1 %v23518_v63  ;;  %v1128_v51 = vcombine.high %v1105_v41, %v1119_v47  ;;  %v1127_v52 = vcombine.low %v1105_v41, %v1119_v47  ;;  %v2482_v53 = vpack.c.bf16 %v1130_v46, %v1130_v46  ;;  %v23555_v59 = vld [vmem:[#allocation5 + $0x1348] sm:$0xff]   ;;  %v23559_v63 = vld [vmem:[#allocation5 + $0x1350] sm:$0xff]   ;;  %v23590_v47 = vld [vmem:[#allocation5 + $0x14c0] sm:$0xff]  }
 0x283   :  { %21455 = vmatpush3.bf16.msra.mxu0 %v23515_v55  ;;  %v23554_v55 = vld [vmem:[#allocation5 + $0x1380] sm:$0xff]   ;;  %v2481_v58 = vpack.c.bf16 %v1129_v50, %v1129_v50 }
 0x284   :  { %21456 = vmatprep.subr.bf16.mxu0 %v23517_v60  ;;  %v2480_v56 = vpack.c.bf16 %v1128_v51, %v1128_v51  ;;  %v2479_v57 = vpack.c.bf16 %v1127_v52, %v1127_v52  ;;  %v23556_v60 = vld [vmem:[#allocation5 + $0x13c8] sm:$0xff]   ;;  %16666 = vmatprep.mubr.bf16.mxu1 %v2482_v53  ;;  %v23592_v52 = vld [vmem:[#allocation5 + $0x1480] sm:$0xff]  }
 0x285   :  { %21479 = vmatpush3.bf16.msra.mxu1 %v23520_v1  ;;  %v23561_v1 = vld [vmem:[#allocation5 + $0x1310] sm:$0xff]  }
 0x286   :  { %21480 = vmatprep.subr.bf16.mxu1 %v23522_v3  ;;  %16626 = vmatprep.mubr.bf16.mxu0 %v2480_v56  ;;  %v23562_v3 = vld [vmem:[#allocation5 + $0x1390] sm:$0xff]  }
 0x287   :  { %21457 = vmatpush3.bf16.msra.mxu0 %v23519_v0  ;;  %v23560_v0 = vld [vmem:[#allocation5 + $0x13d0] sm:$0xff]  }
 0x288   :  { %21458 = vmatprep.subr.bf16.mxu0 %v23521_v2 }
 0x289   :  { %21481 = vmatpush3.bf16.msra.mxu1 %v23524_v6 }
 0x28a   :  { %21482 = vmatprep.subr.bf16.mxu1 %v23526_v10  ;;  %v23565_v10 = vld [vmem:[#allocation5 + $0x1318] sm:$0xff]  }
 0x28b   :  { %21459 = vmatpush3.bf16.msra.mxu0 %v23523_v4 }
 0x28c   :  { %21460 = vmatprep.subr.bf16.mxu0 %v23525_v8 }
 0x28d   :  { %21483 = vmatpush3.bf16.msra.mxu1 %v23528_v16  ;;  %v23567_v16 = vld [vmem:[#allocation5 + $0x1360] sm:$0xff]  }
 0x28e   :  { %21484 = vmatprep.subr.bf16.mxu1 %v23530_v21  ;;  %v23569_v21 = vld [vmem:[#allocation5 + $0x1320] sm:$0xff]  }
 0x28f   :  { %21461 = vmatpush3.bf16.msra.mxu0 %v23527_v13  ;;  %v23566_v13 = vld [vmem:[#allocation5 + $0x1398] sm:$0xff]  }
 0x290   :  { %21462 = vmatprep.subr.bf16.mxu0 %v23529_v19 }
 0x291   :  { %21485 = vmatpush3.bf16.msra.mxu1 %v23532_v26  ;;  %v23572_v26 = vld [vmem:[#allocation5 + $0x13e8] sm:$0xff]  }
 0x292   :  { %v21162_v5 = vpop.f32.mrb[44].mxu0  ;;  %21486 = vmatprep.subr.bf16.mxu1 %v23534_v29  ;;  %v23575_v29 = vld [vmem:[#allocation5 + $0x1370] sm:$0xff]  }
 0x293   :  { %v21184_v7 = vpop.f32.mrb[44].mxu1  ;;  %v21163_v9 = vpop.f32.mrb[45].mxu0  ;;  %21463 = vmatpush3.bf16.msra.mxu0 %v23531_v24  ;;  %v23571_v24 = vld [vmem:[#allocation5 + $0x1368] sm:$0xff]  }
 0x294   :  { %v21164_v11 = vadd.f32 %v21163_v9, %v21162_v5  ;;  %v21185_v12 = vpop.f32.mrb[45].mxu1  ;;  %v21165_v15 = vpop.f32.mrb[46].mxu0  ;;  %21464 = vmatprep.subr.bf16.mxu0 %v23533_v27  ;;  %v23563_v5 = vld [vmem:[#allocation5 + $0x1358] sm:$0xff]   ;;  %v23574_v27 = vld [vmem:[#allocation5 + $0x13a8] sm:$0xff]  }
 0x295   :  { %v21186_v14 = vadd.f32 %v21185_v12, %v21184_v7  ;;  %v21187_v18 = vpop.f32.mrb[46].mxu1  ;;  %v21166_v20 = vpop.f32.mrb[47].mxu0  ;;  %21487 = vmatpush3.bf16.msra.mxu1 %v23536_v30  ;;  %v23564_v7 = vld [vmem:[#allocation5 + $0x13d8] sm:$0xff]   ;;  %v23577_v30 = vld [vmem:[#allocation5 + $0x1330] sm:$0xff]  }
 0x296   :  { %v16069_v17 = vadd.f32 %v21164_v11, %v24952_v25  ;;  %v21188_v23 = vpop.f32.mrb[47].mxu1  ;;  %v23535_v25 = vld [vmem:[#allocation5 + $0x1228] sm:$0xff]   ;;  %21488 = vmatprep.subr.bf16.mxu1 %v23538_v28  ;;  %v23568_v18 = vld [vmem:[#allocation5 + $0x13e0] sm:$0xff]   ;;  %v23579_v28 = vld [vmem:[#allocation5 + $0x1378] sm:$0xff]  }
 0x297   :  { %21465 = vmatpush3.bf16.msra.mxu0 %v23535_v25  ;;  %v23570_v23 = vld [vmem:[#allocation5 + $0x13a0] sm:$0xff]   ;;  %v23576_v25 = vld [vmem:[#allocation5 + $0x13f0] sm:$0xff]  }
 0x298   :  { %v24959_v22 = vadd.f32 %v21186_v14, %v16069_v17  ;;  %21466 = vmatprep.subr.bf16.mxu0 %v23537_v32  ;;  %v23578_v32 = vld [vmem:[#allocation5 + $0x13b0] sm:$0xff]  }
 0x299   :  { %21489 = vmatpush3.bf16.msra.mxu1 %v23540_v35  ;;  %v23581_v35 = vld [vmem:[#allocation5 + $0x1338] sm:$0xff]  }
 0x29a   :  { %21490 = vmatprep.subr.bf16.mxu1 %v23542_v38  ;;  %v23583_v38 = vld [vmem:[#allocation2 + $0x98] ss:$392 sps:$4 sm:$0xff]  }
 0x29b   :  { %21467 = vmatpush3.bf16.msra.mxu0 %v23539_v33  ;;  %v23580_v33 = vld [vmem:[#allocation5 + $0x13f8] sm:$0xff]   ;;  %v1141_v42 = vrot.slane %v23583_v38, %v24852_v37 }
 0x29c   :  { %21468 = vmatprep.subr.bf16.mxu0 %v23541_v31  ;;  %v23582_v31 = vld [vmem:[#allocation5 + $0x13b8] sm:$0xff]  }
 0x29d   :  { %21491 = vmatpush3.bf16.msra.mxu1 %v23544_v34  ;;  %v23587_v34 = vld [vmem:[#allocation2 + $0x9c] ss:$392 sps:$4 sm:$0xff]  }
 0x29e   :  { %21520 = vmatprep.subr.bf16.mxu1 %v23552_v49  ;;  %v1148_v41 = vrot.slane %v23587_v34, %v24852_v37  ;;  %v23591_v49 = vld [vmem:[#allocation5 + $0x1400] sm:$0xff]   ;;  %v23626_v38 = vld [vmem:[#allocation2 + $0x3b4] ss:$392 sps:$4 sm:$0xff]  }
 0x29f   :  { %21469 = vmatpush3.bf16.msra.mxu0 %v23543_v39  ;;  %v23585_v39 = vld [vmem:[#allocation2 + $0x3a8] ss:$392 sps:$4 sm:$0xff]  }
 0x2a0   :  { %21498 = vmatprep.subr.bf16.mxu0 %v23551_v45  ;;  %16667 = vmatmul.mubr.bf16.vlgmr.msra.gmra.mrb[72].mxu1 %v2481_v58  ;;  %v1155_v36 = vrot.slane %v23585_v39, %v24852_v37  ;;  %v1162_v45 = vrot.slane %v23588_v40, %v24852_v37  ;;  %v23595_v58 = vld [vmem:[#allocation5 + $0x1408] sm:$0xff]  }
 0x2a1   :  { %21521 = vmatpush3.bf16.msra.mxu1 %v23554_v55  ;;  %v23593_v55 = vld [vmem:[#allocation5 + $0x1448] sm:$0xff]  }
 0x2a2   :  { %16627 = vmatmul.mubr.bf16.vlgmr.msra.gmra.mrb[72].mxu0 %v2479_v57  ;;  %21522 = vmatprep.subr.bf16.mxu1 %v23556_v60  ;;  %v1164_v48 = vcombine.high %v1141_v42, %v1155_v36  ;;  %v1163_v44 = vcombine.low %v1141_v42, %v1155_v36  ;;  %v1166_v51 = vcombine.high %v1148_v41, %v1162_v45  ;;  %v23594_v57 = vld [vmem:[#allocation5 + $0x14c8] sm:$0xff]   ;;  %v23597_v60 = vld [vmem:[#allocation5 + $0x1450] sm:$0xff]   ;;  %v23627_v42 = vld [vmem:[#allocation5 + $0x1540] sm:$0xff]  }
 0x2a3   :  { %21499 = vmatpush3.bf16.msra.mxu0 %v23553_v54  ;;  %v1165_v46 = vcombine.low %v1148_v41, %v1162_v45  ;;  %v1198_v36 = vrot.slane %v23626_v38, %v24852_v37 }
 0x2a4   :  { %21500 = vmatprep.subr.bf16.mxu0 %v23555_v59  ;;  %v2484_v50 = vpack.c.bf16 %v1164_v48, %v1164_v48  ;;  %v2483_v54 = vpack.c.bf16 %v1163_v44, %v1163_v44  ;;  %v2486_v56 = vpack.c.bf16 %v1166_v51, %v1166_v51  ;;  %v23596_v59 = vld [vmem:[#allocation5 + $0x1488] sm:$0xff]  }
 0x2a5   :  { %21523 = vmatpush3.bf16.msra.mxu1 %v23558_v62  ;;  %v2485_v53 = vpack.c.bf16 %v1165_v46, %v1165_v46  ;;  %v23599_v62 = vld [vmem:[#allocation5 + $0x1410] sm:$0xff]  }
 0x2a6   :  { %21524 = vmatprep.subr.bf16.mxu1 %v23560_v0  ;;  %16706 = vmatprep.mubr.bf16.mxu0 %v2484_v50  ;;  %v23600_v0 = vld [vmem:[#allocation5 + $0x1490] sm:$0xff]  }
 0x2a7   :  { %21501 = vmatpush3.bf16.msra.mxu0 %v23557_v61  ;;  %16746 = vmatprep.mubr.bf16.mxu1 %v2486_v56  ;;  %v23598_v61 = vld [vmem:[#allocation5 + $0x14d0] sm:$0xff]   ;;  %v23633_v56 = vld [vmem:[#allocation5 + $0x1508] sm:$0xff]  }
 0x2a8   :  { %21502 = vmatprep.subr.bf16.mxu0 %v23559_v63 }
 0x2a9   :  { %21525 = vmatpush3.bf16.msra.mxu1 %v23562_v3 }
 0x2aa   :  { %21526 = vmatprep.subr.bf16.mxu1 %v23564_v7  ;;  %v23603_v7 = vld [vmem:[#allocation5 + $0x1418] sm:$0xff]  }
 0x2ab   :  { %21503 = vmatpush3.bf16.msra.mxu0 %v23561_v1 }
 0x2ac   :  { %21504 = vmatprep.subr.bf16.mxu0 %v23563_v5 }
 0x2ad   :  { %21527 = vmatpush3.bf16.msra.mxu1 %v23566_v13  ;;  %v23605_v13 = vld [vmem:[#allocation5 + $0x1460] sm:$0xff]  }
 0x2ae   :  { %21528 = vmatprep.subr.bf16.mxu1 %v23568_v18  ;;  %v23607_v18 = vld [vmem:[#allocation5 + $0x1420] sm:$0xff]  }
 0x2af   :  { %21505 = vmatpush3.bf16.msra.mxu0 %v23565_v10  ;;  %v23604_v10 = vld [vmem:[#allocation5 + $0x1498] sm:$0xff]  }
 0x2b0   :  { %21506 = vmatprep.subr.bf16.mxu0 %v23567_v16 }
 0x2b1   :  { %21529 = vmatpush3.bf16.msra.mxu1 %v23570_v23  ;;  %v23610_v23 = vld [vmem:[#allocation5 + $0x14e8] sm:$0xff]  }
 0x2b2   :  { %v21206_v2 = vpop.f32.mrb[48].mxu0  ;;  %21530 = vmatprep.subr.bf16.mxu1 %v23572_v26  ;;  %v23613_v26 = vld [vmem:[#allocation5 + $0x1470] sm:$0xff]  }
 0x2b3   :  { %v21228_v4 = vpop.f32.mrb[48].mxu1  ;;  %v21207_v6 = vpop.f32.mrb[49].mxu0  ;;  %21507 = vmatpush3.bf16.msra.mxu0 %v23569_v21  ;;  %v23609_v21 = vld [vmem:[#allocation5 + $0x1468] sm:$0xff]  }
 0x2b4   :  { %v21208_v8 = vadd.f32 %v21207_v6, %v21206_v2  ;;  %v21229_v9 = vpop.f32.mrb[49].mxu1  ;;  %v21209_v12 = vpop.f32.mrb[50].mxu0  ;;  %21508 = vmatprep.subr.bf16.mxu0 %v23571_v24  ;;  %v23601_v2 = vld [vmem:[#allocation5 + $0x1458] sm:$0xff]   ;;  %v23612_v24 = vld [vmem:[#allocation5 + $0x14a8] sm:$0xff]  }
 0x2b5   :  { %v21230_v11 = vadd.f32 %v21229_v9, %v21228_v4  ;;  %v21231_v15 = vpop.f32.mrb[50].mxu1  ;;  %v21210_v17 = vpop.f32.mrb[51].mxu0  ;;  %21531 = vmatpush3.bf16.msra.mxu1 %v23574_v27  ;;  %v23602_v4 = vld [vmem:[#allocation5 + $0x14d8] sm:$0xff]   ;;  %v23615_v27 = vld [vmem:[#allocation5 + $0x1430] sm:$0xff]  }
 0x2b6   :  { %v16149_v14 = vadd.f32 %v21208_v8, %v24959_v22  ;;  %v21232_v20 = vpop.f32.mrb[51].mxu1  ;;  %v23573_v22 = vld [vmem:[#allocation5 + $0x1328] sm:$0xff]   ;;  %21532 = vmatprep.subr.bf16.mxu1 %v23576_v25  ;;  %v23606_v15 = vld [vmem:[#allocation5 + $0x14e0] sm:$0xff]   ;;  %v23617_v25 = vld [vmem:[#allocation5 + $0x1478] sm:$0xff]  }
 0x2b7   :  { %21509 = vmatpush3.bf16.msra.mxu0 %v23573_v22  ;;  %v23608_v20 = vld [vmem:[#allocation5 + $0x14a0] sm:$0xff]   ;;  %v23614_v22 = vld [vmem:[#allocation5 + $0x14f0] sm:$0xff]  }
 0x2b8   :  { %v24966_v19 = vadd.f32 %v21230_v11, %v16149_v14  ;;  %21510 = vmatprep.subr.bf16.mxu0 %v23575_v29  ;;  %v23616_v29 = vld [vmem:[#allocation5 + $0x14b0] sm:$0xff]  }
 0x2b9   :  { %21533 = vmatpush3.bf16.msra.mxu1 %v23578_v32  ;;  %v23619_v32 = vld [vmem:[#allocation5 + $0x1438] sm:$0xff]  }
 0x2ba   :  { %21534 = vmatprep.subr.bf16.mxu1 %v23580_v33  ;;  %v23621_v33 = vld [vmem:[#allocation2 + $0xa0] ss:$392 sps:$4 sm:$0xff]  }
 0x2bb   :  { %21511 = vmatpush3.bf16.msra.mxu0 %v23577_v30  ;;  %v23618_v30 = vld [vmem:[#allocation5 + $0x14f8] sm:$0xff]   ;;  %v1177_v39 = vrot.slane %v23621_v33, %v24852_v37 }
 0x2bc   :  { %21512 = vmatprep.subr.bf16.mxu0 %v23579_v28  ;;  %v23620_v28 = vld [vmem:[#allocation5 + $0x14b8] sm:$0xff]  }
 0x2bd   :  { %21535 = vmatpush3.bf16.msra.mxu1 %v23582_v31  ;;  %v23625_v31 = vld [vmem:[#allocation2 + $0xa4] ss:$392 sps:$4 sm:$0xff]  }
 0x2be   :  { %21564 = vmatprep.subr.bf16.mxu1 %v23590_v47  ;;  %v1184_v40 = vrot.slane %v23625_v31, %v24852_v37  ;;  %v23629_v47 = vld [vmem:[#allocation5 + $0x1500] sm:$0xff]  }
 0x2bf   :  { %21513 = vmatpush3.bf16.msra.mxu0 %v23581_v35  ;;  %v23623_v35 = vld [vmem:[#allocation2 + $0x3b0] ss:$392 sps:$4 sm:$0xff]   ;;  %v23664_v33 = vld [vmem:[#allocation2 + $0x3bc] ss:$392 sps:$4 sm:$0xff]  }
 0x2c0   :  { %21542 = vmatprep.subr.bf16.mxu0 %v23589_v43  ;;  %16747 = vmatmul.mubr.bf16.vlgmr.msra.gmra.mrb[76].mxu1 %v2485_v53  ;;  %v1191_v34 = vrot.slane %v23623_v35, %v24852_v37  ;;  %v23628_v43 = vld [vmem:[#allocation5 + $0x15c0] sm:$0xff]   ;;  %v1202_v48 = vcombine.high %v1184_v40, %v1198_v36  ;;  %v1201_v44 = vcombine.low %v1184_v40, %v1198_v36  ;;  %v23634_v53 = vld [vmem:[#allocation5 + $0x1588] sm:$0xff]  }
 0x2c1   :  { %21565 = vmatpush3.bf16.msra.mxu1 %v23592_v52  ;;  %v23631_v52 = vld [vmem:[#allocation5 + $0x1548] sm:$0xff]   ;;  %v23665_v31 = vld [vmem:[#allocation5 + $0x1640] sm:$0xff]  }
 0x2c2   :  { %16707 = vmatmul.mubr.bf16.vlgmr.msra.gmra.mrb[76].mxu0 %v2483_v54  ;;  %21566 = vmatprep.subr.bf16.mxu1 %v23594_v57  ;;  %v1200_v41 = vcombine.high %v1177_v39, %v1191_v34  ;;  %v1199_v45 = vcombine.low %v1177_v39, %v1191_v34  ;;  %v2490_v50 = vpack.c.bf16 %v1202_v48, %v1202_v48  ;;  %v23635_v57 = vld [vmem:[#allocation5 + $0x1550] sm:$0xff]   ;;  %v23666_v40 = vld [vmem:[#allocation5 + $0x16c0] sm:$0xff]  }
 0x2c3   :  { %21543 = vmatpush3.bf16.msra.mxu0 %v23591_v49  ;;  %v23630_v49 = vld [vmem:[#allocation5 + $0x1580] sm:$0xff]   ;;  %v2489_v54 = vpack.c.bf16 %v1201_v44, %v1201_v44  ;;  %v1234_v34 = vrot.slane %v23664_v33, %v24852_v37 }
 0x2c4   :  { %21544 = vmatprep.subr.bf16.mxu0 %v23593_v55  ;;  %v2488_v51 = vpack.c.bf16 %v1200_v41, %v1200_v41  ;;  %v2487_v46 = vpack.c.bf16 %v1199_v45, %v1199_v45  ;;  %v23632_v55 = vld [vmem:[#allocation5 + $0x15c8] sm:$0xff]   ;;  %16826 = vmatprep.mubr.bf16.mxu1 %v2490_v50  ;;  %v23667_v45 = vld [vmem:[#allocation5 + $0x1600] sm:$0xff]  }
 0x2c5   :  { %21567 = vmatpush3.bf16.msra.mxu1 %v23596_v59  ;;  %v23637_v59 = vld [vmem:[#allocation5 + $0x1510] sm:$0xff]   ;;  %v23671_v50 = vld [vmem:[#allocation5 + $0x1608] sm:$0xff]   ;;  %v23703_v33 = vld [vmem:[#allocation5 + $0x1740] sm:$0xff]  }
 0x2c6   :  { %21568 = vmatprep.subr.bf16.mxu1 %v23598_v61  ;;  %16786 = vmatprep.mubr.bf16.mxu0 %v2488_v51  ;;  %v23638_v61 = vld [vmem:[#allocation5 + $0x1590] sm:$0xff]  }
 0x2c7   :  { %21545 = vmatpush3.bf16.msra.mxu0 %v23595_v58  ;;  %v23636_v58 = vld [vmem:[#allocation5 + $0x15d0] sm:$0xff]  }
 0x2c8   :  { %21546 = vmatprep.subr.bf16.mxu0 %v23597_v60 }
 0x2c9   :  { %21569 = vmatpush3.bf16.msra.mxu1 %v23600_v0 }
 0x2ca   :  { %21570 = vmatprep.subr.bf16.mxu1 %v23602_v4  ;;  %v23641_v4 = vld [vmem:[#allocation5 + $0x1518] sm:$0xff]  }
 0x2cb   :  { %21547 = vmatpush3.bf16.msra.mxu0 %v23599_v62 }
 0x2cc   :  { %21548 = vmatprep.subr.bf16.mxu0 %v23601_v2 }
 0x2cd   :  { %21571 = vmatpush3.bf16.msra.mxu1 %v23604_v10  ;;  %v23643_v10 = vld [vmem:[#allocation5 + $0x1560] sm:$0xff]  }
 0x2ce   :  { %21572 = vmatprep.subr.bf16.mxu1 %v23606_v15  ;;  %v23645_v15 = vld [vmem:[#allocation5 + $0x1520] sm:$0xff]  }
 0x2cf   :  { %21549 = vmatpush3.bf16.msra.mxu0 %v23603_v7  ;;  %v23642_v7 = vld [vmem:[#allocation5 + $0x1598] sm:$0xff]  }
 0x2d0   :  { %21550 = vmatprep.subr.bf16.mxu0 %v23605_v13 }
 0x2d1   :  { %21573 = vmatpush3.bf16.msra.mxu1 %v23608_v20  ;;  %v23648_v20 = vld [vmem:[#allocation5 + $0x15e8] sm:$0xff]  }
 0x2d2   :  { %v21250_v63 = vpop.f32.mrb[52].mxu0  ;;  %21574 = vmatprep.subr.bf16.mxu1 %v23610_v23  ;;  %v23651_v23 = vld [vmem:[#allocation5 + $0x1570] sm:$0xff]  }
 0x2d3   :  { %v21272_v1 = vpop.f32.mrb[52].mxu1  ;;  %v21251_v3 = vpop.f32.mrb[53].mxu0  ;;  %21551 = vmatpush3.bf16.msra.mxu0 %v23607_v18  ;;  %v23647_v18 = vld [vmem:[#allocation5 + $0x1568] sm:$0xff]  }
 0x2d4   :  { %v21252_v5 = vadd.f32 %v21251_v3, %v21250_v63  ;;  %v21273_v6 = vpop.f32.mrb[53].mxu1  ;;  %v21253_v9 = vpop.f32.mrb[54].mxu0  ;;  %21552 = vmatprep.subr.bf16.mxu0 %v23609_v21  ;;  %v23639_v63 = vld [vmem:[#allocation5 + $0x1558] sm:$0xff]   ;;  %v23650_v21 = vld [vmem:[#allocation5 + $0x15a8] sm:$0xff]  }
 0x2d5   :  { %v21274_v8 = vadd.f32 %v21273_v6, %v21272_v1  ;;  %v21275_v12 = vpop.f32.mrb[54].mxu1  ;;  %v21254_v14 = vpop.f32.mrb[55].mxu0  ;;  %21575 = vmatpush3.bf16.msra.mxu1 %v23612_v24  ;;  %v23640_v1 = vld [vmem:[#allocation5 + $0x15d8] sm:$0xff]   ;;  %v23653_v24 = vld [vmem:[#allocation5 + $0x1530] sm:$0xff]  }
 0x2d6   :  { %v16229_v11 = vadd.f32 %v21252_v5, %v24966_v19  ;;  %v21276_v17 = vpop.f32.mrb[55].mxu1  ;;  %v23611_v19 = vld [vmem:[#allocation5 + $0x1428] sm:$0xff]   ;;  %21576 = vmatprep.subr.bf16.mxu1 %v23614_v22  ;;  %v23644_v12 = vld [vmem:[#allocation5 + $0x15e0] sm:$0xff]   ;;  %v23655_v22 = vld [vmem:[#allocation5 + $0x1578] sm:$0xff]  }
 0x2d7   :  { %21553 = vmatpush3.bf16.msra.mxu0 %v23611_v19  ;;  %v23646_v17 = vld [vmem:[#allocation5 + $0x15a0] sm:$0xff]   ;;  %v23652_v19 = vld [vmem:[#allocation5 + $0x15f0] sm:$0xff]  }
 0x2d8   :  { %v24973_v16 = vadd.f32 %v21274_v8, %v16229_v11  ;;  %21554 = vmatprep.subr.bf16.mxu0 %v23613_v26  ;;  %v23654_v26 = vld [vmem:[#allocation5 + $0x15b0] sm:$0xff]  }
 0x2d9   :  { %21577 = vmatpush3.bf16.msra.mxu1 %v23616_v29  ;;  %v23657_v29 = vld [vmem:[#allocation5 + $0x1538] sm:$0xff]  }
 0x2da   :  { %21578 = vmatprep.subr.bf16.mxu1 %v23618_v30  ;;  %v23659_v30 = vld [vmem:[#allocation2 + $0xa8] ss:$392 sps:$4 sm:$0xff]  }
 0x2db   :  { %21555 = vmatpush3.bf16.msra.mxu0 %v23615_v27  ;;  %v23656_v27 = vld [vmem:[#allocation5 + $0x15f8] sm:$0xff]   ;;  %v1213_v35 = vrot.slane %v23659_v30, %v24852_v37  ;;  %v23702_v30 = vld [vmem:[#allocation2 + $0x3c4] ss:$392 sps:$4 sm:$0xff]  }
 0x2dc   :  { %21556 = vmatprep.subr.bf16.mxu0 %v23617_v25  ;;  %v23658_v25 = vld [vmem:[#allocation5 + $0x15b8] sm:$0xff]  }
 0x2dd   :  { %21579 = vmatpush3.bf16.msra.mxu1 %v23620_v28  ;;  %v23663_v28 = vld [vmem:[#allocation2 + $0xac] ss:$392 sps:$4 sm:$0xff]  }
 0x2de   :  { %21608 = vmatprep.subr.bf16.mxu1 %v23628_v43  ;;  %v1220_v39 = vrot.slane %v23663_v28, %v24852_v37 }
 0x2df   :  { %21557 = vmatpush3.bf16.msra.mxu0 %v23619_v32  ;;  %v23661_v32 = vld [vmem:[#allocation2 + $0x3b8] ss:$392 sps:$4 sm:$0xff]  }
 0x2e0   :  { %21586 = vmatprep.subr.bf16.mxu0 %v23627_v42  ;;  %16827 = vmatmul.mubr.bf16.vlgmr.msra.gmra.mrb[80].mxu1 %v2489_v54  ;;  %v1227_v38 = vrot.slane %v23661_v32, %v24852_v37  ;;  %v1238_v36 = vcombine.high %v1220_v39, %v1234_v34  ;;  %v1237_v41 = vcombine.low %v1220_v39, %v1234_v34  ;;  %v23672_v54 = vld [vmem:[#allocation5 + $0x1688] sm:$0xff]  }
 0x2e1   :  { %21609 = vmatpush3.bf16.msra.mxu1 %v23630_v49 }
 0x2e2   :  { %16787 = vmatmul.mubr.bf16.vlgmr.msra.gmra.mrb[80].mxu0 %v2487_v46  ;;  %21610 = vmatprep.subr.bf16.mxu1 %v23632_v55  ;;  %v1236_v42 = vcombine.high %v1213_v35, %v1227_v38  ;;  %v1235_v43 = vcombine.low %v1213_v35, %v1227_v38  ;;  %v2494_v44 = vpack.c.bf16 %v1238_v36, %v1238_v36  ;;  %v23669_v46 = vld [vmem:[#allocation5 + $0x1648] sm:$0xff]   ;;  %v23673_v55 = vld [vmem:[#allocation5 + $0x1650] sm:$0xff]   ;;  %v23704_v38 = vld [vmem:[#allocation5 + $0x17c0] sm:$0xff]  }
 0x2e3   :  { %21587 = vmatpush3.bf16.msra.mxu0 %v23629_v47  ;;  %v23668_v47 = vld [vmem:[#allocation5 + $0x1680] sm:$0xff]   ;;  %v2493_v51 = vpack.c.bf16 %v1237_v41, %v1237_v41 }
 0x2e4   :  { %21588 = vmatprep.subr.bf16.mxu0 %v23631_v52  ;;  %v2492_v48 = vpack.c.bf16 %v1236_v42, %v1236_v42  ;;  %v2491_v49 = vpack.c.bf16 %v1235_v43, %v1235_v43  ;;  %v23670_v52 = vld [vmem:[#allocation5 + $0x16c8] sm:$0xff]   ;;  %16906 = vmatprep.mubr.bf16.mxu1 %v2494_v44  ;;  %v23706_v43 = vld [vmem:[#allocation5 + $0x1780] sm:$0xff]  }
 0x2e5   :  { %21611 = vmatpush3.bf16.msra.mxu1 %v23634_v53  ;;  %v23675_v53 = vld [vmem:[#allocation5 + $0x1610] sm:$0xff]  }
 0x2e6   :  { %21612 = vmatprep.subr.bf16.mxu1 %v23636_v58  ;;  %16866 = vmatprep.mubr.bf16.mxu0 %v2492_v48  ;;  %v23676_v58 = vld [vmem:[#allocation5 + $0x1690] sm:$0xff]  }
 0x2e7   :  { %21589 = vmatpush3.bf16.msra.mxu0 %v23633_v56  ;;  %v23674_v56 = vld [vmem:[#allocation5 + $0x16d0] sm:$0xff]  }
 0x2e8   :  { %21590 = vmatprep.subr.bf16.mxu0 %v23635_v57 }
 0x2e9   :  { %21613 = vmatpush3.bf16.msra.mxu1 %v23638_v61 }
 0x2ea   :  { %21614 = vmatprep.subr.bf16.mxu1 %v23640_v1  ;;  %v23679_v1 = vld [vmem:[#allocation5 + $0x1618] sm:$0xff]  }
 0x2eb   :  { %21591 = vmatpush3.bf16.msra.mxu0 %v23637_v59 }
 0x2ec   :  { %21592 = vmatprep.subr.bf16.mxu0 %v23639_v63 }
 0x2ed   :  { %21615 = vmatpush3.bf16.msra.mxu1 %v23642_v7  ;;  %v23681_v7 = vld [vmem:[#allocation5 + $0x1660] sm:$0xff]  }
 0x2ee   :  { %21616 = vmatprep.subr.bf16.mxu1 %v23644_v12  ;;  %v23683_v12 = vld [vmem:[#allocation5 + $0x1620] sm:$0xff]  }
 0x2ef   :  { %21593 = vmatpush3.bf16.msra.mxu0 %v23641_v4  ;;  %v23680_v4 = vld [vmem:[#allocation5 + $0x1698] sm:$0xff]  }
 0x2f0   :  { %21594 = vmatprep.subr.bf16.mxu0 %v23643_v10 }
 0x2f1   :  { %21617 = vmatpush3.bf16.msra.mxu1 %v23646_v17  ;;  %v23686_v17 = vld [vmem:[#allocation5 + $0x16e8] sm:$0xff]  }
 0x2f2   :  { %v21294_v60 = vpop.f32.mrb[56].mxu0  ;;  %21618 = vmatprep.subr.bf16.mxu1 %v23648_v20  ;;  %v23689_v20 = vld [vmem:[#allocation5 + $0x1670] sm:$0xff]  }
 0x2f3   :  { %v21316_v62 = vpop.f32.mrb[56].mxu1  ;;  %v21295_v0 = vpop.f32.mrb[57].mxu0  ;;  %21595 = vmatpush3.bf16.msra.mxu0 %v23645_v15  ;;  %v23685_v15 = vld [vmem:[#allocation5 + $0x1668] sm:$0xff]  }
 0x2f4   :  { %v21296_v2 = vadd.f32 %v21295_v0, %v21294_v60  ;;  %v21317_v3 = vpop.f32.mrb[57].mxu1  ;;  %v21297_v6 = vpop.f32.mrb[58].mxu0  ;;  %21596 = vmatprep.subr.bf16.mxu0 %v23647_v18  ;;  %v23677_v60 = vld [vmem:[#allocation5 + $0x1658] sm:$0xff]   ;;  %v23688_v18 = vld [vmem:[#allocation5 + $0x16a8] sm:$0xff]  }
 0x2f5   :  { %v21318_v5 = vadd.f32 %v21317_v3, %v21316_v62  ;;  %v21319_v9 = vpop.f32.mrb[58].mxu1  ;;  %v21298_v11 = vpop.f32.mrb[59].mxu0  ;;  %21619 = vmatpush3.bf16.msra.mxu1 %v23650_v21  ;;  %v23678_v62 = vld [vmem:[#allocation5 + $0x16d8] sm:$0xff]   ;;  %v23691_v21 = vld [vmem:[#allocation5 + $0x1630] sm:$0xff]  }
 0x2f6   :  { %v16309_v8 = vadd.f32 %v21296_v2, %v24973_v16  ;;  %v21320_v14 = vpop.f32.mrb[59].mxu1  ;;  %v23649_v16 = vld [vmem:[#allocation5 + $0x1528] sm:$0xff]   ;;  %21620 = vmatprep.subr.bf16.mxu1 %v23652_v19  ;;  %v23682_v9 = vld [vmem:[#allocation5 + $0x16e0] sm:$0xff]   ;;  %v23693_v19 = vld [vmem:[#allocation5 + $0x1678] sm:$0xff]  }
 0x2f7   :  { %21597 = vmatpush3.bf16.msra.mxu0 %v23649_v16  ;;  %v23684_v14 = vld [vmem:[#allocation5 + $0x16a0] sm:$0xff]   ;;  %v23690_v16 = vld [vmem:[#allocation5 + $0x16f0] sm:$0xff]  }
 0x2f8   :  { %v24980_v13 = vadd.f32 %v21318_v5, %v16309_v8  ;;  %21598 = vmatprep.subr.bf16.mxu0 %v23651_v23  ;;  %v23692_v23 = vld [vmem:[#allocation5 + $0x16b0] sm:$0xff]  }
 0x2f9   :  { %21621 = vmatpush3.bf16.msra.mxu1 %v23654_v26  ;;  %v23695_v26 = vld [vmem:[#allocation5 + $0x1638] sm:$0xff]  }
 0x2fa   :  { %21622 = vmatprep.subr.bf16.mxu1 %v23656_v27  ;;  %v23697_v27 = vld [vmem:[#allocation2 + $0xb0] ss:$392 sps:$4 sm:$0xff]  }
 0x2fb   :  { %21599 = vmatpush3.bf16.msra.mxu0 %v23653_v24  ;;  %v23694_v24 = vld [vmem:[#allocation5 + $0x16f8] sm:$0xff]   ;;  %v1249_v32 = vrot.slane %v23697_v27, %v24852_v37  ;;  %v23740_v27 = vld [vmem:[#allocation2 + $0x3cc] ss:$392 sps:$4 sm:$0xff]  }
 0x2fc   :  { %21600 = vmatprep.subr.bf16.mxu0 %v23655_v22  ;;  %v23696_v22 = vld [vmem:[#allocation5 + $0x16b8] sm:$0xff]  }
 0x2fd   :  { %21623 = vmatpush3.bf16.msra.mxu1 %v23658_v25  ;;  %v23701_v25 = vld [vmem:[#allocation2 + $0xb4] ss:$392 sps:$4 sm:$0xff]  }
 0x2fe   :  { %21652 = vmatprep.subr.bf16.mxu1 %v23666_v40  ;;  %v1256_v35 = vrot.slane %v23701_v25, %v24852_v37  ;;  %v23705_v40 = vld [vmem:[#allocation5 + $0x1700] sm:$0xff]  }
 0x2ff   :  { %21601 = vmatpush3.bf16.msra.mxu0 %v23657_v29  ;;  %v23699_v29 = vld [vmem:[#allocation2 + $0x3c0] ss:$392 sps:$4 sm:$0xff]  }
 0x300   :  { %21630 = vmatprep.subr.bf16.mxu0 %v23665_v31  ;;  %16907 = vmatmul.mubr.bf16.vlgmr.msra.gmra.mrb[84].mxu1 %v2493_v51  ;;  %v1263_v28 = vrot.slane %v23699_v29, %v24852_v37  ;;  %v1270_v31 = vrot.slane %v23702_v30, %v24852_v37  ;;  %v23709_v51 = vld [vmem:[#allocation5 + $0x1708] sm:$0xff]  }
 0x301   :  { %21653 = vmatpush3.bf16.msra.mxu1 %v23668_v47  ;;  %v23707_v47 = vld [vmem:[#allocation5 + $0x1748] sm:$0xff]  }
 0x302   :  { %16867 = vmatmul.mubr.bf16.vlgmr.msra.gmra.mrb[84].mxu0 %v2491_v49  ;;  %21654 = vmatprep.subr.bf16.mxu1 %v23670_v52  ;;  %v1272_v39 = vcombine.high %v1249_v32, %v1263_v28  ;;  %v1271_v34 = vcombine.low %v1249_v32, %v1263_v28  ;;  %v1274_v42 = vcombine.high %v1256_v35, %v1270_v31  ;;  %v23708_v49 = vld [vmem:[#allocation5 + $0x17c8] sm:$0xff]   ;;  %v23711_v52 = vld [vmem:[#allocation5 + $0x1750] sm:$0xff]   ;;  %v23741_v32 = vld [vmem:[#allocation5 + $0x1840] sm:$0xff]  }
 0x303   :  { %21631 = vmatpush3.bf16.msra.mxu0 %v23667_v45  ;;  %v1273_v36 = vcombine.low %v1256_v35, %v1270_v31  ;;  %v1306_v28 = vrot.slane %v23740_v27, %v24852_v37 }
 0x304   :  { %21632 = vmatprep.subr.bf16.mxu0 %v23669_v46  ;;  %v2496_v41 = vpack.c.bf16 %v1272_v39, %v1272_v39  ;;  %v2495_v45 = vpack.c.bf16 %v1271_v34, %v1271_v34  ;;  %v2498_v48 = vpack.c.bf16 %v1274_v42, %v1274_v42  ;;  %v23710_v46 = vld [vmem:[#allocation5 + $0x1788] sm:$0xff]  }
 0x305   :  { %21655 = vmatpush3.bf16.msra.mxu1 %v23672_v54  ;;  %v2497_v44 = vpack.c.bf16 %v1273_v36, %v1273_v36  ;;  %v23713_v54 = vld [vmem:[#allocation5 + $0x1710] sm:$0xff]  }
 0x306   :  { %21656 = vmatprep.subr.bf16.mxu1 %v23674_v56  ;;  %16946 = vmatprep.mubr.bf16.mxu0 %v2496_v41  ;;  %v23714_v56 = vld [vmem:[#allocation5 + $0x1790] sm:$0xff]  }
 0x307   :  { %21633 = vmatpush3.bf16.msra.mxu0 %v23671_v50  ;;  %16986 = vmatprep.mubr.bf16.mxu1 %v2498_v48  ;;  %v23712_v50 = vld [vmem:[#allocation5 + $0x17d0] sm:$0xff]   ;;  %v23747_v48 = vld [vmem:[#allocation5 + $0x1808] sm:$0xff]  }
 0x308   :  { %21634 = vmatprep.subr.bf16.mxu0 %v23673_v55 }
 0x309   :  { %21657 = vmatpush3.bf16.msra.mxu1 %v23676_v58 }
 0x30a   :  { %21658 = vmatprep.subr.bf16.mxu1 %v23678_v62  ;;  %v23717_v62 = vld [vmem:[#allocation5 + $0x1718] sm:$0xff]  }
 0x30b   :  { %21635 = vmatpush3.bf16.msra.mxu0 %v23675_v53 }
 0x30c   :  { %21636 = vmatprep.subr.bf16.mxu0 %v23677_v60 }
 0x30d   :  { %21659 = vmatpush3.bf16.msra.mxu1 %v23680_v4  ;;  %v23719_v4 = vld [vmem:[#allocation5 + $0x1760] sm:$0xff]  }
 0x30e   :  { %21660 = vmatprep.subr.bf16.mxu1 %v23682_v9  ;;  %v23721_v9 = vld [vmem:[#allocation5 + $0x1720] sm:$0xff]  }
 0x30f   :  { %21637 = vmatpush3.bf16.msra.mxu0 %v23679_v1  ;;  %v23718_v1 = vld [vmem:[#allocation5 + $0x1798] sm:$0xff]  }
 0x310   :  { %21638 = vmatprep.subr.bf16.mxu0 %v23681_v7 }
 0x311   :  { %21661 = vmatpush3.bf16.msra.mxu1 %v23684_v14  ;;  %v23724_v14 = vld [vmem:[#allocation5 + $0x17e8] sm:$0xff]  }
 0x312   :  { %v21338_v57 = vpop.f32.mrb[60].mxu0  ;;  %21662 = vmatprep.subr.bf16.mxu1 %v23686_v17  ;;  %v23727_v17 = vld [vmem:[#allocation5 + $0x1770] sm:$0xff]  }
 0x313   :  { %v21360_v59 = vpop.f32.mrb[60].mxu1  ;;  %v21339_v61 = vpop.f32.mrb[61].mxu0  ;;  %21639 = vmatpush3.bf16.msra.mxu0 %v23683_v12  ;;  %v23723_v12 = vld [vmem:[#allocation5 + $0x1768] sm:$0xff]  }
 0x314   :  { %v21340_v63 = vadd.f32 %v21339_v61, %v21338_v57  ;;  %v21361_v0 = vpop.f32.mrb[61].mxu1  ;;  %v21341_v3 = vpop.f32.mrb[62].mxu0  ;;  %21640 = vmatprep.subr.bf16.mxu0 %v23685_v15  ;;  %v23715_v57 = vld [vmem:[#allocation5 + $0x1758] sm:$0xff]   ;;  %v23726_v15 = vld [vmem:[#allocation5 + $0x17a8] sm:$0xff]  }
 0x315   :  { %v21362_v2 = vadd.f32 %v21361_v0, %v21360_v59  ;;  %v21363_v6 = vpop.f32.mrb[62].mxu1  ;;  %v21342_v8 = vpop.f32.mrb[63].mxu0  ;;  %21663 = vmatpush3.bf16.msra.mxu1 %v23688_v18  ;;  %v23716_v59 = vld [vmem:[#allocation5 + $0x17d8] sm:$0xff]   ;;  %v23729_v18 = vld [vmem:[#allocation5 + $0x1730] sm:$0xff]  }
 0x316   :  { %v16389_v5 = vadd.f32 %v21340_v63, %v24980_v13  ;;  %v21364_v11 = vpop.f32.mrb[63].mxu1  ;;  %v23687_v13 = vld [vmem:[#allocation5 + $0x1628] sm:$0xff]   ;;  %21664 = vmatprep.subr.bf16.mxu1 %v23690_v16  ;;  %v23720_v6 = vld [vmem:[#allocation5 + $0x17e0] sm:$0xff]   ;;  %v23731_v16 = vld [vmem:[#allocation5 + $0x1778] sm:$0xff]  }
 0x317   :  { %21641 = vmatpush3.bf16.msra.mxu0 %v23687_v13  ;;  %v23722_v11 = vld [vmem:[#allocation5 + $0x17a0] sm:$0xff]   ;;  %v23728_v13 = vld [vmem:[#allocation5 + $0x17f0] sm:$0xff]  }
 0x318   :  { %v24987_v10 = vadd.f32 %v21362_v2, %v16389_v5  ;;  %21642 = vmatprep.subr.bf16.mxu0 %v23689_v20  ;;  %v23730_v20 = vld [vmem:[#allocation5 + $0x17b0] sm:$0xff]  }
 0x319   :  { %21665 = vmatpush3.bf16.msra.mxu1 %v23692_v23  ;;  %v23733_v23 = vld [vmem:[#allocation5 + $0x1738] sm:$0xff]  }
 0x31a   :  { %21666 = vmatprep.subr.bf16.mxu1 %v23694_v24  ;;  %v23735_v24 = vld [vmem:[#allocation2 + $0xb8] ss:$392 sps:$4 sm:$0xff]  }
 0x31b   :  { %21643 = vmatpush3.bf16.msra.mxu0 %v23691_v21  ;;  %v23732_v21 = vld [vmem:[#allocation5 + $0x17f8] sm:$0xff]   ;;  %v1285_v29 = vrot.slane %v23735_v24, %v24852_v37 }
 0x31c   :  { %21644 = vmatprep.subr.bf16.mxu0 %v23693_v19  ;;  %v23734_v19 = vld [vmem:[#allocation5 + $0x17b8] sm:$0xff]  }
 0x31d   :  { %21667 = vmatpush3.bf16.msra.mxu1 %v23696_v22  ;;  %v23739_v22 = vld [vmem:[#allocation2 + $0xbc] ss:$392 sps:$4 sm:$0xff]  }
 0x31e   :  { %21696 = vmatprep.subr.bf16.mxu1 %v23704_v38  ;;  %v1292_v30 = vrot.slane %v23739_v22, %v24852_v37  ;;  %v23743_v38 = vld [vmem:[#allocation5 + $0x1800] sm:$0xff]   ;;  %v23778_v24 = vld [vmem:[#allocation2 + $0x3d4] ss:$392 sps:$4 sm:$0xff]  }
 0x31f   :  { %21645 = vmatpush3.bf16.msra.mxu0 %v23695_v26  ;;  %v23737_v26 = vld [vmem:[#allocation2 + $0x3c8] ss:$392 sps:$4 sm:$0xff]   ;;  %v23779_v22 = vld [vmem:[#allocation5 + $0x1940] sm:$0xff]  }
 0x320   :  { %21674 = vmatprep.subr.bf16.mxu0 %v23703_v33  ;;  %16987 = vmatmul.mubr.bf16.vlgmr.msra.gmra.mrb[88].mxu1 %v2497_v44  ;;  %v1299_v25 = vrot.slane %v23737_v26, %v24852_v37  ;;  %v23742_v33 = vld [vmem:[#allocation5 + $0x18c0] sm:$0xff]   ;;  %v1310_v39 = vcombine.high %v1292_v30, %v1306_v28  ;;  %v1309_v34 = vcombine.low %v1292_v30, %v1306_v28  ;;  %v23748_v44 = vld [vmem:[#allocation5 + $0x1888] sm:$0xff]  }
 0x321   :  { %21697 = vmatpush3.bf16.msra.mxu1 %v23706_v43  ;;  %v23745_v43 = vld [vmem:[#allocation5 + $0x1848] sm:$0xff]   ;;  %v23780_v30 = vld [vmem:[#allocation5 + $0x19c0] sm:$0xff]  }
 0x322   :  { %16947 = vmatmul.mubr.bf16.vlgmr.msra.gmra.mrb[88].mxu0 %v2495_v45  ;;  %21698 = vmatprep.subr.bf16.mxu1 %v23708_v49  ;;  %v1308_v35 = vcombine.high %v1285_v29, %v1299_v25  ;;  %v1307_v31 = vcombine.low %v1285_v29, %v1299_v25  ;;  %v2502_v41 = vpack.c.bf16 %v1310_v39, %v1310_v39  ;;  %v23749_v49 = vld [vmem:[#allocation5 + $0x1850] sm:$0xff]  }
 0x323   :  { %21675 = vmatpush3.bf16.msra.mxu0 %v23705_v40  ;;  %v23744_v40 = vld [vmem:[#allocation5 + $0x1880] sm:$0xff]   ;;  %v2501_v45 = vpack.c.bf16 %v1309_v34, %v1309_v34  ;;  %v1342_v25 = vrot.slane %v23778_v24, %v24852_v37 }
 0x324   :  { %21676 = vmatprep.subr.bf16.mxu0 %v23707_v47  ;;  %v2500_v42 = vpack.c.bf16 %v1308_v35, %v1308_v35  ;;  %v2499_v36 = vpack.c.bf16 %v1307_v31, %v1307_v31  ;;  %v23746_v47 = vld [vmem:[#allocation5 + $0x18c8] sm:$0xff]   ;;  %17066 = vmatprep.mubr.bf16.mxu1 %v2502_v41  ;;  %v23781_v31 = vld [vmem:[#allocation5 + $0x1900] sm:$0xff]  }
 0x325   :  { %21699 = vmatpush3.bf16.msra.mxu1 %v23710_v46  ;;  %v23751_v46 = vld [vmem:[#allocation5 + $0x1810] sm:$0xff]   ;;  %v23785_v41 = vld [vmem:[#allocation5 + $0x1908] sm:$0xff]   ;;  %v23817_v24 = vld [vmem:[#allocation5 + $0x1a40] sm:$0xff]  }
 0x326   :  { %21700 = vmatprep.subr.bf16.mxu1 %v23712_v50  ;;  %17026 = vmatprep.mubr.bf16.mxu0 %v2500_v42  ;;  %v23752_v50 = vld [vmem:[#allocation5 + $0x1890] sm:$0xff]  }
 0x327   :  { %21677 = vmatpush3.bf16.msra.mxu0 %v23709_v51  ;;  %v23750_v51 = vld [vmem:[#allocation5 + $0x18d0] sm:$0xff]  }
 0x328   :  { %21678 = vmatprep.subr.bf16.mxu0 %v23711_v52 }
 0x329   :  { %21701 = vmatpush3.bf16.msra.mxu1 %v23714_v56 }
 0x32a   :  { %21702 = vmatprep.subr.bf16.mxu1 %v23716_v59  ;;  %v23755_v59 = vld [vmem:[#allocation5 + $0x1818] sm:$0xff]  }
 0x32b   :  { %21679 = vmatpush3.bf16.msra.mxu0 %v23713_v54 }
 0x32c   :  { %21680 = vmatprep.subr.bf16.mxu0 %v23715_v57 }
 0x32d   :  { %21703 = vmatpush3.bf16.msra.mxu1 %v23718_v1  ;;  %v23757_v1 = vld [vmem:[#allocation5 + $0x1860] sm:$0xff]  }
 0x32e   :  { %21704 = vmatprep.subr.bf16.mxu1 %v23720_v6  ;;  %v23759_v6 = vld [vmem:[#allocation5 + $0x1820] sm:$0xff]  }
 0x32f   :  { %21681 = vmatpush3.bf16.msra.mxu0 %v23717_v62  ;;  %v23756_v62 = vld [vmem:[#allocation5 + $0x1898] sm:$0xff]  }
 0x330   :  { %21682 = vmatprep.subr.bf16.mxu0 %v23719_v4 }
 0x331   :  { %21705 = vmatpush3.bf16.msra.mxu1 %v23722_v11  ;;  %v23762_v11 = vld [vmem:[#allocation5 + $0x18e8] sm:$0xff]  }
 0x332   :  { %21706 = vmatprep.subr.bf16.mxu1 %v23724_v14  ;;  %v23765_v14 = vld [vmem:[#allocation5 + $0x1870] sm:$0xff]  }
 0x333   :  { %v21404_v53 = vpop.f32.mrb[64].mxu1  ;;  %21683 = vmatpush3.bf16.msra.mxu0 %v23721_v9  ;;  %v23761_v9 = vld [vmem:[#allocation5 + $0x1868] sm:$0xff]  }
 0x334   :  { %v21405_v61 = vpop.f32.mrb[65].mxu1  ;;  %21684 = vmatprep.subr.bf16.mxu0 %v23723_v12  ;;  %v23764_v12 = vld [vmem:[#allocation5 + $0x18a8] sm:$0xff]  }
 0x335   :  { %v21382_v55 = vpop.f32.mrb[64].mxu0  ;;  %v21406_v63 = vadd.f32 %v21405_v61, %v21404_v53  ;;  %v21407_v3 = vpop.f32.mrb[66].mxu1  ;;  %21707 = vmatpush3.bf16.msra.mxu1 %v23726_v15  ;;  %v23754_v53 = vld [vmem:[#allocation5 + $0x18d8] sm:$0xff]   ;;  %v23767_v15 = vld [vmem:[#allocation5 + $0x1830] sm:$0xff]  }
 0x336   :  { %v21383_v58 = vpop.f32.mrb[65].mxu0  ;;  %v21408_v8 = vpop.f32.mrb[67].mxu1  ;;  %21708 = vmatprep.subr.bf16.mxu1 %v23728_v13  ;;  %v23758_v3 = vld [vmem:[#allocation5 + $0x18e0] sm:$0xff]   ;;  %v23769_v13 = vld [vmem:[#allocation5 + $0x1878] sm:$0xff]  }
 0x337   :  { %v21384_v60 = vadd.f32 %v21383_v58, %v21382_v55  ;;  %v21385_v0 = vpop.f32.mrb[66].mxu0  ;;  %v23753_v55 = vld [vmem:[#allocation5 + $0x1858] sm:$0xff]   ;;  %v23760_v8 = vld [vmem:[#allocation5 + $0x18a0] sm:$0xff]  }
 0x338   :  { %v21386_v5 = vpop.f32.mrb[67].mxu0 }
 0x339   :  { %v16469_v2 = vadd.f32 %v21384_v60, %v24987_v10  ;;  %v23725_v10 = vld [vmem:[#allocation5 + $0x1728] sm:$0xff]   ;;  %21709 = vmatpush3.bf16.msra.mxu1 %v23730_v20  ;;  %v23771_v20 = vld [vmem:[#allocation5 + $0x1838] sm:$0xff]  }
 0x33a   :  { %21685 = vmatpush3.bf16.msra.mxu0 %v23725_v10  ;;  %21710 = vmatprep.subr.bf16.mxu1 %v23732_v21  ;;  %v23766_v10 = vld [vmem:[#allocation5 + $0x18f0] sm:$0xff]   ;;  %v23773_v21 = vld [vmem:[#allocation2 + $0xc0] ss:$392 sps:$4 sm:$0xff]  }
 0x33b   :  { %v24994_v7 = vadd.f32 %v21406_v63, %v16469_v2  ;;  %21686 = vmatprep.subr.bf16.mxu0 %v23727_v17  ;;  %v23768_v17 = vld [vmem:[#allocation5 + $0x18b0] sm:$0xff]   ;;  %v1321_v26 = vrot.slane %v23773_v21, %v24852_v37  ;;  %v23816_v21 = vld [vmem:[#allocation2 + $0x3dc] ss:$392 sps:$4 sm:$0xff]  }
 0x33d   :  { %21711 = vmatpush3.bf16.msra.mxu1 %v23734_v19  ;;  %v23777_v19 = vld [vmem:[#allocation2 + $0xc4] ss:$392 sps:$4 sm:$0xff]  }
 0x33e   :  { %21687 = vmatpush3.bf16.msra.mxu0 %v23729_v18  ;;  %21740 = vmatprep.subr.bf16.mxu1 %v23742_v33  ;;  %v23770_v18 = vld [vmem:[#allocation5 + $0x18f8] sm:$0xff]   ;;  %v1328_v29 = vrot.slane %v23777_v19, %v24852_v37 }
 0x33f   :  { %21688 = vmatprep.subr.bf16.mxu0 %v23731_v16  ;;  %v23772_v16 = vld [vmem:[#allocation5 + $0x18b8] sm:$0xff]  }
 0x340   :  { %17067 = vmatmul.mubr.bf16.vlgmr.msra.gmra.mrb[92].mxu1 %v2501_v45  ;;  %v1346_v28 = vcombine.high %v1328_v29, %v1342_v25  ;;  %v1345_v35 = vcombine.low %v1328_v29, %v1342_v25  ;;  %v23786_v45 = vld [vmem:[#allocation5 + $0x1988] sm:$0xff]  }
 0x341   :  { %21741 = vmatpush3.bf16.msra.mxu1 %v23744_v40 }
 0x342   :  { %21689 = vmatpush3.bf16.msra.mxu0 %v23733_v23  ;;  %21742 = vmatprep.subr.bf16.mxu1 %v23746_v47  ;;  %v23775_v23 = vld [vmem:[#allocation2 + $0x3d0] ss:$392 sps:$4 sm:$0xff]   ;;  %v2506_v34 = vpack.c.bf16 %v1346_v28, %v1346_v28  ;;  %v2505_v42 = vpack.c.bf16 %v1345_v35, %v1345_v35 }
 0x343   :  { %21718 = vmatprep.subr.bf16.mxu0 %v23741_v32  ;;  %v1335_v27 = vrot.slane %v23775_v23, %v24852_v37  ;;  %v23787_v47 = vld [vmem:[#allocation5 + $0x1950] sm:$0xff]  }
 0x344   :  { %17146 = vmatprep.mubr.bf16.mxu1 %v2506_v34 }
 0x345   :  { %17027 = vmatmul.mubr.bf16.vlgmr.msra.gmra.mrb[92].mxu0 %v2499_v36  ;;  %21743 = vmatpush3.bf16.msra.mxu1 %v23748_v44  ;;  %v1344_v32 = vcombine.high %v1321_v26, %v1335_v27  ;;  %v1343_v33 = vcombine.low %v1321_v26, %v1335_v27  ;;  %v23783_v36 = vld [vmem:[#allocation5 + $0x1948] sm:$0xff]   ;;  %v23789_v44 = vld [vmem:[#allocation5 + $0x1910] sm:$0xff]   ;;  %v23818_v27 = vld [vmem:[#allocation5 + $0x1ac0] sm:$0xff]  }
 0x346   :  { %21719 = vmatpush3.bf16.msra.mxu0 %v23743_v38  ;;  %21744 = vmatprep.subr.bf16.mxu1 %v23750_v51  ;;  %v23782_v38 = vld [vmem:[#allocation5 + $0x1980] sm:$0xff]   ;;  %v23790_v51 = vld [vmem:[#allocation5 + $0x1990] sm:$0xff]  }
 0x347   :  { %21720 = vmatprep.subr.bf16.mxu0 %v23745_v43  ;;  %v2504_v39 = vpack.c.bf16 %v1344_v32, %v1344_v32  ;;  %v2503_v40 = vpack.c.bf16 %v1343_v33, %v1343_v33  ;;  %v23784_v43 = vld [vmem:[#allocation5 + $0x19c8] sm:$0xff]   ;;  %v23820_v33 = vld [vmem:[#allocation5 + $0x1a80] sm:$0xff]  }
 0x349   :  { %21745 = vmatpush3.bf16.msra.mxu1 %v23752_v50  ;;  %17106 = vmatprep.mubr.bf16.mxu0 %v2504_v39 }
 0x34a   :  { %21721 = vmatpush3.bf16.msra.mxu0 %v23747_v48  ;;  %21746 = vmatprep.subr.bf16.mxu1 %v23754_v53  ;;  %v23788_v48 = vld [vmem:[#allocation5 + $0x19d0] sm:$0xff]   ;;  %v23793_v53 = vld [vmem:[#allocation5 + $0x1918] sm:$0xff]  }
 0x34b   :  { %21722 = vmatprep.subr.bf16.mxu0 %v23749_v49 }
 0x34d   :  { %21747 = vmatpush3.bf16.msra.mxu1 %v23756_v62  ;;  %v23795_v62 = vld [vmem:[#allocation5 + $0x1960] sm:$0xff]  }
 0x34e   :  { %21723 = vmatpush3.bf16.msra.mxu0 %v23751_v46  ;;  %21748 = vmatprep.subr.bf16.mxu1 %v23758_v3  ;;  %v23797_v3 = vld [vmem:[#allocation5 + $0x1920] sm:$0xff]  }
 0x34f   :  { %21724 = vmatprep.subr.bf16.mxu0 %v23753_v55 }
 0x351   :  { %21749 = vmatpush3.bf16.msra.mxu1 %v23760_v8  ;;  %v23800_v8 = vld [vmem:[#allocation5 + $0x19e8] sm:$0xff]  }
 0x352   :  { %21725 = vmatpush3.bf16.msra.mxu0 %v23755_v59  ;;  %21750 = vmatprep.subr.bf16.mxu1 %v23762_v11  ;;  %v23794_v59 = vld [vmem:[#allocation5 + $0x1998] sm:$0xff]   ;;  %v23803_v11 = vld [vmem:[#allocation5 + $0x1970] sm:$0xff]  }
 0x353   :  { %v21448_v54 = vpop.f32.mrb[68].mxu1  ;;  %21726 = vmatprep.subr.bf16.mxu0 %v23757_v1 }
 0x354   :  { %v21449_v58 = vpop.f32.mrb[69].mxu1 }
 0x355   :  { %v21426_v52 = vpop.f32.mrb[68].mxu0  ;;  %v21450_v60 = vadd.f32 %v21449_v58, %v21448_v54  ;;  %v21451_v0 = vpop.f32.mrb[70].mxu1  ;;  %21751 = vmatpush3.bf16.msra.mxu1 %v23764_v12  ;;  %v23792_v54 = vld [vmem:[#allocation5 + $0x19d8] sm:$0xff]   ;;  %v23805_v12 = vld [vmem:[#allocation5 + $0x1930] sm:$0xff]  }
 0x356   :  { %v21427_v56 = vpop.f32.mrb[69].mxu0  ;;  %v21452_v5 = vpop.f32.mrb[71].mxu1  ;;  %21727 = vmatpush3.bf16.msra.mxu0 %v23759_v6  ;;  %21752 = vmatprep.subr.bf16.mxu1 %v23766_v10  ;;  %v23796_v0 = vld [vmem:[#allocation5 + $0x19e0] sm:$0xff]   ;;  %v23799_v6 = vld [vmem:[#allocation5 + $0x1968] sm:$0xff]   ;;  %v23807_v10 = vld [vmem:[#allocation5 + $0x1978] sm:$0xff]  }
 0x357   :  { %v21428_v57 = vadd.f32 %v21427_v56, %v21426_v52  ;;  %v21429_v61 = vpop.f32.mrb[70].mxu0  ;;  %21728 = vmatprep.subr.bf16.mxu0 %v23761_v9  ;;  %v23791_v52 = vld [vmem:[#allocation5 + $0x1958] sm:$0xff]   ;;  %v23798_v5 = vld [vmem:[#allocation5 + $0x19a0] sm:$0xff]   ;;  %v23802_v9 = vld [vmem:[#allocation5 + $0x19a8] sm:$0xff]  }
 0x358   :  { %v21430_v2 = vpop.f32.mrb[71].mxu0 }
 0x359   :  { %v16549_v63 = vadd.f32 %v21428_v57, %v24994_v7  ;;  %v23763_v7 = vld [vmem:[#allocation5 + $0x1828] sm:$0xff]   ;;  %21753 = vmatpush3.bf16.msra.mxu1 %v23768_v17  ;;  %v23809_v17 = vld [vmem:[#allocation5 + $0x1938] sm:$0xff]  }
 0x35a   :  { %21729 = vmatpush3.bf16.msra.mxu0 %v23763_v7  ;;  %21754 = vmatprep.subr.bf16.mxu1 %v23770_v18  ;;  %v23804_v7 = vld [vmem:[#allocation5 + $0x19f0] sm:$0xff]  }
 0x35b   :  { %v25001_v4 = vadd.f32 %v21450_v60, %v16549_v63  ;;  %21730 = vmatprep.subr.bf16.mxu0 %v23765_v14  ;;  %v23806_v14 = vld [vmem:[#allocation5 + $0x19b0] sm:$0xff]  }
 0x35c   :  { %v23811_v18 = vld [vmem:[#allocation2 + $0xc8] ss:$392 sps:$4 sm:$0xff]  }
 0x35d   :  { %21755 = vmatpush3.bf16.msra.mxu1 %v23772_v16  ;;  %v23815_v16 = vld [vmem:[#allocation2 + $0xcc] ss:$392 sps:$4 sm:$0xff]   ;;  %v1357_v23 = vrot.slane %v23811_v18, %v24852_v37 }
 0x35e   :  { %21731 = vmatpush3.bf16.msra.mxu0 %v23767_v15  ;;  %21784 = vmatprep.subr.bf16.mxu1 %v23780_v30  ;;  %v23808_v15 = vld [vmem:[#allocation5 + $0x19f8] sm:$0xff]   ;;  %v1364_v26 = vrot.slane %v23815_v16, %v24852_v37  ;;  %v23819_v30 = vld [vmem:[#allocation5 + $0x1a00] sm:$0xff]  }
 0x35f   :  { %21732 = vmatprep.subr.bf16.mxu0 %v23769_v13  ;;  %v23810_v13 = vld [vmem:[#allocation5 + $0x19b8] sm:$0xff]   ;;  %v23854_v18 = vld [vmem:[#allocation2 + $0x3e4] ss:$392 sps:$4 sm:$0xff]  }
 0x360   :  { %17147 = vmatmul.mubr.bf16.vlgmr.msra.gmra.mrb[96].mxu1 %v2505_v42  ;;  %v23823_v42 = vld [vmem:[#allocation5 + $0x1a08] sm:$0xff]  }
 0x361   :  { %21785 = vmatpush3.bf16.msra.mxu1 %v23782_v38  ;;  %v23821_v38 = vld [vmem:[#allocation5 + $0x1a48] sm:$0xff]  }
 0x362   :  { %21733 = vmatpush3.bf16.msra.mxu0 %v23771_v20  ;;  %21786 = vmatprep.subr.bf16.mxu1 %v23784_v43  ;;  %v23813_v20 = vld [vmem:[#allocation2 + $0x3d8] ss:$392 sps:$4 sm:$0xff]   ;;  %v23825_v43 = vld [vmem:[#allocation5 + $0x1a50] sm:$0xff]  }
 0x363   :  { %21762 = vmatprep.subr.bf16.mxu0 %v23779_v22  ;;  %v1371_v19 = vrot.slane %v23813_v20, %v24852_v37  ;;  %v1378_v22 = vrot.slane %v23816_v21, %v24852_v37 }
 0x365   :  { %17107 = vmatmul.mubr.bf16.vlgmr.msra.gmra.mrb[96].mxu0 %v2503_v40  ;;  %21787 = vmatpush3.bf16.msra.mxu1 %v23786_v45  ;;  %v1380_v29 = vcombine.high %v1357_v23, %v1371_v19  ;;  %v1379_v25 = vcombine.low %v1357_v23, %v1371_v19  ;;  %v1382_v32 = vcombine.high %v1364_v26, %v1378_v22  ;;  %v23822_v40 = vld [vmem:[#allocation5 + $0x1ac8] sm:$0xff]   ;;  %v23827_v45 = vld [vmem:[#allocation5 + $0x1a10] sm:$0xff]   ;;  %v23855_v23 = vld [vmem:[#allocation5 + $0x1b40] sm:$0xff]  }
 0x366   :  { %21763 = vmatpush3.bf16.msra.mxu0 %v23781_v31  ;;  %21788 = vmatprep.subr.bf16.mxu1 %v23788_v48  ;;  %v1381_v28 = vcombine.low %v1364_v26, %v1378_v22  ;;  %v23828_v48 = vld [vmem:[#allocation5 + $0x1a90] sm:$0xff]   ;;  %v1414_v19 = vrot.slane %v23854_v18, %v24852_v37 }
 0x367   :  { %21764 = vmatprep.subr.bf16.mxu0 %v23783_v36  ;;  %v2508_v35 = vpack.c.bf16 %v1380_v29, %v1380_v29  ;;  %v2507_v31 = vpack.c.bf16 %v1379_v25, %v1379_v25  ;;  %v2510_v39 = vpack.c.bf16 %v1382_v32, %v1382_v32  ;;  %v23824_v36 = vld [vmem:[#allocation5 + $0x1a88] sm:$0xff]  }
 0x368   :  { %v2509_v34 = vpack.c.bf16 %v1381_v28, %v1381_v28 }
 0x369   :  { %21789 = vmatpush3.bf16.msra.mxu1 %v23790_v51  ;;  %17186 = vmatprep.mubr.bf16.mxu0 %v2508_v35 }
 0x36a   :  { %21765 = vmatpush3.bf16.msra.mxu0 %v23785_v41  ;;  %21790 = vmatprep.subr.bf16.mxu1 %v23792_v54  ;;  %v23826_v41 = vld [vmem:[#allocation5 + $0x1ad0] sm:$0xff]   ;;  %v23831_v54 = vld [vmem:[#allocation5 + $0x1a18] sm:$0xff]  }
 0x36b   :  { %21766 = vmatprep.subr.bf16.mxu0 %v23787_v47  ;;  %17226 = vmatprep.mubr.bf16.mxu1 %v2510_v39  ;;  %v23861_v39 = vld [vmem:[#allocation5 + $0x1b08] sm:$0xff]  }
 0x36d   :  { %21791 = vmatpush3.bf16.msra.mxu1 %v23794_v59  ;;  %v23833_v59 = vld [vmem:[#allocation5 + $0x1a60] sm:$0xff]  }
 0x36e   :  { %21767 = vmatpush3.bf16.msra.mxu0 %v23789_v44  ;;  %21792 = vmatprep.subr.bf16.mxu1 %v23796_v0  ;;  %v23835_v0 = vld [vmem:[#allocation5 + $0x1a20] sm:$0xff]  }
 0x36f   :  { %21768 = vmatprep.subr.bf16.mxu0 %v23791_v52 }
 0x371   :  { %21793 = vmatpush3.bf16.msra.mxu1 %v23798_v5  ;;  %v23838_v5 = vld [vmem:[#allocation5 + $0x1ae8] sm:$0xff]  }
 0x372   :  { %21769 = vmatpush3.bf16.msra.mxu0 %v23793_v53  ;;  %21794 = vmatprep.subr.bf16.mxu1 %v23800_v8  ;;  %v23832_v53 = vld [vmem:[#allocation5 + $0x1a98] sm:$0xff]   ;;  %v23841_v8 = vld [vmem:[#allocation5 + $0x1a70] sm:$0xff]  }
 0x373   :  { %v21492_v46 = vpop.f32.mrb[72].mxu1  ;;  %21770 = vmatprep.subr.bf16.mxu0 %v23795_v62 }
 0x374   :  { %v21493_v56 = vpop.f32.mrb[73].mxu1 }
 0x375   :  { %v21470_v49 = vpop.f32.mrb[72].mxu0  ;;  %v21494_v57 = vadd.f32 %v21493_v56, %v21492_v46  ;;  %v21495_v61 = vpop.f32.mrb[74].mxu1  ;;  %21795 = vmatpush3.bf16.msra.mxu1 %v23802_v9  ;;  %v23830_v46 = vld [vmem:[#allocation5 + $0x1ad8] sm:$0xff]   ;;  %v23843_v9 = vld [vmem:[#allocation5 + $0x1a30] sm:$0xff]  }
 0x376   :  { %v21471_v50 = vpop.f32.mrb[73].mxu0  ;;  %v21496_v2 = vpop.f32.mrb[75].mxu1  ;;  %21771 = vmatpush3.bf16.msra.mxu0 %v23797_v3  ;;  %21796 = vmatprep.subr.bf16.mxu1 %v23804_v7  ;;  %v23834_v61 = vld [vmem:[#allocation5 + $0x1ae0] sm:$0xff]   ;;  %v23837_v3 = vld [vmem:[#allocation5 + $0x1a68] sm:$0xff]   ;;  %v23845_v7 = vld [vmem:[#allocation5 + $0x1a78] sm:$0xff]  }
 0x377   :  { %v21472_v55 = vadd.f32 %v21471_v50, %v21470_v49  ;;  %v21473_v58 = vpop.f32.mrb[74].mxu0  ;;  %21772 = vmatprep.subr.bf16.mxu0 %v23799_v6  ;;  %v23829_v49 = vld [vmem:[#allocation5 + $0x1a58] sm:$0xff]   ;;  %v23836_v2 = vld [vmem:[#allocation5 + $0x1aa0] sm:$0xff]   ;;  %v23840_v6 = vld [vmem:[#allocation5 + $0x1aa8] sm:$0xff]  }
 0x378   :  { %v21474_v63 = vpop.f32.mrb[75].mxu0 }
 0x379   :  { %v16629_v60 = vadd.f32 %v21472_v55, %v25001_v4  ;;  %v23801_v4 = vld [vmem:[#allocation5 + $0x1928] sm:$0xff]   ;;  %21797 = vmatpush3.bf16.msra.mxu1 %v23806_v14  ;;  %v23847_v14 = vld [vmem:[#allocation5 + $0x1a38] sm:$0xff]  }
 0x37a   :  { %21773 = vmatpush3.bf16.msra.mxu0 %v23801_v4  ;;  %21798 = vmatprep.subr.bf16.mxu1 %v23808_v15  ;;  %v23842_v4 = vld [vmem:[#allocation5 + $0x1af0] sm:$0xff]  }
 0x37b   :  { %v25008_v1 = vadd.f32 %v21494_v57, %v16629_v60  ;;  %21774 = vmatprep.subr.bf16.mxu0 %v23803_v11  ;;  %v23844_v11 = vld [vmem:[#allocation5 + $0x1ab0] sm:$0xff]  }
 0x37c   :  { %v23849_v15 = vld [vmem:[#allocation2 + $0xd0] ss:$392 sps:$4 sm:$0xff]  }
 0x37d   :  { %21799 = vmatpush3.bf16.msra.mxu1 %v23810_v13  ;;  %v23853_v13 = vld [vmem:[#allocation2 + $0xd4] ss:$392 sps:$4 sm:$0xff]   ;;  %v1393_v20 = vrot.slane %v23849_v15, %v24852_v37 }
 0x37e   :  { %21775 = vmatpush3.bf16.msra.mxu0 %v23805_v12  ;;  %21828 = vmatprep.subr.bf16.mxu1 %v23818_v27  ;;  %v23846_v12 = vld [vmem:[#allocation5 + $0x1af8] sm:$0xff]   ;;  %v1400_v21 = vrot.slane %v23853_v13, %v24852_v37  ;;  %v23857_v27 = vld [vmem:[#allocation5 + $0x1b00] sm:$0xff]   ;;  %v23892_v15 = vld [vmem:[#allocation2 + $0x3ec] ss:$392 sps:$4 sm:$0xff]  }
 0x37f   :  { %21776 = vmatprep.subr.bf16.mxu0 %v23807_v10  ;;  %v23848_v10 = vld [vmem:[#allocation5 + $0x1ab8] sm:$0xff]   ;;  %v23893_v13 = vld [vmem:[#allocation5 + $0x1c40] sm:$0xff]  }
 0x380   :  { %17227 = vmatmul.mubr.bf16.vlgmr.msra.gmra.mrb[100].mxu1 %v2509_v34  ;;  %v1418_v29 = vcombine.high %v1400_v21, %v1414_v19  ;;  %v1417_v25 = vcombine.low %v1400_v21, %v1414_v19  ;;  %v23862_v34 = vld [vmem:[#allocation5 + $0x1b88] sm:$0xff]   ;;  %v23894_v21 = vld [vmem:[#allocation5 + $0x1cc0] sm:$0xff]  }
 0x381   :  { %21829 = vmatpush3.bf16.msra.mxu1 %v23820_v33  ;;  %v23859_v33 = vld [vmem:[#allocation5 + $0x1b48] sm:$0xff]  }
 0x382   :  { %21777 = vmatpush3.bf16.msra.mxu0 %v23809_v17  ;;  %21830 = vmatprep.subr.bf16.mxu1 %v23822_v40  ;;  %v23851_v17 = vld [vmem:[#allocation2 + $0x3e0] ss:$392 sps:$4 sm:$0xff]   ;;  %v2514_v35 = vpack.c.bf16 %v1418_v29, %v1418_v29  ;;  %v23863_v40 = vld [vmem:[#allocation5 + $0x1b50] sm:$0xff]  }
 0x383   :  { %21806 = vmatprep.subr.bf16.mxu0 %v23817_v24  ;;  %v1407_v16 = vrot.slane %v23851_v17, %v24852_v37  ;;  %v23856_v24 = vld [vmem:[#allocation5 + $0x1bc0] sm:$0xff]  }
 0x384   :  { %17306 = vmatprep.mubr.bf16.mxu1 %v2514_v35  ;;  %v23899_v35 = vld [vmem:[#allocation5 + $0x1c08] sm:$0xff]  }
 0x385   :  { %17187 = vmatmul.mubr.bf16.vlgmr.msra.gmra.mrb[100].mxu0 %v2507_v31  ;;  %21831 = vmatpush3.bf16.msra.mxu1 %v23824_v36  ;;  %v1416_v26 = vcombine.high %v1393_v20, %v1407_v16  ;;  %v1415_v22 = vcombine.low %v1393_v20, %v1407_v16  ;;  %v2513_v31 = vpack.c.bf16 %v1417_v25, %v1417_v25  ;;  %v23865_v36 = vld [vmem:[#allocation5 + $0x1b10] sm:$0xff]  }
 0x386   :  { %21807 = vmatpush3.bf16.msra.mxu0 %v23819_v30  ;;  %21832 = vmatprep.subr.bf16.mxu1 %v23826_v41  ;;  %v23858_v30 = vld [vmem:[#allocation5 + $0x1b80] sm:$0xff]   ;;  %v23866_v41 = vld [vmem:[#allocation5 + $0x1b90] sm:$0xff]   ;;  %v1450_v16 = vrot.slane %v23892_v15, %v24852_v37 }
 0x387   :  { %21808 = vmatprep.subr.bf16.mxu0 %v23821_v38  ;;  %v2512_v32 = vpack.c.bf16 %v1416_v26, %v1416_v26  ;;  %v2511_v28 = vpack.c.bf16 %v1415_v22, %v1415_v22  ;;  %v23860_v38 = vld [vmem:[#allocation5 + $0x1bc8] sm:$0xff]   ;;  %v23895_v22 = vld [vmem:[#allocation5 + $0x1c00] sm:$0xff]  }
 0x388   :  { %v23931_v15 = vld [vmem:[#allocation5 + $0x1d40] sm:$0xff]  }
 0x389   :  { %21833 = vmatpush3.bf16.msra.mxu1 %v23828_v48  ;;  %17266 = vmatprep.mubr.bf16.mxu0 %v2512_v32 }
 0x38a   :  { %21809 = vmatpush3.bf16.msra.mxu0 %v23823_v42  ;;  %21834 = vmatprep.subr.bf16.mxu1 %v23830_v46  ;;  %v23864_v42 = vld [vmem:[#allocation5 + $0x1bd0] sm:$0xff]   ;;  %v23869_v46 = vld [vmem:[#allocation5 + $0x1b18] sm:$0xff]  }
 0x38b   :  { %21810 = vmatprep.subr.bf16.mxu0 %v23825_v43 }
 0x38d   :  { %21835 = vmatpush3.bf16.msra.mxu1 %v23832_v53  ;;  %v23871_v53 = vld [vmem:[#allocation5 + $0x1b60] sm:$0xff]  }
 0x38e   :  { %21811 = vmatpush3.bf16.msra.mxu0 %v23827_v45  ;;  %21836 = vmatprep.subr.bf16.mxu1 %v23834_v61  ;;  %v23873_v61 = vld [vmem:[#allocation5 + $0x1b20] sm:$0xff]  }
 0x38f   :  { %21812 = vmatprep.subr.bf16.mxu0 %v23829_v49 }
 0x391   :  { %21837 = vmatpush3.bf16.msra.mxu1 %v23836_v2  ;;  %v23876_v2 = vld [vmem:[#allocation5 + $0x1be8] sm:$0xff]  }
 0x392   :  { %21813 = vmatpush3.bf16.msra.mxu0 %v23831_v54  ;;  %21838 = vmatprep.subr.bf16.mxu1 %v23838_v5  ;;  %v23870_v54 = vld [vmem:[#allocation5 + $0x1b98] sm:$0xff]   ;;  %v23879_v5 = vld [vmem:[#allocation5 + $0x1b70] sm:$0xff]  }
 0x393   :  { %v21536_v44 = vpop.f32.mrb[76].mxu1  ;;  %21814 = vmatprep.subr.bf16.mxu0 %v23833_v59 }
 0x394   :  { %v21537_v50 = vpop.f32.mrb[77].mxu1 }
 0x395   :  { %v21514_v47 = vpop.f32.mrb[76].mxu0  ;;  %v21538_v55 = vadd.f32 %v21537_v50, %v21536_v44  ;;  %v21539_v58 = vpop.f32.mrb[78].mxu1  ;;  %21839 = vmatpush3.bf16.msra.mxu1 %v23840_v6  ;;  %v23868_v44 = vld [vmem:[#allocation5 + $0x1bd8] sm:$0xff]   ;;  %v23881_v6 = vld [vmem:[#allocation5 + $0x1b30] sm:$0xff]  }
 0x396   :  { %v21515_v51 = vpop.f32.mrb[77].mxu0  ;;  %v21540_v63 = vpop.f32.mrb[79].mxu1  ;;  %21815 = vmatpush3.bf16.msra.mxu0 %v23835_v0  ;;  %21840 = vmatprep.subr.bf16.mxu1 %v23842_v4  ;;  %v23872_v58 = vld [vmem:[#allocation5 + $0x1be0] sm:$0xff]   ;;  %v23875_v0 = vld [vmem:[#allocation5 + $0x1b68] sm:$0xff]   ;;  %v23883_v4 = vld [vmem:[#allocation5 + $0x1b78] sm:$0xff]  }
 0x397   :  { %v21516_v52 = vadd.f32 %v21515_v51, %v21514_v47  ;;  %v21517_v56 = vpop.f32.mrb[78].mxu0  ;;  %21816 = vmatprep.subr.bf16.mxu0 %v23837_v3  ;;  %v23867_v47 = vld [vmem:[#allocation5 + $0x1b58] sm:$0xff]   ;;  %v23874_v63 = vld [vmem:[#allocation5 + $0x1ba0] sm:$0xff]   ;;  %v23878_v3 = vld [vmem:[#allocation5 + $0x1ba8] sm:$0xff]  }
 0x398   :  { %v21518_v60 = vpop.f32.mrb[79].mxu0 }
 0x399   :  { %v16709_v57 = vadd.f32 %v21516_v52, %v25008_v1  ;;  %v23839_v1 = vld [vmem:[#allocation5 + $0x1a28] sm:$0xff]   ;;  %21841 = vmatpush3.bf16.msra.mxu1 %v23844_v11  ;;  %v23885_v11 = vld [vmem:[#allocation5 + $0x1b38] sm:$0xff]  }
 0x39a   :  { %21817 = vmatpush3.bf16.msra.mxu0 %v23839_v1  ;;  %21842 = vmatprep.subr.bf16.mxu1 %v23846_v12  ;;  %v23880_v1 = vld [vmem:[#allocation5 + $0x1bf0] sm:$0xff]   ;;  %v23887_v12 = vld [vmem:[#allocation2 + $0xd8] ss:$392 sps:$4 sm:$0xff]  }
 0x39b   :  { %v25015_v62 = vadd.f32 %v21538_v55, %v16709_v57  ;;  %21818 = vmatprep.subr.bf16.mxu0 %v23841_v8  ;;  %v23882_v8 = vld [vmem:[#allocation5 + $0x1bb0] sm:$0xff]   ;;  %v1429_v17 = vrot.slane %v23887_v12, %v24852_v37 }
 0x39c   :  { %v23930_v12 = vld [vmem:[#allocation2 + $0x3f4] ss:$392 sps:$4 sm:$0xff]  }
 0x39d   :  { %21843 = vmatpush3.bf16.msra.mxu1 %v23848_v10  ;;  %v23891_v10 = vld [vmem:[#allocation2 + $0xdc] ss:$392 sps:$4 sm:$0xff]  }
 0x39e   :  { %21819 = vmatpush3.bf16.msra.mxu0 %v23843_v9  ;;  %21872 = vmatprep.subr.bf16.mxu1 %v23856_v24  ;;  %v23884_v9 = vld [vmem:[#allocation5 + $0x1bf8] sm:$0xff]   ;;  %v1436_v20 = vrot.slane %v23891_v10, %v24852_v37 }
 0x39f   :  { %21820 = vmatprep.subr.bf16.mxu0 %v23845_v7  ;;  %v23886_v7 = vld [vmem:[#allocation5 + $0x1bb8] sm:$0xff]  }
 0x3a0   :  { %17307 = vmatmul.mubr.bf16.vlgmr.msra.gmra.mrb[104].mxu1 %v2513_v31  ;;  %v1454_v19 = vcombine.high %v1436_v20, %v1450_v16  ;;  %v1453_v26 = vcombine.low %v1436_v20, %v1450_v16  ;;  %v23900_v31 = vld [vmem:[#allocation5 + $0x1c88] sm:$0xff]  }
 0x3a1   :  { %21873 = vmatpush3.bf16.msra.mxu1 %v23858_v30 }
 0x3a2   :  { %21821 = vmatpush3.bf16.msra.mxu0 %v23847_v14  ;;  %21874 = vmatprep.subr.bf16.mxu1 %v23860_v38  ;;  %v23889_v14 = vld [vmem:[#allocation2 + $0x3e8] ss:$392 sps:$4 sm:$0xff]   ;;  %v2518_v25 = vpack.c.bf16 %v1454_v19, %v1454_v19  ;;  %v2517_v32 = vpack.c.bf16 %v1453_v26, %v1453_v26 }
 0x3a3   :  { %21850 = vmatprep.subr.bf16.mxu0 %v23855_v23  ;;  %v1443_v18 = vrot.slane %v23889_v14, %v24852_v37  ;;  %v23901_v38 = vld [vmem:[#allocation5 + $0x1c50] sm:$0xff]  }
 0x3a4   :  { %17386 = vmatprep.mubr.bf16.mxu1 %v2518_v25 }
 0x3a5   :  { %17267 = vmatmul.mubr.bf16.vlgmr.msra.gmra.mrb[104].mxu0 %v2511_v28  ;;  %21875 = vmatpush3.bf16.msra.mxu1 %v23862_v34  ;;  %v1452_v23 = vcombine.high %v1429_v17, %v1443_v18  ;;  %v1451_v24 = vcombine.low %v1429_v17, %v1443_v18  ;;  %v23897_v28 = vld [vmem:[#allocation5 + $0x1c48] sm:$0xff]   ;;  %v23903_v34 = vld [vmem:[#allocation5 + $0x1c10] sm:$0xff]   ;;  %v23932_v18 = vld [vmem:[#allocation5 + $0x1dc0] sm:$0xff]  }
 0x3a6   :  { %21851 = vmatpush3.bf16.msra.mxu0 %v23857_v27  ;;  %21876 = vmatprep.subr.bf16.mxu1 %v23864_v42  ;;  %v23896_v27 = vld [vmem:[#allocation5 + $0x1c80] sm:$0xff]   ;;  %v23904_v42 = vld [vmem:[#allocation5 + $0x1c90] sm:$0xff]  }
 0x3a7   :  { %21852 = vmatprep.subr.bf16.mxu0 %v23859_v33  ;;  %v2516_v29 = vpack.c.bf16 %v1452_v23, %v1452_v23  ;;  %v2515_v30 = vpack.c.bf16 %v1451_v24, %v1451_v24  ;;  %v23898_v33 = vld [vmem:[#allocation5 + $0x1cc8] sm:$0xff]   ;;  %v23934_v24 = vld [vmem:[#allocation5 + $0x1d80] sm:$0xff]  }
 0x3a9   :  { %21877 = vmatpush3.bf16.msra.mxu1 %v23866_v41  ;;  %17346 = vmatprep.mubr.bf16.mxu0 %v2516_v29 }
 0x3aa   :  { %21853 = vmatpush3.bf16.msra.mxu0 %v23861_v39  ;;  %21878 = vmatprep.subr.bf16.mxu1 %v23868_v44  ;;  %v23902_v39 = vld [vmem:[#allocation5 + $0x1cd0] sm:$0xff]   ;;  %v23907_v44 = vld [vmem:[#allocation5 + $0x1c18] sm:$0xff]  }
 0x3ab   :  { %21854 = vmatprep.subr.bf16.mxu0 %v23863_v40 }
 0x3ad   :  { %21879 = vmatpush3.bf16.msra.mxu1 %v23870_v54  ;;  %v23909_v54 = vld [vmem:[#allocation5 + $0x1c60] sm:$0xff]  }
 0x3ae   :  { %21855 = vmatpush3.bf16.msra.mxu0 %v23865_v36  ;;  %21880 = vmatprep.subr.bf16.mxu1 %v23872_v58  ;;  %v23911_v58 = vld [vmem:[#allocation5 + $0x1c20] sm:$0xff]  }
 0x3af   :  { %21856 = vmatprep.subr.bf16.mxu0 %v23867_v47 }
 0x3b1   :  { %21881 = vmatpush3.bf16.msra.mxu1 %v23874_v63  ;;  %v23914_v63 = vld [vmem:[#allocation5 + $0x1ce8] sm:$0xff]  }
 0x3b2   :  { %21857 = vmatpush3.bf16.msra.mxu0 %v23869_v46  ;;  %21882 = vmatprep.subr.bf16.mxu1 %v23876_v2  ;;  %v23908_v46 = vld [vmem:[#allocation5 + $0x1c98] sm:$0xff]   ;;  %v23917_v2 = vld [vmem:[#allocation5 + $0x1c70] sm:$0xff]  }
 0x3b3   :  { %v21580_v45 = vpop.f32.mrb[80].mxu1  ;;  %21858 = vmatprep.subr.bf16.mxu0 %v23871_v53 }
 0x3b4   :  { %v21581_v51 = vpop.f32.mrb[81].mxu1 }
 0x3b5   :  { %v21558_v43 = vpop.f32.mrb[80].mxu0  ;;  %v21582_v52 = vadd.f32 %v21581_v51, %v21580_v45  ;;  %v21583_v56 = vpop.f32.mrb[82].mxu1  ;;  %21883 = vmatpush3.bf16.msra.mxu1 %v23878_v3  ;;  %v23906_v45 = vld [vmem:[#allocation5 + $0x1cd8] sm:$0xff]   ;;  %v23919_v3 = vld [vmem:[#allocation5 + $0x1c30] sm:$0xff]  }
 0x3b6   :  { %v21559_v48 = vpop.f32.mrb[81].mxu0  ;;  %v21584_v60 = vpop.f32.mrb[83].mxu1  ;;  %21859 = vmatpush3.bf16.msra.mxu0 %v23873_v61  ;;  %21884 = vmatprep.subr.bf16.mxu1 %v23880_v1  ;;  %v23910_v56 = vld [vmem:[#allocation5 + $0x1ce0] sm:$0xff]   ;;  %v23913_v61 = vld [vmem:[#allocation5 + $0x1c68] sm:$0xff]   ;;  %v23921_v1 = vld [vmem:[#allocation5 + $0x1c78] sm:$0xff]  }
 0x3b7   :  { %v21560_v49 = vadd.f32 %v21559_v48, %v21558_v43  ;;  %v21561_v50 = vpop.f32.mrb[82].mxu0  ;;  %21860 = vmatprep.subr.bf16.mxu0 %v23875_v0  ;;  %v23905_v43 = vld [vmem:[#allocation5 + $0x1c58] sm:$0xff]   ;;  %v23912_v60 = vld [vmem:[#allocation5 + $0x1ca0] sm:$0xff]   ;;  %v23916_v0 = vld [vmem:[#allocation5 + $0x1ca8] sm:$0xff]  }
 0x3b8   :  { %v21562_v57 = vpop.f32.mrb[83].mxu0 }
 0x3b9   :  { %v16789_v55 = vadd.f32 %v21560_v49, %v25015_v62  ;;  %v23877_v62 = vld [vmem:[#allocation5 + $0x1b28] sm:$0xff]   ;;  %21885 = vmatpush3.bf16.msra.mxu1 %v23882_v8  ;;  %v23923_v8 = vld [vmem:[#allocation5 + $0x1c38] sm:$0xff]  }
 0x3ba   :  { %21861 = vmatpush3.bf16.msra.mxu0 %v23877_v62  ;;  %21886 = vmatprep.subr.bf16.mxu1 %v23884_v9  ;;  %v23918_v62 = vld [vmem:[#allocation5 + $0x1cf0] sm:$0xff]   ;;  %v23925_v9 = vld [vmem:[#allocation2 + $0xe0] ss:$392 sps:$4 sm:$0xff]  }
 0x3bb   :  { %v25022_v59 = vadd.f32 %v21582_v52, %v16789_v55  ;;  %21862 = vmatprep.subr.bf16.mxu0 %v23879_v5  ;;  %v23920_v5 = vld [vmem:[#allocation5 + $0x1cb0] sm:$0xff]   ;;  %v1465_v14 = vrot.slane %v23925_v9, %v24852_v37  ;;  %v23968_v9 = vld [vmem:[#allocation2 + $0x3fc] ss:$392 sps:$4 sm:$0xff]  }
 0x3bd   :  { %21887 = vmatpush3.bf16.msra.mxu1 %v23886_v7  ;;  %v23929_v7 = vld [vmem:[#allocation2 + $0xe4] ss:$392 sps:$4 sm:$0xff]  }
 0x3be   :  { %21863 = vmatpush3.bf16.msra.mxu0 %v23881_v6  ;;  %21916 = vmatprep.subr.bf16.mxu1 %v23894_v21  ;;  %v23922_v6 = vld [vmem:[#allocation5 + $0x1cf8] sm:$0xff]   ;;  %v1472_v17 = vrot.slane %v23929_v7, %v24852_v37  ;;  %v23933_v21 = vld [vmem:[#allocation5 + $0x1d00] sm:$0xff]  }
 0x3bf   :  { %21864 = vmatprep.subr.bf16.mxu0 %v23883_v4  ;;  %v23924_v4 = vld [vmem:[#allocation5 + $0x1cb8] sm:$0xff]  }
 0x3c0   :  { %17387 = vmatmul.mubr.bf16.vlgmr.msra.gmra.mrb[108].mxu1 %v2517_v32  ;;  %v23937_v32 = vld [vmem:[#allocation5 + $0x1d08] sm:$0xff]  }
 0x3c1   :  { %21917 = vmatpush3.bf16.msra.mxu1 %v23896_v27  ;;  %v23935_v27 = vld [vmem:[#allocation5 + $0x1d48] sm:$0xff]  }
 0x3c2   :  { %21865 = vmatpush3.bf16.msra.mxu0 %v23885_v11  ;;  %21918 = vmatprep.subr.bf16.mxu1 %v23898_v33  ;;  %v23927_v11 = vld [vmem:[#allocation2 + $0x3f0] ss:$392 sps:$4 sm:$0xff]  }
 0x3c3   :  { %21894 = vmatprep.subr.bf16.mxu0 %v23893_v13  ;;  %v1479_v10 = vrot.slane %v23927_v11, %v24852_v37  ;;  %v1486_v13 = vrot.slane %v23930_v12, %v24852_v37  ;;  %v23939_v33 = vld [vmem:[#allocation5 + $0x1d50] sm:$0xff]  }
 0x3c5   :  { %17347 = vmatmul.mubr.bf16.vlgmr.msra.gmra.mrb[108].mxu0 %v2515_v30  ;;  %21919 = vmatpush3.bf16.msra.mxu1 %v23900_v31  ;;  %v1488_v20 = vcombine.high %v1465_v14, %v1479_v10  ;;  %v1487_v16 = vcombine.low %v1465_v14, %v1479_v10  ;;  %v1490_v23 = vcombine.high %v1472_v17, %v1486_v13  ;;  %v23936_v30 = vld [vmem:[#allocation5 + $0x1dc8] sm:$0xff]   ;;  %v23941_v31 = vld [vmem:[#allocation5 + $0x1d10] sm:$0xff]   ;;  %v23969_v14 = vld [vmem:[#allocation5 + $0x1e40] sm:$0xff]  }
 0x3c6   :  { %21895 = vmatpush3.bf16.msra.mxu0 %v23895_v22  ;;  %21920 = vmatprep.subr.bf16.mxu1 %v23902_v39  ;;  %v1489_v19 = vcombine.low %v1472_v17, %v1486_v13  ;;  %v23942_v39 = vld [vmem:[#allocation5 + $0x1d90] sm:$0xff]   ;;  %v1522_v10 = vrot.slane %v23968_v9, %v24852_v37 }
 0x3c7   :  { %21896 = vmatprep.subr.bf16.mxu0 %v23897_v28  ;;  %v2520_v26 = vpack.c.bf16 %v1488_v20, %v1488_v20  ;;  %v2519_v22 = vpack.c.bf16 %v1487_v16, %v1487_v16  ;;  %v2522_v29 = vpack.c.bf16 %v1490_v23, %v1490_v23  ;;  %v23938_v28 = vld [vmem:[#allocation5 + $0x1d88] sm:$0xff]  }
 0x3c8   :  { %v2521_v25 = vpack.c.bf16 %v1489_v19, %v1489_v19 }
 0x3c9   :  { %21921 = vmatpush3.bf16.msra.mxu1 %v23904_v42  ;;  %17426 = vmatprep.mubr.bf16.mxu0 %v2520_v26 }
 0x3ca   :  { %21897 = vmatpush3.bf16.msra.mxu0 %v23899_v35  ;;  %21922 = vmatprep.subr.bf16.mxu1 %v23906_v45  ;;  %v23940_v35 = vld [vmem:[#allocation5 + $0x1dd0] sm:$0xff]   ;;  %v23945_v45 = vld [vmem:[#allocation5 + $0x1d18] sm:$0xff]  }
 0x3cb   :  { %21898 = vmatprep.subr.bf16.mxu0 %v23901_v38  ;;  %17466 = vmatprep.mubr.bf16.mxu1 %v2522_v29  ;;  %v23975_v29 = vld [vmem:[#allocation5 + $0x1e08] sm:$0xff]  }
 0x3cd   :  { %21923 = vmatpush3.bf16.msra.mxu1 %v23908_v46  ;;  %v23947_v46 = vld [vmem:[#allocation5 + $0x1d60] sm:$0xff]  }
 0x3ce   :  { %21899 = vmatpush3.bf16.msra.mxu0 %v23903_v34  ;;  %21924 = vmatprep.subr.bf16.mxu1 %v23910_v56  ;;  %v23949_v56 = vld [vmem:[#allocation5 + $0x1d20] sm:$0xff]  }
 0x3cf   :  { %21900 = vmatprep.subr.bf16.mxu0 %v23905_v43 }
 0x3d1   :  { %21925 = vmatpush3.bf16.msra.mxu1 %v23912_v60  ;;  %v23952_v60 = vld [vmem:[#allocation5 + $0x1de8] sm:$0xff]  }
 0x3d2   :  { %21901 = vmatpush3.bf16.msra.mxu0 %v23907_v44  ;;  %21926 = vmatprep.subr.bf16.mxu1 %v23914_v63  ;;  %v23946_v44 = vld [vmem:[#allocation5 + $0x1d98] sm:$0xff]   ;;  %v23955_v63 = vld [vmem:[#allocation5 + $0x1d70] sm:$0xff]  }
 0x3d3   :  { %v21624_v36 = vpop.f32.mrb[84].mxu1  ;;  %21902 = vmatprep.subr.bf16.mxu0 %v23909_v54 }
 0x3d4   :  { %v21625_v48 = vpop.f32.mrb[85].mxu1 }
 0x3d5   :  { %v21602_v40 = vpop.f32.mrb[84].mxu0  ;;  %v21626_v49 = vadd.f32 %v21625_v48, %v21624_v36  ;;  %v21627_v50 = vpop.f32.mrb[86].mxu1  ;;  %21927 = vmatpush3.bf16.msra.mxu1 %v23916_v0  ;;  %v23944_v36 = vld [vmem:[#allocation5 + $0x1dd8] sm:$0xff]   ;;  %v23957_v0 = vld [vmem:[#allocation5 + $0x1d30] sm:$0xff]  }
 0x3d6   :  { %v21603_v41 = vpop.f32.mrb[85].mxu0  ;;  %v21628_v57 = vpop.f32.mrb[87].mxu1  ;;  %21903 = vmatpush3.bf16.msra.mxu0 %v23911_v58  ;;  %21928 = vmatprep.subr.bf16.mxu1 %v23918_v62  ;;  %v23948_v50 = vld [vmem:[#allocation5 + $0x1de0] sm:$0xff]   ;;  %v23951_v58 = vld [vmem:[#allocation5 + $0x1d68] sm:$0xff]   ;;  %v23959_v62 = vld [vmem:[#allocation5 + $0x1d78] sm:$0xff]  }
 0x3d7   :  { %v21604_v47 = vadd.f32 %v21603_v41, %v21602_v40  ;;  %v21605_v51 = vpop.f32.mrb[86].mxu0  ;;  %21904 = vmatprep.subr.bf16.mxu0 %v23913_v61  ;;  %v23943_v40 = vld [vmem:[#allocation5 + $0x1d58] sm:$0xff]   ;;  %v23950_v57 = vld [vmem:[#allocation5 + $0x1da0] sm:$0xff]   ;;  %v23954_v61 = vld [vmem:[#allocation5 + $0x1da8] sm:$0xff]  }
 0x3d8   :  { %v21606_v55 = vpop.f32.mrb[87].mxu0 }
 0x3d9   :  { %v16869_v52 = vadd.f32 %v21604_v47, %v25022_v59  ;;  %v23915_v59 = vld [vmem:[#allocation5 + $0x1c28] sm:$0xff]   ;;  %21929 = vmatpush3.bf16.msra.mxu1 %v23920_v5  ;;  %v23961_v5 = vld [vmem:[#allocation5 + $0x1d38] sm:$0xff]  }
 0x3da   :  { %21905 = vmatpush3.bf16.msra.mxu0 %v23915_v59  ;;  %21930 = vmatprep.subr.bf16.mxu1 %v23922_v6  ;;  %v23956_v59 = vld [vmem:[#allocation5 + $0x1df0] sm:$0xff]  }
 0x3db   :  { %v25029_v53 = vadd.f32 %v21626_v49, %v16869_v52  ;;  %21906 = vmatprep.subr.bf16.mxu0 %v23917_v2  ;;  %v23958_v2 = vld [vmem:[#allocation5 + $0x1db0] sm:$0xff]  }
 0x3dc   :  { %v23963_v6 = vld [vmem:[#allocation2 + $0xe8] ss:$392 sps:$4 sm:$0xff]  }
 0x3dd   :  { %21931 = vmatpush3.bf16.msra.mxu1 %v23924_v4  ;;  %v23967_v4 = vld [vmem:[#allocation2 + $0xec] ss:$392 sps:$4 sm:$0xff]   ;;  %v1501_v11 = vrot.slane %v23963_v6, %v24852_v37 }
 0x3de   :  { %21907 = vmatpush3.bf16.msra.mxu0 %v23919_v3  ;;  %21960 = vmatprep.subr.bf16.mxu1 %v23932_v18  ;;  %v23960_v3 = vld [vmem:[#allocation5 + $0x1df8] sm:$0xff]   ;;  %v1508_v12 = vrot.slane %v23967_v4, %v24852_v37  ;;  %v23971_v18 = vld [vmem:[#allocation5 + $0x1e00] sm:$0xff]  }
 0x3df   :  { %21908 = vmatprep.subr.bf16.mxu0 %v23921_v1  ;;  %v23962_v1 = vld [vmem:[#allocation5 + $0x1db8] sm:$0xff]   ;;  %v24006_v6 = vld [vmem:[#allocation2 + $0x404] ss:$392 sps:$4 sm:$0xff]  }
 0x3e0   :  { %17467 = vmatmul.mubr.bf16.vlgmr.msra.gmra.mrb[112].mxu1 %v2521_v25  ;;  %v1526_v20 = vcombine.high %v1508_v12, %v1522_v10  ;;  %v1525_v16 = vcombine.low %v1508_v12, %v1522_v10  ;;  %v23976_v25 = vld [vmem:[#allocation5 + $0x1e88] sm:$0xff]   ;;  %v24007_v4 = vld [vmem:[#allocation5 + $0x1f40] sm:$0xff]  }
 0x3e1   :  { %21961 = vmatpush3.bf16.msra.mxu1 %v23934_v24  ;;  %v23973_v24 = vld [vmem:[#allocation5 + $0x1e48] sm:$0xff]   ;;  %v24008_v12 = vld [vmem:[#allocation5 + $0x1fc0] sm:$0xff]  }
 0x3e2   :  { %21909 = vmatpush3.bf16.msra.mxu0 %v23923_v8  ;;  %21962 = vmatprep.subr.bf16.mxu1 %v23936_v30  ;;  %v23965_v8 = vld [vmem:[#allocation2 + $0x3f8] ss:$392 sps:$4 sm:$0xff]   ;;  %v2526_v26 = vpack.c.bf16 %v1526_v20, %v1526_v20  ;;  %v23977_v30 = vld [vmem:[#allocation5 + $0x1e50] sm:$0xff]  }
 0x3e3   :  { %21938 = vmatprep.subr.bf16.mxu0 %v23931_v15  ;;  %v1515_v7 = vrot.slane %v23965_v8, %v24852_v37  ;;  %v23970_v15 = vld [vmem:[#allocation5 + $0x1ec0] sm:$0xff]  }
 0x3e4   :  { %17546 = vmatprep.mubr.bf16.mxu1 %v2526_v26  ;;  %v24013_v26 = vld [vmem:[#allocation5 + $0x1f08] sm:$0xff]  }
 0x3e5   :  { %17427 = vmatmul.mubr.bf16.vlgmr.msra.gmra.mrb[112].mxu0 %v2519_v22  ;;  %21963 = vmatpush3.bf16.msra.mxu1 %v23938_v28  ;;  %v1524_v17 = vcombine.high %v1501_v11, %v1515_v7  ;;  %v1523_v13 = vcombine.low %v1501_v11, %v1515_v7  ;;  %v2525_v22 = vpack.c.bf16 %v1525_v16, %v1525_v16  ;;  %v23979_v28 = vld [vmem:[#allocation5 + $0x1e10] sm:$0xff]  }
 0x3e6   :  { %21939 = vmatpush3.bf16.msra.mxu0 %v23933_v21  ;;  %21964 = vmatprep.subr.bf16.mxu1 %v23940_v35  ;;  %v23972_v21 = vld [vmem:[#allocation5 + $0x1e80] sm:$0xff]   ;;  %v23980_v35 = vld [vmem:[#allocation5 + $0x1e90] sm:$0xff]   ;;  %v1558_v7 = vrot.slane %v24006_v6, %v24852_v37 }
 0x3e7   :  { %21940 = vmatprep.subr.bf16.mxu0 %v23935_v27  ;;  %v2524_v23 = vpack.c.bf16 %v1524_v17, %v1524_v17  ;;  %v2523_v19 = vpack.c.bf16 %v1523_v13, %v1523_v13  ;;  %v23974_v27 = vld [vmem:[#allocation5 + $0x1ec8] sm:$0xff]   ;;  %v24009_v13 = vld [vmem:[#allocation5 + $0x1f00] sm:$0xff]  }
 0x3e8   :  { %v24045_v6 = vld [vmem:[#allocation5 + $0x2040] sm:$0xff]  }
 0x3e9   :  { %21965 = vmatpush3.bf16.msra.mxu1 %v23942_v39  ;;  %17506 = vmatprep.mubr.bf16.mxu0 %v2524_v23 }
 0x3ea   :  { %21941 = vmatpush3.bf16.msra.mxu0 %v23937_v32  ;;  %21966 = vmatprep.subr.bf16.mxu1 %v23944_v36  ;;  %v23978_v32 = vld [vmem:[#allocation5 + $0x1ed0] sm:$0xff]   ;;  %v23983_v36 = vld [vmem:[#allocation5 + $0x1e18] sm:$0xff]  }
 0x3eb   :  { %21942 = vmatprep.subr.bf16.mxu0 %v23939_v33 }
 0x3ed   :  { %21967 = vmatpush3.bf16.msra.mxu1 %v23946_v44  ;;  %v23985_v44 = vld [vmem:[#allocation5 + $0x1e60] sm:$0xff]  }
 0x3ee   :  { %21943 = vmatpush3.bf16.msra.mxu0 %v23941_v31  ;;  %21968 = vmatprep.subr.bf16.mxu1 %v23948_v50  ;;  %v23987_v50 = vld [vmem:[#allocation5 + $0x1e20] sm:$0xff]  }
 0x3ef   :  { %21944 = vmatprep.subr.bf16.mxu0 %v23943_v40 }
 0x3f1   :  { %21969 = vmatpush3.bf16.msra.mxu1 %v23950_v57  ;;  %v23990_v57 = vld [vmem:[#allocation5 + $0x1ee8] sm:$0xff]  }
 0x3f2   :  { %21945 = vmatpush3.bf16.msra.mxu0 %v23945_v45  ;;  %21970 = vmatprep.subr.bf16.mxu1 %v23952_v60  ;;  %v23984_v45 = vld [vmem:[#allocation5 + $0x1e98] sm:$0xff]   ;;  %v23993_v60 = vld [vmem:[#allocation5 + $0x1e70] sm:$0xff]  }
 0x3f3   :  { %v21668_v34 = vpop.f32.mrb[88].mxu1  ;;  %21946 = vmatprep.subr.bf16.mxu0 %v23947_v46 }
 0x3f4   :  { %v21669_v41 = vpop.f32.mrb[89].mxu1 }
 0x3f5   :  { %v21646_v38 = vpop.f32.mrb[88].mxu0  ;;  %v21670_v47 = vadd.f32 %v21669_v41, %v21668_v34  ;;  %v21671_v51 = vpop.f32.mrb[90].mxu1  ;;  %21971 = vmatpush3.bf16.msra.mxu1 %v23954_v61  ;;  %v23982_v34 = vld [vmem:[#allocation5 + $0x1ed8] sm:$0xff]   ;;  %v23995_v61 = vld [vmem:[#allocation5 + $0x1e30] sm:$0xff]  }
 0x3f6   :  { %v21647_v42 = vpop.f32.mrb[89].mxu0  ;;  %v21672_v55 = vpop.f32.mrb[91].mxu1  ;;  %21947 = vmatpush3.bf16.msra.mxu0 %v23949_v56  ;;  %21972 = vmatprep.subr.bf16.mxu1 %v23956_v59  ;;  %v23986_v51 = vld [vmem:[#allocation5 + $0x1ee0] sm:$0xff]   ;;  %v23989_v56 = vld [vmem:[#allocation5 + $0x1e68] sm:$0xff]   ;;  %v23997_v59 = vld [vmem:[#allocation5 + $0x1e78] sm:$0xff]  }
 0x3f7   :  { %v21648_v43 = vadd.f32 %v21647_v42, %v21646_v38  ;;  %v21649_v48 = vpop.f32.mrb[90].mxu0  ;;  %21948 = vmatprep.subr.bf16.mxu0 %v23951_v58  ;;  %v23981_v38 = vld [vmem:[#allocation5 + $0x1e58] sm:$0xff]   ;;  %v23988_v55 = vld [vmem:[#allocation5 + $0x1ea0] sm:$0xff]   ;;  %v23992_v58 = vld [vmem:[#allocation5 + $0x1ea8] sm:$0xff]  }
 0x3f8   :  { %v21650_v52 = vpop.f32.mrb[91].mxu0 }
 0x3f9   :  { %v16949_v49 = vadd.f32 %v21648_v43, %v25029_v53  ;;  %v23953_v53 = vld [vmem:[#allocation5 + $0x1d28] sm:$0xff]   ;;  %21973 = vmatpush3.bf16.msra.mxu1 %v23958_v2  ;;  %v23999_v2 = vld [vmem:[#allocation5 + $0x1e38] sm:$0xff]  }
 0x3fa   :  { %21949 = vmatpush3.bf16.msra.mxu0 %v23953_v53  ;;  %21974 = vmatprep.subr.bf16.mxu1 %v23960_v3  ;;  %v23994_v53 = vld [vmem:[#allocation5 + $0x1ef0] sm:$0xff]  }
 0x3fb   :  { %v25036_v54 = vadd.f32 %v21670_v47, %v16949_v49  ;;  %21950 = vmatprep.subr.bf16.mxu0 %v23955_v63  ;;  %v23996_v63 = vld [vmem:[#allocation5 + $0x1eb0] sm:$0xff]  }
 0x3fc   :  { %v24001_v3 = vld [vmem:[#allocation2 + $0xf0] ss:$392 sps:$4 sm:$0xff]  }
 0x3fd   :  { %21975 = vmatpush3.bf16.msra.mxu1 %v23962_v1  ;;  %v24005_v1 = vld [vmem:[#allocation2 + $0xf4] ss:$392 sps:$4 sm:$0xff]   ;;  %v1537_v8 = vrot.slane %v24001_v3, %v24852_v37 }
 0x3fe   :  { %21951 = vmatpush3.bf16.msra.mxu0 %v23957_v0  ;;  %22004 = vmatprep.subr.bf16.mxu1 %v23970_v15  ;;  %v23998_v0 = vld [vmem:[#allocation5 + $0x1ef8] sm:$0xff]   ;;  %v1544_v11 = vrot.slane %v24005_v1, %v24852_v37  ;;  %v24044_v3 = vld [vmem:[#allocation2 + $0x40c] ss:$392 sps:$4 sm:$0xff]  }
 0x3ff   :  { %21952 = vmatprep.subr.bf16.mxu0 %v23959_v62  ;;  %v24000_v62 = vld [vmem:[#allocation5 + $0x1eb8] sm:$0xff]  }
 0x400   :  { %17547 = vmatmul.mubr.bf16.vlgmr.msra.gmra.mrb[116].mxu1 %v2525_v22  ;;  %v1562_v10 = vcombine.high %v1544_v11, %v1558_v7  ;;  %v1561_v17 = vcombine.low %v1544_v11, %v1558_v7  ;;  %v24014_v22 = vld [vmem:[#allocation5 + $0x1f88] sm:$0xff]  }
 0x401   :  { %22005 = vmatpush3.bf16.msra.mxu1 %v23972_v21 }
 0x402   :  { %21953 = vmatpush3.bf16.msra.mxu0 %v23961_v5  ;;  %22006 = vmatprep.subr.bf16.mxu1 %v23974_v27  ;;  %v24003_v5 = vld [vmem:[#allocation2 + $0x400] ss:$392 sps:$4 sm:$0xff]   ;;  %v2530_v16 = vpack.c.bf16 %v1562_v10, %v1562_v10  ;;  %v2529_v23 = vpack.c.bf16 %v1561_v17, %v1561_v17  ;;  %v24015_v27 = vld [vmem:[#allocation5 + $0x1f50] sm:$0xff]  }
 0x403   :  { %21982 = vmatprep.subr.bf16.mxu0 %v23969_v14  ;;  %v1551_v9 = vrot.slane %v24003_v5, %v24852_v37 }
 0x404   :  { %17626 = vmatprep.mubr.bf16.mxu1 %v2530_v16 }
 0x405   :  { %17507 = vmatmul.mubr.bf16.vlgmr.msra.gmra.mrb[116].mxu0 %v2523_v19  ;;  %22007 = vmatpush3.bf16.msra.mxu1 %v23976_v25  ;;  %v1560_v14 = vcombine.high %v1537_v8, %v1551_v9  ;;  %v1559_v15 = vcombine.low %v1537_v8, %v1551_v9  ;;  %v24011_v19 = vld [vmem:[#allocation5 + $0x1f48] sm:$0xff]   ;;  %v24017_v25 = vld [vmem:[#allocation5 + $0x1f10] sm:$0xff]   ;;  %v24046_v9 = vld [vmem:[#allocation5 + $0x20c0] sm:$0xff]  }
 0x406   :  { %21983 = vmatpush3.bf16.msra.mxu0 %v23971_v18  ;;  %22008 = vmatprep.subr.bf16.mxu1 %v23978_v32  ;;  %v24010_v18 = vld [vmem:[#allocation5 + $0x1f80] sm:$0xff]   ;;  %v24018_v32 = vld [vmem:[#allocation5 + $0x1f90] sm:$0xff]  }
 0x407   :  { %21984 = vmatprep.subr.bf16.mxu0 %v23973_v24  ;;  %v2528_v20 = vpack.c.bf16 %v1560_v14, %v1560_v14  ;;  %v2527_v21 = vpack.c.bf16 %v1559_v15, %v1559_v15  ;;  %v24012_v24 = vld [vmem:[#allocation5 + $0x1fc8] sm:$0xff]   ;;  %v24048_v15 = vld [vmem:[#allocation5 + $0x2080] sm:$0xff]  }
 0x409   :  { %22009 = vmatpush3.bf16.msra.mxu1 %v23980_v35  ;;  %17586 = vmatprep.mubr.bf16.mxu0 %v2528_v20 }
 0x40a   :  { %21985 = vmatpush3.bf16.msra.mxu0 %v23975_v29  ;;  %22010 = vmatprep.subr.bf16.mxu1 %v23982_v34  ;;  %v24016_v29 = vld [vmem:[#allocation5 + $0x1fd0] sm:$0xff]   ;;  %v24021_v34 = vld [vmem:[#allocation5 + $0x1f18] sm:$0xff]  }
 0x40b   :  { %21986 = vmatprep.subr.bf16.mxu0 %v23977_v30 }
 0x40d   :  { %22011 = vmatpush3.bf16.msra.mxu1 %v23984_v45  ;;  %v24023_v45 = vld [vmem:[#allocation5 + $0x1f60] sm:$0xff]  }
 0x40e   :  { %21987 = vmatpush3.bf16.msra.mxu0 %v23979_v28  ;;  %22012 = vmatprep.subr.bf16.mxu1 %v23986_v51  ;;  %v24025_v51 = vld [vmem:[#allocation5 + $0x1f20] sm:$0xff]  }
 0x40f   :  { %21988 = vmatprep.subr.bf16.mxu0 %v23981_v38 }
 0x411   :  { %22013 = vmatpush3.bf16.msra.mxu1 %v23988_v55  ;;  %v24028_v55 = vld [vmem:[#allocation5 + $0x1fe8] sm:$0xff]  }
 0x412   :  { %21989 = vmatpush3.bf16.msra.mxu0 %v23983_v36  ;;  %22014 = vmatprep.subr.bf16.mxu1 %v23990_v57  ;;  %v24022_v36 = vld [vmem:[#allocation5 + $0x1f98] sm:$0xff]   ;;  %v24031_v57 = vld [vmem:[#allocation5 + $0x1f70] sm:$0xff]  }
 0x413   :  { %v21712_v31 = vpop.f32.mrb[92].mxu1  ;;  %21990 = vmatprep.subr.bf16.mxu0 %v23985_v44 }
 0x414   :  { %v21713_v42 = vpop.f32.mrb[93].mxu1 }
 0x415   :  { %v21714_v43 = vadd.f32 %v21713_v42, %v21712_v31  ;;  %v21715_v48 = vpop.f32.mrb[94].mxu1  ;;  %22015 = vmatpush3.bf16.msra.mxu1 %v23992_v58  ;;  %v24020_v31 = vld [vmem:[#allocation5 + $0x1fd8] sm:$0xff]   ;;  %v24033_v58 = vld [vmem:[#allocation5 + $0x1f30] sm:$0xff]  }
 0x416   :  { %v21716_v52 = vpop.f32.mrb[95].mxu1  ;;  %21991 = vmatpush3.bf16.msra.mxu0 %v23987_v50  ;;  %22016 = vmatprep.subr.bf16.mxu1 %v23994_v53  ;;  %v24024_v48 = vld [vmem:[#allocation5 + $0x1fe0] sm:$0xff]   ;;  %v24027_v50 = vld [vmem:[#allocation5 + $0x1f68] sm:$0xff]   ;;  %v24035_v53 = vld [vmem:[#allocation5 + $0x1f78] sm:$0xff]  }
 0x417   :  { %21992 = vmatprep.subr.bf16.mxu0 %v23989_v56  ;;  %v24026_v52 = vld [vmem:[#allocation5 + $0x1fa0] sm:$0xff]   ;;  %v24030_v56 = vld [vmem:[#allocation5 + $0x1fa8] sm:$0xff]  }
 0x418   :  { %v21690_v33 = vpop.f32.mrb[92].mxu0 }
 0x419   :  { %v21691_v39 = vpop.f32.mrb[93].mxu0  ;;  %22017 = vmatpush3.bf16.msra.mxu1 %v23996_v63  ;;  %v24037_v63 = vld [vmem:[#allocation5 + $0x1f38] sm:$0xff]  }
 0x41a   :  { %v21692_v40 = vadd.f32 %v21691_v39, %v21690_v33  ;;  %v21693_v41 = vpop.f32.mrb[94].mxu0  ;;  %22018 = vmatprep.subr.bf16.mxu1 %v23998_v0  ;;  %v24019_v33 = vld [vmem:[#allocation5 + $0x1f58] sm:$0xff]  }
 0x41b   :  { %v21694_v49 = vpop.f32.mrb[95].mxu0  ;;  %v24039_v0 = vld [vmem:[#allocation2 + $0xf8] ss:$392 sps:$4 sm:$0xff]  }
 0x41c   :  { %v17029_v47 = vadd.f32 %v21692_v40, %v25036_v54  ;;  %v23991_v54 = vld [vmem:[#allocation5 + $0x1e28] sm:$0xff]   ;;  %v1573_v5 = vrot.slane %v24039_v0, %v24852_v37  ;;  %v24082_v0 = vld [vmem:[#allocation2 + $0x414] ss:$392 sps:$4 sm:$0xff]  }
 0x41d   :  { %21993 = vmatpush3.bf16.msra.mxu0 %v23991_v54  ;;  %22019 = vmatpush3.bf16.msra.mxu1 %v24000_v62  ;;  %v24032_v54 = vld [vmem:[#allocation5 + $0x1ff0] sm:$0xff]   ;;  %v24043_v62 = vld [vmem:[#allocation2 + $0xfc] ss:$392 sps:$4 sm:$0xff]  }
 0x41e   :  { %v25043_v46 = vadd.f32 %v21714_v43, %v17029_v47  ;;  %21994 = vmatprep.subr.bf16.mxu0 %v23993_v60  ;;  %22048 = vmatprep.subr.bf16.mxu1 %v24008_v12  ;;  %v24034_v60 = vld [vmem:[#allocation5 + $0x1fb0] sm:$0xff]   ;;  %v1580_v8 = vrot.slane %v24043_v62, %v24852_v37  ;;  %v24047_v12 = vld [vmem:[#allocation5 + $0x2000] sm:$0xff]  }
 0x420   :  { %17627 = vmatmul.mubr.bf16.vlgmr.msra.gmra.mrb[120].mxu1 %v2529_v23  ;;  %v24051_v23 = vld [vmem:[#allocation5 + $0x2008] sm:$0xff]  }
 0x421   :  { %21995 = vmatpush3.bf16.msra.mxu0 %v23995_v61  ;;  %22049 = vmatpush3.bf16.msra.mxu1 %v24010_v18  ;;  %v24036_v61 = vld [vmem:[#allocation5 + $0x1ff8] sm:$0xff]   ;;  %v24049_v18 = vld [vmem:[#allocation5 + $0x2048] sm:$0xff]  }
 0x422   :  { %21996 = vmatprep.subr.bf16.mxu0 %v23997_v59  ;;  %22050 = vmatprep.subr.bf16.mxu1 %v24012_v24  ;;  %v24038_v59 = vld [vmem:[#allocation5 + $0x1fb8] sm:$0xff]   ;;  %v24053_v24 = vld [vmem:[#allocation5 + $0x2050] sm:$0xff]  }
 0x425   :  { %21997 = vmatpush3.bf16.msra.mxu0 %v23999_v2  ;;  %22051 = vmatpush3.bf16.msra.mxu1 %v24014_v22  ;;  %v24041_v2 = vld [vmem:[#allocation2 + $0x408] ss:$392 sps:$4 sm:$0xff]  }
 0x426   :  { %22026 = vmatprep.subr.bf16.mxu0 %v24007_v4  ;;  %22052 = vmatprep.subr.bf16.mxu1 %v24016_v29  ;;  %v1587_v1 = vrot.slane %v24041_v2, %v24852_v37  ;;  %v1594_v4 = vrot.slane %v24044_v3, %v24852_v37  ;;  %v24055_v22 = vld [vmem:[#allocation5 + $0x2010] sm:$0xff]  }
 0x427   :  { %v24056_v29 = vld [vmem:[#allocation5 + $0x2090] sm:$0xff]  }
 0x428   :  { %17587 = vmatmul.mubr.bf16.vlgmr.msra.gmra.mrb[120].mxu0 %v2527_v21  ;;  %v1596_v11 = vcombine.high %v1573_v5, %v1587_v1  ;;  %v1595_v7 = vcombine.low %v1573_v5, %v1587_v1  ;;  %v1598_v14 = vcombine.high %v1580_v8, %v1594_v4  ;;  %v1597_v10 = vcombine.low %v1580_v8, %v1594_v4  ;;  %v24050_v21 = vld [vmem:[#allocation5 + $0x20c8] sm:$0xff]   ;;  %v24083_v5 = vld [vmem:[#allocation5 + $0x2140] sm:$0xff]  }
 0x429   :  { %22027 = vmatpush3.bf16.msra.mxu0 %v24009_v13  ;;  %22053 = vmatpush3.bf16.msra.mxu1 %v24018_v32  ;;  %v1630_v1 = vrot.slane %v24082_v0, %v24852_v37 }
 0x42a   :  { %22028 = vmatprep.subr.bf16.mxu0 %v24011_v19  ;;  %22054 = vmatprep.subr.bf16.mxu1 %v24020_v31  ;;  %v2532_v17 = vpack.c.bf16 %v1596_v11, %v1596_v11  ;;  %v2531_v13 = vpack.c.bf16 %v1595_v7, %v1595_v7  ;;  %v2534_v20 = vpack.c.bf16 %v1598_v14, %v1598_v14  ;;  %v24052_v19 = vld [vmem:[#allocation5 + $0x2088] sm:$0xff]   ;;  %v24059_v31 = vld [vmem:[#allocation5 + $0x2018] sm:$0xff]  }
 0x42b   :  { %v2533_v16 = vpack.c.bf16 %v1597_v10, %v1597_v10 }
 0x42c   :  { %17666 = vmatprep.mubr.bf16.mxu0 %v2532_v17  ;;  %17706 = vmatprep.mubr.bf16.mxu1 %v2534_v20  ;;  %v24089_v20 = vld [vmem:[#allocation5 + $0x2108] sm:$0xff]  }
 0x42d   :  { %22029 = vmatpush3.bf16.msra.mxu0 %v24013_v26  ;;  %22055 = vmatpush3.bf16.msra.mxu1 %v24022_v36  ;;  %v24054_v26 = vld [vmem:[#allocation5 + $0x20d0] sm:$0xff]   ;;  %v24061_v36 = vld [vmem:[#allocation5 + $0x2060] sm:$0xff]  }
 0x42e   :  { %22030 = vmatprep.subr.bf16.mxu0 %v24015_v27  ;;  %22056 = vmatprep.subr.bf16.mxu1 %v24024_v48  ;;  %v24063_v48 = vld [vmem:[#allocation5 + $0x2020] sm:$0xff]  }
 0x431   :  { %22031 = vmatpush3.bf16.msra.mxu0 %v24017_v25  ;;  %22057 = vmatpush3.bf16.msra.mxu1 %v24026_v52  ;;  %v24066_v52 = vld [vmem:[#allocation5 + $0x20e8] sm:$0xff]  }
 0x432   :  { %22032 = vmatprep.subr.bf16.mxu0 %v24019_v33  ;;  %22058 = vmatprep.subr.bf16.mxu1 %v24028_v55  ;;  %v24069_v55 = vld [vmem:[#allocation5 + $0x2070] sm:$0xff]  }
 0x433   :  { %v21756_v28 = vpop.f32.mrb[96].mxu1 }
 0x434   :  { %v21757_v39 = vpop.f32.mrb[97].mxu1 }
 0x435   :  { %v21758_v40 = vadd.f32 %v21757_v39, %v21756_v28  ;;  %v21759_v41 = vpop.f32.mrb[98].mxu1  ;;  %22033 = vmatpush3.bf16.msra.mxu0 %v24021_v34  ;;  %22059 = vmatpush3.bf16.msra.mxu1 %v24030_v56  ;;  %v24058_v28 = vld [vmem:[#allocation5 + $0x20d8] sm:$0xff]   ;;  %v24071_v56 = vld [vmem:[#allocation5 + $0x2030] sm:$0xff]  }
 0x436   :  { %v21760_v49 = vpop.f32.mrb[99].mxu1  ;;  %22034 = vmatprep.subr.bf16.mxu0 %v24023_v45  ;;  %22060 = vmatprep.subr.bf16.mxu1 %v24032_v54  ;;  %v24060_v34 = vld [vmem:[#allocation5 + $0x2098] sm:$0xff]   ;;  %v24062_v41 = vld [vmem:[#allocation5 + $0x20e0] sm:$0xff]  }
 0x437   :  { %v24064_v49 = vld [vmem:[#allocation5 + $0x20a0] sm:$0xff]   ;;  %v24073_v54 = vld [vmem:[#allocation5 + $0x2078] sm:$0xff]  }
 0x438   :  { %v21734_v30 = vpop.f32.mrb[96].mxu0 }
 0x439   :  { %v21735_v35 = vpop.f32.mrb[97].mxu0  ;;  %22035 = vmatpush3.bf16.msra.mxu0 %v24025_v51  ;;  %22061 = vmatpush3.bf16.msra.mxu1 %v24034_v60  ;;  %v24065_v51 = vld [vmem:[#allocation5 + $0x2068] sm:$0xff]   ;;  %v24075_v60 = vld [vmem:[#allocation5 + $0x2038] sm:$0xff]  }
 0x43a   :  { %v21736_v38 = vadd.f32 %v21735_v35, %v21734_v30  ;;  %v21737_v42 = vpop.f32.mrb[98].mxu0  ;;  %22036 = vmatprep.subr.bf16.mxu0 %v24027_v50  ;;  %22062 = vmatprep.subr.bf16.mxu1 %v24036_v61  ;;  %v24057_v30 = vld [vmem:[#allocation5 + $0x2058] sm:$0xff]   ;;  %v24068_v50 = vld [vmem:[#allocation5 + $0x20a8] sm:$0xff]  }
 0x43b   :  { %v21738_v47 = vpop.f32.mrb[99].mxu0  ;;  %v24077_v61 = vld [vmem:[#allocation2 + $0x100] ss:$392 sps:$4 sm:$0xff]  }
 0x43c   :  { %v17109_v43 = vadd.f32 %v21736_v38, %v25043_v46  ;;  %v24029_v46 = vld [vmem:[#allocation5 + $0x1f28] sm:$0xff]   ;;  %v1609_v2 = vrot.slane %v24077_v61, %v24852_v37  ;;  %v24120_v61 = vld [vmem:[#allocation2 + $0x41c] ss:$392 sps:$4 sm:$0xff]  }
 0x43d   :  { %22037 = vmatpush3.bf16.msra.mxu0 %v24029_v46  ;;  %22063 = vmatpush3.bf16.msra.mxu1 %v24038_v59  ;;  %v24070_v46 = vld [vmem:[#allocation5 + $0x20f0] sm:$0xff]   ;;  %v24081_v59 = vld [vmem:[#allocation2 + $0x104] ss:$392 sps:$4 sm:$0xff]  }
 0x43e   :  { %v25050_v44 = vadd.f32 %v21758_v40, %v17109_v43  ;;  %22038 = vmatprep.subr.bf16.mxu0 %v24031_v57  ;;  %22092 = vmatprep.subr.bf16.mxu1 %v24046_v9  ;;  %v24072_v57 = vld [vmem:[#allocation5 + $0x20b0] sm:$0xff]   ;;  %v1616_v3 = vrot.slane %v24081_v59, %v24852_v37  ;;  %v24085_v9 = vld [vmem:[#allocation5 + $0x2100] sm:$0xff]  }
 0x43f   :  { %v24121_v59 = vld [vmem:[#allocation5 + $0x2240] sm:$0xff]  }
 0x440   :  { %17707 = vmatmul.mubr.bf16.vlgmr.msra.gmra.mrb[124].mxu1 %v2533_v16  ;;  %v1634_v11 = vcombine.high %v1616_v3, %v1630_v1  ;;  %v1633_v7 = vcombine.low %v1616_v3, %v1630_v1  ;;  %v24090_v16 = vld [vmem:[#allocation5 + $0x2188] sm:$0xff]   ;;  %v24122_v3 = vld [vmem:[#allocation5 + $0x22c0] sm:$0xff]  }
 0x441   :  { %22039 = vmatpush3.bf16.msra.mxu0 %v24033_v58  ;;  %22093 = vmatpush3.bf16.msra.mxu1 %v24048_v15  ;;  %v24074_v58 = vld [vmem:[#allocation5 + $0x20f8] sm:$0xff]   ;;  %v24087_v15 = vld [vmem:[#allocation5 + $0x2148] sm:$0xff]  }
 0x442   :  { %22040 = vmatprep.subr.bf16.mxu0 %v24035_v53  ;;  %22094 = vmatprep.subr.bf16.mxu1 %v24050_v21  ;;  %v24076_v53 = vld [vmem:[#allocation5 + $0x20b8] sm:$0xff]   ;;  %v2538_v17 = vpack.c.bf16 %v1634_v11, %v1634_v11  ;;  %v24091_v21 = vld [vmem:[#allocation5 + $0x2150] sm:$0xff]  }
 0x444   :  { %17786 = vmatprep.mubr.bf16.mxu1 %v2538_v17  ;;  %v24127_v17 = vld [vmem:[#allocation5 + $0x2208] sm:$0xff]  }
 0x445   :  { %22041 = vmatpush3.bf16.msra.mxu0 %v24037_v63  ;;  %22095 = vmatpush3.bf16.msra.mxu1 %v24052_v19  ;;  %v24079_v63 = vld [vmem:[#allocation2 + $0x410] ss:$392 sps:$4 sm:$0xff]  }
 0x446   :  { %22070 = vmatprep.subr.bf16.mxu0 %v24045_v6  ;;  %22096 = vmatprep.subr.bf16.mxu1 %v24054_v26  ;;  %v1623_v62 = vrot.slane %v24079_v63, %v24852_v37  ;;  %v24084_v6 = vld [vmem:[#allocation5 + $0x21c0] sm:$0xff]   ;;  %v24093_v19 = vld [vmem:[#allocation5 + $0x2110] sm:$0xff]  }
 0x447   :  { %v24094_v26 = vld [vmem:[#allocation5 + $0x2190] sm:$0xff]  }
 0x448   :  { %17667 = vmatmul.mubr.bf16.vlgmr.msra.gmra.mrb[124].mxu0 %v2531_v13  ;;  %v1632_v8 = vcombine.high %v1609_v2, %v1623_v62  ;;  %v1631_v4 = vcombine.low %v1609_v2, %v1623_v62  ;;  %v2537_v13 = vpack.c.bf16 %v1633_v7, %v1633_v7  ;;  %v1666_v62 = vrot.slane %v24120_v61, %v24852_v37  ;;  %v24159_v61 = vld [vmem:[#allocation5 + $0x2340] sm:$0xff]  }
 0x449   :  { %22071 = vmatpush3.bf16.msra.mxu0 %v24047_v12  ;;  %22097 = vmatpush3.bf16.msra.mxu1 %v24056_v29  ;;  %v24086_v12 = vld [vmem:[#allocation5 + $0x2180] sm:$0xff]  }
 0x44a   :  { %22072 = vmatprep.subr.bf16.mxu0 %v24049_v18  ;;  %22098 = vmatprep.subr.bf16.mxu1 %v24058_v28  ;;  %v2536_v14 = vpack.c.bf16 %v1632_v8, %v1632_v8  ;;  %v2535_v10 = vpack.c.bf16 %v1631_v4, %v1631_v4  ;;  %v24088_v18 = vld [vmem:[#allocation5 + $0x21c8] sm:$0xff]   ;;  %v24097_v28 = vld [vmem:[#allocation5 + $0x2118] sm:$0xff]   ;;  %v24123_v4 = vld [vmem:[#allocation5 + $0x2200] sm:$0xff]  }
 0x44c   :  { %17746 = vmatprep.mubr.bf16.mxu0 %v2536_v14 }
 0x44d   :  { %22073 = vmatpush3.bf16.msra.mxu0 %v24051_v23  ;;  %22099 = vmatpush3.bf16.msra.mxu1 %v24060_v34  ;;  %v24092_v23 = vld [vmem:[#allocation5 + $0x21d0] sm:$0xff]   ;;  %v24099_v34 = vld [vmem:[#allocation5 + $0x2160] sm:$0xff]  }
 0x44e   :  { %22074 = vmatprep.subr.bf16.mxu0 %v24053_v24  ;;  %22100 = vmatprep.subr.bf16.mxu1 %v24062_v41  ;;  %v24101_v41 = vld [vmem:[#allocation5 + $0x2120] sm:$0xff]  }
 0x451   :  { %22075 = vmatpush3.bf16.msra.mxu0 %v24055_v22  ;;  %22101 = vmatpush3.bf16.msra.mxu1 %v24064_v49  ;;  %v24104_v49 = vld [vmem:[#allocation5 + $0x21e8] sm:$0xff]  }
 0x452   :  { %22076 = vmatprep.subr.bf16.mxu0 %v24057_v30  ;;  %22102 = vmatprep.subr.bf16.mxu1 %v24066_v52  ;;  %v24107_v52 = vld [vmem:[#allocation5 + $0x2170] sm:$0xff]  }
 0x453   :  { %v21800_v25 = vpop.f32.mrb[100].mxu1 }
 0x454   :  { %v21801_v35 = vpop.f32.mrb[101].mxu1 }
 0x455   :  { %v21802_v38 = vadd.f32 %v21801_v35, %v21800_v25  ;;  %v21803_v42 = vpop.f32.mrb[102].mxu1  ;;  %22077 = vmatpush3.bf16.msra.mxu0 %v24059_v31  ;;  %22103 = vmatpush3.bf16.msra.mxu1 %v24068_v50  ;;  %v24096_v25 = vld [vmem:[#allocation5 + $0x21d8] sm:$0xff]   ;;  %v24109_v50 = vld [vmem:[#allocation5 + $0x2130] sm:$0xff]  }
 0x456   :  { %v21804_v47 = vpop.f32.mrb[103].mxu1  ;;  %22078 = vmatprep.subr.bf16.mxu0 %v24061_v36  ;;  %22104 = vmatprep.subr.bf16.mxu1 %v24070_v46  ;;  %v24098_v31 = vld [vmem:[#allocation5 + $0x2198] sm:$0xff]   ;;  %v24100_v42 = vld [vmem:[#allocation5 + $0x21e0] sm:$0xff]  }
 0x457   :  { %v24102_v47 = vld [vmem:[#allocation5 + $0x21a0] sm:$0xff]   ;;  %v24111_v46 = vld [vmem:[#allocation5 + $0x2178] sm:$0xff]  }
 0x458   :  { %v21778_v27 = vpop.f32.mrb[100].mxu0 }
 0x459   :  { %v21779_v32 = vpop.f32.mrb[101].mxu0  ;;  %22079 = vmatpush3.bf16.msra.mxu0 %v24063_v48  ;;  %22105 = vmatpush3.bf16.msra.mxu1 %v24072_v57  ;;  %v24103_v48 = vld [vmem:[#allocation5 + $0x2168] sm:$0xff]   ;;  %v24113_v57 = vld [vmem:[#allocation5 + $0x2138] sm:$0xff]  }
 0x45a   :  { %v21780_v33 = vadd.f32 %v21779_v32, %v21778_v27  ;;  %v21781_v39 = vpop.f32.mrb[102].mxu0  ;;  %22080 = vmatprep.subr.bf16.mxu0 %v24065_v51  ;;  %22106 = vmatprep.subr.bf16.mxu1 %v24074_v58  ;;  %v24095_v27 = vld [vmem:[#allocation5 + $0x2158] sm:$0xff]   ;;  %v24106_v51 = vld [vmem:[#allocation5 + $0x21a8] sm:$0xff]  }
 0x45b   :  { %v21782_v43 = vpop.f32.mrb[103].mxu0  ;;  %v24115_v58 = vld [vmem:[#allocation2 + $0x108] ss:$392 sps:$4 sm:$0xff]  }
 0x45c   :  { %v17189_v40 = vadd.f32 %v21780_v33, %v25050_v44  ;;  %v24067_v44 = vld [vmem:[#allocation5 + $0x2028] sm:$0xff]   ;;  %v1645_v63 = vrot.slane %v24115_v58, %v24852_v37 }
 0x45d   :  { %22081 = vmatpush3.bf16.msra.mxu0 %v24067_v44  ;;  %22107 = vmatpush3.bf16.msra.mxu1 %v24076_v53  ;;  %v24108_v44 = vld [vmem:[#allocation5 + $0x21f0] sm:$0xff]   ;;  %v24158_v58 = vld [vmem:[#allocation2 + $0x424] ss:$392 sps:$4 sm:$0xff]  }
 0x45e   :  { %v25057_v45 = vadd.f32 %v21802_v38, %v17189_v40  ;;  %22082 = vmatprep.subr.bf16.mxu0 %v24069_v55  ;;  %22136 = vmatprep.subr.bf16.mxu1 %v24084_v6  ;;  %v24110_v55 = vld [vmem:[#allocation5 + $0x21b0] sm:$0xff]  }
 0x45f   :  { %v24119_v53 = vld [vmem:[#allocation2 + $0x10c] ss:$392 sps:$4 sm:$0xff]  }
 0x460   :  { %17787 = vmatmul.mubr.bf16.vlgmr.msra.gmra.mrb[128].mxu1 %v2537_v13  ;;  %v1652_v2 = vrot.slane %v24119_v53, %v24852_v37  ;;  %v24128_v13 = vld [vmem:[#allocation5 + $0x2288] sm:$0xff]  }
 0x461   :  { %22083 = vmatpush3.bf16.msra.mxu0 %v24071_v56  ;;  %22137 = vmatpush3.bf16.msra.mxu1 %v24086_v12  ;;  %v24112_v56 = vld [vmem:[#allocation5 + $0x21f8] sm:$0xff]  }
 0x462   :  { %22084 = vmatprep.subr.bf16.mxu0 %v24073_v54  ;;  %22138 = vmatprep.subr.bf16.mxu1 %v24088_v18  ;;  %v24114_v54 = vld [vmem:[#allocation5 + $0x21b8] sm:$0xff]   ;;  %v1670_v1 = vcombine.high %v1652_v2, %v1666_v62  ;;  %v1669_v8 = vcombine.low %v1652_v2, %v1666_v62  ;;  %v24129_v18 = vld [vmem:[#allocation5 + $0x2250] sm:$0xff]  }
 0x464   :  { %v2542_v7 = vpack.c.bf16 %v1670_v1, %v1670_v1  ;;  %v2541_v14 = vpack.c.bf16 %v1669_v8, %v1669_v8 }
 0x465   :  { %22085 = vmatpush3.bf16.msra.mxu0 %v24075_v60  ;;  %22139 = vmatpush3.bf16.msra.mxu1 %v24090_v16  ;;  %v24117_v60 = vld [vmem:[#allocation2 + $0x418] ss:$392 sps:$4 sm:$0xff]   ;;  %v24131_v16 = vld [vmem:[#allocation5 + $0x2210] sm:$0xff]  }
 0x466   :  { %22114 = vmatprep.subr.bf16.mxu0 %v24083_v5  ;;  %22140 = vmatprep.subr.bf16.mxu1 %v24092_v23  ;;  %v1659_v0 = vrot.slane %v24117_v60, %v24852_v37  ;;  %v24132_v23 = vld [vmem:[#allocation5 + $0x2290] sm:$0xff]  }
 0x467   :  { %17866 = vmatprep.mubr.bf16.mxu1 %v2542_v7 }
 0x468   :  { %17747 = vmatmul.mubr.bf16.vlgmr.msra.gmra.mrb[128].mxu0 %v2535_v10  ;;  %v1668_v5 = vcombine.high %v1645_v63, %v1659_v0  ;;  %v1667_v6 = vcombine.low %v1645_v63, %v1659_v0  ;;  %v24125_v10 = vld [vmem:[#allocation5 + $0x2248] sm:$0xff]   ;;  %v24160_v0 = vld [vmem:[#allocation5 + $0x23c0] sm:$0xff]  }
 0x469   :  { %22115 = vmatpush3.bf16.msra.mxu0 %v24085_v9  ;;  %22141 = vmatpush3.bf16.msra.mxu1 %v24094_v26  ;;  %v24124_v9 = vld [vmem:[#allocation5 + $0x2280] sm:$0xff]  }
 0x46a   :  { %22116 = vmatprep.subr.bf16.mxu0 %v24087_v15  ;;  %22142 = vmatprep.subr.bf16.mxu1 %v24096_v25  ;;  %v2540_v11 = vpack.c.bf16 %v1668_v5, %v1668_v5  ;;  %v2539_v12 = vpack.c.bf16 %v1667_v6, %v1667_v6  ;;  %v24126_v15 = vld [vmem:[#allocation5 + $0x22c8] sm:$0xff]   ;;  %v24135_v25 = vld [vmem:[#allocation5 + $0x2218] sm:$0xff]   ;;  %v24162_v6 = vld [vmem:[#allocation5 + $0x2380] sm:$0xff]  }
 0x46c   :  { %17826 = vmatprep.mubr.bf16.mxu0 %v2540_v11 }
 0x46d   :  { %22117 = vmatpush3.bf16.msra.mxu0 %v24089_v20  ;;  %22143 = vmatpush3.bf16.msra.mxu1 %v24098_v31  ;;  %v24130_v20 = vld [vmem:[#allocation5 + $0x22d0] sm:$0xff]   ;;  %v24137_v31 = vld [vmem:[#allocation5 + $0x2260] sm:$0xff]  }
 0x46e   :  { %22118 = vmatprep.subr.bf16.mxu0 %v24091_v21  ;;  %22144 = vmatprep.subr.bf16.mxu1 %v24100_v42  ;;  %v24139_v42 = vld [vmem:[#allocation5 + $0x2220] sm:$0xff]  }
 0x471   :  { %22119 = vmatpush3.bf16.msra.mxu0 %v24093_v19  ;;  %22145 = vmatpush3.bf16.msra.mxu1 %v24102_v47  ;;  %v24142_v47 = vld [vmem:[#allocation5 + $0x22e8] sm:$0xff]  }
 0x472   :  { %22120 = vmatprep.subr.bf16.mxu0 %v24095_v27  ;;  %22146 = vmatprep.subr.bf16.mxu1 %v24104_v49  ;;  %v24145_v49 = vld [vmem:[#allocation5 + $0x2270] sm:$0xff]  }
 0x473   :  { %v21844_v22 = vpop.f32.mrb[104].mxu1 }
 0x474   :  { %v21845_v32 = vpop.f32.mrb[105].mxu1 }
 0x475   :  { %v21846_v33 = vadd.f32 %v21845_v32, %v21844_v22  ;;  %v21847_v39 = vpop.f32.mrb[106].mxu1  ;;  %22121 = vmatpush3.bf16.msra.mxu0 %v24097_v28  ;;  %22147 = vmatpush3.bf16.msra.mxu1 %v24106_v51  ;;  %v24134_v22 = vld [vmem:[#allocation5 + $0x22d8] sm:$0xff]   ;;  %v24147_v51 = vld [vmem:[#allocation5 + $0x2230] sm:$0xff]  }
 0x476   :  { %v21848_v43 = vpop.f32.mrb[107].mxu1  ;;  %22122 = vmatprep.subr.bf16.mxu0 %v24099_v34  ;;  %22148 = vmatprep.subr.bf16.mxu1 %v24108_v44  ;;  %v24136_v28 = vld [vmem:[#allocation5 + $0x2298] sm:$0xff]   ;;  %v24138_v39 = vld [vmem:[#allocation5 + $0x22e0] sm:$0xff]  }
 0x477   :  { %v24140_v43 = vld [vmem:[#allocation5 + $0x22a0] sm:$0xff]   ;;  %v24149_v44 = vld [vmem:[#allocation5 + $0x2278] sm:$0xff]  }
 0x478   :  { %v21822_v24 = vpop.f32.mrb[104].mxu0 }
 0x479   :  { %v21823_v29 = vpop.f32.mrb[105].mxu0  ;;  %22123 = vmatpush3.bf16.msra.mxu0 %v24101_v41  ;;  %22149 = vmatpush3.bf16.msra.mxu1 %v24110_v55  ;;  %v24141_v41 = vld [vmem:[#allocation5 + $0x2268] sm:$0xff]   ;;  %v24151_v55 = vld [vmem:[#allocation5 + $0x2238] sm:$0xff]  }
 0x47a   :  { %v21824_v30 = vadd.f32 %v21823_v29, %v21822_v24  ;;  %v21825_v35 = vpop.f32.mrb[106].mxu0  ;;  %22124 = vmatprep.subr.bf16.mxu0 %v24103_v48  ;;  %22150 = vmatprep.subr.bf16.mxu1 %v24112_v56  ;;  %v24133_v24 = vld [vmem:[#allocation5 + $0x2258] sm:$0xff]   ;;  %v24144_v48 = vld [vmem:[#allocation5 + $0x22a8] sm:$0xff]  }
 0x47b   :  { %v21826_v40 = vpop.f32.mrb[107].mxu0  ;;  %v24153_v56 = vld [vmem:[#allocation2 + $0x110] ss:$392 sps:$4 sm:$0xff]  }
 0x47c   :  { %v17269_v38 = vadd.f32 %v21824_v30, %v25057_v45  ;;  %v24105_v45 = vld [vmem:[#allocation5 + $0x2128] sm:$0xff]   ;;  %v1681_v60 = vrot.slane %v24153_v56, %v24852_v37 }
 0x47d   :  { %22125 = vmatpush3.bf16.msra.mxu0 %v24105_v45  ;;  %22151 = vmatpush3.bf16.msra.mxu1 %v24114_v54  ;;  %v24146_v45 = vld [vmem:[#allocation5 + $0x22f0] sm:$0xff]  }
 0x47e   :  { %v25064_v36 = vadd.f32 %v21846_v33, %v17269_v38  ;;  %22126 = vmatprep.subr.bf16.mxu0 %v24107_v52  ;;  %22180 = vmatprep.subr.bf16.mxu1 %v24122_v3  ;;  %v24148_v52 = vld [vmem:[#allocation5 + $0x22b0] sm:$0xff]   ;;  %v24161_v3 = vld [vmem:[#allocation5 + $0x2300] sm:$0xff]  }
 0x47f   :  { %v24157_v54 = vld [vmem:[#allocation2 + $0x114] ss:$392 sps:$4 sm:$0xff]  }
 0x480   :  { %17867 = vmatmul.mubr.bf16.vlgmr.msra.gmra.mrb[132].mxu1 %v2541_v14  ;;  %v1688_v63 = vrot.slane %v24157_v54, %v24852_v37  ;;  %v24165_v14 = vld [vmem:[#allocation5 + $0x2308] sm:$0xff]  }
 0x481   :  { %22127 = vmatpush3.bf16.msra.mxu0 %v24109_v50  ;;  %22181 = vmatpush3.bf16.msra.mxu1 %v24124_v9  ;;  %v24150_v50 = vld [vmem:[#allocation5 + $0x22f8] sm:$0xff]   ;;  %v24163_v9 = vld [vmem:[#allocation5 + $0x2348] sm:$0xff]  }
 0x482   :  { %22128 = vmatprep.subr.bf16.mxu0 %v24111_v46  ;;  %22182 = vmatprep.subr.bf16.mxu1 %v24126_v15  ;;  %v24152_v46 = vld [vmem:[#allocation5 + $0x22b8] sm:$0xff]   ;;  %v24167_v15 = vld [vmem:[#allocation5 + $0x2350] sm:$0xff]  }
 0x483   :  { %v24196_v56 = vld [vmem:[#allocation2 + $0x42c] ss:$392 sps:$4 sm:$0xff]  }
 0x485   :  { %22129 = vmatpush3.bf16.msra.mxu0 %v24113_v57  ;;  %22183 = vmatpush3.bf16.msra.mxu1 %v24128_v13  ;;  %v24155_v57 = vld [vmem:[#allocation2 + $0x420] ss:$392 sps:$4 sm:$0xff]   ;;  %v24169_v13 = vld [vmem:[#allocation5 + $0x2310] sm:$0xff]  }
 0x486   :  { %22158 = vmatprep.subr.bf16.mxu0 %v24121_v59  ;;  %22184 = vmatprep.subr.bf16.mxu1 %v24130_v20  ;;  %v1695_v53 = vrot.slane %v24155_v57, %v24852_v37  ;;  %v1702_v59 = vrot.slane %v24158_v58, %v24852_v37  ;;  %v24170_v20 = vld [vmem:[#allocation5 + $0x2390] sm:$0xff]  }
 0x488   :  { %17827 = vmatmul.mubr.bf16.vlgmr.msra.gmra.mrb[132].mxu0 %v2539_v12  ;;  %v1704_v2 = vcombine.high %v1681_v60, %v1695_v53  ;;  %v1703_v62 = vcombine.low %v1681_v60, %v1695_v53  ;;  %v1706_v5 = vcombine.high %v1688_v63, %v1702_v59  ;;  %v1705_v1 = vcombine.low %v1688_v63, %v1702_v59  ;;  %v24164_v12 = vld [vmem:[#allocation5 + $0x23c8] sm:$0xff]   ;;  %v24197_v60 = vld [vmem:[#allocation5 + $0x2440] sm:$0xff]  }
 0x489   :  { %22159 = vmatpush3.bf16.msra.mxu0 %v24123_v4  ;;  %22185 = vmatpush3.bf16.msra.mxu1 %v24132_v23  ;;  %v1738_v53 = vrot.slane %v24196_v56, %v24852_v37 }
 0x48a   :  { %22160 = vmatprep.subr.bf16.mxu0 %v24125_v10  ;;  %22186 = vmatprep.subr.bf16.mxu1 %v24134_v22  ;;  %v2544_v8 = vpack.c.bf16 %v1704_v2, %v1704_v2  ;;  %v2543_v4 = vpack.c.bf16 %v1703_v62, %v1703_v62  ;;  %v2546_v11 = vpack.c.bf16 %v1706_v5, %v1706_v5  ;;  %v24166_v10 = vld [vmem:[#allocation5 + $0x2388] sm:$0xff]   ;;  %v24173_v22 = vld [vmem:[#allocation5 + $0x2318] sm:$0xff]  }
 0x48b   :  { %v2545_v7 = vpack.c.bf16 %v1705_v1, %v1705_v1 }
 0x48c   :  { %17906 = vmatprep.mubr.bf16.mxu0 %v2544_v8  ;;  %17946 = vmatprep.mubr.bf16.mxu1 %v2546_v11  ;;  %v24203_v11 = vld [vmem:[#allocation5 + $0x2408] sm:$0xff]  }
 0x48d   :  { %22161 = vmatpush3.bf16.msra.mxu0 %v24127_v17  ;;  %22187 = vmatpush3.bf16.msra.mxu1 %v24136_v28  ;;  %v24168_v17 = vld [vmem:[#allocation5 + $0x23d0] sm:$0xff]   ;;  %v24175_v28 = vld [vmem:[#allocation5 + $0x2360] sm:$0xff]  }
 0x48e   :  { %22162 = vmatprep.subr.bf16.mxu0 %v24129_v18  ;;  %22188 = vmatprep.subr.bf16.mxu1 %v24138_v39  ;;  %v24177_v39 = vld [vmem:[#allocation5 + $0x2320] sm:$0xff]  }
 0x491   :  { %22163 = vmatpush3.bf16.msra.mxu0 %v24131_v16  ;;  %22189 = vmatpush3.bf16.msra.mxu1 %v24140_v43  ;;  %v24180_v43 = vld [vmem:[#allocation5 + $0x23e8] sm:$0xff]  }
 0x492   :  { %22164 = vmatprep.subr.bf16.mxu0 %v24133_v24  ;;  %22190 = vmatprep.subr.bf16.mxu1 %v24142_v47  ;;  %v24183_v47 = vld [vmem:[#allocation5 + $0x2370] sm:$0xff]  }
 0x493   :  { %v21888_v19 = vpop.f32.mrb[108].mxu1 }
 0x494   :  { %v21889_v29 = vpop.f32.mrb[109].mxu1 }
 0x495   :  { %v21890_v30 = vadd.f32 %v21889_v29, %v21888_v19  ;;  %v21891_v35 = vpop.f32.mrb[110].mxu1  ;;  %22165 = vmatpush3.bf16.msra.mxu0 %v24135_v25  ;;  %22191 = vmatpush3.bf16.msra.mxu1 %v24144_v48  ;;  %v24172_v19 = vld [vmem:[#allocation5 + $0x23d8] sm:$0xff]   ;;  %v24185_v48 = vld [vmem:[#allocation5 + $0x2330] sm:$0xff]  }
 0x496   :  { %v21892_v40 = vpop.f32.mrb[111].mxu1  ;;  %22166 = vmatprep.subr.bf16.mxu0 %v24137_v31  ;;  %22192 = vmatprep.subr.bf16.mxu1 %v24146_v45  ;;  %v24174_v25 = vld [vmem:[#allocation5 + $0x2398] sm:$0xff]   ;;  %v24176_v35 = vld [vmem:[#allocation5 + $0x23e0] sm:$0xff]  }
 0x497   :  { %v24178_v40 = vld [vmem:[#allocation5 + $0x23a0] sm:$0xff]   ;;  %v24187_v45 = vld [vmem:[#allocation5 + $0x2378] sm:$0xff]  }
 0x498   :  { %v21866_v21 = vpop.f32.mrb[108].mxu0 }
 0x499   :  { %v21867_v26 = vpop.f32.mrb[109].mxu0  ;;  %22167 = vmatpush3.bf16.msra.mxu0 %v24139_v42  ;;  %22193 = vmatpush3.bf16.msra.mxu1 %v24148_v52  ;;  %v24179_v42 = vld [vmem:[#allocation5 + $0x2368] sm:$0xff]   ;;  %v24189_v52 = vld [vmem:[#allocation5 + $0x2338] sm:$0xff]  }
 0x49a   :  { %v21868_v27 = vadd.f32 %v21867_v26, %v21866_v21  ;;  %v21869_v32 = vpop.f32.mrb[110].mxu0  ;;  %22168 = vmatprep.subr.bf16.mxu0 %v24141_v41  ;;  %22194 = vmatprep.subr.bf16.mxu1 %v24150_v50  ;;  %v24171_v21 = vld [vmem:[#allocation5 + $0x2358] sm:$0xff]   ;;  %v24182_v41 = vld [vmem:[#allocation5 + $0x23a8] sm:$0xff]  }
 0x49b   :  { %v21870_v38 = vpop.f32.mrb[111].mxu0  ;;  %v24191_v50 = vld [vmem:[#allocation2 + $0x118] ss:$392 sps:$4 sm:$0xff]  }
 0x49c   :  { %v17349_v33 = vadd.f32 %v21868_v27, %v25064_v36  ;;  %v24143_v36 = vld [vmem:[#allocation5 + $0x2228] sm:$0xff]   ;;  %v1717_v57 = vrot.slane %v24191_v50, %v24852_v37  ;;  %v24234_v50 = vld [vmem:[#allocation2 + $0x434] ss:$392 sps:$4 sm:$0xff]  }
 0x49d   :  { %22169 = vmatpush3.bf16.msra.mxu0 %v24143_v36  ;;  %22195 = vmatpush3.bf16.msra.mxu1 %v24152_v46  ;;  %v24184_v36 = vld [vmem:[#allocation5 + $0x23f0] sm:$0xff]   ;;  %v24195_v46 = vld [vmem:[#allocation2 + $0x11c] ss:$392 sps:$4 sm:$0xff]  }
 0x49e   :  { %v25071_v34 = vadd.f32 %v21890_v30, %v17349_v33  ;;  %22170 = vmatprep.subr.bf16.mxu0 %v24145_v49  ;;  %22224 = vmatprep.subr.bf16.mxu1 %v24160_v0  ;;  %v24186_v49 = vld [vmem:[#allocation5 + $0x23b0] sm:$0xff]   ;;  %v1724_v58 = vrot.slane %v24195_v46, %v24852_v37  ;;  %v24199_v0 = vld [vmem:[#allocation5 + $0x2400] sm:$0xff]  }
 0x49f   :  { %v24235_v46 = vld [vmem:[#allocation5 + $0x2540] sm:$0xff]  }
 0x4a0   :  { %17947 = vmatmul.mubr.bf16.vlgmr.msra.gmra.mrb[136].mxu1 %v2545_v7  ;;  %v1742_v2 = vcombine.high %v1724_v58, %v1738_v53  ;;  %v1741_v62 = vcombine.low %v1724_v58, %v1738_v53  ;;  %v24204_v7 = vld [vmem:[#allocation5 + $0x2488] sm:$0xff]   ;;  %v24236_v58 = vld [vmem:[#allocation5 + $0x25c0] sm:$0xff]  }
 0x4a1   :  { %22171 = vmatpush3.bf16.msra.mxu0 %v24147_v51  ;;  %22225 = vmatpush3.bf16.msra.mxu1 %v24162_v6  ;;  %v24188_v51 = vld [vmem:[#allocation5 + $0x23f8] sm:$0xff]   ;;  %v24201_v6 = vld [vmem:[#allocation5 + $0x2448] sm:$0xff]  }
 0x4a2   :  { %22172 = vmatprep.subr.bf16.mxu0 %v24149_v44  ;;  %22226 = vmatprep.subr.bf16.mxu1 %v24164_v12  ;;  %v24190_v44 = vld [vmem:[#allocation5 + $0x23b8] sm:$0xff]   ;;  %v2550_v8 = vpack.c.bf16 %v1742_v2, %v1742_v2  ;;  %v24205_v12 = vld [vmem:[#allocation5 + $0x2450] sm:$0xff]  }
 0x4a4   :  { %18026 = vmatprep.mubr.bf16.mxu1 %v2550_v8  ;;  %v24241_v8 = vld [vmem:[#allocation5 + $0x2508] sm:$0xff]  }
 0x4a5   :  { %22173 = vmatpush3.bf16.msra.mxu0 %v24151_v55  ;;  %22227 = vmatpush3.bf16.msra.mxu1 %v24166_v10  ;;  %v24193_v55 = vld [vmem:[#allocation2 + $0x428] ss:$392 sps:$4 sm:$0xff]  }
 0x4a6   :  { %22202 = vmatprep.subr.bf16.mxu0 %v24159_v61  ;;  %22228 = vmatprep.subr.bf16.mxu1 %v24168_v17  ;;  %v1731_v54 = vrot.slane %v24193_v55, %v24852_v37  ;;  %v24198_v61 = vld [vmem:[#allocation5 + $0x24c0] sm:$0xff]   ;;  %v24207_v10 = vld [vmem:[#allocation5 + $0x2410] sm:$0xff]  }
 0x4a7   :  { %v24208_v17 = vld [vmem:[#allocation5 + $0x2490] sm:$0xff]  }
 0x4a8   :  { %17907 = vmatmul.mubr.bf16.vlgmr.msra.gmra.mrb[136].mxu0 %v2543_v4  ;;  %v1740_v63 = vcombine.high %v1717_v57, %v1731_v54  ;;  %v1739_v59 = vcombine.low %v1717_v57, %v1731_v54  ;;  %v2549_v4 = vpack.c.bf16 %v1741_v62, %v1741_v62  ;;  %v1774_v54 = vrot.slane %v24234_v50, %v24852_v37  ;;  %v24273_v50 = vld [vmem:[#allocation5 + $0x2640] sm:$0xff]  }
 0x4a9   :  { %22203 = vmatpush3.bf16.msra.mxu0 %v24161_v3  ;;  %22229 = vmatpush3.bf16.msra.mxu1 %v24170_v20  ;;  %v24200_v3 = vld [vmem:[#allocation5 + $0x2480] sm:$0xff]  }
 0x4aa   :  { %22204 = vmatprep.subr.bf16.mxu0 %v24163_v9  ;;  %22230 = vmatprep.subr.bf16.mxu1 %v24172_v19  ;;  %v2548_v5 = vpack.c.bf16 %v1740_v63, %v1740_v63  ;;  %v2547_v1 = vpack.c.bf16 %v1739_v59, %v1739_v59  ;;  %v24202_v9 = vld [vmem:[#allocation5 + $0x24c8] sm:$0xff]   ;;  %v24211_v19 = vld [vmem:[#allocation5 + $0x2418] sm:$0xff]   ;;  %v24237_v59 = vld [vmem:[#allocation5 + $0x2500] sm:$0xff]  }
 0x4ac   :  { %17986 = vmatprep.mubr.bf16.mxu0 %v2548_v5 }
 0x4ad   :  { %22205 = vmatpush3.bf16.msra.mxu0 %v24165_v14  ;;  %22231 = vmatpush3.bf16.msra.mxu1 %v24174_v25  ;;  %v24206_v14 = vld [vmem:[#allocation5 + $0x24d0] sm:$0xff]   ;;  %v24213_v25 = vld [vmem:[#allocation5 + $0x2460] sm:$0xff]  }
 0x4ae   :  { %22206 = vmatprep.subr.bf16.mxu0 %v24167_v15  ;;  %22232 = vmatprep.subr.bf16.mxu1 %v24176_v35  ;;  %v24215_v35 = vld [vmem:[#allocation5 + $0x2420] sm:$0xff]  }
 0x4b1   :  { %22207 = vmatpush3.bf16.msra.mxu0 %v24169_v13  ;;  %22233 = vmatpush3.bf16.msra.mxu1 %v24178_v40  ;;  %v24218_v40 = vld [vmem:[#allocation5 + $0x24e8] sm:$0xff]  }
 0x4b2   :  { %22208 = vmatprep.subr.bf16.mxu0 %v24171_v21  ;;  %22234 = vmatprep.subr.bf16.mxu1 %v24180_v43  ;;  %v24221_v43 = vld [vmem:[#allocation5 + $0x2470] sm:$0xff]  }
 0x4b3   :  { %v21932_v16 = vpop.f32.mrb[112].mxu1 }
 0x4b4   :  { %v21933_v26 = vpop.f32.mrb[113].mxu1 }
 0x4b5   :  { %v21934_v27 = vadd.f32 %v21933_v26, %v21932_v16  ;;  %v21935_v32 = vpop.f32.mrb[114].mxu1  ;;  %22209 = vmatpush3.bf16.msra.mxu0 %v24173_v22  ;;  %22235 = vmatpush3.bf16.msra.mxu1 %v24182_v41  ;;  %v24210_v16 = vld [vmem:[#allocation5 + $0x24d8] sm:$0xff]   ;;  %v24223_v41 = vld [vmem:[#allocation5 + $0x2430] sm:$0xff]  }
 0x4b6   :  { %v21936_v38 = vpop.f32.mrb[115].mxu1  ;;  %22210 = vmatprep.subr.bf16.mxu0 %v24175_v28  ;;  %22236 = vmatprep.subr.bf16.mxu1 %v24184_v36  ;;  %v24212_v22 = vld [vmem:[#allocation5 + $0x2498] sm:$0xff]   ;;  %v24214_v32 = vld [vmem:[#allocation5 + $0x24e0] sm:$0xff]  }
 0x4b7   :  { %v24216_v38 = vld [vmem:[#allocation5 + $0x24a0] sm:$0xff]   ;;  %v24225_v36 = vld [vmem:[#allocation5 + $0x2478] sm:$0xff]  }
 0x4b8   :  { %v21910_v18 = vpop.f32.mrb[112].mxu0 }
 0x4b9   :  { %v21911_v23 = vpop.f32.mrb[113].mxu0  ;;  %22211 = vmatpush3.bf16.msra.mxu0 %v24177_v39  ;;  %22237 = vmatpush3.bf16.msra.mxu1 %v24186_v49  ;;  %v24217_v39 = vld [vmem:[#allocation5 + $0x2468] sm:$0xff]   ;;  %v24227_v49 = vld [vmem:[#allocation5 + $0x2438] sm:$0xff]  }
 0x4ba   :  { %v21912_v24 = vadd.f32 %v21911_v23, %v21910_v18  ;;  %v21913_v29 = vpop.f32.mrb[114].mxu0  ;;  %22212 = vmatprep.subr.bf16.mxu0 %v24179_v42  ;;  %22238 = vmatprep.subr.bf16.mxu1 %v24188_v51  ;;  %v24209_v18 = vld [vmem:[#allocation5 + $0x2458] sm:$0xff]   ;;  %v24220_v42 = vld [vmem:[#allocation5 + $0x24a8] sm:$0xff]  }
 0x4bb   :  { %v21914_v33 = vpop.f32.mrb[115].mxu0  ;;  %v24229_v51 = vld [vmem:[#allocation2 + $0x120] ss:$392 sps:$4 sm:$0xff]  }
 0x4bc   :  { %v17429_v30 = vadd.f32 %v21912_v24, %v25071_v34  ;;  %v24181_v34 = vld [vmem:[#allocation5 + $0x2328] sm:$0xff]   ;;  %v1753_v55 = vrot.slane %v24229_v51, %v24852_v37  ;;  %v24272_v51 = vld [vmem:[#allocation2 + $0x43c] ss:$392 sps:$4 sm:$0xff]  }
 0x4bd   :  { %22213 = vmatpush3.bf16.msra.mxu0 %v24181_v34  ;;  %22239 = vmatpush3.bf16.msra.mxu1 %v24190_v44  ;;  %v24222_v34 = vld [vmem:[#allocation5 + $0x24f0] sm:$0xff]   ;;  %v24233_v44 = vld [vmem:[#allocation2 + $0x124] ss:$392 sps:$4 sm:$0xff]  }
 0x4be   :  { %v25078_v31 = vadd.f32 %v21934_v27, %v17429_v30  ;;  %22214 = vmatprep.subr.bf16.mxu0 %v24183_v47  ;;  %22268 = vmatprep.subr.bf16.mxu1 %v24198_v61  ;;  %v24224_v47 = vld [vmem:[#allocation5 + $0x24b0] sm:$0xff]   ;;  %v1760_v57 = vrot.slane %v24233_v44, %v24852_v37 }
 0x4c0   :  { %18027 = vmatmul.mubr.bf16.vlgmr.msra.gmra.mrb[140].mxu1 %v2549_v4  ;;  %v1778_v53 = vcombine.high %v1760_v57, %v1774_v54  ;;  %v1777_v63 = vcombine.low %v1760_v57, %v1774_v54  ;;  %v24242_v4 = vld [vmem:[#allocation5 + $0x2588] sm:$0xff]  }
 0x4c1   :  { %22215 = vmatpush3.bf16.msra.mxu0 %v24185_v48  ;;  %22269 = vmatpush3.bf16.msra.mxu1 %v24200_v3  ;;  %v24226_v48 = vld [vmem:[#allocation5 + $0x24f8] sm:$0xff]  }
 0x4c2   :  { %22216 = vmatprep.subr.bf16.mxu0 %v24187_v45  ;;  %22270 = vmatprep.subr.bf16.mxu1 %v24202_v9  ;;  %v24228_v45 = vld [vmem:[#allocation5 + $0x24b8] sm:$0xff]   ;;  %v2554_v62 = vpack.c.bf16 %v1778_v53, %v1778_v53  ;;  %v2553_v5 = vpack.c.bf16 %v1777_v63, %v1777_v63  ;;  %v24243_v9 = vld [vmem:[#allocation5 + $0x2550] sm:$0xff]  }
 0x4c4   :  { %18106 = vmatprep.mubr.bf16.mxu1 %v2554_v62 }
 0x4c5   :  { %22217 = vmatpush3.bf16.msra.mxu0 %v24189_v52  ;;  %22271 = vmatpush3.bf16.msra.mxu1 %v24204_v7  ;;  %v24231_v52 = vld [vmem:[#allocation2 + $0x430] ss:$392 sps:$4 sm:$0xff]  }
 0x4c6   :  { %22246 = vmatprep.subr.bf16.mxu0 %v24197_v60  ;;  %22272 = vmatprep.subr.bf16.mxu1 %v24206_v14  ;;  %v1767_v56 = vrot.slane %v24231_v52, %v24852_v37  ;;  %v24245_v7 = vld [vmem:[#allocation5 + $0x2510] sm:$0xff]  }
 0x4c7   :  { %v24246_v14 = vld [vmem:[#allocation5 + $0x2590] sm:$0xff]  }
 0x4c8   :  { %17987 = vmatmul.mubr.bf16.vlgmr.msra.gmra.mrb[140].mxu0 %v2547_v1  ;;  %v1776_v60 = vcombine.high %v1753_v55, %v1767_v56  ;;  %v1775_v61 = vcombine.low %v1753_v55, %v1767_v56  ;;  %v24239_v1 = vld [vmem:[#allocation5 + $0x2548] sm:$0xff]   ;;  %v24274_v56 = vld [vmem:[#allocation5 + $0x26c0] sm:$0xff]  }
 0x4c9   :  { %22247 = vmatpush3.bf16.msra.mxu0 %v24199_v0  ;;  %22273 = vmatpush3.bf16.msra.mxu1 %v24208_v17  ;;  %v24238_v0 = vld [vmem:[#allocation5 + $0x2580] sm:$0xff]  }
 0x4ca   :  { %22248 = vmatprep.subr.bf16.mxu0 %v24201_v6  ;;  %22274 = vmatprep.subr.bf16.mxu1 %v24210_v16  ;;  %v2552_v2 = vpack.c.bf16 %v1776_v60, %v1776_v60  ;;  %v2551_v3 = vpack.c.bf16 %v1775_v61, %v1775_v61  ;;  %v24240_v6 = vld [vmem:[#allocation5 + $0x25c8] sm:$0xff]   ;;  %v24249_v16 = vld [vmem:[#allocation5 + $0x2518] sm:$0xff]   ;;  %v24276_v61 = vld [vmem:[#allocation5 + $0x2680] sm:$0xff]  }
 0x4cc   :  { %18066 = vmatprep.mubr.bf16.mxu0 %v2552_v2 }
 0x4cd   :  { %22249 = vmatpush3.bf16.msra.mxu0 %v24203_v11  ;;  %22275 = vmatpush3.bf16.msra.mxu1 %v24212_v22  ;;  %v24244_v11 = vld [vmem:[#allocation5 + $0x25d0] sm:$0xff]   ;;  %v24251_v22 = vld [vmem:[#allocation5 + $0x2560] sm:$0xff]  }
 0x4ce   :  { %22250 = vmatprep.subr.bf16.mxu0 %v24205_v12  ;;  %22276 = vmatprep.subr.bf16.mxu1 %v24214_v32  ;;  %v24253_v32 = vld [vmem:[#allocation5 + $0x2520] sm:$0xff]  }
 0x4d1   :  { %22251 = vmatpush3.bf16.msra.mxu0 %v24207_v10  ;;  %22277 = vmatpush3.bf16.msra.mxu1 %v24216_v38  ;;  %v24256_v38 = vld [vmem:[#allocation5 + $0x25e8] sm:$0xff]  }
 0x4d2   :  { %22252 = vmatprep.subr.bf16.mxu0 %v24209_v18  ;;  %22278 = vmatprep.subr.bf16.mxu1 %v24218_v40  ;;  %v24259_v40 = vld [vmem:[#allocation5 + $0x2570] sm:$0xff]  }
 0x4d3   :  { %v21976_v13 = vpop.f32.mrb[116].mxu1 }
 0x4d4   :  { %v21977_v23 = vpop.f32.mrb[117].mxu1 }
 0x4d5   :  { %v21978_v24 = vadd.f32 %v21977_v23, %v21976_v13  ;;  %v21979_v29 = vpop.f32.mrb[118].mxu1  ;;  %22253 = vmatpush3.bf16.msra.mxu0 %v24211_v19  ;;  %22279 = vmatpush3.bf16.msra.mxu1 %v24220_v42  ;;  %v24248_v13 = vld [vmem:[#allocation5 + $0x25d8] sm:$0xff]   ;;  %v24261_v42 = vld [vmem:[#allocation5 + $0x2530] sm:$0xff]  }
 0x4d6   :  { %v21980_v33 = vpop.f32.mrb[119].mxu1  ;;  %22254 = vmatprep.subr.bf16.mxu0 %v24213_v25  ;;  %22280 = vmatprep.subr.bf16.mxu1 %v24222_v34  ;;  %v24250_v19 = vld [vmem:[#allocation5 + $0x2598] sm:$0xff]   ;;  %v24252_v29 = vld [vmem:[#allocation5 + $0x25e0] sm:$0xff]  }
 0x4d7   :  { %v24254_v33 = vld [vmem:[#allocation5 + $0x25a0] sm:$0xff]   ;;  %v24263_v34 = vld [vmem:[#allocation5 + $0x2578] sm:$0xff]  }
 0x4d8   :  { %v21954_v15 = vpop.f32.mrb[116].mxu0 }
 0x4d9   :  { %v21955_v20 = vpop.f32.mrb[117].mxu0  ;;  %22255 = vmatpush3.bf16.msra.mxu0 %v24215_v35  ;;  %22281 = vmatpush3.bf16.msra.mxu1 %v24224_v47  ;;  %v24255_v35 = vld [vmem:[#allocation5 + $0x2568] sm:$0xff]   ;;  %v24265_v47 = vld [vmem:[#allocation5 + $0x2538] sm:$0xff]  }
 0x4da   :  { %v21956_v21 = vadd.f32 %v21955_v20, %v21954_v15  ;;  %v21957_v26 = vpop.f32.mrb[118].mxu0  ;;  %22256 = vmatprep.subr.bf16.mxu0 %v24217_v39  ;;  %22282 = vmatprep.subr.bf16.mxu1 %v24226_v48  ;;  %v24247_v15 = vld [vmem:[#allocation5 + $0x2558] sm:$0xff]   ;;  %v24258_v39 = vld [vmem:[#allocation5 + $0x25a8] sm:$0xff]  }
 0x4db   :  { %v21958_v30 = vpop.f32.mrb[119].mxu0  ;;  %v24267_v48 = vld [vmem:[#allocation2 + $0x128] ss:$392 sps:$4 sm:$0xff]  }
 0x4dc   :  { %v17509_v27 = vadd.f32 %v21956_v21, %v25078_v31  ;;  %v24219_v31 = vld [vmem:[#allocation5 + $0x2428] sm:$0xff]   ;;  %v1789_v52 = vrot.slane %v24267_v48, %v24852_v37 }
 0x4dd   :  { %22257 = vmatpush3.bf16.msra.mxu0 %v24219_v31  ;;  %22283 = vmatpush3.bf16.msra.mxu1 %v24228_v45  ;;  %v24260_v31 = vld [vmem:[#allocation5 + $0x25f0] sm:$0xff]   ;;  %v24310_v48 = vld [vmem:[#allocation2 + $0x444] ss:$392 sps:$4 sm:$0xff]  }
 0x4de   :  { %v25085_v28 = vadd.f32 %v21978_v24, %v17509_v27  ;;  %22258 = vmatprep.subr.bf16.mxu0 %v24221_v43  ;;  %22312 = vmatprep.subr.bf16.mxu1 %v24236_v58  ;;  %v24262_v43 = vld [vmem:[#allocation5 + $0x25b0] sm:$0xff]   ;;  %v24275_v58 = vld [vmem:[#allocation5 + $0x2600] sm:$0xff]  }
 0x4df   :  { %v24271_v45 = vld [vmem:[#allocation2 + $0x12c] ss:$392 sps:$4 sm:$0xff]  }
 0x4e0   :  { %18107 = vmatmul.mubr.bf16.vlgmr.msra.gmra.mrb[144].mxu1 %v2553_v5  ;;  %v1796_v55 = vrot.slane %v24271_v45, %v24852_v37  ;;  %v24279_v5 = vld [vmem:[#allocation5 + $0x2608] sm:$0xff]  }
 0x4e1   :  { %22259 = vmatpush3.bf16.msra.mxu0 %v24223_v41  ;;  %22313 = vmatpush3.bf16.msra.mxu1 %v24238_v0  ;;  %v24264_v41 = vld [vmem:[#allocation5 + $0x25f8] sm:$0xff]   ;;  %v24277_v0 = vld [vmem:[#allocation5 + $0x2648] sm:$0xff]  }
 0x4e2   :  { %22260 = vmatprep.subr.bf16.mxu0 %v24225_v36  ;;  %22314 = vmatprep.subr.bf16.mxu1 %v24240_v6  ;;  %v24266_v36 = vld [vmem:[#allocation5 + $0x25b8] sm:$0xff]   ;;  %v24281_v6 = vld [vmem:[#allocation5 + $0x2650] sm:$0xff]  }
 0x4e5   :  { %22261 = vmatpush3.bf16.msra.mxu0 %v24227_v49  ;;  %22315 = vmatpush3.bf16.msra.mxu1 %v24242_v4  ;;  %v24269_v49 = vld [vmem:[#allocation2 + $0x438] ss:$392 sps:$4 sm:$0xff]   ;;  %v24283_v4 = vld [vmem:[#allocation5 + $0x2610] sm:$0xff]  }
 0x4e6   :  { %22290 = vmatprep.subr.bf16.mxu0 %v24235_v46  ;;  %22316 = vmatprep.subr.bf16.mxu1 %v24244_v11  ;;  %v1803_v44 = vrot.slane %v24269_v49, %v24852_v37  ;;  %v1810_v46 = vrot.slane %v24272_v51, %v24852_v37  ;;  %v24284_v11 = vld [vmem:[#allocation5 + $0x2690] sm:$0xff]  }
 0x4e8   :  { %18067 = vmatmul.mubr.bf16.vlgmr.msra.gmra.mrb[144].mxu0 %v2551_v3  ;;  %v1812_v57 = vcombine.high %v1789_v52, %v1803_v44  ;;  %v1811_v54 = vcombine.low %v1789_v52, %v1803_v44  ;;  %v1814_v60 = vcombine.high %v1796_v55, %v1810_v46  ;;  %v1813_v53 = vcombine.low %v1796_v55, %v1810_v46  ;;  %v24278_v3 = vld [vmem:[#allocation5 + $0x26c8] sm:$0xff]   ;;  %v24311_v52 = vld [vmem:[#allocation5 + $0x2740] sm:$0xff]  }
 0x4e9   :  { %22291 = vmatpush3.bf16.msra.mxu0 %v24237_v59  ;;  %22317 = vmatpush3.bf16.msra.mxu1 %v24246_v14  ;;  %v1846_v44 = vrot.slane %v24310_v48, %v24852_v37 }
 0x4ea   :  { %22292 = vmatprep.subr.bf16.mxu0 %v24239_v1  ;;  %22318 = vmatprep.subr.bf16.mxu1 %v24248_v13  ;;  %v2556_v63 = vpack.c.bf16 %v1812_v57, %v1812_v57  ;;  %v2555_v59 = vpack.c.bf16 %v1811_v54, %v1811_v54  ;;  %v2558_v2 = vpack.c.bf16 %v1814_v60, %v1814_v60  ;;  %v24280_v1 = vld [vmem:[#allocation5 + $0x2688] sm:$0xff]   ;;  %v24287_v13 = vld [vmem:[#allocation5 + $0x2618] sm:$0xff]  }
 0x4eb   :  { %v2557_v62 = vpack.c.bf16 %v1813_v53, %v1813_v53 }
 0x4ec   :  { %18146 = vmatprep.mubr.bf16.mxu0 %v2556_v63  ;;  %18186 = vmatprep.mubr.bf16.mxu1 %v2558_v2  ;;  %v24317_v2 = vld [vmem:[#allocation5 + $0x2708] sm:$0xff]  }
 0x4ed   :  { %22293 = vmatpush3.bf16.msra.mxu0 %v24241_v8  ;;  %22319 = vmatpush3.bf16.msra.mxu1 %v24250_v19  ;;  %v24282_v8 = vld [vmem:[#allocation5 + $0x26d0] sm:$0xff]   ;;  %v24289_v19 = vld [vmem:[#allocation5 + $0x2660] sm:$0xff]  }
 0x4ee   :  { %22294 = vmatprep.subr.bf16.mxu0 %v24243_v9  ;;  %22320 = vmatprep.subr.bf16.mxu1 %v24252_v29  ;;  %v24291_v29 = vld [vmem:[#allocation5 + $0x2620] sm:$0xff]  }
 0x4f1   :  { %22295 = vmatpush3.bf16.msra.mxu0 %v24245_v7  ;;  %22321 = vmatpush3.bf16.msra.mxu1 %v24254_v33  ;;  %v24294_v33 = vld [vmem:[#allocation5 + $0x26e8] sm:$0xff]  }
 0x4f2   :  { %22296 = vmatprep.subr.bf16.mxu0 %v24247_v15  ;;  %22322 = vmatprep.subr.bf16.mxu1 %v24256_v38  ;;  %v24297_v38 = vld [vmem:[#allocation5 + $0x2670] sm:$0xff]  }
 0x4f3   :  { %v22020_v10 = vpop.f32.mrb[120].mxu1 }
 0x4f4   :  { %v22021_v20 = vpop.f32.mrb[121].mxu1 }
 0x4f5   :  { %v22022_v21 = vadd.f32 %v22021_v20, %v22020_v10  ;;  %v22023_v26 = vpop.f32.mrb[122].mxu1  ;;  %22297 = vmatpush3.bf16.msra.mxu0 %v24249_v16  ;;  %22323 = vmatpush3.bf16.msra.mxu1 %v24258_v39  ;;  %v24286_v10 = vld [vmem:[#allocation5 + $0x26d8] sm:$0xff]   ;;  %v24299_v39 = vld [vmem:[#allocation5 + $0x2630] sm:$0xff]  }
 0x4f6   :  { %v22024_v30 = vpop.f32.mrb[123].mxu1  ;;  %22298 = vmatprep.subr.bf16.mxu0 %v24251_v22  ;;  %22324 = vmatprep.subr.bf16.mxu1 %v24260_v31  ;;  %v24288_v16 = vld [vmem:[#allocation5 + $0x2698] sm:$0xff]   ;;  %v24290_v26 = vld [vmem:[#allocation5 + $0x26e0] sm:$0xff]  }
 0x4f7   :  { %v24292_v30 = vld [vmem:[#allocation5 + $0x26a0] sm:$0xff]   ;;  %v24301_v31 = vld [vmem:[#allocation5 + $0x2678] sm:$0xff]  }
 0x4f9   :  { %22299 = vmatpush3.bf16.msra.mxu0 %v24253_v32  ;;  %22325 = vmatpush3.bf16.msra.mxu1 %v24262_v43  ;;  %v24293_v32 = vld [vmem:[#allocation5 + $0x2668] sm:$0xff]   ;;  %v24303_v43 = vld [vmem:[#allocation5 + $0x2638] sm:$0xff]  }
 0x4fa   :  { %22300 = vmatprep.subr.bf16.mxu0 %v24255_v35  ;;  %22326 = vmatprep.subr.bf16.mxu1 %v24264_v41  ;;  %v24296_v35 = vld [vmem:[#allocation5 + $0x26a8] sm:$0xff]   ;;  %v24305_v41 = vld [vmem:[#allocation2 + $0x130] ss:$392 sps:$4 sm:$0xff]  }
 0x4fb   :  { %v21998_v12 = vpop.f32.mrb[120].mxu0  ;;  %v1825_v49 = vrot.slane %v24305_v41, %v24852_v37  ;;  %v24348_v41 = vld [vmem:[#allocation2 + $0x44c] ss:$392 sps:$4 sm:$0xff]  }
 0x4fc   :  { %v21999_v17 = vpop.f32.mrb[121].mxu0 }
 0x4fd   :  { %v22000_v18 = vadd.f32 %v21999_v17, %v21998_v12  ;;  %v22001_v23 = vpop.f32.mrb[122].mxu0  ;;  %22327 = vmatpush3.bf16.msra.mxu1 %v24266_v36  ;;  %v24285_v12 = vld [vmem:[#allocation5 + $0x2658] sm:$0xff]  }
 0x4fe   :  { %v22002_v27 = vpop.f32.mrb[123].mxu0  ;;  %22356 = vmatprep.subr.bf16.mxu1 %v24274_v56  ;;  %v24309_v36 = vld [vmem:[#allocation2 + $0x134] ss:$392 sps:$4 sm:$0xff]   ;;  %v24313_v56 = vld [vmem:[#allocation5 + $0x2700] sm:$0xff]  }
 0x4ff   :  { %v17589_v24 = vadd.f32 %v22000_v18, %v25085_v28  ;;  %v24257_v28 = vld [vmem:[#allocation5 + $0x2528] sm:$0xff]   ;;  %v1832_v51 = vrot.slane %v24309_v36, %v24852_v37  ;;  %v24349_v36 = vld [vmem:[#allocation5 + $0x2840] sm:$0xff]  }
 0x500   :  { %22301 = vmatpush3.bf16.msra.mxu0 %v24257_v28  ;;  %18187 = vmatmul.mubr.bf16.vlgmr.msra.gmra.mrb[148].mxu1 %v2557_v62  ;;  %v24298_v28 = vld [vmem:[#allocation5 + $0x26f0] sm:$0xff]   ;;  %v24318_v62 = vld [vmem:[#allocation5 + $0x2788] sm:$0xff]  }
 0x501   :  { %v25092_v25 = vadd.f32 %v22022_v21, %v17589_v24  ;;  %22302 = vmatprep.subr.bf16.mxu0 %v24259_v40  ;;  %22357 = vmatpush3.bf16.msra.mxu1 %v24276_v61  ;;  %v24300_v40 = vld [vmem:[#allocation5 + $0x26b0] sm:$0xff]   ;;  %v1850_v57 = vcombine.high %v1832_v51, %v1846_v44  ;;  %v1849_v54 = vcombine.low %v1832_v51, %v1846_v44  ;;  %v24315_v61 = vld [vmem:[#allocation5 + $0x2748] sm:$0xff]   ;;  %v24350_v51 = vld [vmem:[#allocation5 + $0x28c0] sm:$0xff]  }
 0x502   :  { %22358 = vmatprep.subr.bf16.mxu1 %v24278_v3  ;;  %v24319_v3 = vld [vmem:[#allocation5 + $0x2750] sm:$0xff]  }
 0x503   :  { %v2562_v63 = vpack.c.bf16 %v1850_v57, %v1850_v57 }
 0x504   :  { %22303 = vmatpush3.bf16.msra.mxu0 %v24261_v42  ;;  %v24302_v42 = vld [vmem:[#allocation5 + $0x26f8] sm:$0xff]  }
 0x505   :  { %22304 = vmatprep.subr.bf16.mxu0 %v24263_v34  ;;  %22359 = vmatpush3.bf16.msra.mxu1 %v24280_v1  ;;  %v24304_v34 = vld [vmem:[#allocation5 + $0x26b8] sm:$0xff]   ;;  %v24321_v1 = vld [vmem:[#allocation5 + $0x2710] sm:$0xff]  }
 0x506   :  { %22360 = vmatprep.subr.bf16.mxu1 %v24282_v8  ;;  %18266 = vmatprep.mubr.bf16.mxu1 %v2562_v63  ;;  %v24322_v8 = vld [vmem:[#allocation5 + $0x2790] sm:$0xff]   ;;  %v24355_v63 = vld [vmem:[#allocation5 + $0x2808] sm:$0xff]  }
 0x508   :  { %22305 = vmatpush3.bf16.msra.mxu0 %v24265_v47  ;;  %v24307_v47 = vld [vmem:[#allocation2 + $0x440] ss:$392 sps:$4 sm:$0xff]  }
 0x509   :  { %22334 = vmatprep.subr.bf16.mxu0 %v24273_v50  ;;  %22361 = vmatpush3.bf16.msra.mxu1 %v24284_v11  ;;  %v1839_v45 = vrot.slane %v24307_v47, %v24852_v37  ;;  %v24312_v50 = vld [vmem:[#allocation5 + $0x27c0] sm:$0xff]  }
 0x50a   :  { %22362 = vmatprep.subr.bf16.mxu1 %v24286_v10  ;;  %v24325_v10 = vld [vmem:[#allocation5 + $0x2718] sm:$0xff]  }
 0x50b   :  { %18147 = vmatmul.mubr.bf16.vlgmr.msra.gmra.mrb[148].mxu0 %v2555_v59  ;;  %v1848_v55 = vcombine.high %v1825_v49, %v1839_v45  ;;  %v1847_v46 = vcombine.low %v1825_v49, %v1839_v45  ;;  %v2561_v59 = vpack.c.bf16 %v1849_v54, %v1849_v54  ;;  %v1882_v45 = vrot.slane %v24348_v41, %v24852_v37  ;;  %v24387_v41 = vld [vmem:[#allocation5 + $0x2940] sm:$0xff]  }
 0x50c   :  { %22335 = vmatpush3.bf16.msra.mxu0 %v24275_v58  ;;  %v24314_v58 = vld [vmem:[#allocation5 + $0x2780] sm:$0xff]  }
 0x50d   :  { %22336 = vmatprep.subr.bf16.mxu0 %v24277_v0  ;;  %22363 = vmatpush3.bf16.msra.mxu1 %v24288_v16  ;;  %v2560_v60 = vpack.c.bf16 %v1848_v55, %v1848_v55  ;;  %v2559_v53 = vpack.c.bf16 %v1847_v46, %v1847_v46  ;;  %v24316_v0 = vld [vmem:[#allocation5 + $0x27c8] sm:$0xff]   ;;  %v24327_v16 = vld [vmem:[#allocation5 + $0x2760] sm:$0xff]  }
 0x50e   :  { %22364 = vmatprep.subr.bf16.mxu1 %v24290_v26  ;;  %v24329_v26 = vld [vmem:[#allocation5 + $0x2720] sm:$0xff]  }
 0x50f   :  { %18226 = vmatprep.mubr.bf16.mxu0 %v2560_v60  ;;  %v24351_v46 = vld [vmem:[#allocation5 + $0x2800] sm:$0xff]  }
 0x510   :  { %22337 = vmatpush3.bf16.msra.mxu0 %v24279_v5  ;;  %v24320_v5 = vld [vmem:[#allocation5 + $0x27d0] sm:$0xff]  }
 0x511   :  { %22338 = vmatprep.subr.bf16.mxu0 %v24281_v6  ;;  %22365 = vmatpush3.bf16.msra.mxu1 %v24292_v30  ;;  %v24332_v30 = vld [vmem:[#allocation5 + $0x27e8] sm:$0xff]  }
 0x512   :  { %22366 = vmatprep.subr.bf16.mxu1 %v24294_v33  ;;  %v24335_v33 = vld [vmem:[#allocation5 + $0x2770] sm:$0xff]  }
 0x513   :  { %v22064_v7 = vpop.f32.mrb[124].mxu1 }
 0x514   :  { %v22065_v17 = vpop.f32.mrb[125].mxu1  ;;  %22339 = vmatpush3.bf16.msra.mxu0 %v24283_v4 }
 0x515   :  { %v22066_v18 = vadd.f32 %v22065_v17, %v22064_v7  ;;  %v22067_v23 = vpop.f32.mrb[126].mxu1  ;;  %22340 = vmatprep.subr.bf16.mxu0 %v24285_v12  ;;  %22367 = vmatpush3.bf16.msra.mxu1 %v24296_v35  ;;  %v24324_v7 = vld [vmem:[#allocation5 + $0x27d8] sm:$0xff]   ;;  %v24337_v35 = vld [vmem:[#allocation5 + $0x2730] sm:$0xff]  }
 0x516   :  { %v22068_v27 = vpop.f32.mrb[127].mxu1  ;;  %22368 = vmatprep.subr.bf16.mxu1 %v24298_v28  ;;  %v24328_v23 = vld [vmem:[#allocation5 + $0x27e0] sm:$0xff]   ;;  %v24339_v28 = vld [vmem:[#allocation5 + $0x2778] sm:$0xff]  }
 0x517   :  { %v24330_v27 = vld [vmem:[#allocation5 + $0x27a0] sm:$0xff]  }
 0x518   :  { %22341 = vmatpush3.bf16.msra.mxu0 %v24287_v13  ;;  %v24326_v13 = vld [vmem:[#allocation5 + $0x2798] sm:$0xff]  }
 0x519   :  { %22342 = vmatprep.subr.bf16.mxu0 %v24289_v19  ;;  %22369 = vmatpush3.bf16.msra.mxu1 %v24300_v40  ;;  %v24341_v40 = vld [vmem:[#allocation5 + $0x2738] sm:$0xff]  }
 0x51a   :  { %22370 = vmatprep.subr.bf16.mxu1 %v24302_v42  ;;  %v24343_v42 = vld [vmem:[#allocation2 + $0x138] ss:$392 sps:$4 sm:$0xff]  }
 0x51b   :  { %v22042_v9 = vpop.f32.mrb[124].mxu0  ;;  %v1861_v47 = vrot.slane %v24343_v42, %v24852_v37  ;;  %v24386_v42 = vld [vmem:[#allocation2 + $0x454] ss:$392 sps:$4 sm:$0xff]  }
 0x51c   :  { %v22043_v14 = vpop.f32.mrb[125].mxu0  ;;  %22343 = vmatpush3.bf16.msra.mxu0 %v24291_v29  ;;  %v24331_v29 = vld [vmem:[#allocation5 + $0x2768] sm:$0xff]  }
 0x51d   :  { %v22044_v15 = vadd.f32 %v22043_v14, %v22042_v9  ;;  %v22045_v20 = vpop.f32.mrb[126].mxu0  ;;  %22344 = vmatprep.subr.bf16.mxu0 %v24293_v32  ;;  %22371 = vmatpush3.bf16.msra.mxu1 %v24304_v34  ;;  %v24323_v9 = vld [vmem:[#allocation5 + $0x2758] sm:$0xff]   ;;  %v24334_v32 = vld [vmem:[#allocation5 + $0x27a8] sm:$0xff]  }
 0x51e   :  { %v22046_v24 = vpop.f32.mrb[127].mxu0  ;;  %22400 = vmatprep.subr.bf16.mxu1 %v24312_v50  ;;  %v24347_v34 = vld [vmem:[#allocation2 + $0x13c] ss:$392 sps:$4 sm:$0xff]  }
 0x51f   :  { %v17669_v21 = vadd.f32 %v22044_v15, %v25092_v25  ;;  %v24295_v25 = vld [vmem:[#allocation5 + $0x2628] sm:$0xff]   ;;  %v1868_v49 = vrot.slane %v24347_v34, %v24852_v37 }
 0x520   :  { %22345 = vmatpush3.bf16.msra.mxu0 %v24295_v25  ;;  %18267 = vmatmul.mubr.bf16.vlgmr.msra.gmra.mrb[152].mxu1 %v2561_v59  ;;  %v24336_v25 = vld [vmem:[#allocation5 + $0x27f0] sm:$0xff]   ;;  %v24356_v59 = vld [vmem:[#allocation5 + $0x2888] sm:$0xff]  }
 0x521   :  { %v25099_v22 = vadd.f32 %v22066_v18, %v17669_v21  ;;  %22346 = vmatprep.subr.bf16.mxu0 %v24297_v38  ;;  %22401 = vmatpush3.bf16.msra.mxu1 %v24314_v58  ;;  %v24338_v38 = vld [vmem:[#allocation5 + $0x27b0] sm:$0xff]   ;;  %v1886_v44 = vcombine.high %v1868_v49, %v1882_v45  ;;  %v1885_v55 = vcombine.low %v1868_v49, %v1882_v45 }
 0x522   :  { %22402 = vmatprep.subr.bf16.mxu1 %v24316_v0  ;;  %v24357_v0 = vld [vmem:[#allocation5 + $0x2850] sm:$0xff]  }
 0x523   :  { %v2566_v54 = vpack.c.bf16 %v1886_v44, %v1886_v44  ;;  %v2565_v60 = vpack.c.bf16 %v1885_v55, %v1885_v55 }
 0x524   :  { %22347 = vmatpush3.bf16.msra.mxu0 %v24299_v39  ;;  %v24340_v39 = vld [vmem:[#allocation5 + $0x27f8] sm:$0xff]  }
 0x525   :  { %22348 = vmatprep.subr.bf16.mxu0 %v24301_v31  ;;  %22403 = vmatpush3.bf16.msra.mxu1 %v24318_v62  ;;  %v24342_v31 = vld [vmem:[#allocation5 + $0x27b8] sm:$0xff]   ;;  %v24359_v62 = vld [vmem:[#allocation5 + $0x2810] sm:$0xff]  }
 0x526   :  { %22404 = vmatprep.subr.bf16.mxu1 %v24320_v5  ;;  %18346 = vmatprep.mubr.bf16.mxu1 %v2566_v54  ;;  %v24360_v5 = vld [vmem:[#allocation5 + $0x2890] sm:$0xff]  }
 0x528   :  { %22349 = vmatpush3.bf16.msra.mxu0 %v24303_v43  ;;  %v24345_v43 = vld [vmem:[#allocation2 + $0x448] ss:$392 sps:$4 sm:$0xff]  }
 0x529   :  { %22378 = vmatprep.subr.bf16.mxu0 %v24311_v52  ;;  %22405 = vmatpush3.bf16.msra.mxu1 %v24322_v8  ;;  %v1875_v48 = vrot.slane %v24345_v43, %v24852_v37 }
 0x52a   :  { %22406 = vmatprep.subr.bf16.mxu1 %v24324_v7  ;;  %v24363_v7 = vld [vmem:[#allocation5 + $0x2818] sm:$0xff]  }
 0x52b   :  { %18227 = vmatmul.mubr.bf16.vlgmr.msra.gmra.mrb[152].mxu0 %v2559_v53  ;;  %v1884_v52 = vcombine.high %v1861_v47, %v1875_v48  ;;  %v1883_v50 = vcombine.low %v1861_v47, %v1875_v48  ;;  %v24353_v53 = vld [vmem:[#allocation5 + $0x2848] sm:$0xff]   ;;  %v24388_v48 = vld [vmem:[#allocation5 + $0x29c0] sm:$0xff]  }
 0x52c   :  { %22379 = vmatpush3.bf16.msra.mxu0 %v24313_v56  ;;  %v24352_v56 = vld [vmem:[#allocation5 + $0x2880] sm:$0xff]  }
 0x52d   :  { %22380 = vmatprep.subr.bf16.mxu0 %v24315_v61  ;;  %22407 = vmatpush3.bf16.msra.mxu1 %v24326_v13  ;;  %v2564_v57 = vpack.c.bf16 %v1884_v52, %v1884_v52  ;;  %v2563_v58 = vpack.c.bf16 %v1883_v50, %v1883_v50  ;;  %v24354_v61 = vld [vmem:[#allocation5 + $0x28c8] sm:$0xff]   ;;  %v24365_v13 = vld [vmem:[#allocation5 + $0x2860] sm:$0xff]  }
 0x52e   :  { %22408 = vmatprep.subr.bf16.mxu1 %v24328_v23  ;;  %v24367_v23 = vld [vmem:[#allocation5 + $0x2820] sm:$0xff]  }
 0x52f   :  { %18306 = vmatprep.mubr.bf16.mxu0 %v2564_v57  ;;  %v24390_v50 = vld [vmem:[#allocation5 + $0x2980] sm:$0xff]  }
 0x530   :  { %22381 = vmatpush3.bf16.msra.mxu0 %v24317_v2  ;;  %v24358_v2 = vld [vmem:[#allocation5 + $0x28d0] sm:$0xff]  }
 0x531   :  { %22382 = vmatprep.subr.bf16.mxu0 %v24319_v3  ;;  %22409 = vmatpush3.bf16.msra.mxu1 %v24330_v27  ;;  %v24370_v27 = vld [vmem:[#allocation5 + $0x28e8] sm:$0xff]  }
 0x532   :  { %22410 = vmatprep.subr.bf16.mxu1 %v24332_v30  ;;  %v24373_v30 = vld [vmem:[#allocation5 + $0x2870] sm:$0xff]  }
 0x533   :  { %v22108_v4 = vpop.f32.mrb[128].mxu1 }
 0x534   :  { %v22109_v14 = vpop.f32.mrb[129].mxu1  ;;  %22383 = vmatpush3.bf16.msra.mxu0 %v24321_v1 }
 0x535   :  { %v22110_v15 = vadd.f32 %v22109_v14, %v22108_v4  ;;  %v22111_v20 = vpop.f32.mrb[130].mxu1  ;;  %22384 = vmatprep.subr.bf16.mxu0 %v24323_v9  ;;  %22411 = vmatpush3.bf16.msra.mxu1 %v24334_v32  ;;  %v24362_v4 = vld [vmem:[#allocation5 + $0x28d8] sm:$0xff]   ;;  %v24375_v32 = vld [vmem:[#allocation5 + $0x2830] sm:$0xff]  }
 0x536   :  { %v22112_v24 = vpop.f32.mrb[131].mxu1  ;;  %22412 = vmatprep.subr.bf16.mxu1 %v24336_v25  ;;  %v24366_v20 = vld [vmem:[#allocation5 + $0x28e0] sm:$0xff]   ;;  %v24377_v25 = vld [vmem:[#allocation5 + $0x2878] sm:$0xff]  }
 0x537   :  { %v24368_v24 = vld [vmem:[#allocation5 + $0x28a0] sm:$0xff]  }
 0x538   :  { %22385 = vmatpush3.bf16.msra.mxu0 %v24325_v10  ;;  %v24364_v10 = vld [vmem:[#allocation5 + $0x2898] sm:$0xff]  }
 0x539   :  { %22386 = vmatprep.subr.bf16.mxu0 %v24327_v16  ;;  %22413 = vmatpush3.bf16.msra.mxu1 %v24338_v38  ;;  %v24379_v38 = vld [vmem:[#allocation5 + $0x2838] sm:$0xff]  }
 0x53a   :  { %22414 = vmatprep.subr.bf16.mxu1 %v24340_v39  ;;  %v24381_v39 = vld [vmem:[#allocation2 + $0x140] ss:$392 sps:$4 sm:$0xff]  }
 0x53b   :  { %v22086_v6 = vpop.f32.mrb[128].mxu0  ;;  %v1897_v43 = vrot.slane %v24381_v39, %v24852_v37  ;;  %v24424_v39 = vld [vmem:[#allocation2 + $0x45c] ss:$392 sps:$4 sm:$0xff]  }
 0x53c   :  { %v22087_v11 = vpop.f32.mrb[129].mxu0  ;;  %22387 = vmatpush3.bf16.msra.mxu0 %v24329_v26  ;;  %v24369_v26 = vld [vmem:[#allocation5 + $0x2868] sm:$0xff]  }
 0x53d   :  { %v22088_v12 = vadd.f32 %v22087_v11, %v22086_v6  ;;  %v22089_v17 = vpop.f32.mrb[130].mxu0  ;;  %22388 = vmatprep.subr.bf16.mxu0 %v24331_v29  ;;  %22415 = vmatpush3.bf16.msra.mxu1 %v24342_v31  ;;  %v24361_v6 = vld [vmem:[#allocation5 + $0x2858] sm:$0xff]   ;;  %v24372_v29 = vld [vmem:[#allocation5 + $0x28a8] sm:$0xff]  }
 0x53e   :  { %v22090_v21 = vpop.f32.mrb[131].mxu0  ;;  %22444 = vmatprep.subr.bf16.mxu1 %v24350_v51  ;;  %v24385_v31 = vld [vmem:[#allocation2 + $0x144] ss:$392 sps:$4 sm:$0xff]  }
 0x53f   :  { %v17749_v18 = vadd.f32 %v22088_v12, %v25099_v22  ;;  %v24333_v22 = vld [vmem:[#allocation5 + $0x2728] sm:$0xff]   ;;  %v1904_v47 = vrot.slane %v24385_v31, %v24852_v37  ;;  %v24389_v51 = vld [vmem:[#allocation5 + $0x2900] sm:$0xff]  }
 0x540   :  { %22389 = vmatpush3.bf16.msra.mxu0 %v24333_v22  ;;  %18347 = vmatmul.mubr.bf16.vlgmr.msra.gmra.mrb[156].mxu1 %v2565_v60  ;;  %v24374_v22 = vld [vmem:[#allocation5 + $0x28f0] sm:$0xff]   ;;  %v24393_v60 = vld [vmem:[#allocation5 + $0x2908] sm:$0xff]  }
 0x541   :  { %v25106_v19 = vadd.f32 %v22110_v15, %v17749_v18  ;;  %22390 = vmatprep.subr.bf16.mxu0 %v24335_v33  ;;  %22445 = vmatpush3.bf16.msra.mxu1 %v24352_v56  ;;  %v24376_v33 = vld [vmem:[#allocation5 + $0x28b0] sm:$0xff]   ;;  %v24391_v56 = vld [vmem:[#allocation5 + $0x2948] sm:$0xff]  }
 0x542   :  { %22446 = vmatprep.subr.bf16.mxu1 %v24354_v61  ;;  %v24395_v61 = vld [vmem:[#allocation5 + $0x2950] sm:$0xff]  }
 0x544   :  { %22391 = vmatpush3.bf16.msra.mxu0 %v24337_v35  ;;  %v24378_v35 = vld [vmem:[#allocation5 + $0x28f8] sm:$0xff]  }
 0x545   :  { %22392 = vmatprep.subr.bf16.mxu0 %v24339_v28  ;;  %22447 = vmatpush3.bf16.msra.mxu1 %v24356_v59  ;;  %v24380_v28 = vld [vmem:[#allocation5 + $0x28b8] sm:$0xff]   ;;  %v24397_v59 = vld [vmem:[#allocation5 + $0x2910] sm:$0xff]  }
 0x546   :  { %22448 = vmatprep.subr.bf16.mxu1 %v24358_v2  ;;  %v24398_v2 = vld [vmem:[#allocation5 + $0x2990] sm:$0xff]  }
 0x548   :  { %22393 = vmatpush3.bf16.msra.mxu0 %v24341_v40  ;;  %v24383_v40 = vld [vmem:[#allocation2 + $0x450] ss:$392 sps:$4 sm:$0xff]  }
 0x549   :  { %22422 = vmatprep.subr.bf16.mxu0 %v24349_v36  ;;  %22449 = vmatpush3.bf16.msra.mxu1 %v24360_v5  ;;  %v1911_v34 = vrot.slane %v24383_v40, %v24852_v37  ;;  %v1918_v36 = vrot.slane %v24386_v42, %v24852_v37 }
 0x54a   :  { %22450 = vmatprep.subr.bf16.mxu1 %v24362_v4  ;;  %v24401_v4 = vld [vmem:[#allocation5 + $0x2918] sm:$0xff]  }
 0x54b   :  { %18307 = vmatmul.mubr.bf16.vlgmr.msra.gmra.mrb[156].mxu0 %v2563_v58  ;;  %v1920_v49 = vcombine.high %v1897_v43, %v1911_v34  ;;  %v1919_v45 = vcombine.low %v1897_v43, %v1911_v34  ;;  %v1922_v52 = vcombine.high %v1904_v47, %v1918_v36  ;;  %v1921_v44 = vcombine.low %v1904_v47, %v1918_v36  ;;  %v24392_v58 = vld [vmem:[#allocation5 + $0x29c8] sm:$0xff]   ;;  %v24425_v43 = vld [vmem:[#allocation5 + $0x2a40] sm:$0xff]  }
 0x54c   :  { %22423 = vmatpush3.bf16.msra.mxu0 %v24351_v46  ;;  %v1954_v34 = vrot.slane %v24424_v39, %v24852_v37 }
 0x54d   :  { %22424 = vmatprep.subr.bf16.mxu0 %v24353_v53  ;;  %22451 = vmatpush3.bf16.msra.mxu1 %v24364_v10  ;;  %v2568_v55 = vpack.c.bf16 %v1920_v49, %v1920_v49  ;;  %v2567_v46 = vpack.c.bf16 %v1919_v45, %v1919_v45  ;;  %v2570_v57 = vpack.c.bf16 %v1922_v52, %v1922_v52  ;;  %v24394_v53 = vld [vmem:[#allocation5 + $0x2988] sm:$0xff]   ;;  %v24403_v10 = vld [vmem:[#allocation5 + $0x2960] sm:$0xff]  }
 0x54e   :  { %22452 = vmatprep.subr.bf16.mxu1 %v24366_v20  ;;  %v2569_v54 = vpack.c.bf16 %v1921_v44, %v1921_v44  ;;  %v24405_v20 = vld [vmem:[#allocation5 + $0x2920] sm:$0xff]  }
 0x54f   :  { %18386 = vmatprep.mubr.bf16.mxu0 %v2568_v55  ;;  %18426 = vmatprep.mubr.bf16.mxu1 %v2570_v57  ;;  %v24431_v57 = vld [vmem:[#allocation5 + $0x2a08] sm:$0xff]  }
 0x550   :  { %22425 = vmatpush3.bf16.msra.mxu0 %v24355_v63  ;;  %v24396_v63 = vld [vmem:[#allocation5 + $0x29d0] sm:$0xff]  }
 0x551   :  { %22426 = vmatprep.subr.bf16.mxu0 %v24357_v0  ;;  %22453 = vmatpush3.bf16.msra.mxu1 %v24368_v24  ;;  %v24408_v24 = vld [vmem:[#allocation5 + $0x29e8] sm:$0xff]  }
 0x552   :  { %22454 = vmatprep.subr.bf16.mxu1 %v24370_v27  ;;  %v24411_v27 = vld [vmem:[#allocation5 + $0x2970] sm:$0xff]  }
 0x553   :  { %v22152_v1 = vpop.f32.mrb[132].mxu1 }
 0x554   :  { %v22153_v11 = vpop.f32.mrb[133].mxu1  ;;  %22427 = vmatpush3.bf16.msra.mxu0 %v24359_v62 }
 0x555   :  { %v22154_v12 = vadd.f32 %v22153_v11, %v22152_v1  ;;  %v22155_v17 = vpop.f32.mrb[134].mxu1  ;;  %22428 = vmatprep.subr.bf16.mxu0 %v24361_v6  ;;  %22455 = vmatpush3.bf16.msra.mxu1 %v24372_v29  ;;  %v24400_v1 = vld [vmem:[#allocation5 + $0x29d8] sm:$0xff]   ;;  %v24413_v29 = vld [vmem:[#allocation5 + $0x2930] sm:$0xff]  }
 0x556   :  { %v22156_v21 = vpop.f32.mrb[135].mxu1  ;;  %22456 = vmatprep.subr.bf16.mxu1 %v24374_v22  ;;  %v24404_v17 = vld [vmem:[#allocation5 + $0x29e0] sm:$0xff]   ;;  %v24415_v22 = vld [vmem:[#allocation5 + $0x2978] sm:$0xff]  }
 0x557   :  { %v24406_v21 = vld [vmem:[#allocation5 + $0x29a0] sm:$0xff]  }
 0x558   :  { %22429 = vmatpush3.bf16.msra.mxu0 %v24363_v7  ;;  %v24402_v7 = vld [vmem:[#allocation5 + $0x2998] sm:$0xff]  }
 0x559   :  { %22430 = vmatprep.subr.bf16.mxu0 %v24365_v13  ;;  %22457 = vmatpush3.bf16.msra.mxu1 %v24376_v33  ;;  %v24417_v33 = vld [vmem:[#allocation5 + $0x2938] sm:$0xff]  }
 0x55a   :  { %22458 = vmatprep.subr.bf16.mxu1 %v24378_v35  ;;  %v24419_v35 = vld [vmem:[#allocation2 + $0x148] ss:$392 sps:$4 sm:$0xff]  }
 0x55b   :  { %v22130_v3 = vpop.f32.mrb[132].mxu0  ;;  %v1933_v40 = vrot.slane %v24419_v35, %v24852_v37  ;;  %v24462_v35 = vld [vmem:[#allocation2 + $0x464] ss:$392 sps:$4 sm:$0xff]  }
 0x55c   :  { %v22131_v8 = vpop.f32.mrb[133].mxu0  ;;  %22431 = vmatpush3.bf16.msra.mxu0 %v24367_v23  ;;  %v24407_v23 = vld [vmem:[#allocation5 + $0x2968] sm:$0xff]  }
 0x55d   :  { %v22132_v9 = vadd.f32 %v22131_v8, %v22130_v3  ;;  %v22133_v14 = vpop.f32.mrb[134].mxu0  ;;  %22432 = vmatprep.subr.bf16.mxu0 %v24369_v26  ;;  %22459 = vmatpush3.bf16.msra.mxu1 %v24380_v28  ;;  %v24399_v3 = vld [vmem:[#allocation5 + $0x2958] sm:$0xff]   ;;  %v24410_v26 = vld [vmem:[#allocation5 + $0x29a8] sm:$0xff]  }
 0x55e   :  { %v22134_v18 = vpop.f32.mrb[135].mxu0  ;;  %22488 = vmatprep.subr.bf16.mxu1 %v24388_v48  ;;  %v24423_v28 = vld [vmem:[#allocation2 + $0x14c] ss:$392 sps:$4 sm:$0xff]   ;;  %v24427_v48 = vld [vmem:[#allocation5 + $0x2a00] sm:$0xff]  }
 0x55f   :  { %v17829_v15 = vadd.f32 %v22132_v9, %v25106_v19  ;;  %v24371_v19 = vld [vmem:[#allocation5 + $0x2828] sm:$0xff]   ;;  %v1940_v42 = vrot.slane %v24423_v28, %v24852_v37  ;;  %v24463_v28 = vld [vmem:[#allocation5 + $0x2b40] sm:$0xff]  }
 0x560   :  { %22433 = vmatpush3.bf16.msra.mxu0 %v24371_v19  ;;  %18427 = vmatmul.mubr.bf16.vlgmr.msra.gmra.mrb[160].mxu1 %v2569_v54  ;;  %v24412_v19 = vld [vmem:[#allocation5 + $0x29f0] sm:$0xff]   ;;  %v24432_v54 = vld [vmem:[#allocation5 + $0x2a88] sm:$0xff]  }
 0x561   :  { %v25113_v16 = vadd.f32 %v22154_v12, %v17829_v15  ;;  %22434 = vmatprep.subr.bf16.mxu0 %v24373_v30  ;;  %22489 = vmatpush3.bf16.msra.mxu1 %v24390_v50  ;;  %v24414_v30 = vld [vmem:[#allocation5 + $0x29b0] sm:$0xff]   ;;  %v1958_v49 = vcombine.high %v1940_v42, %v1954_v34  ;;  %v1957_v45 = vcombine.low %v1940_v42, %v1954_v34  ;;  %v24429_v50 = vld [vmem:[#allocation5 + $0x2a48] sm:$0xff]   ;;  %v24464_v42 = vld [vmem:[#allocation5 + $0x2bc0] sm:$0xff]  }
 0x562   :  { %22490 = vmatprep.subr.bf16.mxu1 %v24392_v58  ;;  %v24433_v58 = vld [vmem:[#allocation5 + $0x2a50] sm:$0xff]  }
 0x563   :  { %v2574_v55 = vpack.c.bf16 %v1958_v49, %v1958_v49 }
 0x564   :  { %22435 = vmatpush3.bf16.msra.mxu0 %v24375_v32  ;;  %v24416_v32 = vld [vmem:[#allocation5 + $0x29f8] sm:$0xff]  }
 0x565   :  { %22436 = vmatprep.subr.bf16.mxu0 %v24377_v25  ;;  %22491 = vmatpush3.bf16.msra.mxu1 %v24394_v53  ;;  %v24418_v25 = vld [vmem:[#allocation5 + $0x29b8] sm:$0xff]   ;;  %v24435_v53 = vld [vmem:[#allocation5 + $0x2a10] sm:$0xff]  }
 0x566   :  { %22492 = vmatprep.subr.bf16.mxu1 %v24396_v63  ;;  %18506 = vmatprep.mubr.bf16.mxu1 %v2574_v55  ;;  %v24436_v63 = vld [vmem:[#allocation5 + $0x2a90] sm:$0xff]   ;;  %v24469_v55 = vld [vmem:[#allocation5 + $0x2b08] sm:$0xff]  }
 0x568   :  { %22437 = vmatpush3.bf16.msra.mxu0 %v24379_v38  ;;  %v24421_v38 = vld [vmem:[#allocation2 + $0x458] ss:$392 sps:$4 sm:$0xff]  }
 0x569   :  { %22466 = vmatprep.subr.bf16.mxu0 %v24387_v41  ;;  %22493 = vmatpush3.bf16.msra.mxu1 %v24398_v2  ;;  %v1947_v31 = vrot.slane %v24421_v38, %v24852_v37  ;;  %v24426_v41 = vld [vmem:[#allocation5 + $0x2ac0] sm:$0xff]  }
 0x56a   :  { %22494 = vmatprep.subr.bf16.mxu1 %v24400_v1  ;;  %v24439_v1 = vld [vmem:[#allocation5 + $0x2a18] sm:$0xff]  }
 0x56b   :  { %18387 = vmatmul.mubr.bf16.vlgmr.msra.gmra.mrb[160].mxu0 %v2567_v46  ;;  %v1956_v47 = vcombine.high %v1933_v40, %v1947_v31  ;;  %v1955_v36 = vcombine.low %v1933_v40, %v1947_v31  ;;  %v2573_v46 = vpack.c.bf16 %v1957_v45, %v1957_v45  ;;  %v1990_v31 = vrot.slane %v24462_v35, %v24852_v37  ;;  %v24501_v35 = vld [vmem:[#allocation5 + $0x2c40] sm:$0xff]  }
 0x56c   :  { %22467 = vmatpush3.bf16.msra.mxu0 %v24389_v51  ;;  %v24428_v51 = vld [vmem:[#allocation5 + $0x2a80] sm:$0xff]  }
 0x56d   :  { %22468 = vmatprep.subr.bf16.mxu0 %v24391_v56  ;;  %22495 = vmatpush3.bf16.msra.mxu1 %v24402_v7  ;;  %v2572_v52 = vpack.c.bf16 %v1956_v47, %v1956_v47  ;;  %v2571_v44 = vpack.c.bf16 %v1955_v36, %v1955_v36  ;;  %v24430_v56 = vld [vmem:[#allocation5 + $0x2ac8] sm:$0xff]   ;;  %v24441_v7 = vld [vmem:[#allocation5 + $0x2a60] sm:$0xff]  }
 0x56e   :  { %22496 = vmatprep.subr.bf16.mxu1 %v24404_v17  ;;  %v24443_v17 = vld [vmem:[#allocation5 + $0x2a20] sm:$0xff]  }
 0x56f   :  { %18466 = vmatprep.mubr.bf16.mxu0 %v2572_v52  ;;  %v24465_v36 = vld [vmem:[#allocation5 + $0x2b00] sm:$0xff]  }
 0x570   :  { %22469 = vmatpush3.bf16.msra.mxu0 %v24393_v60  ;;  %v24434_v60 = vld [vmem:[#allocation5 + $0x2ad0] sm:$0xff]  }
 0x571   :  { %22470 = vmatprep.subr.bf16.mxu0 %v24395_v61  ;;  %22497 = vmatpush3.bf16.msra.mxu1 %v24406_v21  ;;  %v24446_v21 = vld [vmem:[#allocation5 + $0x2ae8] sm:$0xff]  }
 0x572   :  { %22498 = vmatprep.subr.bf16.mxu1 %v24408_v24  ;;  %v24449_v24 = vld [vmem:[#allocation5 + $0x2a70] sm:$0xff]  }
 0x573   :  { %v22196_v62 = vpop.f32.mrb[136].mxu1 }
 0x574   :  { %v22197_v8 = vpop.f32.mrb[137].mxu1  ;;  %22471 = vmatpush3.bf16.msra.mxu0 %v24397_v59 }
 0x575   :  { %v22198_v9 = vadd.f32 %v22197_v8, %v22196_v62  ;;  %v22199_v14 = vpop.f32.mrb[138].mxu1  ;;  %22472 = vmatprep.subr.bf16.mxu0 %v24399_v3  ;;  %22499 = vmatpush3.bf16.msra.mxu1 %v24410_v26  ;;  %v24438_v62 = vld [vmem:[#allocation5 + $0x2ad8] sm:$0xff]   ;;  %v24451_v26 = vld [vmem:[#allocation5 + $0x2a30] sm:$0xff]  }
 0x576   :  { %v22200_v18 = vpop.f32.mrb[139].mxu1  ;;  %22500 = vmatprep.subr.bf16.mxu1 %v24412_v19  ;;  %v24442_v14 = vld [vmem:[#allocation5 + $0x2ae0] sm:$0xff]   ;;  %v24453_v19 = vld [vmem:[#allocation5 + $0x2a78] sm:$0xff]  }
 0x577   :  { %v24444_v18 = vld [vmem:[#allocation5 + $0x2aa0] sm:$0xff]  }
 0x578   :  { %22473 = vmatpush3.bf16.msra.mxu0 %v24401_v4  ;;  %v24440_v4 = vld [vmem:[#allocation5 + $0x2a98] sm:$0xff]  }
 0x579   :  { %22474 = vmatprep.subr.bf16.mxu0 %v24403_v10  ;;  %22501 = vmatpush3.bf16.msra.mxu1 %v24414_v30  ;;  %v24455_v30 = vld [vmem:[#allocation5 + $0x2a38] sm:$0xff]  }
 0x57a   :  { %22502 = vmatprep.subr.bf16.mxu1 %v24416_v32  ;;  %v24457_v32 = vld [vmem:[#allocation2 + $0x150] ss:$392 sps:$4 sm:$0xff]  }
 0x57b   :  { %v22174_v0 = vpop.f32.mrb[136].mxu0  ;;  %v1969_v38 = vrot.slane %v24457_v32, %v24852_v37  ;;  %v24500_v32 = vld [vmem:[#allocation2 + $0x46c] ss:$392 sps:$4 sm:$0xff]  }
 0x57c   :  { %v22175_v5 = vpop.f32.mrb[137].mxu0  ;;  %22475 = vmatpush3.bf16.msra.mxu0 %v24405_v20  ;;  %v24445_v20 = vld [vmem:[#allocation5 + $0x2a68] sm:$0xff]  }
 0x57d   :  { %v22176_v6 = vadd.f32 %v22175_v5, %v22174_v0  ;;  %v22177_v11 = vpop.f32.mrb[138].mxu0  ;;  %22476 = vmatprep.subr.bf16.mxu0 %v24407_v23  ;;  %22503 = vmatpush3.bf16.msra.mxu1 %v24418_v25  ;;  %v24437_v0 = vld [vmem:[#allocation5 + $0x2a58] sm:$0xff]   ;;  %v24448_v23 = vld [vmem:[#allocation5 + $0x2aa8] sm:$0xff]  }
 0x57e   :  { %v22178_v15 = vpop.f32.mrb[139].mxu0  ;;  %22532 = vmatprep.subr.bf16.mxu1 %v24426_v41  ;;  %v24461_v25 = vld [vmem:[#allocation2 + $0x154] ss:$392 sps:$4 sm:$0xff]  }
 0x57f   :  { %v17909_v12 = vadd.f32 %v22176_v6, %v25113_v16  ;;  %v24409_v16 = vld [vmem:[#allocation5 + $0x2928] sm:$0xff]   ;;  %v1976_v40 = vrot.slane %v24461_v25, %v24852_v37 }
 0x580   :  { %22477 = vmatpush3.bf16.msra.mxu0 %v24409_v16  ;;  %18507 = vmatmul.mubr.bf16.vlgmr.msra.gmra.mrb[164].mxu1 %v2573_v46  ;;  %v24450_v16 = vld [vmem:[#allocation5 + $0x2af0] sm:$0xff]   ;;  %v24470_v46 = vld [vmem:[#allocation5 + $0x2b88] sm:$0xff]  }
 0x581   :  { %v25120_v13 = vadd.f32 %v22198_v9, %v17909_v12  ;;  %22478 = vmatprep.subr.bf16.mxu0 %v24411_v27  ;;  %22533 = vmatpush3.bf16.msra.mxu1 %v24428_v51  ;;  %v24452_v27 = vld [vmem:[#allocation5 + $0x2ab0] sm:$0xff]   ;;  %v1994_v34 = vcombine.high %v1976_v40, %v1990_v31  ;;  %v1993_v47 = vcombine.low %v1976_v40, %v1990_v31 }
 0x582   :  { %22534 = vmatprep.subr.bf16.mxu1 %v24430_v56  ;;  %v24471_v56 = vld [vmem:[#allocation5 + $0x2b50] sm:$0xff]  }
 0x583   :  { %v2578_v45 = vpack.c.bf16 %v1994_v34, %v1994_v34  ;;  %v2577_v52 = vpack.c.bf16 %v1993_v47, %v1993_v47 }
 0x584   :  { %22479 = vmatpush3.bf16.msra.mxu0 %v24413_v29  ;;  %v24454_v29 = vld [vmem:[#allocation5 + $0x2af8] sm:$0xff]  }
 0x585   :  { %22480 = vmatprep.subr.bf16.mxu0 %v24415_v22  ;;  %22535 = vmatpush3.bf16.msra.mxu1 %v24432_v54  ;;  %v24456_v22 = vld [vmem:[#allocation5 + $0x2ab8] sm:$0xff]   ;;  %v24473_v54 = vld [vmem:[#allocation5 + $0x2b10] sm:$0xff]  }
 0x586   :  { %22536 = vmatprep.subr.bf16.mxu1 %v24434_v60  ;;  %18586 = vmatprep.mubr.bf16.mxu1 %v2578_v45  ;;  %v24474_v60 = vld [vmem:[#allocation5 + $0x2b90] sm:$0xff]  }
 0x588   :  { %22481 = vmatpush3.bf16.msra.mxu0 %v24417_v33  ;;  %v24459_v33 = vld [vmem:[#allocation2 + $0x460] ss:$392 sps:$4 sm:$0xff]  }
 0x589   :  { %22510 = vmatprep.subr.bf16.mxu0 %v24425_v43  ;;  %22537 = vmatpush3.bf16.msra.mxu1 %v24436_v63  ;;  %v1983_v39 = vrot.slane %v24459_v33, %v24852_v37 }
 0x58a   :  { %22538 = vmatprep.subr.bf16.mxu1 %v24438_v62  ;;  %v24477_v62 = vld [vmem:[#allocation5 + $0x2b18] sm:$0xff]  }
 0x58b   :  { %18467 = vmatmul.mubr.bf16.vlgmr.msra.gmra.mrb[164].mxu0 %v2571_v44  ;;  %v1992_v43 = vcombine.high %v1969_v38, %v1983_v39  ;;  %v1991_v41 = vcombine.low %v1969_v38, %v1983_v39  ;;  %v24467_v44 = vld [vmem:[#allocation5 + $0x2b48] sm:$0xff]   ;;  %v24502_v39 = vld [vmem:[#allocation5 + $0x2cc0] sm:$0xff]  }
 0x58c   :  { %22511 = vmatpush3.bf16.msra.mxu0 %v24427_v48  ;;  %v24466_v48 = vld [vmem:[#allocation5 + $0x2b80] sm:$0xff]  }
 0x58d   :  { %22512 = vmatprep.subr.bf16.mxu0 %v24429_v50  ;;  %22539 = vmatpush3.bf16.msra.mxu1 %v24440_v4  ;;  %v2576_v49 = vpack.c.bf16 %v1992_v43, %v1992_v43  ;;  %v2575_v51 = vpack.c.bf16 %v1991_v41, %v1991_v41  ;;  %v24468_v50 = vld [vmem:[#allocation5 + $0x2bc8] sm:$0xff]   ;;  %v24479_v4 = vld [vmem:[#allocation5 + $0x2b60] sm:$0xff]  }
 0x58e   :  { %22540 = vmatprep.subr.bf16.mxu1 %v24442_v14  ;;  %v24481_v14 = vld [vmem:[#allocation5 + $0x2b20] sm:$0xff]  }
 0x58f   :  { %18546 = vmatprep.mubr.bf16.mxu0 %v2576_v49  ;;  %v24504_v41 = vld [vmem:[#allocation5 + $0x2c80] sm:$0xff]  }
 0x590   :  { %22513 = vmatpush3.bf16.msra.mxu0 %v24431_v57  ;;  %v24472_v57 = vld [vmem:[#allocation5 + $0x2bd0] sm:$0xff]  }
 0x591   :  { %22514 = vmatprep.subr.bf16.mxu0 %v24433_v58  ;;  %22541 = vmatpush3.bf16.msra.mxu1 %v24444_v18  ;;  %v24484_v18 = vld [vmem:[#allocation5 + $0x2be8] sm:$0xff]  }
 0x592   :  { %22542 = vmatprep.subr.bf16.mxu1 %v24446_v21  ;;  %v24487_v21 = vld [vmem:[#allocation5 + $0x2b70] sm:$0xff]  }
 0x593   :  { %v22240_v59 = vpop.f32.mrb[140].mxu1 }
 0x594   :  { %v22241_v5 = vpop.f32.mrb[141].mxu1  ;;  %22515 = vmatpush3.bf16.msra.mxu0 %v24435_v53 }
 0x595   :  { %v22242_v6 = vadd.f32 %v22241_v5, %v22240_v59  ;;  %v22243_v11 = vpop.f32.mrb[142].mxu1  ;;  %22516 = vmatprep.subr.bf16.mxu0 %v24437_v0  ;;  %22543 = vmatpush3.bf16.msra.mxu1 %v24448_v23  ;;  %v24476_v59 = vld [vmem:[#allocation5 + $0x2bd8] sm:$0xff]   ;;  %v24489_v23 = vld [vmem:[#allocation5 + $0x2b30] sm:$0xff]  }
 0x596   :  { %v22244_v15 = vpop.f32.mrb[143].mxu1  ;;  %22544 = vmatprep.subr.bf16.mxu1 %v24450_v16  ;;  %v24480_v11 = vld [vmem:[#allocation5 + $0x2be0] sm:$0xff]   ;;  %v24491_v16 = vld [vmem:[#allocation5 + $0x2b78] sm:$0xff]  }
 0x597   :  { %v24482_v15 = vld [vmem:[#allocation5 + $0x2ba0] sm:$0xff]  }
 0x598   :  { %22517 = vmatpush3.bf16.msra.mxu0 %v24439_v1  ;;  %v24478_v1 = vld [vmem:[#allocation5 + $0x2b98] sm:$0xff]  }
 0x599   :  { %22518 = vmatprep.subr.bf16.mxu0 %v24441_v7  ;;  %22545 = vmatpush3.bf16.msra.mxu1 %v24452_v27  ;;  %v24493_v27 = vld [vmem:[#allocation5 + $0x2b38] sm:$0xff]  }
 0x59a   :  { %22546 = vmatprep.subr.bf16.mxu1 %v24454_v29  ;;  %v24495_v29 = vld [vmem:[#allocation2 + $0x158] ss:$392 sps:$4 sm:$0xff]  }
 0x59b   :  { %v22218_v61 = vpop.f32.mrb[140].mxu0  ;;  %v2005_v33 = vrot.slane %v24495_v29, %v24852_v37  ;;  %v24538_v29 = vld [vmem:[#allocation2 + $0x474] ss:$392 sps:$4 sm:$0xff]  }
 0x59c   :  { %v22219_v2 = vpop.f32.mrb[141].mxu0  ;;  %22519 = vmatpush3.bf16.msra.mxu0 %v24443_v17  ;;  %v24483_v17 = vld [vmem:[#allocation5 + $0x2b68] sm:$0xff]  }
 0x59d   :  { %v22220_v3 = vadd.f32 %v22219_v2, %v22218_v61  ;;  %v22221_v8 = vpop.f32.mrb[142].mxu0  ;;  %22520 = vmatprep.subr.bf16.mxu0 %v24445_v20  ;;  %22547 = vmatpush3.bf16.msra.mxu1 %v24456_v22  ;;  %v24475_v61 = vld [vmem:[#allocation5 + $0x2b58] sm:$0xff]   ;;  %v24486_v20 = vld [vmem:[#allocation5 + $0x2ba8] sm:$0xff]  }
 0x59e   :  { %v22222_v12 = vpop.f32.mrb[143].mxu0  ;;  %22576 = vmatprep.subr.bf16.mxu1 %v24464_v42  ;;  %v24499_v22 = vld [vmem:[#allocation2 + $0x15c] ss:$392 sps:$4 sm:$0xff]  }
 0x59f   :  { %v17989_v9 = vadd.f32 %v22220_v3, %v25120_v13  ;;  %v24447_v13 = vld [vmem:[#allocation5 + $0x2a28] sm:$0xff]   ;;  %v2012_v38 = vrot.slane %v24499_v22, %v24852_v37  ;;  %v24503_v42 = vld [vmem:[#allocation5 + $0x2c00] sm:$0xff]  }
 0x5a0   :  { %22521 = vmatpush3.bf16.msra.mxu0 %v24447_v13  ;;  %18587 = vmatmul.mubr.bf16.vlgmr.msra.gmra.mrb[168].mxu1 %v2577_v52  ;;  %v24488_v13 = vld [vmem:[#allocation5 + $0x2bf0] sm:$0xff]   ;;  %v24507_v52 = vld [vmem:[#allocation5 + $0x2c08] sm:$0xff]  }
 0x5a1   :  { %v25127_v10 = vadd.f32 %v22242_v6, %v17989_v9  ;;  %22522 = vmatprep.subr.bf16.mxu0 %v24449_v24  ;;  %22577 = vmatpush3.bf16.msra.mxu1 %v24466_v48  ;;  %v24490_v24 = vld [vmem:[#allocation5 + $0x2bb0] sm:$0xff]   ;;  %v24505_v48 = vld [vmem:[#allocation5 + $0x2c48] sm:$0xff]  }
 0x5a2   :  { %22578 = vmatprep.subr.bf16.mxu1 %v24468_v50  ;;  %v24509_v50 = vld [vmem:[#allocation5 + $0x2c50] sm:$0xff]  }
 0x5a4   :  { %22523 = vmatpush3.bf16.msra.mxu0 %v24451_v26  ;;  %v24492_v26 = vld [vmem:[#allocation5 + $0x2bf8] sm:$0xff]  }
 0x5a5   :  { %22524 = vmatprep.subr.bf16.mxu0 %v24453_v19  ;;  %22579 = vmatpush3.bf16.msra.mxu1 %v24470_v46  ;;  %v24494_v19 = vld [vmem:[#allocation5 + $0x2bb8] sm:$0xff]   ;;  %v24511_v46 = vld [vmem:[#allocation5 + $0x2c10] sm:$0xff]  }
 0x5a6   :  { %22580 = vmatprep.subr.bf16.mxu1 %v24472_v57  ;;  %v24512_v57 = vld [vmem:[#allocation5 + $0x2c90] sm:$0xff]  }
 0x5a8   :  { %22525 = vmatpush3.bf16.msra.mxu0 %v24455_v30  ;;  %v24497_v30 = vld [vmem:[#allocation2 + $0x468] ss:$392 sps:$4 sm:$0xff]  }
 0x5a9   :  { %22554 = vmatprep.subr.bf16.mxu0 %v24463_v28  ;;  %22581 = vmatpush3.bf16.msra.mxu1 %v24474_v60  ;;  %v2019_v25 = vrot.slane %v24497_v30, %v24852_v37  ;;  %v2026_v28 = vrot.slane %v24500_v32, %v24852_v37 }
 0x5aa   :  { %22582 = vmatprep.subr.bf16.mxu1 %v24476_v59  ;;  %v24515_v59 = vld [vmem:[#allocation5 + $0x2c18] sm:$0xff]  }
 0x5ab   :  { %18547 = vmatmul.mubr.bf16.vlgmr.msra.gmra.mrb[168].mxu0 %v2575_v51  ;;  %v2028_v40 = vcombine.high %v2005_v33, %v2019_v25  ;;  %v2027_v31 = vcombine.low %v2005_v33, %v2019_v25  ;;  %v2030_v43 = vcombine.high %v2012_v38, %v2026_v28  ;;  %v2029_v34 = vcombine.low %v2012_v38, %v2026_v28  ;;  %v24506_v51 = vld [vmem:[#allocation5 + $0x2cc8] sm:$0xff]   ;;  %v24539_v33 = vld [vmem:[#allocation5 + $0x2d40] sm:$0xff]  }
 0x5ac   :  { %22555 = vmatpush3.bf16.msra.mxu0 %v24465_v36  ;;  %v2062_v25 = vrot.slane %v24538_v29, %v24852_v37 }
 0x5ad   :  { %22556 = vmatprep.subr.bf16.mxu0 %v24467_v44  ;;  %22583 = vmatpush3.bf16.msra.mxu1 %v24478_v1  ;;  %v2580_v47 = vpack.c.bf16 %v2028_v40, %v2028_v40  ;;  %v2579_v36 = vpack.c.bf16 %v2027_v31, %v2027_v31  ;;  %v2582_v49 = vpack.c.bf16 %v2030_v43, %v2030_v43  ;;  %v24508_v44 = vld [vmem:[#allocation5 + $0x2c88] sm:$0xff]   ;;  %v24517_v1 = vld [vmem:[#allocation5 + $0x2c60] sm:$0xff]  }
 0x5ae   :  { %22584 = vmatprep.subr.bf16.mxu1 %v24480_v11  ;;  %v2581_v45 = vpack.c.bf16 %v2029_v34, %v2029_v34  ;;  %v24519_v11 = vld [vmem:[#allocation5 + $0x2c20] sm:$0xff]  }
 0x5af   :  { %18626 = vmatprep.mubr.bf16.mxu0 %v2580_v47  ;;  %18666 = vmatprep.mubr.bf16.mxu1 %v2582_v49  ;;  %v24545_v49 = vld [vmem:[#allocation5 + $0x2d08] sm:$0xff]  }
 0x5b0   :  { %22557 = vmatpush3.bf16.msra.mxu0 %v24469_v55  ;;  %v24510_v55 = vld [vmem:[#allocation5 + $0x2cd0] sm:$0xff]  }
 0x5b1   :  { %22558 = vmatprep.subr.bf16.mxu0 %v24471_v56  ;;  %22585 = vmatpush3.bf16.msra.mxu1 %v24482_v15  ;;  %v24522_v15 = vld [vmem:[#allocation5 + $0x2ce8] sm:$0xff]  }
 0x5b2   :  { %22586 = vmatprep.subr.bf16.mxu1 %v24484_v18  ;;  %v24525_v18 = vld [vmem:[#allocation5 + $0x2c70] sm:$0xff]  }
 0x5b3   :  { %v22284_v53 = vpop.f32.mrb[144].mxu1 }
 0x5b4   :  { %v22285_v2 = vpop.f32.mrb[145].mxu1  ;;  %22559 = vmatpush3.bf16.msra.mxu0 %v24473_v54 }
 0x5b5   :  { %v22286_v3 = vadd.f32 %v22285_v2, %v22284_v53  ;;  %v22287_v8 = vpop.f32.mrb[146].mxu1  ;;  %22560 = vmatprep.subr.bf16.mxu0 %v24475_v61  ;;  %22587 = vmatpush3.bf16.msra.mxu1 %v24486_v20  ;;  %v24514_v53 = vld [vmem:[#allocation5 + $0x2cd8] sm:$0xff]   ;;  %v24527_v20 = vld [vmem:[#allocation5 + $0x2c30] sm:$0xff]  }
 0x5b6   :  { %v22288_v12 = vpop.f32.mrb[147].mxu1  ;;  %22588 = vmatprep.subr.bf16.mxu1 %v24488_v13  ;;  %v24518_v8 = vld [vmem:[#allocation5 + $0x2ce0] sm:$0xff]   ;;  %v24529_v13 = vld [vmem:[#allocation5 + $0x2c78] sm:$0xff]  }
 0x5b7   :  { %v24520_v12 = vld [vmem:[#allocation5 + $0x2ca0] sm:$0xff]  }
 0x5b8   :  { %22561 = vmatpush3.bf16.msra.mxu0 %v24477_v62  ;;  %v24516_v62 = vld [vmem:[#allocation5 + $0x2c98] sm:$0xff]  }
 0x5b9   :  { %22562 = vmatprep.subr.bf16.mxu0 %v24479_v4  ;;  %22589 = vmatpush3.bf16.msra.mxu1 %v24490_v24  ;;  %v24531_v24 = vld [vmem:[#allocation5 + $0x2c38] sm:$0xff]  }
 0x5ba   :  { %22590 = vmatprep.subr.bf16.mxu1 %v24492_v26  ;;  %v24533_v26 = vld [vmem:[#allocation2 + $0x160] ss:$392 sps:$4 sm:$0xff]  }
 0x5bb   :  { %v22262_v58 = vpop.f32.mrb[144].mxu0  ;;  %v2041_v30 = vrot.slane %v24533_v26, %v24852_v37  ;;  %v24576_v26 = vld [vmem:[#allocation2 + $0x47c] ss:$392 sps:$4 sm:$0xff]  }
 0x5bc   :  { %v22263_v63 = vpop.f32.mrb[145].mxu0  ;;  %22563 = vmatpush3.bf16.msra.mxu0 %v24481_v14  ;;  %v24521_v14 = vld [vmem:[#allocation5 + $0x2c68] sm:$0xff]  }
 0x5bd   :  { %v22264_v0 = vadd.f32 %v22263_v63, %v22262_v58  ;;  %v22265_v5 = vpop.f32.mrb[146].mxu0  ;;  %22564 = vmatprep.subr.bf16.mxu0 %v24483_v17  ;;  %22591 = vmatpush3.bf16.msra.mxu1 %v24494_v19  ;;  %v24513_v58 = vld [vmem:[#allocation5 + $0x2c58] sm:$0xff]   ;;  %v24524_v17 = vld [vmem:[#allocation5 + $0x2ca8] sm:$0xff]  }
 0x5be   :  { %v22266_v9 = vpop.f32.mrb[147].mxu0  ;;  %22620 = vmatprep.subr.bf16.mxu1 %v24502_v39  ;;  %v24537_v19 = vld [vmem:[#allocation2 + $0x164] ss:$392 sps:$4 sm:$0xff]  }
 0x5bf   :  { %v18069_v6 = vadd.f32 %v22264_v0, %v25127_v10  ;;  %v24485_v10 = vld [vmem:[#allocation5 + $0x2b28] sm:$0xff]   ;;  %v2048_v32 = vrot.slane %v24537_v19, %v24852_v37  ;;  %v24541_v39 = vld [vmem:[#allocation5 + $0x2d00] sm:$0xff]  }
 0x5c0   :  { %22565 = vmatpush3.bf16.msra.mxu0 %v24485_v10  ;;  %18667 = vmatmul.mubr.bf16.vlgmr.msra.gmra.mrb[172].mxu1 %v2581_v45  ;;  %v24526_v10 = vld [vmem:[#allocation5 + $0x2cf0] sm:$0xff]   ;;  %v24546_v45 = vld [vmem:[#allocation5 + $0x2d88] sm:$0xff]   ;;  %v24577_v19 = vld [vmem:[#allocation5 + $0x2e40] sm:$0xff]  }
 0x5c1   :  { %v25134_v7 = vadd.f32 %v22286_v3, %v18069_v6  ;;  %22566 = vmatprep.subr.bf16.mxu0 %v24487_v21  ;;  %22621 = vmatpush3.bf16.msra.mxu1 %v24504_v41  ;;  %v24528_v21 = vld [vmem:[#allocation5 + $0x2cb0] sm:$0xff]   ;;  %v2066_v40 = vcombine.high %v2048_v32, %v2062_v25  ;;  %v2065_v31 = vcombine.low %v2048_v32, %v2062_v25  ;;  %v24543_v41 = vld [vmem:[#allocation5 + $0x2d48] sm:$0xff]   ;;  %v24578_v32 = vld [vmem:[#allocation5 + $0x2ec0] sm:$0xff]  }
 0x5c2   :  { %22622 = vmatprep.subr.bf16.mxu1 %v24506_v51  ;;  %v24547_v51 = vld [vmem:[#allocation5 + $0x2d50] sm:$0xff]  }
 0x5c3   :  { %v2586_v47 = vpack.c.bf16 %v2066_v40, %v2066_v40 }
 0x5c4   :  { %22567 = vmatpush3.bf16.msra.mxu0 %v24489_v23  ;;  %v24530_v23 = vld [vmem:[#allocation5 + $0x2cf8] sm:$0xff]  }
 0x5c5   :  { %22568 = vmatprep.subr.bf16.mxu0 %v24491_v16  ;;  %22623 = vmatpush3.bf16.msra.mxu1 %v24508_v44  ;;  %v24532_v16 = vld [vmem:[#allocation5 + $0x2cb8] sm:$0xff]   ;;  %v24549_v44 = vld [vmem:[#allocation5 + $0x2d10] sm:$0xff]  }
 0x5c6   :  { %22624 = vmatprep.subr.bf16.mxu1 %v24510_v55  ;;  %18746 = vmatprep.mubr.bf16.mxu1 %v2586_v47  ;;  %v24550_v55 = vld [vmem:[#allocation5 + $0x2d90] sm:$0xff]   ;;  %v24583_v47 = vld [vmem:[#allocation5 + $0x2e08] sm:$0xff]  }
 0x5c8   :  { %22569 = vmatpush3.bf16.msra.mxu0 %v24493_v27  ;;  %v24535_v27 = vld [vmem:[#allocation2 + $0x470] ss:$392 sps:$4 sm:$0xff]  }
 0x5c9   :  { %22598 = vmatprep.subr.bf16.mxu0 %v24501_v35  ;;  %22625 = vmatpush3.bf16.msra.mxu1 %v24512_v57  ;;  %v2055_v22 = vrot.slane %v24535_v27, %v24852_v37  ;;  %v24540_v35 = vld [vmem:[#allocation5 + $0x2dc0] sm:$0xff]  }
 0x5ca   :  { %22626 = vmatprep.subr.bf16.mxu1 %v24514_v53  ;;  %v24553_v53 = vld [vmem:[#allocation5 + $0x2d18] sm:$0xff]  }
 0x5cb   :  { %18627 = vmatmul.mubr.bf16.vlgmr.msra.gmra.mrb[172].mxu0 %v2579_v36  ;;  %v2064_v38 = vcombine.high %v2041_v30, %v2055_v22  ;;  %v2063_v28 = vcombine.low %v2041_v30, %v2055_v22  ;;  %v2585_v36 = vpack.c.bf16 %v2065_v31, %v2065_v31  ;;  %v2098_v22 = vrot.slane %v24576_v26, %v24852_v37  ;;  %v24615_v26 = vld [vmem:[#allocation5 + $0x2f40] sm:$0xff]  }
 0x5cc   :  { %22599 = vmatpush3.bf16.msra.mxu0 %v24503_v42  ;;  %v24542_v42 = vld [vmem:[#allocation5 + $0x2d80] sm:$0xff]  }
 0x5cd   :  { %22600 = vmatprep.subr.bf16.mxu0 %v24505_v48  ;;  %22627 = vmatpush3.bf16.msra.mxu1 %v24516_v62  ;;  %v2584_v43 = vpack.c.bf16 %v2064_v38, %v2064_v38  ;;  %v2583_v34 = vpack.c.bf16 %v2063_v28, %v2063_v28  ;;  %v24544_v48 = vld [vmem:[#allocation5 + $0x2dc8] sm:$0xff]   ;;  %v24555_v62 = vld [vmem:[#allocation5 + $0x2d60] sm:$0xff]  }
 0x5ce   :  { %22628 = vmatprep.subr.bf16.mxu1 %v24518_v8  ;;  %v24557_v8 = vld [vmem:[#allocation5 + $0x2d20] sm:$0xff]  }
 0x5cf   :  { %18706 = vmatprep.mubr.bf16.mxu0 %v2584_v43  ;;  %v24579_v28 = vld [vmem:[#allocation5 + $0x2e00] sm:$0xff]  }
 0x5d0   :  { %22601 = vmatpush3.bf16.msra.mxu0 %v24507_v52  ;;  %v24548_v52 = vld [vmem:[#allocation5 + $0x2dd0] sm:$0xff]  }
 0x5d1   :  { %22602 = vmatprep.subr.bf16.mxu0 %v24509_v50  ;;  %22629 = vmatpush3.bf16.msra.mxu1 %v24520_v12  ;;  %v24560_v12 = vld [vmem:[#allocation5 + $0x2de8] sm:$0xff]  }
 0x5d2   :  { %22630 = vmatprep.subr.bf16.mxu1 %v24522_v15  ;;  %v24563_v15 = vld [vmem:[#allocation5 + $0x2d70] sm:$0xff]  }
 0x5d3   :  { %v22328_v54 = vpop.f32.mrb[148].mxu1 }
 0x5d4   :  { %v22329_v63 = vpop.f32.mrb[149].mxu1  ;;  %22603 = vmatpush3.bf16.msra.mxu0 %v24511_v46 }
 0x5d5   :  { %v22330_v0 = vadd.f32 %v22329_v63, %v22328_v54  ;;  %v22331_v5 = vpop.f32.mrb[150].mxu1  ;;  %22604 = vmatprep.subr.bf16.mxu0 %v24513_v58  ;;  %22631 = vmatpush3.bf16.msra.mxu1 %v24524_v17  ;;  %v24552_v54 = vld [vmem:[#allocation5 + $0x2dd8] sm:$0xff]   ;;  %v24565_v17 = vld [vmem:[#allocation5 + $0x2d30] sm:$0xff]  }
 0x5d6   :  { %v22332_v9 = vpop.f32.mrb[151].mxu1  ;;  %22632 = vmatprep.subr.bf16.mxu1 %v24526_v10  ;;  %v24556_v5 = vld [vmem:[#allocation5 + $0x2de0] sm:$0xff]   ;;  %v24567_v10 = vld [vmem:[#allocation5 + $0x2d78] sm:$0xff]  }
 0x5d7   :  { %v24558_v9 = vld [vmem:[#allocation5 + $0x2da0] sm:$0xff]  }
 0x5d8   :  { %22605 = vmatpush3.bf16.msra.mxu0 %v24515_v59  ;;  %v24554_v59 = vld [vmem:[#allocation5 + $0x2d98] sm:$0xff]  }
 0x5d9   :  { %22606 = vmatprep.subr.bf16.mxu0 %v24517_v1  ;;  %22633 = vmatpush3.bf16.msra.mxu1 %v24528_v21  ;;  %v24569_v21 = vld [vmem:[#allocation5 + $0x2d38] sm:$0xff]  }
 0x5da   :  { %22634 = vmatprep.subr.bf16.mxu1 %v24530_v23  ;;  %v24571_v23 = vld [vmem:[#allocation2 + $0x168] ss:$392 sps:$4 sm:$0xff]  }
 0x5db   :  { %v2077_v27 = vrot.slane %v24571_v23, %v24852_v37  ;;  %v24614_v23 = vld [vmem:[#allocation2 + $0x484] ss:$392 sps:$4 sm:$0xff]  }
 0x5dc   :  { %22607 = vmatpush3.bf16.msra.mxu0 %v24519_v11  ;;  %v24559_v11 = vld [vmem:[#allocation5 + $0x2d68] sm:$0xff]  }
 0x5dd   :  { %22608 = vmatprep.subr.bf16.mxu0 %v24521_v14  ;;  %22635 = vmatpush3.bf16.msra.mxu1 %v24532_v16  ;;  %v24562_v14 = vld [vmem:[#allocation5 + $0x2da8] sm:$0xff]  }
 0x5de   :  { %v22306_v56 = vpop.f32.mrb[148].mxu0  ;;  %22664 = vmatprep.subr.bf16.mxu1 %v24540_v35  ;;  %v24575_v16 = vld [vmem:[#allocation2 + $0x16c] ss:$392 sps:$4 sm:$0xff]  }
 0x5df   :  { %v22307_v60 = vpop.f32.mrb[149].mxu0  ;;  %v2084_v30 = vrot.slane %v24575_v16, %v24852_v37 }
 0x5e0   :  { %v22308_v61 = vadd.f32 %v22307_v60, %v22306_v56  ;;  %v22309_v2 = vpop.f32.mrb[150].mxu0  ;;  %18747 = vmatmul.mubr.bf16.vlgmr.msra.gmra.mrb[176].mxu1 %v2585_v36  ;;  %v24551_v56 = vld [vmem:[#allocation5 + $0x2d58] sm:$0xff]   ;;  %v24584_v36 = vld [vmem:[#allocation5 + $0x2e88] sm:$0xff]  }
 0x5e1   :  { %v22310_v6 = vpop.f32.mrb[151].mxu0  ;;  %22665 = vmatpush3.bf16.msra.mxu1 %v24542_v42  ;;  %v2102_v25 = vcombine.high %v2084_v30, %v2098_v22  ;;  %v2101_v38 = vcombine.low %v2084_v30, %v2098_v22 }
 0x5e2   :  { %v18149_v3 = vadd.f32 %v22308_v61, %v25134_v7  ;;  %v24523_v7 = vld [vmem:[#allocation5 + $0x2c28] sm:$0xff]   ;;  %22666 = vmatprep.subr.bf16.mxu1 %v24544_v48  ;;  %v24585_v48 = vld [vmem:[#allocation5 + $0x2e50] sm:$0xff]  }
 0x5e3   :  { %22609 = vmatpush3.bf16.msra.mxu0 %v24523_v7  ;;  %v24564_v7 = vld [vmem:[#allocation5 + $0x2df0] sm:$0xff]   ;;  %v2590_v31 = vpack.c.bf16 %v2102_v25, %v2102_v25  ;;  %v2589_v43 = vpack.c.bf16 %v2101_v38, %v2101_v38 }
 0x5e4   :  { %v25141_v4 = vadd.f32 %v22330_v0, %v18149_v3  ;;  %22610 = vmatprep.subr.bf16.mxu0 %v24525_v18  ;;  %v24566_v18 = vld [vmem:[#allocation5 + $0x2db0] sm:$0xff]  }
 0x5e5   :  { %22667 = vmatpush3.bf16.msra.mxu1 %v24546_v45  ;;  %18826 = vmatprep.mubr.bf16.mxu1 %v2590_v31  ;;  %v24587_v45 = vld [vmem:[#allocation5 + $0x2e10] sm:$0xff]  }
 0x5e6   :  { %22668 = vmatprep.subr.bf16.mxu1 %v24548_v52  ;;  %v24588_v52 = vld [vmem:[#allocation5 + $0x2e90] sm:$0xff]  }
 0x5e7   :  { %22611 = vmatpush3.bf16.msra.mxu0 %v24527_v20  ;;  %v24568_v20 = vld [vmem:[#allocation5 + $0x2df8] sm:$0xff]  }
 0x5e8   :  { %22612 = vmatprep.subr.bf16.mxu0 %v24529_v13  ;;  %v24570_v13 = vld [vmem:[#allocation5 + $0x2db8] sm:$0xff]  }
 0x5e9   :  { %22669 = vmatpush3.bf16.msra.mxu1 %v24550_v55 }
 0x5ea   :  { %22670 = vmatprep.subr.bf16.mxu1 %v24552_v54  ;;  %v24591_v54 = vld [vmem:[#allocation5 + $0x2e18] sm:$0xff]  }
 0x5eb   :  { %22613 = vmatpush3.bf16.msra.mxu0 %v24531_v24  ;;  %v24573_v24 = vld [vmem:[#allocation2 + $0x478] ss:$392 sps:$4 sm:$0xff]  }
 0x5ec   :  { %22642 = vmatprep.subr.bf16.mxu0 %v24539_v33  ;;  %v2091_v29 = vrot.slane %v24573_v24, %v24852_v37 }
 0x5ed   :  { %22671 = vmatpush3.bf16.msra.mxu1 %v24554_v59  ;;  %v24593_v59 = vld [vmem:[#allocation5 + $0x2e60] sm:$0xff]  }
 0x5ee   :  { %18707 = vmatmul.mubr.bf16.vlgmr.msra.gmra.mrb[176].mxu0 %v2583_v34  ;;  %22672 = vmatprep.subr.bf16.mxu1 %v24556_v5  ;;  %v2100_v33 = vcombine.high %v2077_v27, %v2091_v29  ;;  %v2099_v35 = vcombine.low %v2077_v27, %v2091_v29  ;;  %v24581_v34 = vld [vmem:[#allocation5 + $0x2e48] sm:$0xff]   ;;  %v24595_v5 = vld [vmem:[#allocation5 + $0x2e20] sm:$0xff]  }
 0x5ef   :  { %22643 = vmatpush3.bf16.msra.mxu0 %v24541_v39  ;;  %v24580_v39 = vld [vmem:[#allocation5 + $0x2e80] sm:$0xff]  }
 0x5f0   :  { %22644 = vmatprep.subr.bf16.mxu0 %v24543_v41  ;;  %v2588_v40 = vpack.c.bf16 %v2100_v33, %v2100_v33  ;;  %v2587_v42 = vpack.c.bf16 %v2099_v35, %v2099_v35  ;;  %v24582_v41 = vld [vmem:[#allocation5 + $0x2ec8] sm:$0xff]   ;;  %v24616_v29 = vld [vmem:[#allocation5 + $0x2fc0] sm:$0xff]  }
 0x5f1   :  { %22673 = vmatpush3.bf16.msra.mxu1 %v24558_v9  ;;  %v24598_v9 = vld [vmem:[#allocation5 + $0x2ee8] sm:$0xff]   ;;  %v24618_v35 = vld [vmem:[#allocation5 + $0x2f80] sm:$0xff]  }
 0x5f2   :  { %22674 = vmatprep.subr.bf16.mxu1 %v24560_v12  ;;  %18786 = vmatprep.mubr.bf16.mxu0 %v2588_v40  ;;  %v24601_v12 = vld [vmem:[#allocation5 + $0x2e70] sm:$0xff]  }
 0x5f3   :  { %v22372_v46 = vpop.f32.mrb[152].mxu1  ;;  %22645 = vmatpush3.bf16.msra.mxu0 %v24545_v49  ;;  %v24586_v49 = vld [vmem:[#allocation5 + $0x2ed0] sm:$0xff]  }
 0x5f4   :  { %22646 = vmatprep.subr.bf16.mxu0 %v24547_v51  ;;  %v22373_v60 = vpop.f32.mrb[153].mxu1 }
 0x5f5   :  { %v22374_v61 = vadd.f32 %v22373_v60, %v22372_v46  ;;  %v22375_v2 = vpop.f32.mrb[154].mxu1  ;;  %22675 = vmatpush3.bf16.msra.mxu1 %v24562_v14  ;;  %v24590_v46 = vld [vmem:[#allocation5 + $0x2ed8] sm:$0xff]   ;;  %v24603_v14 = vld [vmem:[#allocation5 + $0x2e30] sm:$0xff]  }
 0x5f6   :  { %v22376_v6 = vpop.f32.mrb[155].mxu1  ;;  %22676 = vmatprep.subr.bf16.mxu1 %v24564_v7  ;;  %v24594_v2 = vld [vmem:[#allocation5 + $0x2ee0] sm:$0xff]   ;;  %v24605_v7 = vld [vmem:[#allocation5 + $0x2e78] sm:$0xff]  }
 0x5f7   :  { %22647 = vmatpush3.bf16.msra.mxu0 %v24549_v44  ;;  %v24596_v6 = vld [vmem:[#allocation5 + $0x2ea0] sm:$0xff]  }
 0x5f8   :  { %22648 = vmatprep.subr.bf16.mxu0 %v24551_v56 }
 0x5f9   :  { %22677 = vmatpush3.bf16.msra.mxu1 %v24566_v18  ;;  %v24607_v18 = vld [vmem:[#allocation5 + $0x2e38] sm:$0xff]  }
 0x5fa   :  { %22678 = vmatprep.subr.bf16.mxu1 %v24568_v20  ;;  %v24609_v20 = vld [vmem:[#allocation2 + $0x170] ss:$392 sps:$4 sm:$0xff]  }
 0x5fb   :  { %22649 = vmatpush3.bf16.msra.mxu0 %v24553_v53  ;;  %v24592_v53 = vld [vmem:[#allocation5 + $0x2e98] sm:$0xff]   ;;  %v2113_v24 = vrot.slane %v24609_v20, %v24852_v37  ;;  %v24652_v20 = vld [vmem:[#allocation2 + $0x48c] ss:$392 sps:$4 sm:$0xff]  }
 0x5fc   :  { %22650 = vmatprep.subr.bf16.mxu0 %v24555_v62 }
 0x5fd   :  { %22679 = vmatpush3.bf16.msra.mxu1 %v24570_v13  ;;  %v24613_v13 = vld [vmem:[#allocation2 + $0x174] ss:$392 sps:$4 sm:$0xff]  }
 0x5fe   :  { %v22350_v50 = vpop.f32.mrb[152].mxu0  ;;  %22708 = vmatprep.subr.bf16.mxu1 %v24578_v32  ;;  %v2120_v27 = vrot.slane %v24613_v13, %v24852_v37  ;;  %v24617_v32 = vld [vmem:[#allocation5 + $0x2f00] sm:$0xff]  }
 0x5ff   :  { %v22351_v57 = vpop.f32.mrb[153].mxu0  ;;  %22651 = vmatpush3.bf16.msra.mxu0 %v24557_v8  ;;  %v24597_v8 = vld [vmem:[#allocation5 + $0x2e68] sm:$0xff]  }
 0x600   :  { %v22352_v58 = vadd.f32 %v22351_v57, %v22350_v50  ;;  %v22353_v63 = vpop.f32.mrb[154].mxu0  ;;  %22652 = vmatprep.subr.bf16.mxu0 %v24559_v11  ;;  %18827 = vmatmul.mubr.bf16.vlgmr.msra.gmra.mrb[180].mxu1 %v2589_v43  ;;  %v24589_v50 = vld [vmem:[#allocation5 + $0x2e58] sm:$0xff]   ;;  %v24600_v11 = vld [vmem:[#allocation5 + $0x2ea8] sm:$0xff]  }
 0x601   :  { %v22354_v3 = vpop.f32.mrb[155].mxu0  ;;  %22709 = vmatpush3.bf16.msra.mxu1 %v24580_v39  ;;  %v24619_v39 = vld [vmem:[#allocation5 + $0x2f48] sm:$0xff]  }
 0x602   :  { %v18229_v0 = vadd.f32 %v22352_v58, %v25141_v4  ;;  %v24561_v4 = vld [vmem:[#allocation5 + $0x2d28] sm:$0xff]   ;;  %22710 = vmatprep.subr.bf16.mxu1 %v24582_v41  ;;  %v24623_v41 = vld [vmem:[#allocation5 + $0x2f50] sm:$0xff]  }
 0x603   :  { %22653 = vmatpush3.bf16.msra.mxu0 %v24561_v4  ;;  %v24602_v4 = vld [vmem:[#allocation5 + $0x2ef0] sm:$0xff]   ;;  %v24621_v43 = vld [vmem:[#allocation5 + $0x2f08] sm:$0xff]  }
 0x604   :  { %v25148_v1 = vadd.f32 %v22374_v61, %v18229_v0  ;;  %22654 = vmatprep.subr.bf16.mxu0 %v24563_v15  ;;  %v24604_v15 = vld [vmem:[#allocation5 + $0x2eb0] sm:$0xff]  }
 0x605   :  { %22711 = vmatpush3.bf16.msra.mxu1 %v24584_v36  ;;  %v24625_v36 = vld [vmem:[#allocation5 + $0x2f10] sm:$0xff]  }
 0x606   :  { %22712 = vmatprep.subr.bf16.mxu1 %v24586_v49  ;;  %v24626_v49 = vld [vmem:[#allocation5 + $0x2f90] sm:$0xff]  }
 0x607   :  { %22655 = vmatpush3.bf16.msra.mxu0 %v24565_v17  ;;  %v24606_v17 = vld [vmem:[#allocation5 + $0x2ef8] sm:$0xff]  }
 0x608   :  { %22656 = vmatprep.subr.bf16.mxu0 %v24567_v10  ;;  %v24608_v10 = vld [vmem:[#allocation5 + $0x2eb8] sm:$0xff]  }
 0x609   :  { %22713 = vmatpush3.bf16.msra.mxu1 %v24588_v52 }
 0x60a   :  { %22714 = vmatprep.subr.bf16.mxu1 %v24590_v46  ;;  %v24629_v46 = vld [vmem:[#allocation5 + $0x2f18] sm:$0xff]  }
 0x60b   :  { %22657 = vmatpush3.bf16.msra.mxu0 %v24569_v21  ;;  %v24611_v21 = vld [vmem:[#allocation2 + $0x480] ss:$392 sps:$4 sm:$0xff]  }
 0x60c   :  { %22686 = vmatprep.subr.bf16.mxu0 %v24577_v19  ;;  %v2127_v16 = vrot.slane %v24611_v21, %v24852_v37  ;;  %v2134_v19 = vrot.slane %v24614_v23, %v24852_v37 }
 0x60d   :  { %22715 = vmatpush3.bf16.msra.mxu1 %v24592_v53  ;;  %v24631_v53 = vld [vmem:[#allocation5 + $0x2f60] sm:$0xff]  }
 0x60e   :  { %18787 = vmatmul.mubr.bf16.vlgmr.msra.gmra.mrb[180].mxu0 %v2587_v42  ;;  %22716 = vmatprep.subr.bf16.mxu1 %v24594_v2  ;;  %v2136_v30 = vcombine.high %v2113_v24, %v2127_v16  ;;  %v2135_v22 = vcombine.low %v2113_v24, %v2127_v16  ;;  %v2138_v33 = vcombine.high %v2120_v27, %v2134_v19  ;;  %v24620_v42 = vld [vmem:[#allocation5 + $0x2fc8] sm:$0xff]   ;;  %v24633_v2 = vld [vmem:[#allocation5 + $0x2f20] sm:$0xff]  }
 0x60f   :  { %22687 = vmatpush3.bf16.msra.mxu0 %v24579_v28  ;;  %v2137_v25 = vcombine.low %v2120_v27, %v2134_v19  ;;  %v24653_v24 = vld [vmem:[#allocation5 + $0x3040] sm:$0xff]   ;;  %v2170_v16 = vrot.slane %v24652_v20, %v24852_v37 }
 0x610   :  { %22688 = vmatprep.subr.bf16.mxu0 %v24581_v34  ;;  %v2592_v38 = vpack.c.bf16 %v2136_v30, %v2136_v30  ;;  %v2591_v28 = vpack.c.bf16 %v2135_v22, %v2135_v22  ;;  %v2594_v40 = vpack.c.bf16 %v2138_v33, %v2138_v33  ;;  %v24622_v34 = vld [vmem:[#allocation5 + $0x2f88] sm:$0xff]  }
 0x611   :  { %22717 = vmatpush3.bf16.msra.mxu1 %v24596_v6  ;;  %v2593_v31 = vpack.c.bf16 %v2137_v25, %v2137_v25  ;;  %v24636_v6 = vld [vmem:[#allocation5 + $0x2fe8] sm:$0xff]  }
 0x612   :  { %22718 = vmatprep.subr.bf16.mxu1 %v24598_v9  ;;  %18866 = vmatprep.mubr.bf16.mxu0 %v2592_v38  ;;  %v24639_v9 = vld [vmem:[#allocation5 + $0x2f70] sm:$0xff]  }
 0x613   :  { %v22416_v44 = vpop.f32.mrb[156].mxu1  ;;  %22689 = vmatpush3.bf16.msra.mxu0 %v24583_v47  ;;  %18906 = vmatprep.mubr.bf16.mxu1 %v2594_v40  ;;  %v24624_v47 = vld [vmem:[#allocation5 + $0x2fd0] sm:$0xff]   ;;  %v24659_v40 = vld [vmem:[#allocation5 + $0x3008] sm:$0xff]  }
 0x614   :  { %22690 = vmatprep.subr.bf16.mxu0 %v24585_v48  ;;  %v22417_v57 = vpop.f32.mrb[157].mxu1 }
 0x615   :  { %v22418_v58 = vadd.f32 %v22417_v57, %v22416_v44  ;;  %v22419_v63 = vpop.f32.mrb[158].mxu1  ;;  %22719 = vmatpush3.bf16.msra.mxu1 %v24600_v11  ;;  %v24628_v44 = vld [vmem:[#allocation5 + $0x2fd8] sm:$0xff]   ;;  %v24641_v11 = vld [vmem:[#allocation5 + $0x2f30] sm:$0xff]  }
 0x616   :  { %v22420_v3 = vpop.f32.mrb[159].mxu1  ;;  %22720 = vmatprep.subr.bf16.mxu1 %v24602_v4  ;;  %v24632_v63 = vld [vmem:[#allocation5 + $0x2fe0] sm:$0xff]   ;;  %v24643_v4 = vld [vmem:[#allocation5 + $0x2f78] sm:$0xff]  }
 0x617   :  { %22691 = vmatpush3.bf16.msra.mxu0 %v24587_v45  ;;  %v24634_v3 = vld [vmem:[#allocation5 + $0x2fa0] sm:$0xff]  }
 0x618   :  { %22692 = vmatprep.subr.bf16.mxu0 %v24589_v50 }
 0x619   :  { %22721 = vmatpush3.bf16.msra.mxu1 %v24604_v15  ;;  %v24645_v15 = vld [vmem:[#allocation5 + $0x2f38] sm:$0xff]  }
 0x61a   :  { %22722 = vmatprep.subr.bf16.mxu1 %v24606_v17  ;;  %v24647_v17 = vld [vmem:[#allocation2 + $0x178] ss:$392 sps:$4 sm:$0xff]  }
 0x61b   :  { %22693 = vmatpush3.bf16.msra.mxu0 %v24591_v54  ;;  %v24630_v54 = vld [vmem:[#allocation5 + $0x2f98] sm:$0xff]   ;;  %v2149_v21 = vrot.slane %v24647_v17, %v24852_v37 }
 0x61c   :  { %22694 = vmatprep.subr.bf16.mxu0 %v24593_v59  ;;  %v24690_v17 = vld [vmem:[#allocation2 + $0x494] ss:$392 sps:$4 sm:$0xff]  }
 0x61d   :  { %22723 = vmatpush3.bf16.msra.mxu1 %v24608_v10  ;;  %v24651_v10 = vld [vmem:[#allocation2 + $0x17c] ss:$392 sps:$4 sm:$0xff]  }
 0x61e   :  { %v22394_v51 = vpop.f32.mrb[156].mxu0  ;;  %22752 = vmatprep.subr.bf16.mxu1 %v24616_v29  ;;  %v2156_v23 = vrot.slane %v24651_v10, %v24852_v37  ;;  %v24655_v29 = vld [vmem:[#allocation5 + $0x3000] sm:$0xff]  }
 0x61f   :  { %v22395_v55 = vpop.f32.mrb[157].mxu0  ;;  %22695 = vmatpush3.bf16.msra.mxu0 %v24595_v5  ;;  %v24635_v5 = vld [vmem:[#allocation5 + $0x2f68] sm:$0xff]  }
 0x620   :  { %v22396_v56 = vadd.f32 %v22395_v55, %v22394_v51  ;;  %v22397_v60 = vpop.f32.mrb[158].mxu0  ;;  %22696 = vmatprep.subr.bf16.mxu0 %v24597_v8  ;;  %18907 = vmatmul.mubr.bf16.vlgmr.msra.gmra.mrb[184].mxu1 %v2593_v31  ;;  %v24627_v51 = vld [vmem:[#allocation5 + $0x2f58] sm:$0xff]   ;;  %v24638_v8 = vld [vmem:[#allocation5 + $0x2fa8] sm:$0xff]   ;;  %v2174_v30 = vcombine.high %v2156_v23, %v2170_v16  ;;  %v2173_v22 = vcombine.low %v2156_v23, %v2170_v16 }
 0x621   :  { %v22398_v0 = vpop.f32.mrb[159].mxu0  ;;  %22753 = vmatpush3.bf16.msra.mxu1 %v24618_v35  ;;  %v24657_v35 = vld [vmem:[#allocation5 + $0x3048] sm:$0xff]  }
 0x622   :  { %v18309_v61 = vadd.f32 %v22396_v56, %v25148_v1  ;;  %v24599_v1 = vld [vmem:[#allocation5 + $0x2e28] sm:$0xff]   ;;  %22754 = vmatprep.subr.bf16.mxu1 %v24620_v42  ;;  %v2598_v38 = vpack.c.bf16 %v2174_v30, %v2174_v30  ;;  %v24661_v42 = vld [vmem:[#allocation5 + $0x3050] sm:$0xff]  }
 0x623   :  { %22697 = vmatpush3.bf16.msra.mxu0 %v24599_v1  ;;  %v24640_v1 = vld [vmem:[#allocation5 + $0x2ff0] sm:$0xff]   ;;  %v24660_v31 = vld [vmem:[#allocation5 + $0x3088] sm:$0xff]  }
 0x624   :  { %v25155_v62 = vadd.f32 %v22418_v58, %v18309_v61  ;;  %22698 = vmatprep.subr.bf16.mxu0 %v24601_v12  ;;  %v24642_v12 = vld [vmem:[#allocation5 + $0x2fb0] sm:$0xff]   ;;  %18986 = vmatprep.mubr.bf16.mxu1 %v2598_v38 }
 0x625   :  { %22755 = vmatpush3.bf16.msra.mxu1 %v24622_v34  ;;  %v24663_v34 = vld [vmem:[#allocation5 + $0x3010] sm:$0xff]  }
 0x626   :  { %22756 = vmatprep.subr.bf16.mxu1 %v24624_v47  ;;  %v24664_v47 = vld [vmem:[#allocation5 + $0x3090] sm:$0xff]  }
 0x627   :  { %22699 = vmatpush3.bf16.msra.mxu0 %v24603_v14  ;;  %v24644_v14 = vld [vmem:[#allocation5 + $0x2ff8] sm:$0xff]  }
 0x628   :  { %22700 = vmatprep.subr.bf16.mxu0 %v24605_v7  ;;  %v24646_v7 = vld [vmem:[#allocation5 + $0x2fb8] sm:$0xff]  }
 0x629   :  { %22757 = vmatpush3.bf16.msra.mxu1 %v24626_v49 }
 0x62a   :  { %22758 = vmatprep.subr.bf16.mxu1 %v24628_v44  ;;  %v24667_v44 = vld [vmem:[#allocation5 + $0x3018] sm:$0xff]  }
 0x62b   :  { %22701 = vmatpush3.bf16.msra.mxu0 %v24607_v18  ;;  %v24649_v18 = vld [vmem:[#allocation2 + $0x488] ss:$392 sps:$4 sm:$0xff]  }
 0x62c   :  { %22730 = vmatprep.subr.bf16.mxu0 %v24615_v26  ;;  %v2163_v13 = vrot.slane %v24649_v18, %v24852_v37  ;;  %v24654_v26 = vld [vmem:[#allocation5 + $0x30c0] sm:$0xff]  }
 0x62d   :  { %22759 = vmatpush3.bf16.msra.mxu1 %v24630_v54  ;;  %v24669_v54 = vld [vmem:[#allocation5 + $0x3060] sm:$0xff]  }
 0x62e   :  { %18867 = vmatmul.mubr.bf16.vlgmr.msra.gmra.mrb[184].mxu0 %v2591_v28  ;;  %22760 = vmatprep.subr.bf16.mxu1 %v24632_v63  ;;  %v2172_v27 = vcombine.high %v2149_v21, %v2163_v13  ;;  %v2171_v19 = vcombine.low %v2149_v21, %v2163_v13  ;;  %v2597_v28 = vpack.c.bf16 %v2173_v22, %v2173_v22  ;;  %v24671_v63 = vld [vmem:[#allocation5 + $0x3020] sm:$0xff]  }
 0x62f   :  { %22731 = vmatpush3.bf16.msra.mxu0 %v24617_v32  ;;  %v24656_v32 = vld [vmem:[#allocation5 + $0x3080] sm:$0xff]   ;;  %v2206_v21 = vrot.slane %v24690_v17, %v24852_v37 }
 0x630   :  { %22732 = vmatprep.subr.bf16.mxu0 %v24619_v39  ;;  %v2596_v33 = vpack.c.bf16 %v2172_v27, %v2172_v27  ;;  %v2595_v25 = vpack.c.bf16 %v2171_v19, %v2171_v19  ;;  %v24658_v39 = vld [vmem:[#allocation5 + $0x30c8] sm:$0xff]  }
 0x631   :  { %22761 = vmatpush3.bf16.msra.mxu1 %v24634_v3  ;;  %v24674_v3 = vld [vmem:[#allocation5 + $0x30e8] sm:$0xff]  }
 0x632   :  { %22762 = vmatprep.subr.bf16.mxu1 %v24636_v6  ;;  %18946 = vmatprep.mubr.bf16.mxu0 %v2596_v33  ;;  %v24677_v6 = vld [vmem:[#allocation5 + $0x3070] sm:$0xff]  }
 0x633   :  { %v22460_v45 = vpop.f32.mrb[160].mxu1  ;;  %22733 = vmatpush3.bf16.msra.mxu0 %v24621_v43  ;;  %v24662_v43 = vld [vmem:[#allocation5 + $0x30d0] sm:$0xff]  }
 0x634   :  { %22734 = vmatprep.subr.bf16.mxu0 %v24623_v41  ;;  %v22461_v55 = vpop.f32.mrb[161].mxu1 }
 0x635   :  { %v22462_v56 = vadd.f32 %v22461_v55, %v22460_v45  ;;  %v22463_v60 = vpop.f32.mrb[162].mxu1  ;;  %22763 = vmatpush3.bf16.msra.mxu1 %v24638_v8  ;;  %v24666_v45 = vld [vmem:[#allocation5 + $0x30d8] sm:$0xff]   ;;  %v24679_v8 = vld [vmem:[#allocation5 + $0x3030] sm:$0xff]  }
 0x636   :  { %v22464_v0 = vpop.f32.mrb[163].mxu1  ;;  %22764 = vmatprep.subr.bf16.mxu1 %v24640_v1  ;;  %v24670_v60 = vld [vmem:[#allocation5 + $0x30e0] sm:$0xff]   ;;  %v24681_v1 = vld [vmem:[#allocation5 + $0x3078] sm:$0xff]  }
 0x637   :  { %22735 = vmatpush3.bf16.msra.mxu0 %v24625_v36  ;;  %v24672_v0 = vld [vmem:[#allocation5 + $0x30a0] sm:$0xff]  }
 0x638   :  { %22736 = vmatprep.subr.bf16.mxu0 %v24627_v51 }
 0x639   :  { %22765 = vmatpush3.bf16.msra.mxu1 %v24642_v12  ;;  %v24683_v12 = vld [vmem:[#allocation5 + $0x3038] sm:$0xff]  }
 0x63a   :  { %22766 = vmatprep.subr.bf16.mxu1 %v24644_v14  ;;  %v24685_v14 = vld [vmem:[#allocation2 + $0x180] ss:$392 sps:$4 sm:$0xff]  }
 0x63b   :  { %22737 = vmatpush3.bf16.msra.mxu0 %v24629_v46  ;;  %v24668_v46 = vld [vmem:[#allocation5 + $0x3098] sm:$0xff]   ;;  %v2185_v18 = vrot.slane %v24685_v14, %v24852_v37 }
 0x63c   :  { %22738 = vmatprep.subr.bf16.mxu0 %v24631_v53 }
 0x63d   :  { %22767 = vmatpush3.bf16.msra.mxu1 %v24646_v7  ;;  %v24689_v7 = vld [vmem:[#allocation2 + $0x184] ss:$392 sps:$4 sm:$0xff]  }
 0x63e   :  { %v22438_v48 = vpop.f32.mrb[160].mxu0  ;;  %22796 = vmatprep.subr.bf16.mxu1 %v24654_v26  ;;  %v2192_v20 = vrot.slane %v24689_v7, %v24852_v37 }
 0x63f   :  { %v22439_v52 = vpop.f32.mrb[161].mxu0  ;;  %22739 = vmatpush3.bf16.msra.mxu0 %v24633_v2  ;;  %v24673_v2 = vld [vmem:[#allocation5 + $0x3068] sm:$0xff]  }
 0x640   :  { %v22440_v50 = vadd.f32 %v22439_v52, %v22438_v48  ;;  %v22441_v57 = vpop.f32.mrb[162].mxu0  ;;  %22740 = vmatprep.subr.bf16.mxu0 %v24635_v5  ;;  %18987 = vmatmul.mubr.bf16.vlgmr.msra.gmra.mrb[188].mxu1 %v2597_v28  ;;  %v24665_v48 = vld [vmem:[#allocation5 + $0x3058] sm:$0xff]   ;;  %v24676_v5 = vld [vmem:[#allocation5 + $0x30a8] sm:$0xff]   ;;  %v2210_v23 = vcombine.high %v2192_v20, %v2206_v21  ;;  %v2209_v16 = vcombine.low %v2192_v20, %v2206_v21 }
 0x641   :  { %v22442_v61 = vpop.f32.mrb[163].mxu0  ;;  %22797 = vmatpush3.bf16.msra.mxu1 %v24656_v32 }
 0x642   :  { %v18389_v58 = vadd.f32 %v22440_v50, %v25155_v62  ;;  %v24637_v62 = vld [vmem:[#allocation5 + $0x2f28] sm:$0xff]   ;;  %22798 = vmatprep.subr.bf16.mxu1 %v24658_v39  ;;  %v2602_v27 = vpack.c.bf16 %v2210_v23, %v2210_v23 }
 0x643   :  { %22741 = vmatpush3.bf16.msra.mxu0 %v24637_v62  ;;  %v24678_v62 = vld [vmem:[#allocation5 + $0x30f0] sm:$0xff]  }
 0x644   :  { %v25162_v59 = vadd.f32 %v22462_v56, %v18389_v58  ;;  %22742 = vmatprep.subr.bf16.mxu0 %v24639_v9  ;;  %v24680_v9 = vld [vmem:[#allocation5 + $0x30b0] sm:$0xff]   ;;  %19066 = vmatprep.mubr.bf16.mxu1 %v2602_v27 }
 0x645   :  { %22799 = vmatpush3.bf16.msra.mxu1 %v24660_v31 }
 0x646   :  { %22800 = vmatprep.subr.bf16.mxu1 %v24662_v43 }
 0x647   :  { %22743 = vmatpush3.bf16.msra.mxu0 %v24641_v11  ;;  %v24682_v11 = vld [vmem:[#allocation5 + $0x30f8] sm:$0xff]  }
 0x648   :  { %22744 = vmatprep.subr.bf16.mxu0 %v24643_v4  ;;  %v24684_v4 = vld [vmem:[#allocation5 + $0x30b8] sm:$0xff]  }
 0x649   :  { %22801 = vmatpush3.bf16.msra.mxu1 %v24664_v47 }
 0x64a   :  { %22802 = vmatprep.subr.bf16.mxu1 %v24666_v45 }
 0x64b   :  { %22745 = vmatpush3.bf16.msra.mxu0 %v24645_v15  ;;  %v24687_v15 = vld [vmem:[#allocation2 + $0x490] ss:$392 sps:$4 sm:$0xff]  }
 0x64c   :  { %22774 = vmatprep.subr.bf16.mxu0 %v24653_v24  ;;  %v2199_v10 = vrot.slane %v24687_v15, %v24852_v37 }
 0x64d   :  { %22803 = vmatpush3.bf16.msra.mxu1 %v24668_v46 }
 0x64e   :  { %18947 = vmatmul.mubr.bf16.vlgmr.msra.gmra.mrb[188].mxu0 %v2595_v25  ;;  %22804 = vmatprep.subr.bf16.mxu1 %v24670_v60  ;;  %v2208_v13 = vcombine.high %v2185_v18, %v2199_v10  ;;  %v2207_v24 = vcombine.low %v2185_v18, %v2199_v10 }
 0x64f   :  { %22775 = vmatpush3.bf16.msra.mxu0 %v24655_v29  ;;  %v2601_v29 = vpack.c.bf16 %v2209_v16, %v2209_v16 }
 0x650   :  { %22776 = vmatprep.subr.bf16.mxu0 %v24657_v35  ;;  %v2600_v26 = vpack.c.bf16 %v2208_v13, %v2208_v13  ;;  %v2599_v19 = vpack.c.bf16 %v2207_v24, %v2207_v24 }
 0x651   :  { %22805 = vmatpush3.bf16.msra.mxu1 %v24672_v0 }
 0x652   :  { %22806 = vmatprep.subr.bf16.mxu1 %v24674_v3  ;;  %19026 = vmatprep.mubr.bf16.mxu0 %v2600_v26 }
 0x653   :  { %v22504_v36 = vpop.f32.mrb[164].mxu1  ;;  %22777 = vmatpush3.bf16.msra.mxu0 %v24659_v40 }
 0x654   :  { %22778 = vmatprep.subr.bf16.mxu0 %v24661_v42  ;;  %v22505_v52 = vpop.f32.mrb[165].mxu1 }
 0x655   :  { %v22506_v50 = vadd.f32 %v22505_v52, %v22504_v36  ;;  %v22507_v57 = vpop.f32.mrb[166].mxu1  ;;  %22807 = vmatpush3.bf16.msra.mxu1 %v24676_v5 }
 0x656   :  { %v22508_v61 = vpop.f32.mrb[167].mxu1  ;;  %22808 = vmatprep.subr.bf16.mxu1 %v24678_v62 }
 0x657   :  { %22779 = vmatpush3.bf16.msra.mxu0 %v24663_v34 }
 0x658   :  { %22780 = vmatprep.subr.bf16.mxu0 %v24665_v48 }
 0x659   :  { %22809 = vmatpush3.bf16.msra.mxu1 %v24680_v9 }
 0x65a   :  { %22810 = vmatprep.subr.bf16.mxu1 %v24682_v11 }
 0x65b   :  { %22781 = vmatpush3.bf16.msra.mxu0 %v24667_v44 }
 0x65c   :  { %22782 = vmatprep.subr.bf16.mxu0 %v24669_v54 }
 0x65d   :  { %22811 = vmatpush3.bf16.msra.mxu1 %v24684_v4 }
 0x65e   :  { %v22482_v41 = vpop.f32.mrb[164].mxu0 }
 0x65f   :  { %v22483_v49 = vpop.f32.mrb[165].mxu0  ;;  %22783 = vmatpush3.bf16.msra.mxu0 %v24671_v63 }
 0x660   :  { %v22484_v51 = vadd.f32 %v22483_v49, %v22482_v41  ;;  %v22485_v55 = vpop.f32.mrb[166].mxu0  ;;  %22784 = vmatprep.subr.bf16.mxu0 %v24673_v2  ;;  %19067 = vmatmul.mubr.bf16.vlgmr.msra.gmra.mrb[192].mxu1 %v2601_v29 }
 0x661   :  { %v22486_v58 = vpop.f32.mrb[167].mxu0 }
 0x662   :  { %v18469_v56 = vadd.f32 %v22484_v51, %v25162_v59  ;;  %v24675_v59 = vld [vmem:[#allocation5 + $0x3028] sm:$0xff]  }
 0x663   :  { %22785 = vmatpush3.bf16.msra.mxu0 %v24675_v59 }
 0x664   :  { %v25169_v53 = vadd.f32 %v22506_v50, %v18469_v56  ;;  %22786 = vmatprep.subr.bf16.mxu0 %v24677_v6 }
 0x667   :  { %22787 = vmatpush3.bf16.msra.mxu0 %v24679_v8 }
 0x668   :  { %22788 = vmatprep.subr.bf16.mxu0 %v24681_v1 }
 0x66b   :  { %22789 = vmatpush3.bf16.msra.mxu0 %v24683_v12 }
 0x66e   :  { %19027 = vmatmul.mubr.bf16.vlgmr.msra.gmra.mrb[192].mxu0 %v2599_v19 }
 0x673   :  { %v22548_v22 = vpop.f32.mrb[168].mxu1 }
 0x674   :  { %v22549_v33 = vpop.f32.mrb[169].mxu1 }
 0x675   :  { %v22550_v37 = vadd.f32 %v22549_v33, %v22548_v22  ;;  %v22551_v38 = vpop.f32.mrb[170].mxu1 }
 0x676   :  { %v22552_v39 = vpop.f32.mrb[171].mxu1 }
 0x67e   :  { %v22526_v30 = vpop.f32.mrb[168].mxu0 }
 0x67f   :  { %v22527_v32 = vpop.f32.mrb[169].mxu0 }
 0x680   :  { %v22528_v25 = vadd.f32 %v22527_v32, %v22526_v30  ;;  %v22529_v35 = vpop.f32.mrb[170].mxu0 }
 0x681   :  { %v22530_v28 = vpop.f32.mrb[171].mxu0 }
 0x682   :  { %v18549_v40 = vadd.f32 %v22528_v25, %v25169_v53 }
 0x684   :  { %v18589_v31 = vadd.f32 %v22550_v37, %v18549_v40 }
 0x693   :  { %v22592_v43 = vpop.f32.mrb[172].mxu1 }
 0x694   :  { %v22593_v47 = vpop.f32.mrb[173].mxu1 }
 0x695   :  { %v22594_v48 = vadd.f32 %v22593_v47, %v22592_v43  ;;  %v22595_v49 = vpop.f32.mrb[174].mxu1 }
 0x696   :  { %v22596_v52 = vpop.f32.mrb[175].mxu1 }
 0x69e   :  { %v22570_v42 = vpop.f32.mrb[172].mxu0 }
 0x69f   :  { %v22571_v34 = vpop.f32.mrb[173].mxu0 }
 0x6a0   :  { %v22572_v41 = vadd.f32 %v22571_v34, %v22570_v42  ;;  %v22573_v36 = vpop.f32.mrb[174].mxu0 }
 0x6a1   :  { %v22574_v45 = vpop.f32.mrb[175].mxu0 }
 0x6a2   :  { %v18629_v51 = vadd.f32 %v22572_v41, %v18589_v31 }
 0x6a4   :  { %v18669_v44 = vadd.f32 %v22594_v48, %v18629_v51 }
 0x6b3   :  { %v22636_v55 = vpop.f32.mrb[176].mxu1 }
 0x6b4   :  { %v22637_v57 = vpop.f32.mrb[177].mxu1 }
 0x6b5   :  { %v22638_v58 = vadd.f32 %v22637_v57, %v22636_v55  ;;  %v22639_v60 = vpop.f32.mrb[178].mxu1 }
 0x6b6   :  { %v22640_v63 = vpop.f32.mrb[179].mxu1 }
 0x6c1   :  { %v22614_v50 = vpop.f32.mrb[176].mxu0 }
 0x6c2   :  { %v22615_v46 = vpop.f32.mrb[177].mxu0 }
 0x6c3   :  { %v22616_v56 = vadd.f32 %v22615_v46, %v22614_v50  ;;  %v22617_v54 = vpop.f32.mrb[178].mxu0 }
 0x6c4   :  { %v22618_v53 = vpop.f32.mrb[179].mxu0 }
 0x6c5   :  { %v18709_v61 = vadd.f32 %v22616_v56, %v18669_v44 }
 0x6c7   :  { %v18749_v0 = vadd.f32 %v22638_v58, %v18709_v61 }
 0x6d3   :  { %v22680_v3 = vpop.f32.mrb[180].mxu1 }
 0x6d4   :  { %v22681_v5 = vpop.f32.mrb[181].mxu1 }
 0x6d5   :  { %v22682_v62 = vadd.f32 %v22681_v5, %v22680_v3  ;;  %v22683_v9 = vpop.f32.mrb[182].mxu1 }
 0x6d6   :  { %v22684_v11 = vpop.f32.mrb[183].mxu1 }
 0x6e1   :  { %v22658_v2 = vpop.f32.mrb[180].mxu0 }
 0x6e2   :  { %v22659_v59 = vpop.f32.mrb[181].mxu0 }
 0x6e3   :  { %v22660_v6 = vadd.f32 %v22659_v59, %v22658_v2  ;;  %v22661_v8 = vpop.f32.mrb[182].mxu0 }
 0x6e4   :  { %v22662_v1 = vpop.f32.mrb[183].mxu0 }
 0x6e5   :  { %v18789_v12 = vadd.f32 %v22660_v6, %v18749_v0 }
 0x6e7   :  { %v18829_v4 = vadd.f32 %v22682_v62, %v18789_v12 }
 0x6f3   :  { %v22724_v15 = vpop.f32.mrb[184].mxu1 }
 0x6f4   :  { %v22725_v18 = vpop.f32.mrb[185].mxu1 }
 0x6f5   :  { %v22726_v20 = vadd.f32 %v22725_v18, %v22724_v15  ;;  %v22727_v21 = vpop.f32.mrb[186].mxu1 }
 0x6f6   :  { %v22728_v24 = vpop.f32.mrb[187].mxu1 }
 0x701   :  { %v22702_v14 = vpop.f32.mrb[184].mxu0 }
 0x702   :  { %v22703_v7 = vpop.f32.mrb[185].mxu0 }
 0x703   :  { %v22704_v17 = vadd.f32 %v22703_v7, %v22702_v14  ;;  %v22705_v10 = vpop.f32.mrb[186].mxu0 }
 0x704   :  { %v22706_v13 = vpop.f32.mrb[187].mxu0 }
 0x705   :  { %v18869_v23 = vadd.f32 %v22704_v17, %v18829_v4 }
 0x707   :  { %v18909_v16 = vadd.f32 %v22726_v20, %v18869_v23 }
 0x713   :  { %v22768_v27 = vpop.f32.mrb[188].mxu1 }
 0x714   :  { %v22769_v30 = vpop.f32.mrb[189].mxu1 }
 0x715   :  { %v22770_v32 = vadd.f32 %v22769_v30, %v22768_v27  ;;  %v22771_v33 = vpop.f32.mrb[190].mxu1 }
 0x716   :  { %v22772_v35 = vpop.f32.mrb[191].mxu1 }
 0x721   :  { %v22746_v26 = vpop.f32.mrb[188].mxu0 }
 0x722   :  { %v22747_v19 = vpop.f32.mrb[189].mxu0 }
 0x723   :  { %v22748_v29 = vadd.f32 %v22747_v19, %v22746_v26  ;;  %v22749_v22 = vpop.f32.mrb[190].mxu0 }
 0x724   :  { %v22750_v25 = vpop.f32.mrb[191].mxu0 }
 0x725   :  { %v18949_v37 = vadd.f32 %v22748_v29, %v18909_v16 }
 0x727   :  { %v18989_v38 = vadd.f32 %v22770_v32, %v18949_v37 }
 0x733   :  { %v22812_v39 = vpop.f32.mrb[192].mxu1 }
 0x734   :  { %v22813_v31 = vpop.f32.mrb[193].mxu1 }
 0x735   :  { %v22814_v43 = vadd.f32 %v22813_v31, %v22812_v39  ;;  %v22815_v41 = vpop.f32.mrb[194].mxu1 }
 0x736   :  { %v22816_v36 = vpop.f32.mrb[195].mxu1 }
 0x741   :  { %v22790_v28 = vpop.f32.mrb[192].mxu0 }
 0x742   :  { %v22791_v40 = vpop.f32.mrb[193].mxu0 }
 0x743   :  { %v22792_v42 = vadd.f32 %v22791_v40, %v22790_v28  ;;  %v22793_v34 = vpop.f32.mrb[194].mxu0 }
 0x744   :  { %v22794_v47 = vpop.f32.mrb[195].mxu0 }
 0x745   :  { %v19029_v48 = vadd.f32 %v22792_v42, %v18989_v38 }
 0x747   :  { %v19069_v49 = vadd.f32 %v22814_v43, %v19029_v48 }
 0x749   :  { %19074 = vst [vmem:[#allocation8] sm:$0xff] %v19069_v49 }
 0x74a   :  { %19079 = vsyncadd [#allocation4], 96  ;;  %s24793_s2 = smov [#allocation8]  }
 0x74b   :  { %s19080_s25 = sshll.u32 %s24793_s2, 4  ;;  %s19081_s25 = int_to_ptr.vmem [resolvable:$true] %s19080_s25 }
 0x74c   :  { %s24757_s26 = scalar_lea.vmem %s19081_s25, 32  ;;  %s24761_s27 = scalar_lea.vmem %s19081_s25, 128 }
 0x74d   :  { %p24758_p10 = scmp.ne.s32.totalorder %s19081_s25, %s24757_s26  ;;  %p24762_p11 = scmp.lt.s32.totalorder %s19081_s25, %s19081_s25 }
 0x74e   :  { %p24763_p12 = scmp.lt.s32.totalorder %s24761_s27, %s24757_s26 }
 0x750   :  { %p24764_p13 = por %p24763_p12, %p24762_p11 }
 0x752   :  { %p24765_p0 = pnand %p24764_p13, %p24758_p10 }
 0x754   :  { %24768 = shalt.err (!%p24765_p0)
}
 0x755   :  { %s24769_s30 = scalar_lea.hbm %s25191_s3, 32 }
 0x756   :  { %p24770_p1 = scmp.ne.s32.totalorder %s25191_s3, %s24769_s30  ;;  %p24773_p2 = scmp.lt.u32.totalorder %s24769_s30, %s25191_s3 }
 0x758   :  { %p24775_p3 = pnand %p24773_p2, %p24770_p1 }
 0x75a   :  { %24778 = shalt.err (!%p24775_p3)
}
 0x75b   :  { %s24794_s8 = smov 32   ;;  %s24795_s1 = smov 2  }
 0x75c   :  { %19086 = dma.vmem_to_hbm [thread:$0]  %s19081_s25, 32, %s25191_s3, [#allocation4], %s24794_s8, %s24794_s8, %s24795_s1  }
 0x75d   :  { %24783 = dma.done.wait [#allocation4], 128  }
 0x75e   :  { %24784 = vsyncadd [#allocation4], 4294967168 }
 0x75f   :  { %19090 = vsyncpa [#allocation3], 1 }
 0x760   :  { %19091 = vsyncpa [#allocation6], 1 }
 0x761   :  { %19092 = vsyncpa [#allocation4], 1 }

</bundles_post_ra>
